<compile_context>
chip_gen: v7x
topology: tpu7x:2x2x1
jax: 0.10.0
libtpu: 0.0.40
codegen_flags: <defaults>
</compile_context>

<pallas_src>
import functools

import numpy as np
import jax
import jax.numpy as jnp
from jax import lax
from jax.experimental import pallas as pl
from jax.experimental.pallas import tpu as pltpu

FEAT = 256          # feature width at 1/8 resolution
FLOW_PAD = 128      # lane-dense padding of the 2 flow channels inside the kernel
LEFT_HALO = 8       # interior columns start at a sublane-aligned offset


def _round_up(x, m):
    return (x + m - 1) // m * m


# ----------------------------------------------------------------------------
# Fused kernel: extractor -> motion/attention -> rb1 -> rb2 -> upflow8.
# One grid step per image; weights, activations and flow stay VMEM-resident.
# ----------------------------------------------------------------------------
def _kpa_kernel(patches_ref, wcc_ref, bcc_ref, wmot_ref, bmot_ref,
                watt_ref, batt_ref, w1a_ref, b1a_ref, w2a_ref, b2a_ref,
                w1b_ref, b1b_ref, w2b_ref, b2b_ref, wsb_ref, bsb_ref,
                rh8_ref, rwt_ref, o_ref, pad_a, pad_b, pad_c, t_sc,
                *, h, w, wp, r_main):
    f32 = jnp.float32
    bf16 = jnp.bfloat16
    c0 = LEFT_HALO

    # --- zero only the halo borders; interiors are written before read ------
    for ref in (pad_a, pad_b, pad_c):
        c = ref.shape[-1]
        ref[0, :, :] = jnp.zeros((wp, c), bf16)
        ref[h + 1, :, :] = jnp.zeros((wp, c), bf16)
        ref[:, 0:c0, :] = jnp.zeros((h + 2, c0, c), bf16)
        ref[:, c0 + w:wp, :] = jnp.zeros((h + 2, wp - c0 - w, c), bf16)

    n_full = h // r_main
    r_tail = h - n_full * r_main

    def for_strips(strip_fn):
        """Run strip_fn(row0, rows) over all h output rows in row strips."""
        if n_full == 1:
            strip_fn(0, r_main)
        elif n_full > 1:
            def body(i, carry):
                strip_fn(i * r_main, r_main)
                return carry
            lax.fori_loop(0, n_full, body, 0)
        if r_tail:
            strip_fn(n_full * r_main, r_tail)

    def conv_strip(src_pad, w_ref, y0, rr):
        """3x3 same-conv over rr output rows as 9 strip-batched MXU dots.
        The 3 dx-shifted slabs are hoisted and reused across the 3 dy taps."""
        cin = src_pad.shape[-1]
        acc = None
        for dx in range(3):
            slab = src_pad[pl.ds(y0, rr + 2), pl.ds(c0 - 1 + dx, w), :]
            for dy in range(3):
                tap = slab[dy:dy + rr].reshape(rr * w, cin)
                part = jnp.dot(tap, w_ref[dy * 3 + dx],
                               preferred_element_type=f32)
                acc = part if acc is None else acc + part
        return acc                                        # (rr*w, Cout) f32

    def read_interior(src_pad, y0, rr):
        cin = src_pad.shape[-1]
        return src_pad[pl.ds(1 + y0, rr), pl.ds(c0, w), :].reshape(rr * w, cin)

    def store_interior(dst_pad, y0, rr, val_f32):
        cout = dst_pad.shape[-1]
        dst_pad[pl.ds(1 + y0, rr), pl.ds(c0, w), :] = (
            val_f32.astype(bf16).reshape(rr, w, cout))

    # --- pass 1: extractor (corr & context) -> motion -> attention -> fuse --
    def head_strip(y0, rr):
        pf = patches_ref[0, pl.ds(y0, rr), :, :].reshape(rr * w, 128)
        cc = jnp.dot(pf, wcc_ref[...], preferred_element_type=f32) + bcc_ref[...]
        corr = jnp.maximum(cc[:, :FEAT], 0.0).astype(bf16)
        ctx = jnp.maximum(cc[:, FEAT:], 0.0).astype(bf16)
        feat = jnp.maximum(
            jnp.dot(corr, wmot_ref[...], preferred_element_type=f32)
            + bmot_ref[...], 0.0)
        attn = jax.nn.sigmoid(
            jnp.dot(ctx, watt_ref[...], preferred_element_type=f32)
            + batt_ref[...])
        # updated_feature = feature + feature * attention
        store_interior(pad_a, y0, rr, feat * (1.0 + attn))

    for_strips(head_strip)

    # --- pass 2: rb1 conv3x3 + relu  (pad_a -> pad_b) ------------------------
    def rb1a_strip(y0, rr):
        out = jnp.maximum(conv_strip(pad_a, w1a_ref, y0, rr) + b1a_ref[...], 0.0)
        store_interior(pad_b, y0, rr, out)

    for_strips(rb1a_strip)

    # --- pass 3: rb1 conv3x3 + identity skip (pad_b -> pad_a, fused) ---------
    # TODO(synk): the real ResidualBlock may apply a ReLU after the skip add;
    #             its source is not provided, so none is applied here.
    def rb1b_strip(y0, rr):
        out = (conv_strip(pad_b, w2a_ref, y0, rr) + b2a_ref[...]
               + read_interior(pad_a, y0, rr))
        store_interior(pad_a, y0, rr, out)

    for_strips(rb1b_strip)

    # --- pass 4: rb2 conv3x3 + relu (Cout 2 zero-padded to 128 lanes) --------
    def rb2a_strip(y0, rr):
        out = jnp.maximum(conv_strip(pad_a, w1b_ref, y0, rr) + b1b_ref[...], 0.0)
        store_interior(pad_c, y0, rr, out)

    for_strips(rb2a_strip)

    # --- pass 5: rb2 conv3x3 + 1x1-conv skip, fused column upsample ----------
    def rb2b_strip(y0, rr):
        skip = (jnp.dot(read_interior(pad_a, y0, rr), wsb_ref[...],
                        preferred_element_type=f32) + bsb_ref[...])
        res = (conv_strip(pad_c, w2b_ref, y0, rr) + b2b_ref[...] + skip
               ).reshape(rr, w, FLOW_PAD)
        # Extract the 2 live flow lanes as (rr, w) maps via masked lane
        # reductions (avoids a lane-extraction relayout), then apply the
        # column interpolation on the fly: t[c] = flow_c @ Rw^T.
        lane = lax.broadcasted_iota(jnp.int32, (1, 1, FLOW_PAD), 2)
        rwt = rwt_ref[...]
        for ch in range(2):
            f_ch = jnp.sum(jnp.where(lane == ch, res, 0.0), axis=-1)
            t_sc[ch, pl.ds(y0, rr), :] = jnp.dot(
                f_ch, rwt, preferred_element_type=f32)

    for_strips(rb2b_strip)

    # --- row bilinear upsample (x8 scale folded into rh8), final store -------
    rh8 = rh8_ref[...]
    for ch in range(2):
        o_ref[0, ch] = jnp.dot(rh8, t_sc[ch], preferred_element_type=f32)


def kpa_core(patches, kp, rh8, rwt):
    """patches: (B, h, w, 128) bf16 -> full-resolution flow (B, 2, 8h, 8w) f32."""
    B, h, w, _ = patches.shape
    H, W = 8 * h, 8 * w
    wp = LEFT_HALO + _round_up(w + 1, 8)          # >=1 zero right-halo column
    # Strip height so every conv MXU dot has M = r_main*w ~ 256 rows.
    r_main = max(1, min(h, (256 + w - 1) // w))

    weight_args = [kp["wcc"], kp["bcc"], kp["wmot"], kp["bmot"],
                   kp["watt"], kp["batt"],
                   kp["w1a"], kp["b1a"], kp["w2a"], kp["b2a"],
                   kp["w1b"], kp["b1b"], kp["w2b"], kp["b2b"],
                   kp["wsb"], kp["bsb"], rh8, rwt]

    def const_spec(a):
        nd = a.ndim
        # Constant index map across the grid -> a single VMEM copy suffices.
        return pl.BlockSpec(a.shape, lambda b, nd=nd: (0,) * nd,
                            pipeline_mode=pl.Buffered(1))

    weight_bytes = sum(int(a.size) * a.dtype.itemsize for a in weight_args)
    pad_bytes = (h + 2) * wp * (2 * FEAT + FLOW_PAD) * 2      # bf16 scratches
    io_bytes = 2 * (h * w * 128 * 2) + 2 * (2 * H * W * 4)    # double-buffered
    est = weight_bytes + pad_bytes + 2 * h * W * 4 + io_bytes
    # Cap at 64 MiB so the request stays within v7x physical VMEM.
    vmem_limit = int(min(max(est * 1.3 + (2 << 20), 32 << 20), 64 << 20))

    macs_px = (128 * 2 * FEAT + 2 * FEAT * FEAT               # head
               + 2 * 9 * FEAT * FEAT                           # rb1
               + 9 * FEAT * FLOW_PAD + 9 * FLOW_PAD * FLOW_PAD # rb2 (padded)
               + FEAT * FLOW_PAD)                              # rb2 1x1 skip
    ups_macs = 2 * (h * W * w + H * W * h)
    cost = pl.CostEstimate(
        flops=int(2 * B * (h * w * macs_px + ups_macs)),
        transcendentals=int(B * h * w * FEAT),
        bytes_accessed=int(B * h * w * 128 * 2 + weight_bytes + B * 2 * H * W * 4))

    # TODO(synk): for 1/8-res maps too large for whole-image VMEM residence
    #             (roughly h, w >~ 96 on v7x's 64 MiB VMEM) add a halo-tiled
    #             row-strip grid axis; that axis would also let both v7x
    #             TensorCores share a single image when B is small.
    return pl.pallas_call(
        functools.partial(_kpa_kernel, h=h, w=w, wp=wp, r_main=r_main),
        out_shape=jax.ShapeDtypeStruct((B, 2, H, W), jnp.float32),
        grid=(B,),
        in_specs=[pl.BlockSpec((1, h, w, 128), lambda b: (b, 0, 0, 0))]
                 + [const_spec(a) for a in weight_args],
        out_specs=pl.BlockSpec((1, 2, H, W), lambda b: (b, 0, 0, 0)),
        scratch_shapes=[pltpu.VMEM((h + 2, wp, FEAT), jnp.bfloat16),
                        pltpu.VMEM((h + 2, wp, FEAT), jnp.bfloat16),
                        pltpu.VMEM((h + 2, wp, FLOW_PAD), jnp.bfloat16),
                        pltpu.VMEM((2, h, W), jnp.float32)],
        compiler_params=pltpu.CompilerParams(
            # "parallel" only buys core-splitting on v7x (2 TC/chip); harmless
            # elsewhere.
            dimension_semantics=("parallel",),
            vmem_limit_bytes=vmem_limit),
        cost_estimate=cost,
    )(patches, *weight_args)


# ----------------------------------------------------------------------------
# Parameter init (deterministic, synthetic) and kernel-layout packing
# ----------------------------------------------------------------------------
def _dense_init(key, k_in, k_out):
    return (jax.random.normal(key, (k_in, k_out), jnp.float32)
            / np.sqrt(k_in)).astype(jnp.float32)


def init_params(key):
    ks = jax.random.split(key, 12)
    return {
        # extractor stand-in: space-to-depth(8) of both frames -> 128 -> corr/context
        "ext_corr_w": _dense_init(ks[0], 128, FEAT),
        "ext_corr_b": jnp.zeros((FEAT,), jnp.float32),
        "ext_ctx_w": _dense_init(ks[1], 128, FEAT),
        "ext_ctx_b": jnp.zeros((FEAT,), jnp.float32),
        # motion stand-in: corr -> feature
        "mot_w": _dense_init(ks[2], FEAT, FEAT),
        "mot_b": jnp.zeros((FEAT,), jnp.float32),
        # deform_comv stand-in: context -> attention (sigmoid)
        "att_w": _dense_init(ks[3], FEAT, FEAT),
        "att_b": jnp.zeros((FEAT,), jnp.float32),
        # decoder: ResidualBlock(256) ; ResidualBlock(256, out=2, use_conv=True)
        "rb1": {
            "w1": _dense_init(ks[4], 9 * FEAT, FEAT), "b1": jnp.zeros((FEAT,), jnp.float32),
            "w2": _dense_init(ks[5], 9 * FEAT, FEAT), "b2": jnp.zeros((FEAT,), jnp.float32),
        },
        "rb2": {
            "w1": _dense_init(ks[6], 9 * FEAT, 2), "b1": jnp.zeros((2,), jnp.float32),
            "w2": _dense_init(ks[7], 9 * 2, 2), "b2": jnp.zeros((2,), jnp.float32),
            "ws": _dense_init(ks[8], FEAT, 2), "bs": jnp.zeros((2,), jnp.float32),
        },
    }


def pack_params(p):
    """Pack/pad/cast params into the kernel-ready layout (bf16 weights, f32 biases)."""
    bf = jnp.bfloat16

    def taps(w_flat, cin, cout):            # (9*cin, cout) -> (9, cin, cout), tap = dy*3+dx
        return w_flat.reshape(9, cin, cout)

    def pad_last(a, n):                     # zero-pad last dim to n
        pad = [(0, 0)] * (a.ndim - 1) + [(0, n - a.shape[-1])]
        return jnp.pad(a, pad)

    w2b = jnp.zeros((9, FLOW_PAD, FLOW_PAD), jnp.float32)
    w2b = w2b.at[:, :2, :2].set(taps(p["rb2"]["w2"], 2, 2))

    return {
        "wcc": jnp.concatenate([p["ext_corr_w"], p["ext_ctx_w"]], axis=1).astype(bf),
        "bcc": jnp.concatenate([p["ext_corr_b"], p["ext_ctx_b"]]).reshape(1, -1),
        "wmot": p["mot_w"].astype(bf), "bmot": p["mot_b"].reshape(1, -1),
        "watt": p["att_w"].astype(bf), "batt": p["att_b"].reshape(1, -1),
        "w1a": taps(p["rb1"]["w1"], FEAT, FEAT).astype(bf),
        "b1a": p["rb1"]["b1"].reshape(1, -1),
        "w2a": taps(p["rb1"]["w2"], FEAT, FEAT).astype(bf),
        "b2a": p["rb1"]["b2"].reshape(1, -1),
        "w1b": pad_last(taps(p["rb2"]["w1"], FEAT, 2), FLOW_PAD).astype(bf),
        "b1b": pad_last(p["rb2"]["b1"], FLOW_PAD).reshape(1, -1),
        "w2b": w2b.astype(bf),
        "b2b": pad_last(p["rb2"]["b2"], FLOW_PAD).reshape(1, -1),
        "wsb": pad_last(p["rb2"]["ws"], FLOW_PAD).astype(bf),
        "bsb": pad_last(p["rb2"]["bs"], FLOW_PAD).reshape(1, -1),
    }


# ----------------------------------------------------------------------------
# Forward pass
# ----------------------------------------------------------------------------
def _interp_matrix(n_in, n_out):
    """Bilinear interpolation matrix (n_out, n_in), align_corners=True."""
    if n_in == 1:
        return np.ones((n_out, 1), np.float32)
    i = np.arange(n_out)
    src = i * (n_in - 1) / (n_out - 1)
    lo = np.minimum(np.floor(src).astype(np.int64), n_in - 2)
    frac = (src - lo).astype(np.float32)
    R = np.zeros((n_out, n_in), np.float32)
    R[i, lo] = 1.0 - frac
    R[i, lo + 1] = frac
    return R


def _space_to_depth8(img):
    """(B, H, W) -> (B, H//8, W//8, 64)."""
    B, H, W = img.shape
    h, w = H // 8, W // 8
    return img.reshape(B, h, 8, w, 8).transpose(0, 1, 3, 2, 4).reshape(B, h, w, 64)


@jax.jit
def kpa_forward(kp, x):
    """x: (B, 2, H, W) -> flow: (B, 2, H, W)   (H, W multiples of 8)."""
    B, _, H, W = x.shape
    h, w = H // 8, W // 8

    # extractor front-end glue: patchify both frames (same size as the input)
    patches = jnp.concatenate(
        [_space_to_depth8(x[:, 0]), _space_to_depth8(x[:, 1])],
        axis=-1).astype(jnp.bfloat16)                       # (B, h, w, 128)

    # bilinear x8 upsample matrices (x8 flow scale folded into rh8)
    rh8 = jnp.asarray(_interp_matrix(h, 8 * h) * 8.0)       # (8h, h)
    rwt = jnp.asarray(_interp_matrix(w, 8 * w).T)           # (w, 8w)

    # one fused kernel: 1/8-res pipeline + upflow8, flow never hits HBM at 1/8 res
    return kpa_core(patches, kp, rh8, rwt)                  # (B, 2, H, W)


if __name__ == "__main__":
    key = jax.random.PRNGKey(0)
    kx, kparam = jax.random.split(key)
    x = jax.random.normal(kx, (2, 2, 16, 16), jnp.float32)  # B=2, 2 frames, 16x16
    params = init_params(kparam)
    kp = pack_params(params)

    out = kpa_forward(kp, x)
    out = jax.block_until_ready(out)
    assert out.shape == (2, 2, 16, 16), out.shape
    assert out.dtype == jnp.float32
    print("KERNEL_OK")
</pallas_src>

<mosaic_0001>
module attributes {stable_mosaic.version = 11 : i64} {
  func.func @_kpa_kernel(%arg0: i32, %arg1: memref<1x2x2x128xbf16, #tpu.memory_space<vmem>>, %arg2: memref<128x512xbf16, #tpu.memory_space<vmem>>, %arg3: memref<1x512xf32, #tpu.memory_space<vmem>>, %arg4: memref<256x256xbf16, #tpu.memory_space<vmem>>, %arg5: memref<1x256xf32, #tpu.memory_space<vmem>>, %arg6: memref<256x256xbf16, #tpu.memory_space<vmem>>, %arg7: memref<1x256xf32, #tpu.memory_space<vmem>>, %arg8: memref<9x256x256xbf16, #tpu.memory_space<vmem>>, %arg9: memref<1x256xf32, #tpu.memory_space<vmem>>, %arg10: memref<9x256x256xbf16, #tpu.memory_space<vmem>>, %arg11: memref<1x256xf32, #tpu.memory_space<vmem>>, %arg12: memref<9x256x128xbf16, #tpu.memory_space<vmem>>, %arg13: memref<1x128xf32, #tpu.memory_space<vmem>>, %arg14: memref<9x128x128xbf16, #tpu.memory_space<vmem>>, %arg15: memref<1x128xf32, #tpu.memory_space<vmem>>, %arg16: memref<256x128xbf16, #tpu.memory_space<vmem>>, %arg17: memref<1x128xf32, #tpu.memory_space<vmem>>, %arg18: memref<16x2xf32, #tpu.memory_space<vmem>>, %arg19: memref<2x16xf32, #tpu.memory_space<vmem>>, %arg20: memref<1x2x16x16xf32, #tpu.memory_space<vmem>>, %arg21: memref<4x16x256xbf16, #tpu.memory_space<vmem>>, %arg22: memref<4x16x256xbf16, #tpu.memory_space<vmem>>, %arg23: memref<4x16x128xbf16, #tpu.memory_space<vmem>>, %arg24: memref<2x2x16xf32, #tpu.memory_space<vmem>>) attributes {dimension_semantics = [#tpu.dimension_semantics<parallel>], iteration_bounds = array<i64: 2>, scalar_prefetch = 0 : i64, scratch_operands = 4 : i64, tpu.core_type = #tpu.core_type<tc>, window_params = [{transform_indices = @transform_0, window_bounds = array<i64: 1, 2, 2, 128>}, {pipeline_mode = #tpu.pipeline_mode<synchronous>, transform_indices = @transform_1, window_bounds = array<i64: 128, 512>}, {pipeline_mode = #tpu.pipeline_mode<synchronous>, transform_indices = @transform_2, window_bounds = array<i64: 1, 512>}, {pipeline_mode = #tpu.pipeline_mode<synchronous>, transform_indices = @transform_3, window_bounds = array<i64: 256, 256>}, {pipeline_mode = #tpu.pipeline_mode<synchronous>, transform_indices = @transform_4, window_bounds = array<i64: 1, 256>}, {pipeline_mode = #tpu.pipeline_mode<synchronous>, transform_indices = @transform_5, window_bounds = array<i64: 256, 256>}, {pipeline_mode = #tpu.pipeline_mode<synchronous>, transform_indices = @transform_6, window_bounds = array<i64: 1, 256>}, {pipeline_mode = #tpu.pipeline_mode<synchronous>, transform_indices = @transform_7, window_bounds = array<i64: 9, 256, 256>}, {pipeline_mode = #tpu.pipeline_mode<synchronous>, transform_indices = @transform_8, window_bounds = array<i64: 1, 256>}, {pipeline_mode = #tpu.pipeline_mode<synchronous>, transform_indices = @transform_9, window_bounds = array<i64: 9, 256, 256>}, {pipeline_mode = #tpu.pipeline_mode<synchronous>, transform_indices = @transform_10, window_bounds = array<i64: 1, 256>}, {pipeline_mode = #tpu.pipeline_mode<synchronous>, transform_indices = @transform_11, window_bounds = array<i64: 9, 256, 128>}, {pipeline_mode = #tpu.pipeline_mode<synchronous>, transform_indices = @transform_12, window_bounds = array<i64: 1, 128>}, {pipeline_mode = #tpu.pipeline_mode<synchronous>, transform_indices = @transform_13, window_bounds = array<i64: 9, 128, 128>}, {pipeline_mode = #tpu.pipeline_mode<synchronous>, transform_indices = @transform_14, window_bounds = array<i64: 1, 128>}, {pipeline_mode = #tpu.pipeline_mode<synchronous>, transform_indices = @transform_15, window_bounds = array<i64: 256, 128>}, {pipeline_mode = #tpu.pipeline_mode<synchronous>, transform_indices = @transform_16, window_bounds = array<i64: 1, 128>}, {pipeline_mode = #tpu.pipeline_mode<synchronous>, transform_indices = @transform_17, window_bounds = array<i64: 16, 2>}, {pipeline_mode = #tpu.pipeline_mode<synchronous>, transform_indices = @transform_18, window_bounds = array<i64: 2, 16>}, {transform_indices = @transform_19, window_bounds = array<i64: 1, 2, 16, 16>}]} {
    %cst = arith.constant 0.000000e+00 : bf16
    %0 = vector.broadcast %cst : bf16 to vector<16x256xbf16>
    %c0 = arith.constant 0 : index
    %c0_0 = arith.constant 0 : index
    %c0_1 = arith.constant 0 : index
    %1 = vector.load %arg21[%c0, %c0_0, %c0_1] : memref<4x16x256xbf16, #tpu.memory_space<vmem>>, vector<1x16x256xbf16>
    %2 = vector.shape_cast %1 : vector<1x16x256xbf16> to vector<16x256xbf16>
    %3 = vector.shape_cast %0 : vector<16x256xbf16> to vector<1x16x256xbf16>
    tpu.vector_store %arg21[%c0, %c0_0, %c0_1], %3 {strides = array<i32>} : memref<4x16x256xbf16, #tpu.memory_space<vmem>>, vector<1x16x256xbf16>,
    %cst_2 = arith.constant 0.000000e+00 : bf16
    %4 = vector.broadcast %cst_2 : bf16 to vector<16x256xbf16>
    %c3 = arith.constant 3 : index
    %c0_3 = arith.constant 0 : index
    %c0_4 = arith.constant 0 : index
    %5 = vector.load %arg21[%c3, %c0_3, %c0_4] : memref<4x16x256xbf16, #tpu.memory_space<vmem>>, vector<1x16x256xbf16>
    %6 = vector.shape_cast %5 : vector<1x16x256xbf16> to vector<16x256xbf16>
    %7 = vector.shape_cast %4 : vector<16x256xbf16> to vector<1x16x256xbf16>
    tpu.vector_store %arg21[%c3, %c0_3, %c0_4], %7 {strides = array<i32>} : memref<4x16x256xbf16, #tpu.memory_space<vmem>>, vector<1x16x256xbf16>,
    %cst_5 = arith.constant 0.000000e+00 : bf16
    %8 = vector.broadcast %cst_5 : bf16 to vector<4x8x256xbf16>
    %c0_6 = arith.constant 0 : index
    %c0_7 = arith.constant 0 : index
    %c0_8 = arith.constant 0 : index
    %9 = vector.load %arg21[%c0_6, %c0_7, %c0_8] : memref<4x16x256xbf16, #tpu.memory_space<vmem>>, vector<4x8x256xbf16>
    tpu.vector_store %arg21[%c0_6, %c0_7, %c0_8], %8 {strides = array<i32>} : memref<4x16x256xbf16, #tpu.memory_space<vmem>>, vector<4x8x256xbf16>,
    %cst_9 = arith.constant 0.000000e+00 : bf16
    %10 = vector.broadcast %cst_9 : bf16 to vector<4x6x256xbf16>
    %c0_10 = arith.constant 0 : index
    %c10 = arith.constant 10 : index
    %c0_11 = arith.constant 0 : index
    %11 = vector.load %arg21[%c0_10, %c10, %c0_11] : memref<4x16x256xbf16, #tpu.memory_space<vmem>>, vector<4x6x256xbf16>
    tpu.vector_store %arg21[%c0_10, %c10, %c0_11], %10 {strides = array<i32>} : memref<4x16x256xbf16, #tpu.memory_space<vmem>>, vector<4x6x256xbf16>,
    %cst_12 = arith.constant 0.000000e+00 : bf16
    %12 = vector.broadcast %cst_12 : bf16 to vector<16x256xbf16>
    %c0_13 = arith.constant 0 : index
    %c0_14 = arith.constant 0 : index
    %c0_15 = arith.constant 0 : index
    %13 = vector.load %arg22[%c0_13, %c0_14, %c0_15] : memref<4x16x256xbf16, #tpu.memory_space<vmem>>, vector<1x16x256xbf16>
    %14 = vector.shape_cast %13 : vector<1x16x256xbf16> to vector<16x256xbf16>
    %15 = vector.shape_cast %12 : vector<16x256xbf16> to vector<1x16x256xbf16>
    tpu.vector_store %arg22[%c0_13, %c0_14, %c0_15], %15 {strides = array<i32>} : memref<4x16x256xbf16, #tpu.memory_space<vmem>>, vector<1x16x256xbf16>,
    %cst_16 = arith.constant 0.000000e+00 : bf16
    %16 = vector.broadcast %cst_16 : bf16 to vector<16x256xbf16>
    %c3_17 = arith.constant 3 : index
    %c0_18 = arith.constant 0 : index
    %c0_19 = arith.constant 0 : index
    %17 = vector.load %arg22[%c3_17, %c0_18, %c0_19] : memref<4x16x256xbf16, #tpu.memory_space<vmem>>, vector<1x16x256xbf16>
    %18 = vector.shape_cast %17 : vector<1x16x256xbf16> to vector<16x256xbf16>
    %19 = vector.shape_cast %16 : vector<16x256xbf16> to vector<1x16x256xbf16>
    tpu.vector_store %arg22[%c3_17, %c0_18, %c0_19], %19 {strides = array<i32>} : memref<4x16x256xbf16, #tpu.memory_space<vmem>>, vector<1x16x256xbf16>,
    %cst_20 = arith.constant 0.000000e+00 : bf16
    %20 = vector.broadcast %cst_20 : bf16 to vector<4x8x256xbf16>
    %c0_21 = arith.constant 0 : index
    %c0_22 = arith.constant 0 : index
    %c0_23 = arith.constant 0 : index
    %21 = vector.load %arg22[%c0_21, %c0_22, %c0_23] : memref<4x16x256xbf16, #tpu.memory_space<vmem>>, vector<4x8x256xbf16>
    tpu.vector_store %arg22[%c0_21, %c0_22, %c0_23], %20 {strides = array<i32>} : memref<4x16x256xbf16, #tpu.memory_space<vmem>>, vector<4x8x256xbf16>,
    %cst_24 = arith.constant 0.000000e+00 : bf16
    %22 = vector.broadcast %cst_24 : bf16 to vector<4x6x256xbf16>
    %c0_25 = arith.constant 0 : index
    %c10_26 = arith.constant 10 : index
    %c0_27 = arith.constant 0 : index
    %23 = vector.load %arg22[%c0_25, %c10_26, %c0_27] : memref<4x16x256xbf16, #tpu.memory_space<vmem>>, vector<4x6x256xbf16>
    tpu.vector_store %arg22[%c0_25, %c10_26, %c0_27], %22 {strides = array<i32>} : memref<4x16x256xbf16, #tpu.memory_space<vmem>>, vector<4x6x256xbf16>,
    %cst_28 = arith.constant 0.000000e+00 : bf16
    %24 = vector.broadcast %cst_28 : bf16 to vector<16x128xbf16>
    %c0_29 = arith.constant 0 : index
    %c0_30 = arith.constant 0 : index
    %c0_31 = arith.constant 0 : index
    %25 = vector.load %arg23[%c0_29, %c0_30, %c0_31] : memref<4x16x128xbf16, #tpu.memory_space<vmem>>, vector<1x16x128xbf16>
    %26 = vector.shape_cast %25 : vector<1x16x128xbf16> to vector<16x128xbf16>
    %27 = vector.shape_cast %24 : vector<16x128xbf16> to vector<1x16x128xbf16>
    tpu.vector_store %arg23[%c0_29, %c0_30, %c0_31], %27 {strides = array<i32>} : memref<4x16x128xbf16, #tpu.memory_space<vmem>>, vector<1x16x128xbf16>,
    %cst_32 = arith.constant 0.000000e+00 : bf16
    %28 = vector.broadcast %cst_32 : bf16 to vector<16x128xbf16>
    %c3_33 = arith.constant 3 : index
    %c0_34 = arith.constant 0 : index
    %c0_35 = arith.constant 0 : index
    %29 = vector.load %arg23[%c3_33, %c0_34, %c0_35] : memref<4x16x128xbf16, #tpu.memory_space<vmem>>, vector<1x16x128xbf16>
    %30 = vector.shape_cast %29 : vector<1x16x128xbf16> to vector<16x128xbf16>
    %31 = vector.shape_cast %28 : vector<16x128xbf16> to vector<1x16x128xbf16>
    tpu.vector_store %arg23[%c3_33, %c0_34, %c0_35], %31 {strides = array<i32>} : memref<4x16x128xbf16, #tpu.memory_space<vmem>>, vector<1x16x128xbf16>,
    %cst_36 = arith.constant 0.000000e+00 : bf16
    %32 = vector.broadcast %cst_36 : bf16 to vector<4x8x128xbf16>
    %c0_37 = arith.constant 0 : index
    %c0_38 = arith.constant 0 : index
    %c0_39 = arith.constant 0 : index
    %33 = vector.load %arg23[%c0_37, %c0_38, %c0_39] : memref<4x16x128xbf16, #tpu.memory_space<vmem>>, vector<4x8x128xbf16>
    tpu.vector_store %arg23[%c0_37, %c0_38, %c0_39], %32 {strides = array<i32>} : memref<4x16x128xbf16, #tpu.memory_space<vmem>>, vector<4x8x128xbf16>,
    %cst_40 = arith.constant 0.000000e+00 : bf16
    %34 = vector.broadcast %cst_40 : bf16 to vector<4x6x128xbf16>
    %c0_41 = arith.constant 0 : index
    %c10_42 = arith.constant 10 : index
    %c0_43 = arith.constant 0 : index
    %35 = vector.load %arg23[%c0_41, %c10_42, %c0_43] : memref<4x16x128xbf16, #tpu.memory_space<vmem>>, vector<4x6x128xbf16>
    tpu.vector_store %arg23[%c0_41, %c10_42, %c0_43], %34 {strides = array<i32>} : memref<4x16x128xbf16, #tpu.memory_space<vmem>>, vector<4x6x128xbf16>,
    %c0_44 = arith.constant 0 : index
    %c0_45 = arith.constant 0 : index
    %c0_46 = arith.constant 0 : index
    %c0_47 = arith.constant 0 : index
    %36 = vector.load %arg1[%c0_44, %c0_45, %c0_46, %c0_47] : memref<1x2x2x128xbf16, #tpu.memory_space<vmem>>, vector<1x2x2x128xbf16>
    %37 = vector.shape_cast %36 : vector<1x2x2x128xbf16> to vector<2x2x128xbf16>
    %38 = vector.shape_cast %37 : vector<2x2x128xbf16> to vector<4x128xbf16>
    %c0_48 = arith.constant 0 : index
    %c0_49 = arith.constant 0 : index
    %39 = vector.load %arg2[%c0_48, %c0_49] : memref<128x512xbf16, #tpu.memory_space<vmem>>, vector<128x512xbf16>
    %cst_50 = arith.constant dense<0.000000e+00> : vector<4x512xf32>
    %40 = tpu.matmul %38, %39, %cst_50 {dimension_numbers = #tpu.dot_dimension_numbers<[1], [0], [0], [1], [0, 0, 1, 1], [], []>} : vector<4x128xbf16>, vector<128x512xbf16>, vector<4x512xf32> -> vector<4x512xf32>
    %c0_51 = arith.constant 0 : index
    %c0_52 = arith.constant 0 : index
    %41 = vector.load %arg3[%c0_51, %c0_52] : memref<1x512xf32, #tpu.memory_space<vmem>>, vector<1x512xf32>
    %42 = vector.broadcast %41 : vector<1x512xf32> to vector<4x512xf32>
    %43 = arith.addf %40, %42 : vector<4x512xf32>
    %44 = vector.extract_strided_slice %43 {offsets = [0, 0], sizes = [4, 256], strides = [1, 1]} : vector<4x512xf32> to vector<4x256xf32>
    %cst_53 = arith.constant 0.000000e+00 : f32
    %45 = vector.broadcast %cst_53 : f32 to vector<4x256xf32>
    %46 = arith.maximumf %44, %45 : vector<4x256xf32>
    %47 = arith.truncf %46 : vector<4x256xf32> to vector<4x256xbf16>
    %48 = vector.extract_strided_slice %43 {offsets = [0, 256], sizes = [4, 256], strides = [1, 1]} : vector<4x512xf32> to vector<4x256xf32>
    %cst_54 = arith.constant 0.000000e+00 : f32
    %49 = vector.broadcast %cst_54 : f32 to vector<4x256xf32>
    %50 = arith.maximumf %48, %49 : vector<4x256xf32>
    %51 = arith.truncf %50 : vector<4x256xf32> to vector<4x256xbf16>
    %c0_55 = arith.constant 0 : index
    %c0_56 = arith.constant 0 : index
    %52 = vector.load %arg4[%c0_55, %c0_56] : memref<256x256xbf16, #tpu.memory_space<vmem>>, vector<256x256xbf16>
    %cst_57 = arith.constant dense<0.000000e+00> : vector<4x256xf32>
    %53 = tpu.matmul %47, %52, %cst_57 {dimension_numbers = #tpu.dot_dimension_numbers<[1], [0], [0], [1], [0, 0, 1, 1], [], []>} : vector<4x256xbf16>, vector<256x256xbf16>, vector<4x256xf32> -> vector<4x256xf32>
    %c0_58 = arith.constant 0 : index
    %c0_59 = arith.constant 0 : index
    %54 = vector.load %arg5[%c0_58, %c0_59] : memref<1x256xf32, #tpu.memory_space<vmem>>, vector<1x256xf32>
    %55 = vector.broadcast %54 : vector<1x256xf32> to vector<4x256xf32>
    %56 = arith.addf %53, %55 : vector<4x256xf32>
    %cst_60 = arith.constant 0.000000e+00 : f32
    %57 = vector.broadcast %cst_60 : f32 to vector<4x256xf32>
    %58 = arith.maximumf %56, %57 : vector<4x256xf32>
    %c0_61 = arith.constant 0 : index
    %c0_62 = arith.constant 0 : index
    %59 = vector.load %arg6[%c0_61, %c0_62] : memref<256x256xbf16, #tpu.memory_space<vmem>>, vector<256x256xbf16>
    %cst_63 = arith.constant dense<0.000000e+00> : vector<4x256xf32>
    %60 = tpu.matmul %51, %59, %cst_63 {dimension_numbers = #tpu.dot_dimension_numbers<[1], [0], [0], [1], [0, 0, 1, 1], [], []>} : vector<4x256xbf16>, vector<256x256xbf16>, vector<4x256xf32> -> vector<4x256xf32>
    %c0_64 = arith.constant 0 : index
    %c0_65 = arith.constant 0 : index
    %61 = vector.load %arg7[%c0_64, %c0_65] : memref<1x256xf32, #tpu.memory_space<vmem>>, vector<1x256xf32>
    %62 = vector.broadcast %61 : vector<1x256xf32> to vector<4x256xf32>
    %63 = arith.addf %60, %62 : vector<4x256xf32>
    %64 = arith.negf %63 : vector<4x256xf32>
    %65 = math.exp %64 : vector<4x256xf32>
    %cst_66 = arith.constant 1.000000e+00 : f32
    %66 = vector.broadcast %cst_66 : f32 to vector<4x256xf32>
    %67 = arith.addf %66, %65 : vector<4x256xf32>
    %68 = arith.divf %66, %67 : vector<4x256xf32>
    %cst_67 = arith.constant 1.000000e+00 : f32
    %69 = vector.broadcast %cst_67 : f32 to vector<4x256xf32>
    %70 = arith.addf %69, %68 : vector<4x256xf32>
    %71 = arith.mulf %58, %70 : vector<4x256xf32>
    %72 = arith.truncf %71 : vector<4x256xf32> to vector<4x256xbf16>
    %73 = vector.shape_cast %72 : vector<4x256xbf16> to vector<2x2x256xbf16>
    %c1 = arith.constant 1 : index
    %c8 = arith.constant 8 : index
    %c0_68 = arith.constant 0 : index
    %74 = vector.load %arg21[%c1, %c8, %c0_68] : memref<4x16x256xbf16, #tpu.memory_space<vmem>>, vector<2x2x256xbf16>
    tpu.vector_store %arg21[%c1, %c8, %c0_68], %73 {strides = array<i32>} : memref<4x16x256xbf16, #tpu.memory_space<vmem>>, vector<2x2x256xbf16>,
    %c0_69 = arith.constant 0 : index
    %c7 = arith.constant 7 : index
    %c0_70 = arith.constant 0 : index
    %75 = vector.load %arg21[%c0_69, %c7, %c0_70] : memref<4x16x256xbf16, #tpu.memory_space<vmem>>, vector<4x2x256xbf16>
    %76 = vector.extract_strided_slice %75 {offsets = [0, 0, 0], sizes = [2, 2, 256], strides = [1, 1, 1]} : vector<4x2x256xbf16> to vector<2x2x256xbf16>
    %77 = vector.shape_cast %76 : vector<2x2x256xbf16> to vector<4x256xbf16>
    %c0_71 = arith.constant 0 : index
    %c0_72 = arith.constant 0 : index
    %c0_73 = arith.constant 0 : index
    %78 = vector.load %arg8[%c0_71, %c0_72, %c0_73] : memref<9x256x256xbf16, #tpu.memory_space<vmem>>, vector<1x256x256xbf16>
    %79 = vector.shape_cast %78 : vector<1x256x256xbf16> to vector<256x256xbf16>
    %cst_74 = arith.constant dense<0.000000e+00> : vector<4x256xf32>
    %80 = tpu.matmul %77, %79, %cst_74 {dimension_numbers = #tpu.dot_dimension_numbers<[1], [0], [0], [1], [0, 0, 1, 1], [], []>} : vector<4x256xbf16>, vector<256x256xbf16>, vector<4x256xf32> -> vector<4x256xf32>
    %81 = vector.extract_strided_slice %75 {offsets = [1, 0, 0], sizes = [2, 2, 256], strides = [1, 1, 1]} : vector<4x2x256xbf16> to vector<2x2x256xbf16>
    %82 = vector.shape_cast %81 : vector<2x2x256xbf16> to vector<4x256xbf16>
    %c3_75 = arith.constant 3 : index
    %c0_76 = arith.constant 0 : index
    %c0_77 = arith.constant 0 : index
    %83 = vector.load %arg8[%c3_75, %c0_76, %c0_77] : memref<9x256x256xbf16, #tpu.memory_space<vmem>>, vector<1x256x256xbf16>
    %84 = vector.shape_cast %83 : vector<1x256x256xbf16> to vector<256x256xbf16>
    %cst_78 = arith.constant dense<0.000000e+00> : vector<4x256xf32>
    %85 = tpu.matmul %82, %84, %cst_78 {dimension_numbers = #tpu.dot_dimension_numbers<[1], [0], [0], [1], [0, 0, 1, 1], [], []>} : vector<4x256xbf16>, vector<256x256xbf16>, vector<4x256xf32> -> vector<4x256xf32>
    %86 = arith.addf %80, %85 : vector<4x256xf32>
    %87 = vector.extract_strided_slice %75 {offsets = [2, 0, 0], sizes = [2, 2, 256], strides = [1, 1, 1]} : vector<4x2x256xbf16> to vector<2x2x256xbf16>
    %88 = vector.shape_cast %87 : vector<2x2x256xbf16> to vector<4x256xbf16>
    %c6 = arith.constant 6 : index
    %c0_79 = arith.constant 0 : index
    %c0_80 = arith.constant 0 : index
    %89 = vector.load %arg8[%c6, %c0_79, %c0_80] : memref<9x256x256xbf16, #tpu.memory_space<vmem>>, vector<1x256x256xbf16>
    %90 = vector.shape_cast %89 : vector<1x256x256xbf16> to vector<256x256xbf16>
    %cst_81 = arith.constant dense<0.000000e+00> : vector<4x256xf32>
    %91 = tpu.matmul %88, %90, %cst_81 {dimension_numbers = #tpu.dot_dimension_numbers<[1], [0], [0], [1], [0, 0, 1, 1], [], []>} : vector<4x256xbf16>, vector<256x256xbf16>, vector<4x256xf32> -> vector<4x256xf32>
    %92 = arith.addf %86, %91 : vector<4x256xf32>
    %c0_82 = arith.constant 0 : index
    %c8_83 = arith.constant 8 : index
    %c0_84 = arith.constant 0 : index
    %93 = vector.load %arg21[%c0_82, %c8_83, %c0_84] : memref<4x16x256xbf16, #tpu.memory_space<vmem>>, vector<4x2x256xbf16>
    %94 = vector.extract_strided_slice %93 {offsets = [0, 0, 0], sizes = [2, 2, 256], strides = [1, 1, 1]} : vector<4x2x256xbf16> to vector<2x2x256xbf16>
    %95 = vector.shape_cast %94 : vector<2x2x256xbf16> to vector<4x256xbf16>
    %c1_85 = arith.constant 1 : index
    %c0_86 = arith.constant 0 : index
    %c0_87 = arith.constant 0 : index
    %96 = vector.load %arg8[%c1_85, %c0_86, %c0_87] : memref<9x256x256xbf16, #tpu.memory_space<vmem>>, vector<1x256x256xbf16>
    %97 = vector.shape_cast %96 : vector<1x256x256xbf16> to vector<256x256xbf16>
    %cst_88 = arith.constant dense<0.000000e+00> : vector<4x256xf32>
    %98 = tpu.matmul %95, %97, %cst_88 {dimension_numbers = #tpu.dot_dimension_numbers<[1], [0], [0], [1], [0, 0, 1, 1], [], []>} : vector<4x256xbf16>, vector<256x256xbf16>, vector<4x256xf32> -> vector<4x256xf32>
    %99 = arith.addf %92, %98 : vector<4x256xf32>
    %100 = vector.extract_strided_slice %93 {offsets = [1, 0, 0], sizes = [2, 2, 256], strides = [1, 1, 1]} : vector<4x2x256xbf16> to vector<2x2x256xbf16>
    %101 = vector.shape_cast %100 : vector<2x2x256xbf16> to vector<4x256xbf16>
    %c4 = arith.constant 4 : index
    %c0_89 = arith.constant 0 : index
    %c0_90 = arith.constant 0 : index
    %102 = vector.load %arg8[%c4, %c0_89, %c0_90] : memref<9x256x256xbf16, #tpu.memory_space<vmem>>, vector<1x256x256xbf16>
    %103 = vector.shape_cast %102 : vector<1x256x256xbf16> to vector<256x256xbf16>
    %cst_91 = arith.constant dense<0.000000e+00> : vector<4x256xf32>
    %104 = tpu.matmul %101, %103, %cst_91 {dimension_numbers = #tpu.dot_dimension_numbers<[1], [0], [0], [1], [0, 0, 1, 1], [], []>} : vector<4x256xbf16>, vector<256x256xbf16>, vector<4x256xf32> -> vector<4x256xf32>
    %105 = arith.addf %99, %104 : vector<4x256xf32>
    %106 = vector.extract_strided_slice %93 {offsets = [2, 0, 0], sizes = [2, 2, 256], strides = [1, 1, 1]} : vector<4x2x256xbf16> to vector<2x2x256xbf16>
    %107 = vector.shape_cast %106 : vector<2x2x256xbf16> to vector<4x256xbf16>
    %c7_92 = arith.constant 7 : index
    %c0_93 = arith.constant 0 : index
    %c0_94 = arith.constant 0 : index
    %108 = vector.load %arg8[%c7_92, %c0_93, %c0_94] : memref<9x256x256xbf16, #tpu.memory_space<vmem>>, vector<1x256x256xbf16>
    %109 = vector.shape_cast %108 : vector<1x256x256xbf16> to vector<256x256xbf16>
    %cst_95 = arith.constant dense<0.000000e+00> : vector<4x256xf32>
    %110 = tpu.matmul %107, %109, %cst_95 {dimension_numbers = #tpu.dot_dimension_numbers<[1], [0], [0], [1], [0, 0, 1, 1], [], []>} : vector<4x256xbf16>, vector<256x256xbf16>, vector<4x256xf32> -> vector<4x256xf32>
    %111 = arith.addf %105, %110 : vector<4x256xf32>
    %c0_96 = arith.constant 0 : index
    %c9 = arith.constant 9 : index
    %c0_97 = arith.constant 0 : index
    %112 = vector.load %arg21[%c0_96, %c9, %c0_97] : memref<4x16x256xbf16, #tpu.memory_space<vmem>>, vector<4x2x256xbf16>
    %113 = vector.extract_strided_slice %112 {offsets = [0, 0, 0], sizes = [2, 2, 256], strides = [1, 1, 1]} : vector<4x2x256xbf16> to vector<2x2x256xbf16>
    %114 = vector.shape_cast %113 : vector<2x2x256xbf16> to vector<4x256xbf16>
    %c2 = arith.constant 2 : index
    %c0_98 = arith.constant 0 : index
    %c0_99 = arith.constant 0 : index
    %115 = vector.load %arg8[%c2, %c0_98, %c0_99] : memref<9x256x256xbf16, #tpu.memory_space<vmem>>, vector<1x256x256xbf16>
    %116 = vector.shape_cast %115 : vector<1x256x256xbf16> to vector<256x256xbf16>
    %cst_100 = arith.constant dense<0.000000e+00> : vector<4x256xf32>
    %117 = tpu.matmul %114, %116, %cst_100 {dimension_numbers = #tpu.dot_dimension_numbers<[1], [0], [0], [1], [0, 0, 1, 1], [], []>} : vector<4x256xbf16>, vector<256x256xbf16>, vector<4x256xf32> -> vector<4x256xf32>
    %118 = arith.addf %111, %117 : vector<4x256xf32>
    %119 = vector.extract_strided_slice %112 {offsets = [1, 0, 0], sizes = [2, 2, 256], strides = [1, 1, 1]} : vector<4x2x256xbf16> to vector<2x2x256xbf16>
    %120 = vector.shape_cast %119 : vector<2x2x256xbf16> to vector<4x256xbf16>
    %c5 = arith.constant 5 : index
    %c0_101 = arith.constant 0 : index
    %c0_102 = arith.constant 0 : index
    %121 = vector.load %arg8[%c5, %c0_101, %c0_102] : memref<9x256x256xbf16, #tpu.memory_space<vmem>>, vector<1x256x256xbf16>
    %122 = vector.shape_cast %121 : vector<1x256x256xbf16> to vector<256x256xbf16>
    %cst_103 = arith.constant dense<0.000000e+00> : vector<4x256xf32>
    %123 = tpu.matmul %120, %122, %cst_103 {dimension_numbers = #tpu.dot_dimension_numbers<[1], [0], [0], [1], [0, 0, 1, 1], [], []>} : vector<4x256xbf16>, vector<256x256xbf16>, vector<4x256xf32> -> vector<4x256xf32>
    %124 = arith.addf %118, %123 : vector<4x256xf32>
    %125 = vector.extract_strided_slice %112 {offsets = [2, 0, 0], sizes = [2, 2, 256], strides = [1, 1, 1]} : vector<4x2x256xbf16> to vector<2x2x256xbf16>
    %126 = vector.shape_cast %125 : vector<2x2x256xbf16> to vector<4x256xbf16>
    %c8_104 = arith.constant 8 : index
    %c0_105 = arith.constant 0 : index
    %c0_106 = arith.constant 0 : index
    %127 = vector.load %arg8[%c8_104, %c0_105, %c0_106] : memref<9x256x256xbf16, #tpu.memory_space<vmem>>, vector<1x256x256xbf16>
    %128 = vector.shape_cast %127 : vector<1x256x256xbf16> to vector<256x256xbf16>
    %cst_107 = arith.constant dense<0.000000e+00> : vector<4x256xf32>
    %129 = tpu.matmul %126, %128, %cst_107 {dimension_numbers = #tpu.dot_dimension_numbers<[1], [0], [0], [1], [0, 0, 1, 1], [], []>} : vector<4x256xbf16>, vector<256x256xbf16>, vector<4x256xf32> -> vector<4x256xf32>
    %130 = arith.addf %124, %129 : vector<4x256xf32>
    %c0_108 = arith.constant 0 : index
    %c0_109 = arith.constant 0 : index
    %131 = vector.load %arg9[%c0_108, %c0_109] : memref<1x256xf32, #tpu.memory_space<vmem>>, vector<1x256xf32>
    %132 = vector.broadcast %131 : vector<1x256xf32> to vector<4x256xf32>
    %133 = arith.addf %130, %132 : vector<4x256xf32>
    %cst_110 = arith.constant 0.000000e+00 : f32
    %134 = vector.broadcast %cst_110 : f32 to vector<4x256xf32>
    %135 = arith.maximumf %133, %134 : vector<4x256xf32>
    %136 = arith.truncf %135 : vector<4x256xf32> to vector<4x256xbf16>
    %137 = vector.shape_cast %136 : vector<4x256xbf16> to vector<2x2x256xbf16>
    %c1_111 = arith.constant 1 : index
    %c8_112 = arith.constant 8 : index
    %c0_113 = arith.constant 0 : index
    %138 = vector.load %arg22[%c1_111, %c8_112, %c0_113] : memref<4x16x256xbf16, #tpu.memory_space<vmem>>, vector<2x2x256xbf16>
    tpu.vector_store %arg22[%c1_111, %c8_112, %c0_113], %137 {strides = array<i32>} : memref<4x16x256xbf16, #tpu.memory_space<vmem>>, vector<2x2x256xbf16>,
    %c0_114 = arith.constant 0 : index
    %c7_115 = arith.constant 7 : index
    %c0_116 = arith.constant 0 : index
    %139 = vector.load %arg22[%c0_114, %c7_115, %c0_116] : memref<4x16x256xbf16, #tpu.memory_space<vmem>>, vector<4x2x256xbf16>
    %140 = vector.extract_strided_slice %139 {offsets = [0, 0, 0], sizes = [2, 2, 256], strides = [1, 1, 1]} : vector<4x2x256xbf16> to vector<2x2x256xbf16>
    %141 = vector.shape_cast %140 : vector<2x2x256xbf16> to vector<4x256xbf16>
    %c0_117 = arith.constant 0 : index
    %c0_118 = arith.constant 0 : index
    %c0_119 = arith.constant 0 : index
    %142 = vector.load %arg10[%c0_117, %c0_118, %c0_119] : memref<9x256x256xbf16, #tpu.memory_space<vmem>>, vector<1x256x256xbf16>
    %143 = vector.shape_cast %142 : vector<1x256x256xbf16> to vector<256x256xbf16>
    %cst_120 = arith.constant dense<0.000000e+00> : vector<4x256xf32>
    %144 = tpu.matmul %141, %143, %cst_120 {dimension_numbers = #tpu.dot_dimension_numbers<[1], [0], [0], [1], [0, 0, 1, 1], [], []>} : vector<4x256xbf16>, vector<256x256xbf16>, vector<4x256xf32> -> vector<4x256xf32>
    %145 = vector.extract_strided_slice %139 {offsets = [1, 0, 0], sizes = [2, 2, 256], strides = [1, 1, 1]} : vector<4x2x256xbf16> to vector<2x2x256xbf16>
    %146 = vector.shape_cast %145 : vector<2x2x256xbf16> to vector<4x256xbf16>
    %c3_121 = arith.constant 3 : index
    %c0_122 = arith.constant 0 : index
    %c0_123 = arith.constant 0 : index
    %147 = vector.load %arg10[%c3_121, %c0_122, %c0_123] : memref<9x256x256xbf16, #tpu.memory_space<vmem>>, vector<1x256x256xbf16>
    %148 = vector.shape_cast %147 : vector<1x256x256xbf16> to vector<256x256xbf16>
    %cst_124 = arith.constant dense<0.000000e+00> : vector<4x256xf32>
    %149 = tpu.matmul %146, %148, %cst_124 {dimension_numbers = #tpu.dot_dimension_numbers<[1], [0], [0], [1], [0, 0, 1, 1], [], []>} : vector<4x256xbf16>, vector<256x256xbf16>, vector<4x256xf32> -> vector<4x256xf32>
    %150 = arith.addf %144, %149 : vector<4x256xf32>
    %151 = vector.extract_strided_slice %139 {offsets = [2, 0, 0], sizes = [2, 2, 256], strides = [1, 1, 1]} : vector<4x2x256xbf16> to vector<2x2x256xbf16>
    %152 = vector.shape_cast %151 : vector<2x2x256xbf16> to vector<4x256xbf16>
    %c6_125 = arith.constant 6 : index
    %c0_126 = arith.constant 0 : index
    %c0_127 = arith.constant 0 : index
    %153 = vector.load %arg10[%c6_125, %c0_126, %c0_127] : memref<9x256x256xbf16, #tpu.memory_space<vmem>>, vector<1x256x256xbf16>
    %154 = vector.shape_cast %153 : vector<1x256x256xbf16> to vector<256x256xbf16>
    %cst_128 = arith.constant dense<0.000000e+00> : vector<4x256xf32>
    %155 = tpu.matmul %152, %154, %cst_128 {dimension_numbers = #tpu.dot_dimension_numbers<[1], [0], [0], [1], [0, 0, 1, 1], [], []>} : vector<4x256xbf16>, vector<256x256xbf16>, vector<4x256xf32> -> vector<4x256xf32>
    %156 = arith.addf %150, %155 : vector<4x256xf32>
    %c0_129 = arith.constant 0 : index
    %c8_130 = arith.constant 8 : index
    %c0_131 = arith.constant 0 : index
    %157 = vector.load %arg22[%c0_129, %c8_130, %c0_131] : memref<4x16x256xbf16, #tpu.memory_space<vmem>>, vector<4x2x256xbf16>
    %158 = vector.extract_strided_slice %157 {offsets = [0, 0, 0], sizes = [2, 2, 256], strides = [1, 1, 1]} : vector<4x2x256xbf16> to vector<2x2x256xbf16>
    %159 = vector.shape_cast %158 : vector<2x2x256xbf16> to vector<4x256xbf16>
    %c1_132 = arith.constant 1 : index
    %c0_133 = arith.constant 0 : index
    %c0_134 = arith.constant 0 : index
    %160 = vector.load %arg10[%c1_132, %c0_133, %c0_134] : memref<9x256x256xbf16, #tpu.memory_space<vmem>>, vector<1x256x256xbf16>
    %161 = vector.shape_cast %160 : vector<1x256x256xbf16> to vector<256x256xbf16>
    %cst_135 = arith.constant dense<0.000000e+00> : vector<4x256xf32>
    %162 = tpu.matmul %159, %161, %cst_135 {dimension_numbers = #tpu.dot_dimension_numbers<[1], [0], [0], [1], [0, 0, 1, 1], [], []>} : vector<4x256xbf16>, vector<256x256xbf16>, vector<4x256xf32> -> vector<4x256xf32>
    %163 = arith.addf %156, %162 : vector<4x256xf32>
    %164 = vector.extract_strided_slice %157 {offsets = [1, 0, 0], sizes = [2, 2, 256], strides = [1, 1, 1]} : vector<4x2x256xbf16> to vector<2x2x256xbf16>
    %165 = vector.shape_cast %164 : vector<2x2x256xbf16> to vector<4x256xbf16>
    %c4_136 = arith.constant 4 : index
    %c0_137 = arith.constant 0 : index
    %c0_138 = arith.constant 0 : index
    %166 = vector.load %arg10[%c4_136, %c0_137, %c0_138] : memref<9x256x256xbf16, #tpu.memory_space<vmem>>, vector<1x256x256xbf16>
    %167 = vector.shape_cast %166 : vector<1x256x256xbf16> to vector<256x256xbf16>
    %cst_139 = arith.constant dense<0.000000e+00> : vector<4x256xf32>
    %168 = tpu.matmul %165, %167, %cst_139 {dimension_numbers = #tpu.dot_dimension_numbers<[1], [0], [0], [1], [0, 0, 1, 1], [], []>} : vector<4x256xbf16>, vector<256x256xbf16>, vector<4x256xf32> -> vector<4x256xf32>
    %169 = arith.addf %163, %168 : vector<4x256xf32>
    %170 = vector.extract_strided_slice %157 {offsets = [2, 0, 0], sizes = [2, 2, 256], strides = [1, 1, 1]} : vector<4x2x256xbf16> to vector<2x2x256xbf16>
    %171 = vector.shape_cast %170 : vector<2x2x256xbf16> to vector<4x256xbf16>
    %c7_140 = arith.constant 7 : index
    %c0_141 = arith.constant 0 : index
    %c0_142 = arith.constant 0 : index
    %172 = vector.load %arg10[%c7_140, %c0_141, %c0_142] : memref<9x256x256xbf16, #tpu.memory_space<vmem>>, vector<1x256x256xbf16>
    %173 = vector.shape_cast %172 : vector<1x256x256xbf16> to vector<256x256xbf16>
    %cst_143 = arith.constant dense<0.000000e+00> : vector<4x256xf32>
    %174 = tpu.matmul %171, %173, %cst_143 {dimension_numbers = #tpu.dot_dimension_numbers<[1], [0], [0], [1], [0, 0, 1, 1], [], []>} : vector<4x256xbf16>, vector<256x256xbf16>, vector<4x256xf32> -> vector<4x256xf32>
    %175 = arith.addf %169, %174 : vector<4x256xf32>
    %c0_144 = arith.constant 0 : index
    %c9_145 = arith.constant 9 : index
    %c0_146 = arith.constant 0 : index
    %176 = vector.load %arg22[%c0_144, %c9_145, %c0_146] : memref<4x16x256xbf16, #tpu.memory_space<vmem>>, vector<4x2x256xbf16>
    %177 = vector.extract_strided_slice %176 {offsets = [0, 0, 0], sizes = [2, 2, 256], strides = [1, 1, 1]} : vector<4x2x256xbf16> to vector<2x2x256xbf16>
    %178 = vector.shape_cast %177 : vector<2x2x256xbf16> to vector<4x256xbf16>
    %c2_147 = arith.constant 2 : index
    %c0_148 = arith.constant 0 : index
    %c0_149 = arith.constant 0 : index
    %179 = vector.load %arg10[%c2_147, %c0_148, %c0_149] : memref<9x256x256xbf16, #tpu.memory_space<vmem>>, vector<1x256x256xbf16>
    %180 = vector.shape_cast %179 : vector<1x256x256xbf16> to vector<256x256xbf16>
    %cst_150 = arith.constant dense<0.000000e+00> : vector<4x256xf32>
    %181 = tpu.matmul %178, %180, %cst_150 {dimension_numbers = #tpu.dot_dimension_numbers<[1], [0], [0], [1], [0, 0, 1, 1], [], []>} : vector<4x256xbf16>, vector<256x256xbf16>, vector<4x256xf32> -> vector<4x256xf32>
    %182 = arith.addf %175, %181 : vector<4x256xf32>
    %183 = vector.extract_strided_slice %176 {offsets = [1, 0, 0], sizes = [2, 2, 256], strides = [1, 1, 1]} : vector<4x2x256xbf16> to vector<2x2x256xbf16>
    %184 = vector.shape_cast %183 : vector<2x2x256xbf16> to vector<4x256xbf16>
    %c5_151 = arith.constant 5 : index
    %c0_152 = arith.constant 0 : index
    %c0_153 = arith.constant 0 : index
    %185 = vector.load %arg10[%c5_151, %c0_152, %c0_153] : memref<9x256x256xbf16, #tpu.memory_space<vmem>>, vector<1x256x256xbf16>
    %186 = vector.shape_cast %185 : vector<1x256x256xbf16> to vector<256x256xbf16>
    %cst_154 = arith.constant dense<0.000000e+00> : vector<4x256xf32>
    %187 = tpu.matmul %184, %186, %cst_154 {dimension_numbers = #tpu.dot_dimension_numbers<[1], [0], [0], [1], [0, 0, 1, 1], [], []>} : vector<4x256xbf16>, vector<256x256xbf16>, vector<4x256xf32> -> vector<4x256xf32>
    %188 = arith.addf %182, %187 : vector<4x256xf32>
    %189 = vector.extract_strided_slice %176 {offsets = [2, 0, 0], sizes = [2, 2, 256], strides = [1, 1, 1]} : vector<4x2x256xbf16> to vector<2x2x256xbf16>
    %190 = vector.shape_cast %189 : vector<2x2x256xbf16> to vector<4x256xbf16>
    %c8_155 = arith.constant 8 : index
    %c0_156 = arith.constant 0 : index
    %c0_157 = arith.constant 0 : index
    %191 = vector.load %arg10[%c8_155, %c0_156, %c0_157] : memref<9x256x256xbf16, #tpu.memory_space<vmem>>, vector<1x256x256xbf16>
    %192 = vector.shape_cast %191 : vector<1x256x256xbf16> to vector<256x256xbf16>
    %cst_158 = arith.constant dense<0.000000e+00> : vector<4x256xf32>
    %193 = tpu.matmul %190, %192, %cst_158 {dimension_numbers = #tpu.dot_dimension_numbers<[1], [0], [0], [1], [0, 0, 1, 1], [], []>} : vector<4x256xbf16>, vector<256x256xbf16>, vector<4x256xf32> -> vector<4x256xf32>
    %194 = arith.addf %188, %193 : vector<4x256xf32>
    %c0_159 = arith.constant 0 : index
    %c0_160 = arith.constant 0 : index
    %195 = vector.load %arg11[%c0_159, %c0_160] : memref<1x256xf32, #tpu.memory_space<vmem>>, vector<1x256xf32>
    %196 = vector.broadcast %195 : vector<1x256xf32> to vector<4x256xf32>
    %197 = arith.addf %194, %196 : vector<4x256xf32>
    %c1_161 = arith.constant 1 : index
    %c8_162 = arith.constant 8 : index
    %c0_163 = arith.constant 0 : index
    %198 = vector.load %arg21[%c1_161, %c8_162, %c0_163] : memref<4x16x256xbf16, #tpu.memory_space<vmem>>, vector<2x2x256xbf16>
    %199 = vector.shape_cast %198 : vector<2x2x256xbf16> to vector<4x256xbf16>
    %200 = arith.extf %199 : vector<4x256xbf16> to vector<4x256xf32>
    %201 = arith.addf %197, %200 : vector<4x256xf32>
    %202 = arith.truncf %201 : vector<4x256xf32> to vector<4x256xbf16>
    %203 = vector.shape_cast %202 : vector<4x256xbf16> to vector<2x2x256xbf16>
    %c1_164 = arith.constant 1 : index
    %c8_165 = arith.constant 8 : index
    %c0_166 = arith.constant 0 : index
    %204 = vector.load %arg21[%c1_164, %c8_165, %c0_166] : memref<4x16x256xbf16, #tpu.memory_space<vmem>>, vector<2x2x256xbf16>
    tpu.vector_store %arg21[%c1_164, %c8_165, %c0_166], %203 {strides = array<i32>} : memref<4x16x256xbf16, #tpu.memory_space<vmem>>, vector<2x2x256xbf16>,
    %c0_167 = arith.constant 0 : index
    %c7_168 = arith.constant 7 : index
    %c0_169 = arith.constant 0 : index
    %205 = vector.load %arg21[%c0_167, %c7_168, %c0_169] : memref<4x16x256xbf16, #tpu.memory_space<vmem>>, vector<4x2x256xbf16>
    %206 = vector.extract_strided_slice %205 {offsets = [0, 0, 0], sizes = [2, 2, 256], strides = [1, 1, 1]} : vector<4x2x256xbf16> to vector<2x2x256xbf16>
    %207 = vector.shape_cast %206 : vector<2x2x256xbf16> to vector<4x256xbf16>
    %c0_170 = arith.constant 0 : index
    %c0_171 = arith.constant 0 : index
    %c0_172 = arith.constant 0 : index
    %208 = vector.load %arg12[%c0_170, %c0_171, %c0_172] : memref<9x256x128xbf16, #tpu.memory_space<vmem>>, vector<1x256x128xbf16>
    %209 = vector.shape_cast %208 : vector<1x256x128xbf16> to vector<256x128xbf16>
    %cst_173 = arith.constant dense<0.000000e+00> : vector<4x128xf32>
    %210 = tpu.matmul %207, %209, %cst_173 {dimension_numbers = #tpu.dot_dimension_numbers<[1], [0], [0], [1], [0, 0, 1, 1], [], []>} : vector<4x256xbf16>, vector<256x128xbf16>, vector<4x128xf32> -> vector<4x128xf32>
    %211 = vector.extract_strided_slice %205 {offsets = [1, 0, 0], sizes = [2, 2, 256], strides = [1, 1, 1]} : vector<4x2x256xbf16> to vector<2x2x256xbf16>
    %212 = vector.shape_cast %211 : vector<2x2x256xbf16> to vector<4x256xbf16>
    %c3_174 = arith.constant 3 : index
    %c0_175 = arith.constant 0 : index
    %c0_176 = arith.constant 0 : index
    %213 = vector.load %arg12[%c3_174, %c0_175, %c0_176] : memref<9x256x128xbf16, #tpu.memory_space<vmem>>, vector<1x256x128xbf16>
    %214 = vector.shape_cast %213 : vector<1x256x128xbf16> to vector<256x128xbf16>
    %cst_177 = arith.constant dense<0.000000e+00> : vector<4x128xf32>
    %215 = tpu.matmul %212, %214, %cst_177 {dimension_numbers = #tpu.dot_dimension_numbers<[1], [0], [0], [1], [0, 0, 1, 1], [], []>} : vector<4x256xbf16>, vector<256x128xbf16>, vector<4x128xf32> -> vector<4x128xf32>
    %216 = arith.addf %210, %215 : vector<4x128xf32>
    %217 = vector.extract_strided_slice %205 {offsets = [2, 0, 0], sizes = [2, 2, 256], strides = [1, 1, 1]} : vector<4x2x256xbf16> to vector<2x2x256xbf16>
    %218 = vector.shape_cast %217 : vector<2x2x256xbf16> to vector<4x256xbf16>
    %c6_178 = arith.constant 6 : index
    %c0_179 = arith.constant 0 : index
    %c0_180 = arith.constant 0 : index
    %219 = vector.load %arg12[%c6_178, %c0_179, %c0_180] : memref<9x256x128xbf16, #tpu.memory_space<vmem>>, vector<1x256x128xbf16>
    %220 = vector.shape_cast %219 : vector<1x256x128xbf16> to vector<256x128xbf16>
    %cst_181 = arith.constant dense<0.000000e+00> : vector<4x128xf32>
    %221 = tpu.matmul %218, %220, %cst_181 {dimension_numbers = #tpu.dot_dimension_numbers<[1], [0], [0], [1], [0, 0, 1, 1], [], []>} : vector<4x256xbf16>, vector<256x128xbf16>, vector<4x128xf32> -> vector<4x128xf32>
    %222 = arith.addf %216, %221 : vector<4x128xf32>
    %c0_182 = arith.constant 0 : index
    %c8_183 = arith.constant 8 : index
    %c0_184 = arith.constant 0 : index
    %223 = vector.load %arg21[%c0_182, %c8_183, %c0_184] : memref<4x16x256xbf16, #tpu.memory_space<vmem>>, vector<4x2x256xbf16>
    %224 = vector.extract_strided_slice %223 {offsets = [0, 0, 0], sizes = [2, 2, 256], strides = [1, 1, 1]} : vector<4x2x256xbf16> to vector<2x2x256xbf16>
    %225 = vector.shape_cast %224 : vector<2x2x256xbf16> to vector<4x256xbf16>
    %c1_185 = arith.constant 1 : index
    %c0_186 = arith.constant 0 : index
    %c0_187 = arith.constant 0 : index
    %226 = vector.load %arg12[%c1_185, %c0_186, %c0_187] : memref<9x256x128xbf16, #tpu.memory_space<vmem>>, vector<1x256x128xbf16>
    %227 = vector.shape_cast %226 : vector<1x256x128xbf16> to vector<256x128xbf16>
    %cst_188 = arith.constant dense<0.000000e+00> : vector<4x128xf32>
    %228 = tpu.matmul %225, %227, %cst_188 {dimension_numbers = #tpu.dot_dimension_numbers<[1], [0], [0], [1], [0, 0, 1, 1], [], []>} : vector<4x256xbf16>, vector<256x128xbf16>, vector<4x128xf32> -> vector<4x128xf32>
    %229 = arith.addf %222, %228 : vector<4x128xf32>
    %230 = vector.extract_strided_slice %223 {offsets = [1, 0, 0], sizes = [2, 2, 256], strides = [1, 1, 1]} : vector<4x2x256xbf16> to vector<2x2x256xbf16>
    %231 = vector.shape_cast %230 : vector<2x2x256xbf16> to vector<4x256xbf16>
    %c4_189 = arith.constant 4 : index
    %c0_190 = arith.constant 0 : index
    %c0_191 = arith.constant 0 : index
    %232 = vector.load %arg12[%c4_189, %c0_190, %c0_191] : memref<9x256x128xbf16, #tpu.memory_space<vmem>>, vector<1x256x128xbf16>
    %233 = vector.shape_cast %232 : vector<1x256x128xbf16> to vector<256x128xbf16>
    %cst_192 = arith.constant dense<0.000000e+00> : vector<4x128xf32>
    %234 = tpu.matmul %231, %233, %cst_192 {dimension_numbers = #tpu.dot_dimension_numbers<[1], [0], [0], [1], [0, 0, 1, 1], [], []>} : vector<4x256xbf16>, vector<256x128xbf16>, vector<4x128xf32> -> vector<4x128xf32>
    %235 = arith.addf %229, %234 : vector<4x128xf32>
    %236 = vector.extract_strided_slice %223 {offsets = [2, 0, 0], sizes = [2, 2, 256], strides = [1, 1, 1]} : vector<4x2x256xbf16> to vector<2x2x256xbf16>
    %237 = vector.shape_cast %236 : vector<2x2x256xbf16> to vector<4x256xbf16>
    %c7_193 = arith.constant 7 : index
    %c0_194 = arith.constant 0 : index
    %c0_195 = arith.constant 0 : index
    %238 = vector.load %arg12[%c7_193, %c0_194, %c0_195] : memref<9x256x128xbf16, #tpu.memory_space<vmem>>, vector<1x256x128xbf16>
    %239 = vector.shape_cast %238 : vector<1x256x128xbf16> to vector<256x128xbf16>
    %cst_196 = arith.constant dense<0.000000e+00> : vector<4x128xf32>
    %240 = tpu.matmul %237, %239, %cst_196 {dimension_numbers = #tpu.dot_dimension_numbers<[1], [0], [0], [1], [0, 0, 1, 1], [], []>} : vector<4x256xbf16>, vector<256x128xbf16>, vector<4x128xf32> -> vector<4x128xf32>
    %241 = arith.addf %235, %240 : vector<4x128xf32>
    %c0_197 = arith.constant 0 : index
    %c9_198 = arith.constant 9 : index
    %c0_199 = arith.constant 0 : index
    %242 = vector.load %arg21[%c0_197, %c9_198, %c0_199] : memref<4x16x256xbf16, #tpu.memory_space<vmem>>, vector<4x2x256xbf16>
    %243 = vector.extract_strided_slice %242 {offsets = [0, 0, 0], sizes = [2, 2, 256], strides = [1, 1, 1]} : vector<4x2x256xbf16> to vector<2x2x256xbf16>
    %244 = vector.shape_cast %243 : vector<2x2x256xbf16> to vector<4x256xbf16>
    %c2_200 = arith.constant 2 : index
    %c0_201 = arith.constant 0 : index
    %c0_202 = arith.constant 0 : index
    %245 = vector.load %arg12[%c2_200, %c0_201, %c0_202] : memref<9x256x128xbf16, #tpu.memory_space<vmem>>, vector<1x256x128xbf16>
    %246 = vector.shape_cast %245 : vector<1x256x128xbf16> to vector<256x128xbf16>
    %cst_203 = arith.constant dense<0.000000e+00> : vector<4x128xf32>
    %247 = tpu.matmul %244, %246, %cst_203 {dimension_numbers = #tpu.dot_dimension_numbers<[1], [0], [0], [1], [0, 0, 1, 1], [], []>} : vector<4x256xbf16>, vector<256x128xbf16>, vector<4x128xf32> -> vector<4x128xf32>
    %248 = arith.addf %241, %247 : vector<4x128xf32>
    %249 = vector.extract_strided_slice %242 {offsets = [1, 0, 0], sizes = [2, 2, 256], strides = [1, 1, 1]} : vector<4x2x256xbf16> to vector<2x2x256xbf16>
    %250 = vector.shape_cast %249 : vector<2x2x256xbf16> to vector<4x256xbf16>
    %c5_204 = arith.constant 5 : index
    %c0_205 = arith.constant 0 : index
    %c0_206 = arith.constant 0 : index
    %251 = vector.load %arg12[%c5_204, %c0_205, %c0_206] : memref<9x256x128xbf16, #tpu.memory_space<vmem>>, vector<1x256x128xbf16>
    %252 = vector.shape_cast %251 : vector<1x256x128xbf16> to vector<256x128xbf16>
    %cst_207 = arith.constant dense<0.000000e+00> : vector<4x128xf32>
    %253 = tpu.matmul %250, %252, %cst_207 {dimension_numbers = #tpu.dot_dimension_numbers<[1], [0], [0], [1], [0, 0, 1, 1], [], []>} : vector<4x256xbf16>, vector<256x128xbf16>, vector<4x128xf32> -> vector<4x128xf32>
    %254 = arith.addf %248, %253 : vector<4x128xf32>
    %255 = vector.extract_strided_slice %242 {offsets = [2, 0, 0], sizes = [2, 2, 256], strides = [1, 1, 1]} : vector<4x2x256xbf16> to vector<2x2x256xbf16>
    %256 = vector.shape_cast %255 : vector<2x2x256xbf16> to vector<4x256xbf16>
    %c8_208 = arith.constant 8 : index
    %c0_209 = arith.constant 0 : index
    %c0_210 = arith.constant 0 : index
    %257 = vector.load %arg12[%c8_208, %c0_209, %c0_210] : memref<9x256x128xbf16, #tpu.memory_space<vmem>>, vector<1x256x128xbf16>
    %258 = vector.shape_cast %257 : vector<1x256x128xbf16> to vector<256x128xbf16>
    %cst_211 = arith.constant dense<0.000000e+00> : vector<4x128xf32>
    %259 = tpu.matmul %256, %258, %cst_211 {dimension_numbers = #tpu.dot_dimension_numbers<[1], [0], [0], [1], [0, 0, 1, 1], [], []>} : vector<4x256xbf16>, vector<256x128xbf16>, vector<4x128xf32> -> vector<4x128xf32>
    %260 = arith.addf %254, %259 : vector<4x128xf32>
    %c0_212 = arith.constant 0 : index
    %c0_213 = arith.constant 0 : index
    %261 = vector.load %arg13[%c0_212, %c0_213] : memref<1x128xf32, #tpu.memory_space<vmem>>, vector<1x128xf32>
    %262 = vector.broadcast %261 : vector<1x128xf32> to vector<4x128xf32>
    %263 = arith.addf %260, %262 : vector<4x128xf32>
    %cst_214 = arith.constant 0.000000e+00 : f32
    %264 = vector.broadcast %cst_214 : f32 to vector<4x128xf32>
    %265 = arith.maximumf %263, %264 : vector<4x128xf32>
    %266 = arith.truncf %265 : vector<4x128xf32> to vector<4x128xbf16>
    %267 = vector.shape_cast %266 : vector<4x128xbf16> to vector<2x2x128xbf16>
    %c1_215 = arith.constant 1 : index
    %c8_216 = arith.constant 8 : index
    %c0_217 = arith.constant 0 : index
    %268 = vector.load %arg23[%c1_215, %c8_216, %c0_217] : memref<4x16x128xbf16, #tpu.memory_space<vmem>>, vector<2x2x128xbf16>
    tpu.vector_store %arg23[%c1_215, %c8_216, %c0_217], %267 {strides = array<i32>} : memref<4x16x128xbf16, #tpu.memory_space<vmem>>, vector<2x2x128xbf16>,
    %c1_218 = arith.constant 1 : index
    %c8_219 = arith.constant 8 : index
    %c0_220 = arith.constant 0 : index
    %269 = vector.load %arg21[%c1_218, %c8_219, %c0_220] : memref<4x16x256xbf16, #tpu.memory_space<vmem>>, vector<2x2x256xbf16>
    %270 = vector.shape_cast %269 : vector<2x2x256xbf16> to vector<4x256xbf16>
    %c0_221 = arith.constant 0 : index
    %c0_222 = arith.constant 0 : index
    %271 = vector.load %arg16[%c0_221, %c0_222] : memref<256x128xbf16, #tpu.memory_space<vmem>>, vector<256x128xbf16>
    %cst_223 = arith.constant dense<0.000000e+00> : vector<4x128xf32>
    %272 = tpu.matmul %270, %271, %cst_223 {dimension_numbers = #tpu.dot_dimension_numbers<[1], [0], [0], [1], [0, 0, 1, 1], [], []>} : vector<4x256xbf16>, vector<256x128xbf16>, vector<4x128xf32> -> vector<4x128xf32>
    %c0_224 = arith.constant 0 : index
    %c0_225 = arith.constant 0 : index
    %273 = vector.load %arg17[%c0_224, %c0_225] : memref<1x128xf32, #tpu.memory_space<vmem>>, vector<1x128xf32>
    %274 = vector.broadcast %273 : vector<1x128xf32> to vector<4x128xf32>
    %275 = arith.addf %272, %274 : vector<4x128xf32>
    %c0_226 = arith.constant 0 : index
    %c7_227 = arith.constant 7 : index
    %c0_228 = arith.constant 0 : index
    %276 = vector.load %arg23[%c0_226, %c7_227, %c0_228] : memref<4x16x128xbf16, #tpu.memory_space<vmem>>, vector<4x2x128xbf16>
    %277 = vector.extract_strided_slice %276 {offsets = [0, 0, 0], sizes = [2, 2, 128], strides = [1, 1, 1]} : vector<4x2x128xbf16> to vector<2x2x128xbf16>
    %278 = vector.shape_cast %277 : vector<2x2x128xbf16> to vector<4x128xbf16>
    %c0_229 = arith.constant 0 : index
    %c0_230 = arith.constant 0 : index
    %c0_231 = arith.constant 0 : index
    %279 = vector.load %arg14[%c0_229, %c0_230, %c0_231] : memref<9x128x128xbf16, #tpu.memory_space<vmem>>, vector<1x128x128xbf16>
    %280 = vector.shape_cast %279 : vector<1x128x128xbf16> to vector<128x128xbf16>
    %cst_232 = arith.constant dense<0.000000e+00> : vector<4x128xf32>
    %281 = tpu.matmul %278, %280, %cst_232 {dimension_numbers = #tpu.dot_dimension_numbers<[1], [0], [0], [1], [0, 0, 1, 1], [], []>} : vector<4x128xbf16>, vector<128x128xbf16>, vector<4x128xf32> -> vector<4x128xf32>
    %282 = vector.extract_strided_slice %276 {offsets = [1, 0, 0], sizes = [2, 2, 128], strides = [1, 1, 1]} : vector<4x2x128xbf16> to vector<2x2x128xbf16>
    %283 = vector.shape_cast %282 : vector<2x2x128xbf16> to vector<4x128xbf16>
    %c3_233 = arith.constant 3 : index
    %c0_234 = arith.constant 0 : index
    %c0_235 = arith.constant 0 : index
    %284 = vector.load %arg14[%c3_233, %c0_234, %c0_235] : memref<9x128x128xbf16, #tpu.memory_space<vmem>>, vector<1x128x128xbf16>
    %285 = vector.shape_cast %284 : vector<1x128x128xbf16> to vector<128x128xbf16>
    %cst_236 = arith.constant dense<0.000000e+00> : vector<4x128xf32>
    %286 = tpu.matmul %283, %285, %cst_236 {dimension_numbers = #tpu.dot_dimension_numbers<[1], [0], [0], [1], [0, 0, 1, 1], [], []>} : vector<4x128xbf16>, vector<128x128xbf16>, vector<4x128xf32> -> vector<4x128xf32>
    %287 = arith.addf %281, %286 : vector<4x128xf32>
    %288 = vector.extract_strided_slice %276 {offsets = [2, 0, 0], sizes = [2, 2, 128], strides = [1, 1, 1]} : vector<4x2x128xbf16> to vector<2x2x128xbf16>
    %289 = vector.shape_cast %288 : vector<2x2x128xbf16> to vector<4x128xbf16>
    %c6_237 = arith.constant 6 : index
    %c0_238 = arith.constant 0 : index
    %c0_239 = arith.constant 0 : index
    %290 = vector.load %arg14[%c6_237, %c0_238, %c0_239] : memref<9x128x128xbf16, #tpu.memory_space<vmem>>, vector<1x128x128xbf16>
    %291 = vector.shape_cast %290 : vector<1x128x128xbf16> to vector<128x128xbf16>
    %cst_240 = arith.constant dense<0.000000e+00> : vector<4x128xf32>
    %292 = tpu.matmul %289, %291, %cst_240 {dimension_numbers = #tpu.dot_dimension_numbers<[1], [0], [0], [1], [0, 0, 1, 1], [], []>} : vector<4x128xbf16>, vector<128x128xbf16>, vector<4x128xf32> -> vector<4x128xf32>
    %293 = arith.addf %287, %292 : vector<4x128xf32>
    %c0_241 = arith.constant 0 : index
    %c8_242 = arith.constant 8 : index
    %c0_243 = arith.constant 0 : index
    %294 = vector.load %arg23[%c0_241, %c8_242, %c0_243] : memref<4x16x128xbf16, #tpu.memory_space<vmem>>, vector<4x2x128xbf16>
    %295 = vector.extract_strided_slice %294 {offsets = [0, 0, 0], sizes = [2, 2, 128], strides = [1, 1, 1]} : vector<4x2x128xbf16> to vector<2x2x128xbf16>
    %296 = vector.shape_cast %295 : vector<2x2x128xbf16> to vector<4x128xbf16>
    %c1_244 = arith.constant 1 : index
    %c0_245 = arith.constant 0 : index
    %c0_246 = arith.constant 0 : index
    %297 = vector.load %arg14[%c1_244, %c0_245, %c0_246] : memref<9x128x128xbf16, #tpu.memory_space<vmem>>, vector<1x128x128xbf16>
    %298 = vector.shape_cast %297 : vector<1x128x128xbf16> to vector<128x128xbf16>
    %cst_247 = arith.constant dense<0.000000e+00> : vector<4x128xf32>
    %299 = tpu.matmul %296, %298, %cst_247 {dimension_numbers = #tpu.dot_dimension_numbers<[1], [0], [0], [1], [0, 0, 1, 1], [], []>} : vector<4x128xbf16>, vector<128x128xbf16>, vector<4x128xf32> -> vector<4x128xf32>
    %300 = arith.addf %293, %299 : vector<4x128xf32>
    %301 = vector.extract_strided_slice %294 {offsets = [1, 0, 0], sizes = [2, 2, 128], strides = [1, 1, 1]} : vector<4x2x128xbf16> to vector<2x2x128xbf16>
    %302 = vector.shape_cast %301 : vector<2x2x128xbf16> to vector<4x128xbf16>
    %c4_248 = arith.constant 4 : index
    %c0_249 = arith.constant 0 : index
    %c0_250 = arith.constant 0 : index
    %303 = vector.load %arg14[%c4_248, %c0_249, %c0_250] : memref<9x128x128xbf16, #tpu.memory_space<vmem>>, vector<1x128x128xbf16>
    %304 = vector.shape_cast %303 : vector<1x128x128xbf16> to vector<128x128xbf16>
    %cst_251 = arith.constant dense<0.000000e+00> : vector<4x128xf32>
    %305 = tpu.matmul %302, %304, %cst_251 {dimension_numbers = #tpu.dot_dimension_numbers<[1], [0], [0], [1], [0, 0, 1, 1], [], []>} : vector<4x128xbf16>, vector<128x128xbf16>, vector<4x128xf32> -> vector<4x128xf32>
    %306 = arith.addf %300, %305 : vector<4x128xf32>
    %307 = vector.extract_strided_slice %294 {offsets = [2, 0, 0], sizes = [2, 2, 128], strides = [1, 1, 1]} : vector<4x2x128xbf16> to vector<2x2x128xbf16>
    %308 = vector.shape_cast %307 : vector<2x2x128xbf16> to vector<4x128xbf16>
    %c7_252 = arith.constant 7 : index
    %c0_253 = arith.constant 0 : index
    %c0_254 = arith.constant 0 : index
    %309 = vector.load %arg14[%c7_252, %c0_253, %c0_254] : memref<9x128x128xbf16, #tpu.memory_space<vmem>>, vector<1x128x128xbf16>
    %310 = vector.shape_cast %309 : vector<1x128x128xbf16> to vector<128x128xbf16>
    %cst_255 = arith.constant dense<0.000000e+00> : vector<4x128xf32>
    %311 = tpu.matmul %308, %310, %cst_255 {dimension_numbers = #tpu.dot_dimension_numbers<[1], [0], [0], [1], [0, 0, 1, 1], [], []>} : vector<4x128xbf16>, vector<128x128xbf16>, vector<4x128xf32> -> vector<4x128xf32>
    %312 = arith.addf %306, %311 : vector<4x128xf32>
    %c0_256 = arith.constant 0 : index
    %c9_257 = arith.constant 9 : index
    %c0_258 = arith.constant 0 : index
    %313 = vector.load %arg23[%c0_256, %c9_257, %c0_258] : memref<4x16x128xbf16, #tpu.memory_space<vmem>>, vector<4x2x128xbf16>
    %314 = vector.extract_strided_slice %313 {offsets = [0, 0, 0], sizes = [2, 2, 128], strides = [1, 1, 1]} : vector<4x2x128xbf16> to vector<2x2x128xbf16>
    %315 = vector.shape_cast %314 : vector<2x2x128xbf16> to vector<4x128xbf16>
    %c2_259 = arith.constant 2 : index
    %c0_260 = arith.constant 0 : index
    %c0_261 = arith.constant 0 : index
    %316 = vector.load %arg14[%c2_259, %c0_260, %c0_261] : memref<9x128x128xbf16, #tpu.memory_space<vmem>>, vector<1x128x128xbf16>
    %317 = vector.shape_cast %316 : vector<1x128x128xbf16> to vector<128x128xbf16>
    %cst_262 = arith.constant dense<0.000000e+00> : vector<4x128xf32>
    %318 = tpu.matmul %315, %317, %cst_262 {dimension_numbers = #tpu.dot_dimension_numbers<[1], [0], [0], [1], [0, 0, 1, 1], [], []>} : vector<4x128xbf16>, vector<128x128xbf16>, vector<4x128xf32> -> vector<4x128xf32>
    %319 = arith.addf %312, %318 : vector<4x128xf32>
    %320 = vector.extract_strided_slice %313 {offsets = [1, 0, 0], sizes = [2, 2, 128], strides = [1, 1, 1]} : vector<4x2x128xbf16> to vector<2x2x128xbf16>
    %321 = vector.shape_cast %320 : vector<2x2x128xbf16> to vector<4x128xbf16>
    %c5_263 = arith.constant 5 : index
    %c0_264 = arith.constant 0 : index
    %c0_265 = arith.constant 0 : index
    %322 = vector.load %arg14[%c5_263, %c0_264, %c0_265] : memref<9x128x128xbf16, #tpu.memory_space<vmem>>, vector<1x128x128xbf16>
    %323 = vector.shape_cast %322 : vector<1x128x128xbf16> to vector<128x128xbf16>
    %cst_266 = arith.constant dense<0.000000e+00> : vector<4x128xf32>
    %324 = tpu.matmul %321, %323, %cst_266 {dimension_numbers = #tpu.dot_dimension_numbers<[1], [0], [0], [1], [0, 0, 1, 1], [], []>} : vector<4x128xbf16>, vector<128x128xbf16>, vector<4x128xf32> -> vector<4x128xf32>
    %325 = arith.addf %319, %324 : vector<4x128xf32>
    %326 = vector.extract_strided_slice %313 {offsets = [2, 0, 0], sizes = [2, 2, 128], strides = [1, 1, 1]} : vector<4x2x128xbf16> to vector<2x2x128xbf16>
    %327 = vector.shape_cast %326 : vector<2x2x128xbf16> to vector<4x128xbf16>
    %c8_267 = arith.constant 8 : index
    %c0_268 = arith.constant 0 : index
    %c0_269 = arith.constant 0 : index
    %328 = vector.load %arg14[%c8_267, %c0_268, %c0_269] : memref<9x128x128xbf16, #tpu.memory_space<vmem>>, vector<1x128x128xbf16>
    %329 = vector.shape_cast %328 : vector<1x128x128xbf16> to vector<128x128xbf16>
    %cst_270 = arith.constant dense<0.000000e+00> : vector<4x128xf32>
    %330 = tpu.matmul %327, %329, %cst_270 {dimension_numbers = #tpu.dot_dimension_numbers<[1], [0], [0], [1], [0, 0, 1, 1], [], []>} : vector<4x128xbf16>, vector<128x128xbf16>, vector<4x128xf32> -> vector<4x128xf32>
    %331 = arith.addf %325, %330 : vector<4x128xf32>
    %c0_271 = arith.constant 0 : index
    %c0_272 = arith.constant 0 : index
    %332 = vector.load %arg15[%c0_271, %c0_272] : memref<1x128xf32, #tpu.memory_space<vmem>>, vector<1x128xf32>
    %333 = vector.broadcast %332 : vector<1x128xf32> to vector<4x128xf32>
    %334 = arith.addf %331, %333 : vector<4x128xf32>
    %335 = arith.addf %334, %275 : vector<4x128xf32>
    %336 = vector.shape_cast %335 : vector<4x128xf32> to vector<2x2x128xf32>
    %337 = tpu.iota {dimensions = array<i32: 2>} : vector<1x1x128xi32>
    %c0_273 = arith.constant 0 : index
    %c0_274 = arith.constant 0 : index
    %338 = vector.load %arg19[%c0_273, %c0_274] : memref<2x16xf32, #tpu.memory_space<vmem>>, vector<2x16xf32>
    %c0_i32 = arith.constant 0 : i32
    %339 = vector.broadcast %c0_i32 : i32 to vector<1x1x128xi32>
    %340 = arith.cmpi eq, %337, %339 : vector<1x1x128xi32>
    %cst_275 = arith.constant 0.000000e+00 : f32
    %341 = vector.shape_cast %340 : vector<1x1x128xi1> to vector<1x1x128xi1>
    %342 = vector.broadcast %341 : vector<1x1x128xi1> to vector<2x2x128xi1>
    %343 = vector.broadcast %cst_275 : f32 to vector<2x2x128xf32>
    %344 = arith.select %342, %336, %343 : vector<2x2x128xi1>, vector<2x2x128xf32>
    %cst_276 = arith.constant dense<0.000000e+00> : vector<2x2xf32>
    %345 = vector.multi_reduction <add>, %344, %cst_276 [2] : vector<2x2x128xf32> to vector<2x2xf32>
    %cst_277 = arith.constant dense<0.000000e+00> : vector<2x16xf32>
    %346 = tpu.matmul %345, %338, %cst_277 {dimension_numbers = #tpu.dot_dimension_numbers<[1], [0], [0], [1], [0, 0, 1, 1], [], []>} : vector<2x2xf32>, vector<2x16xf32>, vector<2x16xf32> -> vector<2x16xf32>
    %c0_278 = arith.constant 0 : index
    %c0_279 = arith.constant 0 : index
    %c0_280 = arith.constant 0 : index
    %347 = vector.load %arg24[%c0_278, %c0_279, %c0_280] : memref<2x2x16xf32, #tpu.memory_space<vmem>>, vector<1x2x16xf32>
    %348 = vector.shape_cast %347 : vector<1x2x16xf32> to vector<2x16xf32>
    %349 = vector.shape_cast %346 : vector<2x16xf32> to vector<1x2x16xf32>
    tpu.vector_store %arg24[%c0_278, %c0_279, %c0_280], %349 {strides = array<i32>} : memref<2x2x16xf32, #tpu.memory_space<vmem>>, vector<1x2x16xf32>,
    %c1_i32 = arith.constant 1 : i32
    %350 = vector.broadcast %c1_i32 : i32 to vector<1x1x128xi32>
    %351 = arith.cmpi eq, %337, %350 : vector<1x1x128xi32>
    %cst_281 = arith.constant 0.000000e+00 : f32
    %352 = vector.shape_cast %351 : vector<1x1x128xi1> to vector<1x1x128xi1>
    %353 = vector.broadcast %352 : vector<1x1x128xi1> to vector<2x2x128xi1>
    %354 = vector.broadcast %cst_281 : f32 to vector<2x2x128xf32>
    %355 = arith.select %353, %336, %354 : vector<2x2x128xi1>, vector<2x2x128xf32>
    %cst_282 = arith.constant dense<0.000000e+00> : vector<2x2xf32>
    %356 = vector.multi_reduction <add>, %355, %cst_282 [2] : vector<2x2x128xf32> to vector<2x2xf32>
    %cst_283 = arith.constant dense<0.000000e+00> : vector<2x16xf32>
    %357 = tpu.matmul %356, %338, %cst_283 {dimension_numbers = #tpu.dot_dimension_numbers<[1], [0], [0], [1], [0, 0, 1, 1], [], []>} : vector<2x2xf32>, vector<2x16xf32>, vector<2x16xf32> -> vector<2x16xf32>
    %c1_284 = arith.constant 1 : index
    %c0_285 = arith.constant 0 : index
    %c0_286 = arith.constant 0 : index
    %358 = vector.load %arg24[%c1_284, %c0_285, %c0_286] : memref<2x2x16xf32, #tpu.memory_space<vmem>>, vector<1x2x16xf32>
    %359 = vector.shape_cast %358 : vector<1x2x16xf32> to vector<2x16xf32>
    %360 = vector.shape_cast %357 : vector<2x16xf32> to vector<1x2x16xf32>
    tpu.vector_store %arg24[%c1_284, %c0_285, %c0_286], %360 {strides = array<i32>} : memref<2x2x16xf32, #tpu.memory_space<vmem>>, vector<1x2x16xf32>,
    %c0_287 = arith.constant 0 : index
    %c0_288 = arith.constant 0 : index
    %361 = vector.load %arg18[%c0_287, %c0_288] : memref<16x2xf32, #tpu.memory_space<vmem>>, vector<16x2xf32>
    %c0_289 = arith.constant 0 : index
    %c0_290 = arith.constant 0 : index
    %c0_291 = arith.constant 0 : index
    %362 = vector.load %arg24[%c0_289, %c0_290, %c0_291] : memref<2x2x16xf32, #tpu.memory_space<vmem>>, vector<1x2x16xf32>
    %363 = vector.shape_cast %362 : vector<1x2x16xf32> to vector<2x16xf32>
    %cst_292 = arith.constant dense<0.000000e+00> : vector<16x16xf32>
    %364 = tpu.matmul %361, %363, %cst_292 {dimension_numbers = #tpu.dot_dimension_numbers<[1], [0], [0], [1], [0, 0, 1, 1], [], []>} : vector<16x2xf32>, vector<2x16xf32>, vector<16x16xf32> -> vector<16x16xf32>
    %c0_293 = arith.constant 0 : index
    %c0_294 = arith.constant 0 : index
    %c0_295 = arith.constant 0 : index
    %c0_296 = arith.constant 0 : index
    %365 = vector.load %arg20[%c0_293, %c0_294, %c0_295, %c0_296] : memref<1x2x16x16xf32, #tpu.memory_space<vmem>>, vector<1x1x16x16xf32>
    %366 = vector.shape_cast %365 : vector<1x1x16x16xf32> to vector<16x16xf32>
    %367 = vector.shape_cast %364 : vector<16x16xf32> to vector<1x1x16x16xf32>
    tpu.vector_store %arg20[%c0_293, %c0_294, %c0_295, %c0_296], %367 {strides = array<i32>} : memref<1x2x16x16xf32, #tpu.memory_space<vmem>>, vector<1x1x16x16xf32>,
    %c1_297 = arith.constant 1 : index
    %c0_298 = arith.constant 0 : index
    %c0_299 = arith.constant 0 : index
    %368 = vector.load %arg24[%c1_297, %c0_298, %c0_299] : memref<2x2x16xf32, #tpu.memory_space<vmem>>, vector<1x2x16xf32>
    %369 = vector.shape_cast %368 : vector<1x2x16xf32> to vector<2x16xf32>
    %cst_300 = arith.constant dense<0.000000e+00> : vector<16x16xf32>
    %370 = tpu.matmul %361, %369, %cst_300 {dimension_numbers = #tpu.dot_dimension_numbers<[1], [0], [0], [1], [0, 0, 1, 1], [], []>} : vector<16x2xf32>, vector<2x16xf32>, vector<16x16xf32> -> vector<16x16xf32>
    %c0_301 = arith.constant 0 : index
    %c1_302 = arith.constant 1 : index
    %c0_303 = arith.constant 0 : index
    %c0_304 = arith.constant 0 : index
    %371 = vector.load %arg20[%c0_301, %c1_302, %c0_303, %c0_304] : memref<1x2x16x16xf32, #tpu.memory_space<vmem>>, vector<1x1x16x16xf32>
    %372 = vector.shape_cast %371 : vector<1x1x16x16xf32> to vector<16x16xf32>
    %373 = vector.shape_cast %370 : vector<16x16xf32> to vector<1x1x16x16xf32>
    tpu.vector_store %arg20[%c0_301, %c1_302, %c0_303, %c0_304], %373 {strides = array<i32>} : memref<1x2x16x16xf32, #tpu.memory_space<vmem>>, vector<1x1x16x16xf32>,
    return
  }
  func.func @transform_0(%arg0: i32) -> (i32, i32, i32, i32) {
    %c0_i32 = arith.constant 0 : i32
    %c0_i32_0 = arith.constant 0 : i32
    %c0_i32_1 = arith.constant 0 : i32
    %c0_i32_2 = arith.constant 0 : i32
    return %arg0, %c0_i32, %c0_i32_0, %c0_i32_1 : i32, i32, i32, i32
  }
  func.func @transform_1(%arg0: i32) -> (i32, i32) {
    %c0_i32 = arith.constant 0 : i32
    %c0_i32_0 = arith.constant 0 : i32
    %c0_i32_1 = arith.constant 0 : i32
    return %c0_i32, %c0_i32_0 : i32, i32
  }
  func.func @transform_2(%arg0: i32) -> (i32, i32) {
    %c0_i32 = arith.constant 0 : i32
    %c0_i32_0 = arith.constant 0 : i32
    %c0_i32_1 = arith.constant 0 : i32
    return %c0_i32, %c0_i32_0 : i32, i32
  }
  func.func @transform_3(%arg0: i32) -> (i32, i32) {
    %c0_i32 = arith.constant 0 : i32
    %c0_i32_0 = arith.constant 0 : i32
    %c0_i32_1 = arith.constant 0 : i32
    return %c0_i32, %c0_i32_0 : i32, i32
  }
  func.func @transform_4(%arg0: i32) -> (i32, i32) {
    %c0_i32 = arith.constant 0 : i32
    %c0_i32_0 = arith.constant 0 : i32
    %c0_i32_1 = arith.constant 0 : i32
    return %c0_i32, %c0_i32_0 : i32, i32
  }
  func.func @transform_5(%arg0: i32) -> (i32, i32) {
    %c0_i32 = arith.constant 0 : i32
    %c0_i32_0 = arith.constant 0 : i32
    %c0_i32_1 = arith.constant 0 : i32
    return %c0_i32, %c0_i32_0 : i32, i32
  }
  func.func @transform_6(%arg0: i32) -> (i32, i32) {
    %c0_i32 = arith.constant 0 : i32
    %c0_i32_0 = arith.constant 0 : i32
    %c0_i32_1 = arith.constant 0 : i32
    return %c0_i32, %c0_i32_0 : i32, i32
  }
  func.func @transform_7(%arg0: i32) -> (i32, i32, i32) {
    %c0_i32 = arith.constant 0 : i32
    %c0_i32_0 = arith.constant 0 : i32
    %c0_i32_1 = arith.constant 0 : i32
    %c0_i32_2 = arith.constant 0 : i32
    return %c0_i32, %c0_i32_0, %c0_i32_1 : i32, i32, i32
  }
  func.func @transform_8(%arg0: i32) -> (i32, i32) {
    %c0_i32 = arith.constant 0 : i32
    %c0_i32_0 = arith.constant 0 : i32
    %c0_i32_1 = arith.constant 0 : i32
    return %c0_i32, %c0_i32_0 : i32, i32
  }
  func.func @transform_9(%arg0: i32) -> (i32, i32, i32) {
    %c0_i32 = arith.constant 0 : i32
    %c0_i32_0 = arith.constant 0 : i32
    %c0_i32_1 = arith.constant 0 : i32
    %c0_i32_2 = arith.constant 0 : i32
    return %c0_i32, %c0_i32_0, %c0_i32_1 : i32, i32, i32
  }
  func.func @transform_10(%arg0: i32) -> (i32, i32) {
    %c0_i32 = arith.constant 0 : i32
    %c0_i32_0 = arith.constant 0 : i32
    %c0_i32_1 = arith.constant 0 : i32
    return %c0_i32, %c0_i32_0 : i32, i32
  }
  func.func @transform_11(%arg0: i32) -> (i32, i32, i32) {
    %c0_i32 = arith.constant 0 : i32
    %c0_i32_0 = arith.constant 0 : i32
    %c0_i32_1 = arith.constant 0 : i32
    %c0_i32_2 = arith.constant 0 : i32
    return %c0_i32, %c0_i32_0, %c0_i32_1 : i32, i32, i32
  }
  func.func @transform_12(%arg0: i32) -> (i32, i32) {
    %c0_i32 = arith.constant 0 : i32
    %c0_i32_0 = arith.constant 0 : i32
    %c0_i32_1 = arith.constant 0 : i32
    return %c0_i32, %c0_i32_0 : i32, i32
  }
  func.func @transform_13(%arg0: i32) -> (i32, i32, i32) {
    %c0_i32 = arith.constant 0 : i32
    %c0_i32_0 = arith.constant 0 : i32
    %c0_i32_1 = arith.constant 0 : i32
    %c0_i32_2 = arith.constant 0 : i32
    return %c0_i32, %c0_i32_0, %c0_i32_1 : i32, i32, i32
  }
  func.func @transform_14(%arg0: i32) -> (i32, i32) {
    %c0_i32 = arith.constant 0 : i32
    %c0_i32_0 = arith.constant 0 : i32
    %c0_i32_1 = arith.constant 0 : i32
    return %c0_i32, %c0_i32_0 : i32, i32
  }
  func.func @transform_15(%arg0: i32) -> (i32, i32) {
    %c0_i32 = arith.constant 0 : i32
    %c0_i32_0 = arith.constant 0 : i32
    %c0_i32_1 = arith.constant 0 : i32
    return %c0_i32, %c0_i32_0 : i32, i32
  }
  func.func @transform_16(%arg0: i32) -> (i32, i32) {
    %c0_i32 = arith.constant 0 : i32
    %c0_i32_0 = arith.constant 0 : i32
    %c0_i32_1 = arith.constant 0 : i32
    return %c0_i32, %c0_i32_0 : i32, i32
  }
  func.func @transform_17(%arg0: i32) -> (i32, i32) {
    %c0_i32 = arith.constant 0 : i32
    %c0_i32_0 = arith.constant 0 : i32
    %c0_i32_1 = arith.constant 0 : i32
    return %c0_i32, %c0_i32_0 : i32, i32
  }
  func.func @transform_18(%arg0: i32) -> (i32, i32) {
    %c0_i32 = arith.constant 0 : i32
    %c0_i32_0 = arith.constant 0 : i32
    %c0_i32_1 = arith.constant 0 : i32
    return %c0_i32, %c0_i32_0 : i32, i32
  }
  func.func @transform_19(%arg0: i32) -> (i32, i32, i32, i32) {
    %c0_i32 = arith.constant 0 : i32
    %c0_i32_0 = arith.constant 0 : i32
    %c0_i32_1 = arith.constant 0 : i32
    %c0_i32_2 = arith.constant 0 : i32
    return %arg0, %c0_i32, %c0_i32_0, %c0_i32_1 : i32, i32, i32, i32
  }
}

</mosaic_0001>

<bundles_post_ra>
// kernel: squeeze.1
= control target key start
LH: loop header
LB: loop body
LE: loop exit
PB: predicated region body
PF: predicated region fallthrough
CT: control target
= control target key end

     0   :  { %vm66_vm0 = vcmask 64512   ;;  %v437_v17 = vmov 0.0   ;;  %s598_s0 = inlined_call_operand.vmem [shape: bf16[2,1,16,16], index: 0, kind: input, shape index: {}]   ;;  %s599_s1 = inlined_call_operand.vmem [shape: bf16[2,2,8,2,8], index: 1, kind: output, shape index: {}]  }
   0x1   :  { %v420_v0 = vld [vmem:[%s598_s0] sm:$0xff]   ;;  %v423_v1 = vld [vmem:[%s598_s0 + $0x8] sm:$0xff]   ;;  %s436_s0 = smov 120  }
   0x2   :  { %v421_v2 = vunpack.c.l.bf16 %v420_v0  ;;  %v422_v3 = vunpack.c.h.bf16 %v420_v0  ;;  %v417_v4 = vunpack.c.l.bf16 %v423_v1  ;;  %v418_v5 = vunpack.c.h.bf16 %v423_v1 }
   0x4   :  { %73 = vst.msk [vmem:[#allocation0 + $0x40] ss:$8 sm:$0xf] %vm66_vm0, %v422_v3   ;;  %75 = vst.msk [vmem:[#allocation0 + $0x40] ss:$8 sm:$0xf0] %vm66_vm0, %v422_v3   ;;  %v426_v6 = vpack.i.bf16 %v422_v3, %v421_v2  ;;  %v431_v7 = vpack.i.bf16 %v418_v5, %v417_v4 }
   0x5   :  { %67 = vst.msk [vmem:[#allocation0] ss:$8 sm:$0xf] %vm66_vm0, %v421_v2   ;;  %68 = vst.msk [vmem:[#allocation0] ss:$8 sm:$0xf0] %vm66_vm0, %v421_v2  }
   0x6   :  { %87 = vst.msk [vmem:[#allocation0 + $0xc0] ss:$8 sm:$0xf] %vm66_vm0, %v418_v5   ;;  %89 = vst.msk [vmem:[#allocation0 + $0xc0] ss:$8 sm:$0xf0] %vm66_vm0, %v418_v5   ;;  %427 = vrot.lane.b32.xlu0 %v426_v6, %s436_s0 }
   0x7   :  { %80 = vst.msk [vmem:[#allocation0 + $0x80] ss:$8 sm:$0xf] %vm66_vm0, %v417_v4   ;;  %82 = vst.msk [vmem:[#allocation0 + $0x80] ss:$8 sm:$0xf0] %vm66_vm0, %v417_v4  }
   0xa   :  { %432 = vrot.lane.b32.xlu0 %v431_v7, %s436_s0 }
  0x78   :  { %v428_v8 = vpop.permute.xlu0 %427 }
  0x79   :  { %v430_v9 = vunpack.i.h.bf16 %v428_v8  ;;  %v429_v10 = vunpack.i.l.bf16 %v428_v8 }
  0x7b   :  { %104 = vst.msk [vmem:[#allocation0 + $0x41] ss:$8 sm:$0xf] %vm66_vm0, %v430_v9   ;;  %106 = vst.msk [vmem:[#allocation0 + $0x41] ss:$8 sm:$0xf0] %vm66_vm0, %v430_v9  }
  0x7c   :  { %95 = vst.msk [vmem:[#allocation0 + $0x1] ss:$8 sm:$0xf] %vm66_vm0, %v429_v10   ;;  %97 = vst.msk [vmem:[#allocation0 + $0x1] ss:$8 sm:$0xf0] %vm66_vm0, %v429_v10   ;;  %v433_v11 = vpop.permute.xlu0 %432 }
  0x7d   :  { %v435_v12 = vunpack.i.h.bf16 %v433_v11  ;;  %v434_v13 = vunpack.i.l.bf16 %v433_v11 }
  0x7f   :  { %122 = vst.msk [vmem:[#allocation0 + $0xc1] ss:$8 sm:$0xf] %vm66_vm0, %v435_v12   ;;  %124 = vst.msk [vmem:[#allocation0 + $0xc1] ss:$8 sm:$0xf0] %vm66_vm0, %v435_v12  }
  0x80   :  { %113 = vst.msk [vmem:[#allocation0 + $0x81] ss:$8 sm:$0xf] %vm66_vm0, %v434_v13   ;;  %115 = vst.msk [vmem:[#allocation0 + $0x81] ss:$8 sm:$0xf0] %vm66_vm0, %v434_v13  }
  0x82   :  { %v182_v14 = vld [vmem:[#allocation0 + $0x40] sm:$0x3]  ;;  %v189_v15 = vld [vmem:[#allocation0 + $0x48] sm:$0x3]  ;;  %v196_v16 = vld [vmem:[#allocation0 + $0x50] sm:$0x3] }
  0x83   :  { %v183_v18 = vpack.c.bf16 %v437_v17, %v182_v14  ;;  %v190_v19 = vpack.c.bf16 %v437_v17, %v189_v15  ;;  %v197_v20 = vpack.c.bf16 %v437_v17, %v196_v16  ;;  %v203_v21 = vld [vmem:[#allocation0 + $0x58] sm:$0x3]  ;;  %v210_v22 = vld [vmem:[#allocation0 + $0x60] sm:$0x3]  ;;  %v217_v23 = vld [vmem:[#allocation0 + $0x68] sm:$0x3] }
  0x84   :  { %v204_v24 = vpack.c.bf16 %v437_v17, %v203_v21  ;;  %v211_v25 = vpack.c.bf16 %v437_v17, %v210_v22  ;;  %v218_v26 = vpack.c.bf16 %v437_v17, %v217_v23  ;;  %v224_v27 = vld [vmem:[#allocation0 + $0x70] sm:$0x3]  ;;  %v231_v28 = vld [vmem:[#allocation0 + $0x78] sm:$0x3]  ;;  %v129_v29 = vld [vmem:[#allocation0] sm:$0x3] }
  0x85   :  { %391 = vst [vmem:[%s599_s1 + $0x8] sm:$0x1] %v183_v18  ;;  %392 = vst [vmem:[%s599_s1 + $0x9] sm:$0x1] %v190_v19  ;;  %v225_v30 = vpack.c.bf16 %v437_v17, %v224_v27  ;;  %v232_v31 = vpack.c.bf16 %v437_v17, %v231_v28  ;;  %v130_v32 = vpack.c.bf16 %v437_v17, %v129_v29  ;;  %v134_v33 = vld [vmem:[#allocation0 + $0x8] sm:$0x3] }
  0x86   :  { %393 = vst [vmem:[%s599_s1 + $0xa] sm:$0x1] %v197_v20  ;;  %v140_v34 = vld [vmem:[#allocation0 + $0x10] sm:$0x3]  ;;  %v147_v35 = vld [vmem:[#allocation0 + $0x18] sm:$0x3]  ;;  %v135_v36 = vpack.c.bf16 %v437_v17, %v134_v33 }
  0x87   :  { %394 = vst [vmem:[%s599_s1 + $0xb] sm:$0x1] %v204_v24  ;;  %395 = vst [vmem:[%s599_s1 + $0xc] sm:$0x1] %v211_v25  ;;  %v141_v37 = vpack.c.bf16 %v437_v17, %v140_v34  ;;  %v148_v38 = vpack.c.bf16 %v437_v17, %v147_v35  ;;  %v154_v39 = vld [vmem:[#allocation0 + $0x20] sm:$0x3] }
  0x88   :  { %396 = vst [vmem:[%s599_s1 + $0xd] sm:$0x1] %v218_v26  ;;  %v161_v40 = vld [vmem:[#allocation0 + $0x28] sm:$0x3]  ;;  %v168_v41 = vld [vmem:[#allocation0 + $0x30] sm:$0x3]  ;;  %v155_v42 = vpack.c.bf16 %v437_v17, %v154_v39 }
  0x89   :  { %397 = vst [vmem:[%s599_s1 + $0xe] sm:$0x1] %v225_v30  ;;  %398 = vst [vmem:[%s599_s1 + $0xf] sm:$0x1] %v232_v31  ;;  %v162_v43 = vpack.c.bf16 %v437_v17, %v161_v40  ;;  %v169_v44 = vpack.c.bf16 %v437_v17, %v168_v41  ;;  %v175_v45 = vld [vmem:[#allocation0 + $0x38] sm:$0x3] }
  0x8a   :  { %132 = vst [vmem:[%s599_s1] sm:$0x1] %v130_v32  ;;  %v294_v46 = vld [vmem:[#allocation0 + $0xc0] sm:$0x3]  ;;  %v301_v47 = vld [vmem:[#allocation0 + $0xc8] sm:$0x3]  ;;  %v176_v48 = vpack.c.bf16 %v437_v17, %v175_v45 }
  0x8b   :  { %384 = vst [vmem:[%s599_s1 + $0x1] sm:$0x1] %v135_v36  ;;  %385 = vst [vmem:[%s599_s1 + $0x2] sm:$0x1] %v141_v37  ;;  %v295_v49 = vpack.c.bf16 %v437_v17, %v294_v46  ;;  %v302_v50 = vpack.c.bf16 %v437_v17, %v301_v47  ;;  %v308_v51 = vld [vmem:[#allocation0 + $0xd0] sm:$0x3] }
  0x8c   :  { %386 = vst [vmem:[%s599_s1 + $0x3] sm:$0x1] %v148_v38  ;;  %v315_v52 = vld [vmem:[#allocation0 + $0xd8] sm:$0x3]  ;;  %v322_v53 = vld [vmem:[#allocation0 + $0xe0] sm:$0x3]  ;;  %v309_v54 = vpack.c.bf16 %v437_v17, %v308_v51 }
  0x8d   :  { %387 = vst [vmem:[%s599_s1 + $0x4] sm:$0x1] %v155_v42  ;;  %388 = vst [vmem:[%s599_s1 + $0x5] sm:$0x1] %v162_v43  ;;  %v316_v55 = vpack.c.bf16 %v437_v17, %v315_v52  ;;  %v323_v56 = vpack.c.bf16 %v437_v17, %v322_v53  ;;  %v329_v57 = vld [vmem:[#allocation0 + $0xe8] sm:$0x3] }
  0x8e   :  { %389 = vst [vmem:[%s599_s1 + $0x6] sm:$0x1] %v169_v44  ;;  %v336_v58 = vld [vmem:[#allocation0 + $0xf0] sm:$0x3]  ;;  %v343_v59 = vld [vmem:[#allocation0 + $0xf8] sm:$0x3]  ;;  %v330_v60 = vpack.c.bf16 %v437_v17, %v329_v57 }
  0x8f   :  { %390 = vst [vmem:[%s599_s1 + $0x7] sm:$0x1] %v176_v48  ;;  %407 = vst [vmem:[%s599_s1 + $0x18] sm:$0x1] %v295_v49  ;;  %v337_v61 = vpack.c.bf16 %v437_v17, %v336_v58  ;;  %v344_v62 = vpack.c.bf16 %v437_v17, %v343_v59  ;;  %v238_v63 = vld [vmem:[#allocation0 + $0x80] sm:$0x3] }
  0x90   :  { %408 = vst [vmem:[%s599_s1 + $0x19] sm:$0x1] %v302_v50  ;;  %v245_v0 = vld [vmem:[#allocation0 + $0x88] sm:$0x3]  ;;  %v252_v1 = vld [vmem:[#allocation0 + $0x90] sm:$0x3]  ;;  %v239_v2 = vpack.c.bf16 %v437_v17, %v238_v63 }
  0x91   :  { %409 = vst [vmem:[%s599_s1 + $0x1a] sm:$0x1] %v309_v54  ;;  %410 = vst [vmem:[%s599_s1 + $0x1b] sm:$0x1] %v316_v55  ;;  %v246_v3 = vpack.c.bf16 %v437_v17, %v245_v0  ;;  %v253_v4 = vpack.c.bf16 %v437_v17, %v252_v1  ;;  %v259_v5 = vld [vmem:[#allocation0 + $0x98] sm:$0x3] }
  0x92   :  { %411 = vst [vmem:[%s599_s1 + $0x1c] sm:$0x1] %v323_v56  ;;  %v266_v6 = vld [vmem:[#allocation0 + $0xa0] sm:$0x3]  ;;  %v273_v7 = vld [vmem:[#allocation0 + $0xa8] sm:$0x3]  ;;  %v260_v8 = vpack.c.bf16 %v437_v17, %v259_v5 }
  0x93   :  { %412 = vst [vmem:[%s599_s1 + $0x1d] sm:$0x1] %v330_v60  ;;  %413 = vst [vmem:[%s599_s1 + $0x1e] sm:$0x1] %v337_v61  ;;  %v267_v9 = vpack.c.bf16 %v437_v17, %v266_v6  ;;  %v274_v10 = vpack.c.bf16 %v437_v17, %v273_v7  ;;  %v280_v11 = vld [vmem:[#allocation0 + $0xb0] sm:$0x3] }
  0x94   :  { %414 = vst [vmem:[%s599_s1 + $0x1f] sm:$0x1] %v344_v62  ;;  %v287_v12 = vld [vmem:[#allocation0 + $0xb8] sm:$0x3]  ;;  %399 = vst [vmem:[%s599_s1 + $0x10] sm:$0x1] %v239_v2  ;;  %v281_v13 = vpack.c.bf16 %v437_v17, %v280_v11 }
  0x95   :  { %400 = vst [vmem:[%s599_s1 + $0x11] sm:$0x1] %v246_v3  ;;  %401 = vst [vmem:[%s599_s1 + $0x12] sm:$0x1] %v253_v4  ;;  %v288_v14 = vpack.c.bf16 %v437_v17, %v287_v12 }
  0x96   :  { %402 = vst [vmem:[%s599_s1 + $0x13] sm:$0x1] %v260_v8  ;;  %403 = vst [vmem:[%s599_s1 + $0x14] sm:$0x1] %v267_v9 }
  0x97   :  { %404 = vst [vmem:[%s599_s1 + $0x15] sm:$0x1] %v274_v10  ;;  %405 = vst [vmem:[%s599_s1 + $0x16] sm:$0x1] %v281_v13 }
  0x98   :  { %406 = vst [vmem:[%s599_s1 + $0x17] sm:$0x1] %v288_v14 }

// kernel: kpa_forward.1
= control target key start
LH: loop header
LB: loop body
LE: loop exit
PB: predicated region body
PF: predicated region fallthrough
CT: control target
= control target key end

     0   :  { %s17163_s0 = inlined_call_operand.vmem [shape: bf16[2,2,2,128], index: 0, kind: input, shape index: {}]   ;;  %s17164_s1 = inlined_call_operand.hbm [shape: bf16[128,512], index: 1, kind: input, shape index: {}]   ;;  %s17165_s2 = inlined_call_operand.hbm [shape: f32[1,512], index: 2, kind: input, shape index: {}]   ;;  %s17166_s3 = inlined_call_operand.hbm [shape: bf16[256,256], index: 3, kind: input, shape index: {}]   ;;  %s17167_s4 = inlined_call_operand.hbm [shape: f32[1,256], index: 4, kind: input, shape index: {}]   ;;  %s17168_s5 = inlined_call_operand.hbm [shape: bf16[256,256], index: 5, kind: input, shape index: {}]   ;;  %s17169_s6 = inlined_call_operand.hbm [shape: f32[1,256], index: 6, kind: input, shape index: {}]   ;;  %s17170_s7 = inlined_call_operand.hbm [shape: bf16[9,256,256], index: 7, kind: input, shape index: {}]   ;;  %s17171_s8 = inlined_call_operand.hbm [shape: f32[1,256], index: 8, kind: input, shape index: {}]   ;;  %s17172_s9 = inlined_call_operand.hbm [shape: bf16[9,256,256], index: 9, kind: input, shape index: {}]   ;;  %s17173_s10 = inlined_call_operand.hbm [shape: f32[1,256], index: 10, kind: input, shape index: {}]   ;;  %s17174_s11 = inlined_call_operand.hbm [shape: bf16[9,256,128], index: 11, kind: input, shape index: {}]   ;;  %s17175_s12 = inlined_call_operand.hbm [shape: f32[1,128], index: 12, kind: input, shape index: {}]   ;;  %s17176_s13 = inlined_call_operand.hbm [shape: bf16[9,128,128], index: 13, kind: input, shape index: {}]   ;;  %s17177_s14 = inlined_call_operand.hbm [shape: f32[1,128], index: 14, kind: input, shape index: {}]   ;;  %s17178_s15 = inlined_call_operand.hbm [shape: bf16[256,128], index: 15, kind: input, shape index: {}]   ;;  %s17179_s16 = inlined_call_operand.hbm [shape: f32[1,128], index: 16, kind: input, shape index: {}]   ;;  %s17180_s17 = inlined_call_operand.hbm [shape: f32[16,2], index: 17, kind: input, shape index: {}]   ;;  %s17181_s18 = inlined_call_operand.hbm [shape: f32[2,16], index: 18, kind: input, shape index: {}]   ;;  %s17182_s19 = inlined_call_operand.hbm [shape: f32[2,2,16,16], index: 19, kind: output, shape index: {}]  }
   0x1   :  { %17202 = sst [smem:[#allocation56_spill]] %s17163_s0 }
   0x2   :  { %17203 = sst [smem:[#allocation57_spill]] %s17164_s1 }
   0x3   :  { %17204 = sst [smem:[#allocation58_spill]] %s17165_s2 }
   0x4   :  { %17205 = sst [smem:[#allocation59_spill]] %s17166_s3 }
   0x5   :  { %17206 = sst [smem:[#allocation60_spill]] %s17167_s4 }
   0x6   :  { %17207 = sst [smem:[#allocation61_spill]] %s17169_s6 }
   0x7   :  { %17208 = sst [smem:[#allocation62_spill]] %s17171_s8 }
   0x8   :  { %17209 = sst [smem:[#allocation63_spill]] %s17173_s10 }
   0x9   :  { %17210 = sst [smem:[#allocation64_spill]] %s17175_s12 }
   0xa   :  { %17211 = sst [smem:[#allocation65_spill]] %s17182_s19 }
   0xb   :  { %24 = vsyncpa [#allocation7], 0 }
   0xc   :  { %25 = vsyncpa [#allocation10], 0 }
   0xd   :  { %26 = vsyncpa [#allocation13], 0 }
   0xe   :  { %27 = vsyncpa [#allocation16], 0 }
   0xf   :  { %28 = vsyncpa [#allocation19], 0 }
  0x10   :  { %29 = vsyncpa [#allocation22], 0 }
  0x11   :  { %30 = vsyncpa [#allocation25], 0 }
  0x12   :  { %31 = vsyncpa [#allocation28], 0 }
  0x13   :  { %32 = vsyncpa [#allocation31], 0 }
  0x14   :  { %33 = vsyncpa [#allocation34], 0 }
  0x15   :  { %34 = vsyncpa [#allocation8], 0 }
  0x16   :  { %36 = vsyncpa [#allocation8 + $0x1], 0  ;;  %s15949_s0 = smov 0   ;;  %s15951_s30 = smov 0  }
  0x17   :  { %s15953_s20 = smov 0   ;;  %s15955_s21 = smov 0  }
  0x18 LB: > { %17212 = sst [smem:[#allocation47_spill]] %s15803_s0  ;;  %s15970_s1 = sadd.s32 4294967295, %s15815_s21   ;;  %s15815_s21 = sphi %s15955_s21, %s17269_s21   ;;  %s15811_s20 = sphi %s15953_s20, %s17272_s20   ;;  %s15807_s30 = sphi %s15951_s30, %s17271_s30   ;;  %s15803_s0 = sphi %s15949_s0, %s17270_s0  }
  0x19   : > { %17213 = sst [smem:[#allocation48_spill]] %s15807_s30  ;;  %s12137_s22 = sadd.s32 4294967294, %s15815_s21  }
  0x1a   : > { %17214 = sst [smem:[#allocation49_spill]] %s15811_s20  ;;  %s15974_s2 = sadd.s32 1, %s15815_s21  }
  0x1b   : > { %17215 = sst [smem:[#allocation50_spill]] %s15815_s21  ;;  %s453_s23 = sadd.s32 1, %s15811_s20 }
  0x1c   : > { %17216 = sst [smem:[#allocation51_spill]] %s15970_s1  ;;  %s450_s24 = ssub.s32 %s15815_s21, %s15974_s2 }
  0x1d   : > { %17217 = sst [smem:[#allocation52_spill]] %s15974_s2  ;;  %p463_p0 = scmp.ne.s32.totalorder %s15811_s20, %s15807_s30 }
  0x1e   : > { %p451_p1 = scmp.eq.s32.totalorder %s450_s24, 0  ;;  %p464_p2 = scmp.eq.s32.totalorder %s15970_s1, 1 }
  0x1f   : > { %p469_p3 = scmp.ne.s32.totalorder %s15807_s30, %s15803_s0  ;;  %p470_p4 = scmp.eq.s32.totalorder %s12137_s22, 1 }
  0x20   : > { %s15985_s25 = scalar_select %p451_p1, %s15811_s20, %s453_s23  }
  0x21   : > { %p15987_p5 = por %p464_p2, %p463_p0  ;;  %p15991_p6 = por %p470_p4, %p469_p3 }
  0x22   : > { %17218 = sst [smem:[#allocation53_spill]] %s15985_s25  ;;  %p12138_p7 = scmp.ge.s32.totalorder %s15815_s21, 1 }
  0x23   : > { %s17219_s3 = scalar_select %p15987_p5, 1, 0 }
  0x24   : > { %s17221_s26 = scalar_select %p15991_p6, 1, 0 }
  0x25   : > { %17220 = sst [smem:[#allocation54_spill]] %s17219_s3  ;;  %p477_p8 = scmp.lt.s32.totalorder %s15815_s21, 3 }
  0x26   : > { %17222 = sst [smem:[#allocation55_spill]] %s17221_s26  ;;  %p17195_p9 = scmp.eq.s32.totalorder %s15970_s1, 0 }
  0x27   : > { %p15998_p10 = pnand %p12138_p7, %p477_p8  ;;  %s15817_s28 = smov [#allocation9]  }
  0x28   : > { %s503_s29 = sshll.u32 %s15817_s28, 4  ;;  %s15818_s22 = smov [#allocation12]   ;;  %s504_s29 = int_to_ptr.vmem [resolvable:$true] %s503_s29 }
  0x29   : > { %s17223_s27 = scalar_select %p15998_p10, 1, 0 }
  0x2a   : > { %p13726_p11 = pneg %p15998_p10  ;;  %s527_s23 = sshll.u32 %s15818_s22, 4  ;;  %s16010_s23 = int_to_ptr.vmem [resolvable:$true] %s527_s23 }
  0x2b   : > { %s15819_s25 = smov [#allocation15]   ;;  %s17225_s28 = sld [smem:[#allocation58_spill]] }
  0x2c   : > { %p16006_p12 = pnand %p17195_p9, %p13726_p11  ;;  %s551_s20 = sshll.u32 %s15819_s25, 4  ;;  %s16012_s20 = int_to_ptr.vmem [resolvable:$true] %s551_s20 }
  0x2e   : > { %p16022_p0 = pneg %p16006_p12 }
  0x31   : > { %s15209_s0 = scalar_lea.hbm %s17225_s28, 64 }
  0x32   : > { %p15210_p13 = scmp.ne.s32.totalorder %s17225_s28, %s15209_s0  ;;  %p15216_p3 = scmp.lt.u32.totalorder %s15209_s0, %s17225_s28 }
  0x34   : > { %p15212_p1 = pnand %p16022_p0, %p15210_p13 }
  0x36   : > { %p15213_p2 = pneg %p15212_p1 }
  0x38   : > { %p15218_p4 = pnand %p15216_p3, %p15213_p2 }
  0x3a   : > { %15221 = shalt.err (!%p15218_p4)
}
  0x3b   : > { %s15222_s2 = scalar_lea.vmem %s504_s29, 64  ;;  %p15230_p9 = scmp.lt.s32.totalorder %s504_s29, %s504_s29 }
  0x3c   : > { %p15223_p7 = scmp.ne.s32.totalorder %s504_s29, %s15222_s2  ;;  %p15231_p6 = scmp.lt.s32.totalorder %s15222_s2, %s15222_s2 }
  0x3e   : > { %p15225_p8 = pnand %p15223_p7, %p16022_p0  ;;  %p15232_p5 = por %p15231_p6, %p15230_p9 }
  0x40   : > { %p15226_p11 = pneg %p15225_p8 }
  0x42   : > { %p15233_p10 = pnand %p15232_p5, %p15226_p11 }
  0x44   : > { %15236 = shalt.err (!%p15233_p10)
}
  0x45   : > { %13732 = dma.hbm_to_vmem [thread:$0]  (!%p16006_p12), %s17225_s28, 64, %s504_s29, [#allocation10]  }
  0x46   : > { %s17227_s4 = sld [smem:[#allocation60_spill]] }
  0x4c   : > { %s15237_s26 = scalar_lea.hbm %s17227_s4, 32 }
  0x4d   : > { %p15238_p13 = scmp.ne.s32.totalorder %s17227_s4, %s15237_s26  ;;  %p15244_p5 = scmp.lt.u32.totalorder %s15237_s26, %s17227_s4 }
  0x4f   : > { %p15240_p1 = pnand %p15238_p13, %p16022_p0 }
  0x51   : > { %p15241_p6 = pneg %p15240_p1 }
  0x53   : > { %p15246_p9 = pnand %p15244_p5, %p15241_p6 }
  0x55   : > { %15249 = shalt.err (!%p15246_p9)
}
  0x56   : > { %s15250_s29 = scalar_lea.vmem %s16010_s23, 32  ;;  %p15258_p4 = scmp.lt.s32.totalorder %s16010_s23, %s16010_s23 }
  0x57   : > { %p15251_p10 = scmp.ne.s32.totalorder %s16010_s23, %s15250_s29  ;;  %p15259_p7 = scmp.lt.s32.totalorder %s15250_s29, %s15250_s29 }
  0x59   : > { %p15253_p2 = pnand %p15251_p10, %p16022_p0  ;;  %p15260_p8 = por %p15259_p7, %p15258_p4 }
  0x5b   : > { %p15254_p3 = pneg %p15253_p2 }
  0x5d   : > { %p15261_p11 = pnand %p15260_p8, %p15254_p3 }
  0x5f   : > { %15264 = shalt.err (!%p15261_p11)
}
  0x60   : > { %13738 = dma.hbm_to_vmem [thread:$0]  (!%p16006_p12), %s17227_s4, 32, %s16010_s23, [#allocation13]  }
  0x61   : > { %s17228_s6 = sld [smem:[#allocation61_spill]] }
  0x67   : > { %s15265_s0 = scalar_lea.hbm %s17228_s6, 32 }
  0x68   : > { %p15266_p13 = scmp.ne.s32.totalorder %s17228_s6, %s15265_s0  ;;  %p15272_p5 = scmp.lt.u32.totalorder %s15265_s0, %s17228_s6 }
  0x6a   : > { %p15268_p1 = pnand %p15266_p13, %p16022_p0 }
  0x6c   : > { %p15269_p6 = pneg %p15268_p1 }
  0x6e   : > { %p15274_p9 = pnand %p15272_p5, %p15269_p6 }
  0x70   : > { %15277 = shalt.err (!%p15274_p9)
}
  0x71   : > { %s15278_s23 = scalar_lea.vmem %s16012_s20, 32  ;;  %p15286_p4 = scmp.lt.s32.totalorder %s16012_s20, %s16012_s20 }
  0x72   : > { %p15279_p10 = scmp.ne.s32.totalorder %s16012_s20, %s15278_s23  ;;  %p15287_p7 = scmp.lt.s32.totalorder %s15278_s23, %s15278_s23 }
  0x74   : > { %p15281_p2 = pnand %p15279_p10, %p16022_p0  ;;  %p15288_p8 = por %p15287_p7, %p15286_p4 }
  0x76   : > { %p15282_p3 = pneg %p15281_p2 }
  0x78   : > { %p15289_p11 = pnand %p15288_p8, %p15282_p3 }
  0x7a   : > { %15292 = shalt.err (!%p15289_p11)
}
  0x7b   : > { %13744 = dma.hbm_to_vmem [thread:$0]  (!%p16006_p12), %s17228_s6, 32, %s16012_s20, [#allocation16]  }
  0x7c   : > { %s15820_s1 = smov [#allocation18]   ;;  %s15821_s21 = smov [#allocation21]  }
  0x7d   : > { %s575_s19 = sshll.u32 %s15820_s1, 4  ;;  %s599_s0 = sshll.u32 %s15821_s21, 4  ;;  %s576_s19 = int_to_ptr.vmem [resolvable:$true] %s575_s19  ;;  %s600_s0 = int_to_ptr.vmem [resolvable:$true] %s599_s0 }
  0x7e   : > { %s17229_s8 = sld [smem:[#allocation62_spill]] }
  0x84   : > { %s15293_s25 = scalar_lea.hbm %s17229_s8, 32 }
  0x85   : > { %p15294_p13 = scmp.ne.s32.totalorder %s17229_s8, %s15293_s25  ;;  %p15300_p5 = scmp.lt.u32.totalorder %s15293_s25, %s17229_s8 }
  0x87   : > { %p15296_p1 = pnand %p15294_p13, %p16022_p0 }
  0x89   : > { %p15297_p6 = pneg %p15296_p1 }
  0x8b   : > { %p15302_p9 = pnand %p15300_p5, %p15297_p6 }
  0x8d   : > { %15305 = shalt.err (!%p15302_p9)
}
  0x8e   : > { %s15306_s20 = scalar_lea.vmem %s576_s19, 32  ;;  %p15314_p4 = scmp.lt.s32.totalorder %s576_s19, %s576_s19 }
  0x8f   : > { %p15307_p10 = scmp.ne.s32.totalorder %s576_s19, %s15306_s20  ;;  %p15315_p7 = scmp.lt.s32.totalorder %s15306_s20, %s15306_s20 }
  0x91   : > { %p15309_p2 = pnand %p15307_p10, %p16022_p0  ;;  %p15316_p8 = por %p15315_p7, %p15314_p4 }
  0x93   : > { %p15310_p3 = pneg %p15309_p2 }
  0x95   : > { %p15317_p11 = pnand %p15316_p8, %p15310_p3 }
  0x97   : > { %15320 = shalt.err (!%p15317_p11)
}
  0x98   : > { %13750 = dma.hbm_to_vmem [thread:$0]  (!%p16006_p12), %s17229_s8, 32, %s576_s19, [#allocation19]  }
  0x99   : > { %s17230_s10 = sld [smem:[#allocation63_spill]] }
  0x9f   : > { %s15321_s3 = scalar_lea.hbm %s17230_s10, 32 }
  0xa0   : > { %p15322_p13 = scmp.ne.s32.totalorder %s17230_s10, %s15321_s3  ;;  %p15328_p5 = scmp.lt.u32.totalorder %s15321_s3, %s17230_s10 }
  0xa2   : > { %p15324_p1 = pnand %p15322_p13, %p16022_p0 }
  0xa4   : > { %p15325_p6 = pneg %p15324_p1 }
  0xa6   : > { %p15330_p9 = pnand %p15328_p5, %p15325_p6 }
  0xa8   : > { %15333 = shalt.err (!%p15330_p9)
}
  0xa9   : > { %s15334_s29 = scalar_lea.vmem %s600_s0, 32  ;;  %p15342_p4 = scmp.lt.s32.totalorder %s600_s0, %s600_s0 }
  0xaa   : > { %p15335_p10 = scmp.ne.s32.totalorder %s600_s0, %s15334_s29  ;;  %p15343_p7 = scmp.lt.s32.totalorder %s15334_s29, %s15334_s29 }
  0xac   : > { %p15337_p2 = pnand %p15335_p10, %p16022_p0  ;;  %p15344_p8 = por %p15343_p7, %p15342_p4 }
  0xae   : > { %p15338_p3 = pneg %p15337_p2 }
  0xb0   : > { %p15345_p11 = pnand %p15344_p8, %p15338_p3 }
  0xb2   : > { %15348 = shalt.err (!%p15345_p11)
}
  0xb3   : > { %13756 = dma.hbm_to_vmem [thread:$0]  (!%p16006_p12), %s17230_s10, 32, %s600_s0, [#allocation22]  }
  0xb4   : > { %s15822_s30 = smov [#allocation24]   ;;  %s15823_s4 = smov [#allocation27]  }
  0xb5   : > { %s623_s1 = sshll.u32 %s15822_s30, 4  ;;  %s647_s21 = sshll.u32 %s15823_s4, 4  ;;  %s624_s1 = int_to_ptr.vmem [resolvable:$true] %s623_s1  ;;  %s648_s21 = int_to_ptr.vmem [resolvable:$true] %s647_s21 }
  0xb6   : > { %s17231_s12 = sld [smem:[#allocation64_spill]] }
  0xbc   : > { %s15349_s25 = scalar_lea.hbm %s17231_s12, 16 }
  0xbd   : > { %p15350_p13 = scmp.ne.s32.totalorder %s17231_s12, %s15349_s25  ;;  %p15356_p5 = scmp.lt.u32.totalorder %s15349_s25, %s17231_s12 }
  0xbf   : > { %p15352_p1 = pnand %p15350_p13, %p16022_p0 }
  0xc1   : > { %p15353_p6 = pneg %p15352_p1 }
  0xc3   : > { %p15358_p9 = pnand %p15356_p5, %p15353_p6 }
  0xc5   : > { %15361 = shalt.err (!%p15358_p9)
}
  0xc6   : > { %s15362_s0 = scalar_lea.vmem %s624_s1, 16  ;;  %s15369_s20 = scalar_lea.vmem %s624_s1, 32 }
  0xc7   : > { %p15363_p10 = scmp.ne.s32.totalorder %s624_s1, %s15362_s0  ;;  %p15370_p4 = scmp.lt.s32.totalorder %s624_s1, %s624_s1 }
  0xc8   : > { %p15371_p7 = scmp.lt.s32.totalorder %s15369_s20, %s15362_s0 }
  0xc9   : > { %p15365_p2 = pnand %p15363_p10, %p16022_p0 }
  0xca   : > { %p15372_p8 = por %p15371_p7, %p15370_p4 }
  0xcb   : > { %p15366_p3 = pneg %p15365_p2 }
  0xcd   : > { %p15373_p11 = pnand %p15372_p8, %p15366_p3 }
  0xcf   : > { %15376 = shalt.err (!%p15373_p11)
}
  0xd0   : > { %13762 = dma.hbm_to_vmem [thread:$0]  (!%p16006_p12), %s17231_s12, 16, %s624_s1, [#allocation25]  }
  0xd1   : > { %s15377_s25 = scalar_lea.hbm %s17177_s14, 16 }
  0xd2   : > { %p15378_p13 = scmp.ne.s32.totalorder %s17177_s14, %s15377_s25  ;;  %p15384_p5 = scmp.lt.u32.totalorder %s15377_s25, %s17177_s14 }
  0xd4   : > { %p15380_p1 = pnand %p15378_p13, %p16022_p0 }
  0xd6   : > { %p15381_p6 = pneg %p15380_p1 }
  0xd8   : > { %p15386_p9 = pnand %p15384_p5, %p15381_p6 }
  0xda   : > { %15389 = shalt.err (!%p15386_p9)
}
  0xdb   : > { %s15390_s0 = scalar_lea.vmem %s648_s21, 16  ;;  %s15397_s1 = scalar_lea.vmem %s648_s21, 32 }
  0xdc   : > { %p15391_p10 = scmp.ne.s32.totalorder %s648_s21, %s15390_s0  ;;  %p15398_p4 = scmp.lt.s32.totalorder %s648_s21, %s648_s21 }
  0xdd   : > { %p15399_p7 = scmp.lt.s32.totalorder %s15397_s1, %s15390_s0 }
  0xde   : > { %p15393_p2 = pnand %p15391_p10, %p16022_p0 }
  0xdf   : > { %p15400_p8 = por %p15399_p7, %p15398_p4 }
  0xe0   : > { %p15394_p3 = pneg %p15393_p2 }
  0xe2   : > { %p15401_p11 = pnand %p15400_p8, %p15394_p3 }
  0xe4   : > { %15404 = shalt.err (!%p15401_p11)
}
  0xe5   : > { %13768 = dma.hbm_to_vmem [thread:$0]  (!%p16006_p12), %s17177_s14, 16, %s648_s21, [#allocation28]  }
  0xe6   : > { %s15824_s4 = smov [#allocation30]   ;;  %s15825_s26 = smov [#allocation6]  }
  0xe7   : > { %s671_s3 = sshll.u32 %s15824_s4, 4  ;;  %s489_s25 = sshll.u32 %s15825_s26, 4  ;;  %s672_s3 = int_to_ptr.vmem [resolvable:$true] %s671_s3  ;;  %s490_s25 = int_to_ptr.vmem [resolvable:$true] %s489_s25 }
  0xe8   : > { %s15405_s29 = scalar_lea.hbm %s17179_s16, 16 }
  0xe9   : > { %p15406_p13 = scmp.ne.s32.totalorder %s17179_s16, %s15405_s29  ;;  %p15412_p5 = scmp.lt.u32.totalorder %s15405_s29, %s17179_s16 }
  0xeb   : > { %p15408_p1 = pnand %p15406_p13, %p16022_p0 }
  0xed   : > { %p15409_p6 = pneg %p15408_p1 }
  0xef   : > { %p15414_p9 = pnand %p15412_p5, %p15409_p6 }
  0xf1   : > { %15417 = shalt.err (!%p15414_p9)
}
  0xf2   : > { %s15418_s21 = scalar_lea.vmem %s672_s3, 16  ;;  %s15425_s30 = scalar_lea.vmem %s672_s3, 32 }
  0xf3   : > { %p15419_p10 = scmp.ne.s32.totalorder %s672_s3, %s15418_s21  ;;  %p15426_p4 = scmp.lt.s32.totalorder %s672_s3, %s672_s3 }
  0xf4   : > { %p15427_p7 = scmp.lt.s32.totalorder %s15425_s30, %s15418_s21 }
  0xf5   : > { %p15421_p2 = pnand %p15419_p10, %p16022_p0 }
  0xf6   : > { %p15428_p8 = por %p15427_p7, %p15426_p4 }
  0xf7   : > { %p15422_p3 = pneg %p15421_p2 }
  0xf9   : > { %p15429_p11 = pnand %p15428_p8, %p15422_p3 }
  0xfb   : > { %15432 = shalt.err (!%p15429_p11)
}
  0xfc   : > { %13774 = dma.hbm_to_vmem [thread:$0]  (!%p16006_p12), %s17179_s16, 16, %s672_s3, [#allocation31]  }
  0xfd   : > { %s17232_s29 = sld [smem:[#allocation57_spill]] }
 0x103   : > { %s15433_s19 = scalar_lea.hbm %s17232_s29, 4096 }
 0x104   : > { %p15434_p13 = scmp.ne.s32.totalorder %s17232_s29, %s15433_s19  ;;  %p15440_p5 = scmp.lt.u32.totalorder %s15433_s19, %s17232_s29 }
 0x106   : > { %p15436_p1 = pnand %p15434_p13, %p16022_p0 }
 0x108   : > { %p15437_p6 = pneg %p15436_p1 }
 0x10a   : > { %p15442_p9 = pnand %p15440_p5, %p15437_p6 }
 0x10c   : > { %15445 = shalt.err (!%p15442_p9)
}
 0x10d   : > { %s15446_s30 = scalar_lea.vmem %s490_s25, 4096  ;;  %p15454_p4 = scmp.lt.s32.totalorder %s490_s25, %s490_s25 }
 0x10e   : > { %p15447_p10 = scmp.ne.s32.totalorder %s490_s25, %s15446_s30  ;;  %p15455_p7 = scmp.lt.s32.totalorder %s15446_s30, %s15446_s30 }
 0x110   : > { %p15449_p2 = pnand %p15447_p10, %p16022_p0  ;;  %p15456_p8 = por %p15455_p7, %p15454_p4 }
 0x112   : > { %p15450_p3 = pneg %p15449_p2 }
 0x114   : > { %p15457_p11 = pnand %p15456_p8, %p15450_p3 }
 0x116   : > { %15460 = shalt.err (!%p15457_p11)
}
 0x117   : > { %s15826_s3 = smov 256   ;;  %s15827_s4 = smov 16  }
 0x118   : > { %13729 = dma.hbm_to_vmem [thread:$0]  (!%p16006_p12), %s17232_s29, 4096, %s490_s25, [#allocation7], %s15826_s3, %s15826_s3, %s15827_s4  }
 0x119   : > { %s15828_s23 = smov [#allocation11]   ;;  %s17233_s20 = sld [smem:[#allocation59_spill]] }
 0x11a   : > { %s513_s19 = sshll.u32 %s15828_s23, 4  ;;  %s514_s19 = int_to_ptr.vmem [resolvable:$true] %s513_s19 }
 0x11f   : > { %s17234_s6 = smov %s17233_s20  ;;  %s15461_s21 = scalar_lea.hbm %s17233_s20, 4096 }
 0x120   : > { %p15462_p13 = scmp.ne.s32.totalorder %s17234_s6, %s15461_s21  ;;  %p15468_p5 = scmp.lt.u32.totalorder %s15461_s21, %s17234_s6 }
 0x122   : > { %p15464_p1 = pnand %p15462_p13, %p16022_p0 }
 0x124   : > { %p15465_p6 = pneg %p15464_p1 }
 0x126   : > { %p15470_p9 = pnand %p15468_p5, %p15465_p6 }
 0x128   : > { %15473 = shalt.err (!%p15470_p9)
}
 0x129   : > { %s15474_s25 = scalar_lea.vmem %s514_s19, 4096  ;;  %p15482_p4 = scmp.lt.s32.totalorder %s514_s19, %s514_s19 }
 0x12a   : > { %p15475_p10 = scmp.ne.s32.totalorder %s514_s19, %s15474_s25  ;;  %p15483_p7 = scmp.lt.s32.totalorder %s15474_s25, %s15474_s25 }
 0x12c   : > { %p15477_p2 = pnand %p15475_p10, %p16022_p0  ;;  %p15484_p8 = por %p15483_p7, %p15482_p4 }
 0x12e   : > { %p15478_p3 = pneg %p15477_p2 }
 0x130   : > { %p15485_p11 = pnand %p15484_p8, %p15478_p3 }
 0x132   : > { %15488 = shalt.err (!%p15485_p11)
}
 0x133   : > { %s17201_s8 = smov 128   ;;  %s15830_s3 = smov 8  }
 0x134   : > { %13735 = dma.hbm_to_vmem [thread:$0]  (!%p16006_p12), %s17234_s6, 4096, %s514_s19, [#allocation10], %s17201_s8, %s17201_s8, %s15830_s3  }
 0x135   : > { %s15831_s4 = smov [#allocation14]   ;;  %s15832_s2 = smov [#allocation17]  }
 0x136   : > { %s537_s26 = sshll.u32 %s15831_s4, 4  ;;  %s561_s23 = sshll.u32 %s15832_s2, 4  ;;  %s538_s26 = int_to_ptr.vmem [resolvable:$true] %s537_s26  ;;  %s16213_s23 = int_to_ptr.vmem [resolvable:$true] %s561_s23 }
 0x137   : > { %s15489_s20 = scalar_lea.hbm %s17168_s5, 4096 }
 0x138   : > { %p15490_p13 = scmp.ne.s32.totalorder %s17168_s5, %s15489_s20  ;;  %p15496_p5 = scmp.lt.u32.totalorder %s15489_s20, %s17168_s5 }
 0x13a   : > { %p15492_p1 = pnand %p15490_p13, %p16022_p0 }
 0x13c   : > { %p15493_p6 = pneg %p15492_p1 }
 0x13e   : > { %p15498_p9 = pnand %p15496_p5, %p15493_p6 }
 0x140   : > { %15501 = shalt.err (!%p15498_p9)
}
 0x141   : > { %s15502_s10 = scalar_lea.vmem %s538_s26, 4096  ;;  %p15510_p4 = scmp.lt.s32.totalorder %s538_s26, %s538_s26 }
 0x142   : > { %p15503_p10 = scmp.ne.s32.totalorder %s538_s26, %s15502_s10  ;;  %p15511_p7 = scmp.lt.s32.totalorder %s15502_s10, %s15502_s10 }
 0x144   : > { %p15505_p2 = pnand %p15503_p10, %p16022_p0  ;;  %p15512_p8 = por %p15511_p7, %p15510_p4 }
 0x146   : > { %p15506_p3 = pneg %p15505_p2 }
 0x148   : > { %p15513_p11 = pnand %p15512_p8, %p15506_p3 }
 0x14a   : > { %15516 = shalt.err (!%p15513_p11)
}
 0x14b   : > { %13741 = dma.hbm_to_vmem [thread:$0]  (!%p16006_p12), %s17168_s5, 4096, %s538_s26, [#allocation13], %s17201_s8, %s17201_s8, %s15830_s3  }
 0x14c   : > { %s15517_s1 = scalar_lea.hbm %s17170_s7, 36864 }
 0x14d   : > { %p15518_p13 = scmp.ne.s32.totalorder %s17170_s7, %s15517_s1  ;;  %p15524_p5 = scmp.lt.u32.totalorder %s15517_s1, %s17170_s7 }
 0x14f   : > { %p15520_p1 = pnand %p15518_p13, %p16022_p0 }
 0x151   : > { %p15521_p6 = pneg %p15520_p1 }
 0x153   : > { %p15526_p9 = pnand %p15524_p5, %p15521_p6 }
 0x155   : > { %15529 = shalt.err (!%p15526_p9)
}
 0x156   : > { %s15530_s26 = scalar_lea.vmem %s16213_s23, 36864  ;;  %p15538_p4 = scmp.lt.s32.totalorder %s16213_s23, %s16213_s23 }
 0x157   : > { %p15531_p10 = scmp.ne.s32.totalorder %s16213_s23, %s15530_s26  ;;  %p15539_p7 = scmp.lt.s32.totalorder %s15530_s26, %s15530_s26 }
 0x159   : > { %p15533_p2 = pnand %p15531_p10, %p16022_p0  ;;  %p15540_p8 = por %p15539_p7, %p15538_p4 }
 0x15b   : > { %p15534_p3 = pneg %p15533_p2 }
 0x15d   : > { %p15541_p11 = pnand %p15540_p8, %p15534_p3 }
 0x15f   : > { %15544 = shalt.err (!%p15541_p11)
}
 0x160   : > { %13747 = dma.hbm_to_vmem [thread:$0]  (!%p16006_p12), %s17170_s7, 36864, %s16213_s23, [#allocation16], %s17201_s8, %s17201_s8, %s15830_s3  }
 0x161   : > { %s15833_s12 = smov [#allocation20]   ;;  %s15834_s2 = smov [#allocation23]  }
 0x162   : > { %s585_s4 = sshll.u32 %s15833_s12, 4  ;;  %s609_s0 = sshll.u32 %s15834_s2, 4  ;;  %s586_s4 = int_to_ptr.vmem [resolvable:$true] %s585_s4  ;;  %s16262_s0 = int_to_ptr.vmem [resolvable:$true] %s609_s0 }
 0x163   : > { %s15545_s21 = scalar_lea.hbm %s17172_s9, 36864 }
 0x164   : > { %p15546_p13 = scmp.ne.s32.totalorder %s17172_s9, %s15545_s21  ;;  %p15552_p5 = scmp.lt.u32.totalorder %s15545_s21, %s17172_s9 }
 0x166   : > { %p15548_p1 = pnand %p15546_p13, %p16022_p0 }
 0x168   : > { %p15549_p6 = pneg %p15548_p1 }
 0x16a   : > { %p15554_p9 = pnand %p15552_p5, %p15549_p6 }
 0x16c   : > { %15557 = shalt.err (!%p15554_p9)
}
 0x16d   : > { %s15558_s19 = scalar_lea.vmem %s586_s4, 36864  ;;  %p15566_p4 = scmp.lt.s32.totalorder %s586_s4, %s586_s4 }
 0x16e   : > { %p15559_p10 = scmp.ne.s32.totalorder %s586_s4, %s15558_s19  ;;  %p15567_p7 = scmp.lt.s32.totalorder %s15558_s19, %s15558_s19 }
 0x170   : > { %p15561_p2 = pnand %p15559_p10, %p16022_p0  ;;  %p15568_p8 = por %p15567_p7, %p15566_p4 }
 0x172   : > { %p15562_p3 = pneg %p15561_p2 }
 0x174   : > { %p15569_p11 = pnand %p15568_p8, %p15562_p3 }
 0x176   : > { %15572 = shalt.err (!%p15569_p11)
}
 0x177   : > { %13753 = dma.hbm_to_vmem [thread:$0]  (!%p16006_p12), %s17172_s9, 36864, %s586_s4, [#allocation19], %s17201_s8, %s17201_s8, %s15830_s3  }
 0x178   : > { %s15573_s20 = scalar_lea.hbm %s17174_s11, 18432 }
 0x179   : > { %p15574_p13 = scmp.ne.s32.totalorder %s17174_s11, %s15573_s20  ;;  %p15580_p5 = scmp.lt.u32.totalorder %s15573_s20, %s17174_s11 }
 0x17b   : > { %p15576_p1 = pnand %p15574_p13, %p16022_p0 }
 0x17d   : > { %p15577_p6 = pneg %p15576_p1 }
 0x17f   : > { %p15582_p9 = pnand %p15580_p5, %p15577_p6 }
 0x181   : > { %15585 = shalt.err (!%p15582_p9)
}
 0x182   : > { %s15586_s4 = scalar_lea.vmem %s16262_s0, 18432  ;;  %p15594_p4 = scmp.lt.s32.totalorder %s16262_s0, %s16262_s0 }
 0x183   : > { %p15587_p10 = scmp.ne.s32.totalorder %s16262_s0, %s15586_s4  ;;  %p15595_p7 = scmp.lt.s32.totalorder %s15586_s4, %s15586_s4 }
 0x185   : > { %p15589_p2 = pnand %p15587_p10, %p16022_p0  ;;  %p15596_p8 = por %p15595_p7, %p15594_p4 }
 0x187   : > { %p15590_p3 = pneg %p15589_p2 }
 0x189   : > { %p15597_p11 = pnand %p15596_p8, %p15590_p3 }
 0x18b   : > { %15600 = shalt.err (!%p15597_p11)
}
 0x18c   : > { %s15835_s23 = smov 64   ;;  %s15836_s19 = smov 4  }
 0x18d   : > { %13759 = dma.hbm_to_vmem [thread:$0]  (!%p16006_p12), %s17174_s11, 18432, %s16262_s0, [#allocation22], %s15835_s23, %s15835_s23, %s15836_s19  }
 0x18e   : > { %s15837_s2 = smov [#allocation26]   ;;  %s15838_s20 = smov [#allocation29]  }
 0x18f   : > { %s633_s1 = sshll.u32 %s15837_s2, 4  ;;  %s657_s21 = sshll.u32 %s15838_s20, 4  ;;  %s634_s1 = int_to_ptr.vmem [resolvable:$true] %s633_s1  ;;  %s16311_s21 = int_to_ptr.vmem [resolvable:$true] %s657_s21 }
 0x190   : > { %s15601_s26 = scalar_lea.hbm %s17176_s13, 9216 }
 0x191   : > { %p15602_p13 = scmp.ne.s32.totalorder %s17176_s13, %s15601_s26  ;;  %p15608_p5 = scmp.lt.u32.totalorder %s15601_s26, %s17176_s13 }
 0x193   : > { %p15604_p1 = pnand %p15602_p13, %p16022_p0 }
 0x195   : > { %p15605_p6 = pneg %p15604_p1 }
 0x197   : > { %p15610_p9 = pnand %p15608_p5, %p15605_p6 }
 0x199   : > { %15613 = shalt.err (!%p15610_p9)
}
 0x19a   : > { %s15614_s12 = scalar_lea.vmem %s634_s1, 9216  ;;  %p15622_p4 = scmp.lt.s32.totalorder %s634_s1, %s634_s1 }
 0x19b   : > { %p15615_p10 = scmp.ne.s32.totalorder %s634_s1, %s15614_s12  ;;  %p15623_p7 = scmp.lt.s32.totalorder %s15614_s12, %s15614_s12 }
 0x19d   : > { %p15617_p2 = pnand %p15615_p10, %p16022_p0  ;;  %p15624_p8 = por %p15623_p7, %p15622_p4 }
 0x19f   : > { %p15618_p3 = pneg %p15617_p2 }
 0x1a1   : > { %p15625_p11 = pnand %p15624_p8, %p15618_p3 }
 0x1a3   : > { %15628 = shalt.err (!%p15625_p11)
}
 0x1a4   : > { %13765 = dma.hbm_to_vmem [thread:$0]  (!%p16006_p12), %s17176_s13, 9216, %s634_s1, [#allocation25], %s15835_s23, %s15835_s23, %s15836_s19  }
 0x1a5   : > { %s15629_s25 = scalar_lea.hbm %s17178_s15, 2048 }
 0x1a6   : > { %p15630_p13 = scmp.ne.s32.totalorder %s17178_s15, %s15629_s25  ;;  %p15636_p5 = scmp.lt.u32.totalorder %s15629_s25, %s17178_s15 }
 0x1a8   : > { %p15632_p1 = pnand %p15630_p13, %p16022_p0 }
 0x1aa   : > { %p15633_p6 = pneg %p15632_p1 }
 0x1ac   : > { %p15638_p9 = pnand %p15636_p5, %p15633_p6 }
 0x1ae   : > { %15641 = shalt.err (!%p15638_p9)
}
 0x1af   : > { %s15642_s1 = scalar_lea.vmem %s16311_s21, 2048  ;;  %p15650_p4 = scmp.lt.s32.totalorder %s16311_s21, %s16311_s21 }
 0x1b0   : > { %p15643_p10 = scmp.ne.s32.totalorder %s16311_s21, %s15642_s1  ;;  %p15651_p7 = scmp.lt.s32.totalorder %s15642_s1, %s15642_s1 }
 0x1b2   : > { %p15645_p2 = pnand %p15643_p10, %p16022_p0  ;;  %p15652_p8 = por %p15651_p7, %p15650_p4 }
 0x1b4   : > { %p15646_p3 = pneg %p15645_p2 }
 0x1b6   : > { %p15653_p11 = pnand %p15652_p8, %p15646_p3 }
 0x1b8   : > { %15656 = shalt.err (!%p15653_p11)
}
 0x1b9   : > { %13771 = dma.hbm_to_vmem [thread:$0]  (!%p16006_p12), %s17178_s15, 2048, %s16311_s21, [#allocation28], %s15835_s23, %s15835_s23, %s15836_s19  }
 0x1ba   : > { %s15839_s2 = smov [#allocation32]   ;;  %s15840_s30 = smov [#allocation33]  }
 0x1bb   : > { %s681_s20 = sshll.u32 %s15839_s2, 4  ;;  %s695_s25 = sshll.u32 %s15840_s30, 4  ;;  %s682_s20 = int_to_ptr.vmem [resolvable:$true] %s681_s20  ;;  %s16360_s25 = int_to_ptr.vmem [resolvable:$true] %s695_s25 }
 0x1bc   : > { %s15657_s10 = scalar_lea.hbm %s17180_s17, 256 }
 0x1bd   : > { %p15658_p13 = scmp.ne.s32.totalorder %s17180_s17, %s15657_s10  ;;  %p15664_p5 = scmp.lt.u32.totalorder %s15657_s10, %s17180_s17 }
 0x1bf   : > { %p15660_p1 = pnand %p15658_p13, %p16022_p0 }
 0x1c1   : > { %p15661_p6 = pneg %p15660_p1 }
 0x1c3   : > { %p15666_p9 = pnand %p15664_p5, %p15661_p6 }
 0x1c5   : > { %15669 = shalt.err (!%p15666_p9)
}
 0x1c6   : > { %s15670_s19 = scalar_lea.vmem %s682_s20, 256  ;;  %p15678_p4 = scmp.lt.s32.totalorder %s682_s20, %s682_s20 }
 0x1c7   : > { %p15671_p10 = scmp.ne.s32.totalorder %s682_s20, %s15670_s19  ;;  %p15679_p7 = scmp.lt.s32.totalorder %s15670_s19, %s15670_s19 }
 0x1c9   : > { %p15673_p2 = pnand %p15671_p10, %p16022_p0  ;;  %p15680_p8 = por %p15679_p7, %p15678_p4 }
 0x1cb   : > { %p15674_p3 = pneg %p15673_p2 }
 0x1cd   : > { %p15681_p11 = pnand %p15680_p8, %p15674_p3 }
 0x1cf   : > { %15684 = shalt.err (!%p15681_p11)
}
 0x1d0   : > { %s17235_s21 = smov 128   ;;  %s15685_s4 = scalar_lea.hbm %s17181_s18, 32 }
 0x1d1   : > { %13777 = dma.hbm_to_vmem [thread:$0]  (!%p16006_p12), %s17180_s17, 256, %s682_s20, [#allocation31], %s17235_s21, %s17235_s21, %s15830_s3  }
 0x1d2   : > { %p15686_p13 = scmp.ne.s32.totalorder %s17181_s18, %s15685_s4  ;;  %p15692_p5 = scmp.lt.u32.totalorder %s15685_s4, %s17181_s18 }
 0x1d4   : > { %p15688_p1 = pnand %p15686_p13, %p16022_p0 }
 0x1d6   : > { %p15689_p6 = pneg %p15688_p1 }
 0x1d8   : > { %p15694_p9 = pnand %p15692_p5, %p15689_p6 }
 0x1da   : > { %15697 = shalt.err (!%p15694_p9)
}
 0x1db   : > { %s15698_s3 = scalar_lea.vmem %s16360_s25, 32  ;;  %p15706_p4 = scmp.lt.s32.totalorder %s16360_s25, %s16360_s25 }
 0x1dc   : > { %p15699_p10 = scmp.ne.s32.totalorder %s16360_s25, %s15698_s3  ;;  %p15707_p7 = scmp.lt.s32.totalorder %s15698_s3, %s15698_s3 }
 0x1de   : > { %p15701_p2 = pnand %p15699_p10, %p16022_p0  ;;  %p15708_p8 = por %p15707_p7, %p15706_p4 }
 0x1e0   : > { %p15702_p3 = pneg %p15701_p2 }
 0x1e2   : > { %p15709_p11 = pnand %p15708_p8, %p15702_p3 }
 0x1e4   : > { %15712 = shalt.err (!%p15709_p11)
}
 0x1e5   : > { %13780 = dma.hbm_to_vmem [thread:$0]  (!%p16006_p12), %s17181_s18, 32, %s16360_s25, [#allocation34]  }
 0x1e6   : > { %p17236_p13 = scmp.ne.s32.totalorder %s17223_s27, 0 }
 0x1e7   : > { %s17237_s19 = sld [smem:[#allocation51_spill]] (!%p17236_p13) }
 0x1e8   : > { %715 = sbr.rel (%p17236_p13) target bundleno = 3434 (0xd6a), region = 96 }
 0x1ed   : > { %p17238_p1 = scmp.eq.s32.totalorder (!%p17236_p13), %s17237_s19, 0 }
 0x1ef   : > { %15758 = dma.done.wait (%p17238_p1), [#allocation7], 4096   ;;  %p17239_p0 = pmov %p17238_p1 }
 0x1f1   : > { %15760 = vsyncadd (%p17239_p0), [#allocation7], 4294963200  ;;  %p17240_p6 = pmov %p17239_p0 }
 0x1f2   : > { %p17241_p5 = pmov %p17239_p0 }
 0x1f3   : > { %15762 = dma.done.wait (%p17240_p6), [#allocation10], 4160  }
 0x1f4   : > { %15764 = vsyncadd (%p17241_p5), [#allocation10], 4294963136  ;;  %p17242_p9 = pmov %p17239_p0 }
 0x1f5   : > { %p17243_p12 = pmov %p17239_p0 }
 0x1f6   : > { %15766 = dma.done.wait (%p17242_p9), [#allocation13], 4128  }
 0x1f7   : > { %15768 = vsyncadd (%p17243_p12), [#allocation13], 4294963168  ;;  %p17244_p10 = pmov %p17239_p0 }
 0x1f8   : > { %p17245_p2 = pmov %p17239_p0 }
 0x1f9   : > { %15770 = dma.done.wait (%p17244_p10), [#allocation16], 36896  }
 0x1fa   : > { %15772 = vsyncadd (%p17245_p2), [#allocation16], 4294930400  ;;  %p17246_p3 = pmov %p17239_p0 }
 0x1fb   : > { %p17247_p4 = pmov %p17239_p0 }
 0x1fc   : > { %15774 = dma.done.wait (%p17246_p3), [#allocation19], 36896  }
 0x1fd   : > { %15776 = vsyncadd (%p17247_p4), [#allocation19], 4294930400  ;;  %p17248_p7 = pmov %p17239_p0 }
 0x1fe   : > { %p17249_p8 = pmov %p17239_p0 }
 0x1ff   : > { %15778 = dma.done.wait (%p17248_p7), [#allocation22], 18464  }
 0x200   : > { %15780 = vsyncadd (%p17249_p8), [#allocation22], 4294948832  ;;  %p17250_p11 = pmov %p17239_p0 }
 0x201   : > { %p17251_p13 = pmov %p17239_p0 }
 0x202   : > { %15782 = dma.done.wait (%p17250_p11), [#allocation25], 9232  }
 0x203   : > { %15784 = vsyncadd (%p17251_p13), [#allocation25], 4294958064  ;;  %p17252_p1 = pmov %p17239_p0 }
 0x205   : > { %15786 = dma.done.wait (%p17252_p1), [#allocation28], 2064  }
 0x206   : > { %15788 = vsyncadd (%p17239_p0), [#allocation28], 4294965232  ;;  %p17253_p6 = pmov %p17239_p0 }
 0x207   : > { %p17254_p5 = pmov %p17239_p0 }
 0x208   : > { %15790 = dma.done.wait (%p17253_p6), [#allocation31], 272  }
 0x209   : > { %15792 = vsyncadd (%p17254_p5), [#allocation31], 4294967024  ;;  %p17255_p9 = pmov %p17239_p0 }
 0x20a   : > { %p17256_p12 = pmov %p17239_p0 }
 0x20b   : > { %15794 = dma.done.wait (%p17255_p9), [#allocation34], 32  }
 0x20c   : > { %15796 = vsyncadd (%p17256_p12), [#allocation34], 4294967264  ;;  %v15841_v0 = vmov 0   ;;  %v13885_v1 = vld [vmem:[#allocation6 + $0xc] ss:$16 sps:$4 sm:$0xff]   ;;  %p838_p10 = scmp.lt.s32.totalorder %s17237_s19, 1  ;;  %v932_v16 = vlaneseq }
 0x20d   : > { %1203 = vmatprep.mubr.bf16.mxu1 %v15841_v0  ;;  %843 = vst [vmem:[#allocation2] sm:$0xff] %v15841_v0  ;;  %844 = vst [vmem:[#allocation2 + $0x8] sm:$0xff] %v15841_v0  ;;  %1162 = vmatprep.mubr.bf16.mxu0 %v15841_v0  ;;  %v13887_v2 = vld [vmem:[#allocation6 + $0x8] ss:$16 sps:$4 sm:$0xff]   ;;  %v13888_v3 = vld [vmem:[#allocation6 + $0x2c] ss:$16 sps:$4 sm:$0xff]  }
 0x20e   : > { %846 = vst [vmem:[#allocation2 + $0x30] sm:$0xff] %v15841_v0  ;;  %847 = vst [vmem:[#allocation2 + $0x38] sm:$0xff] %v15841_v0  ;;  %1171 = vmatprep.subr.bf16.mxu1 %v13885_v1  ;;  %v13890_v4 = vld [vmem:[#allocation6 + $0x28] ss:$16 sps:$4 sm:$0xff]   ;;  %v13891_v5 = vld [vmem:[#allocation6 + $0x4c] ss:$16 sps:$4 sm:$0xff]  }
 0x20f   : > { %850 = vst [vmem:[#allocation2 + $0x10] sm:$0xf] %v15841_v0  ;;  %851 = vst [vmem:[#allocation2 + $0x18] sm:$0xf] %v15841_v0  ;;  %1172 = vmatpush1.bf16.msra.mxu1 %v13887_v2  ;;  %s839_s27 = scalar_select %p838_p10, %s17237_s19, 1  ;;  %v16454_v25 = vshrl.u32 %v932_v16, 7 }
 0x210   : > { %852 = vst [vmem:[#allocation2 + $0x20] sm:$0xf] %v15841_v0  ;;  %853 = vst [vmem:[#allocation2 + $0x28] sm:$0xf] %v15841_v0  ;;  %1173 = vmatprep.subr.bf16.mxu1 %v13888_v3  ;;  %v13893_v6 = vld [vmem:[#allocation6 + $0x48] ss:$16 sps:$4 sm:$0xff]  }
 0x211   : > { %858 = vst [vmem:[#allocation2 + $0x10] sm:$0xe0] %v15841_v0  ;;  %859 = vst [vmem:[#allocation2 + $0x18] sm:$0xe0] %v15841_v0  ;;  %v13894_v7 = vld [vmem:[#allocation6 + $0x6c] ss:$16 sps:$4 sm:$0xff]  }
 0x212   : > { %860 = vst [vmem:[#allocation2 + $0x20] sm:$0xe0] %v15841_v0  ;;  %861 = vst [vmem:[#allocation2 + $0x28] sm:$0xe0] %v15841_v0  ;;  %v13902_v8 = vld [vmem:[#allocation6 + $0x4] ss:$16 sps:$4 sm:$0xff]  }
 0x213   : > { %864 = vst [vmem:[#allocation3] sm:$0xff] %v15841_v0  ;;  %865 = vst [vmem:[#allocation3 + $0x8] sm:$0xff] %v15841_v0  ;;  %1174 = vmatpush1.bf16.msra.mxu1 %v13890_v4  ;;  %v13905_v9 = vld [vmem:[#allocation6] ss:$16 sps:$4 sm:$0xff]   ;;  %1130 = vmatprep.subr.bf16.mxu0 %v13902_v8  ;;  %s12178_s24 = sshll.u32 %s839_s27, 1  ;;  %s17257_s21 = sld [smem:[#allocation56_spill]] }
 0x214   : > { %867 = vst [vmem:[#allocation3 + $0x30] sm:$0xff] %v15841_v0  ;;  %868 = vst [vmem:[#allocation3 + $0x38] sm:$0xff] %v15841_v0  ;;  %1175 = vmatprep.subr.bf16.mxu1 %v13891_v5  ;;  %v13896_v10 = vld [vmem:[#allocation6 + $0x68] ss:$16 sps:$4 sm:$0xff]   ;;  %1131 = vmatpush1.bf16.msra.mxu0 %v13905_v9  ;;  %v13908_v11 = vld [vmem:[#allocation6 + $0x24] ss:$16 sps:$4 sm:$0xff]  }
 0x215   : > { %871 = vst [vmem:[#allocation3 + $0x10] sm:$0xf] %v15841_v0  ;;  %872 = vst [vmem:[#allocation3 + $0x18] sm:$0xf] %v15841_v0  ;;  %v13911_v12 = vld [vmem:[#allocation6 + $0x20] ss:$16 sps:$4 sm:$0xff]   ;;  %1132 = vmatprep.subr.bf16.mxu0 %v13908_v11 }
 0x216   : > { %873 = vst [vmem:[#allocation3 + $0x20] sm:$0xf] %v15841_v0  ;;  %874 = vst [vmem:[#allocation3 + $0x28] sm:$0xf] %v15841_v0  ;;  %v13897_v13 = vld [vmem:[#allocation6 + $0x8c] ss:$16 sps:$4 sm:$0xff]  }
 0x217   : > { %879 = vst [vmem:[#allocation3 + $0x10] sm:$0xe0] %v15841_v0  ;;  %880 = vst [vmem:[#allocation3 + $0x18] sm:$0xe0] %v15841_v0  ;;  %1176 = vmatpush1.bf16.msra.mxu1 %v13893_v6  ;;  %v13914_v14 = vld [vmem:[#allocation6 + $0x44] ss:$16 sps:$4 sm:$0xff]  }
 0x218   : > { %881 = vst [vmem:[#allocation3 + $0x20] sm:$0xe0] %v15841_v0  ;;  %882 = vst [vmem:[#allocation3 + $0x28] sm:$0xe0] %v15841_v0  ;;  %1177 = vmatprep.subr.bf16.mxu1 %v13894_v7  ;;  %v13899_v15 = vld [vmem:[#allocation6 + $0x88] ss:$16 sps:$4 sm:$0xff]   ;;  %1133 = vmatpush1.bf16.msra.mxu0 %v13911_v12 }
 0x219   : > { %885 = vst [vmem:[#allocation4] sm:$0xff] %v15841_v0  ;;  %887 = vst [vmem:[#allocation4 + $0x18] sm:$0xff] %v15841_v0  ;;  %s841_s8 = scalar_lea.vmem %s17257_s21, %s12178_s24  ;;  %v15842_v17 = vmov 1966171168   ;;  %v13917_v19 = vld [vmem:[#allocation6 + $0x40] ss:$16 sps:$4 sm:$0xff]   ;;  %1134 = vmatprep.subr.bf16.mxu0 %v13914_v14 }
 0x21a   : > { %889 = vst [vmem:[#allocation4 + $0x8] sm:$0xf] %v15841_v0  ;;  %890 = vst [vmem:[#allocation4 + $0x10] sm:$0xf] %v15841_v0  ;;  %v956_v18 = vunpack.c.l.s4 %v15842_v17  ;;  %v13900_v20 = vld [vmem:[#allocation6 + $0xac] ss:$16 sps:$4 sm:$0xff]  }
 0x21b   : > { %848 = vst [vmem:[#allocation2] sm:$0xf] %v15841_v0  ;;  %849 = vst [vmem:[#allocation2 + $0x8] sm:$0xf] %v15841_v0  ;;  %1178 = vmatpush1.bf16.msra.mxu1 %v13896_v10  ;;  %v13918_v21 = vld [vmem:[#allocation6 + $0x64] ss:$16 sps:$4 sm:$0xff]  }
 0x21c   : > { %854 = vst [vmem:[#allocation2 + $0x30] sm:$0xf] %v15841_v0  ;;  %855 = vst [vmem:[#allocation2 + $0x38] sm:$0xf] %v15841_v0  ;;  %1179 = vmatprep.subr.bf16.mxu1 %v13897_v13  ;;  %v13904_v22 = vld [vmem:[#allocation6 + $0xa8] ss:$16 sps:$4 sm:$0xff]   ;;  %v957_v26 = vunpack.c.0.s8 %v956_v18  ;;  %1135 = vmatpush1.bf16.msra.mxu0 %v13917_v19 }
 0x21d   : > { %856 = vst [vmem:[#allocation2] sm:$0xe0] %v15841_v0  ;;  %857 = vst [vmem:[#allocation2 + $0x8] sm:$0xe0] %v15841_v0  ;;  %v896_v23 = vld [vmem:[%s841_s8] sm:$0x1]  ;;  %1136 = vmatprep.subr.bf16.mxu0 %v13918_v21 }
 0x21e   : > { %862 = vst [vmem:[#allocation2 + $0x30] sm:$0xe0] %v15841_v0  ;;  %863 = vst [vmem:[#allocation2 + $0x38] sm:$0xe0] %v15841_v0  ;;  %v897_v24 = vld [vmem:[%s841_s8 + $0x1] sm:$0x1]  ;;  %v16457_v32 = vsub.s32 %v957_v26, %v16454_v25 }
 0x21f   : > { %869 = vst [vmem:[#allocation3] sm:$0xf] %v15841_v0  ;;  %870 = vst [vmem:[#allocation3 + $0x8] sm:$0xf] %v15841_v0  ;;  %1180 = vmatpush1.bf16.msra.mxu1 %v13899_v15  ;;  %v13920_v27 = vld [vmem:[#allocation6 + $0x60] ss:$16 sps:$4 sm:$0xff]   ;;  %v954_v31 = vcombine.low %v896_v23, %v897_v24 }
 0x220   : > { %875 = vst [vmem:[#allocation3 + $0x30] sm:$0xf] %v15841_v0  ;;  %876 = vst [vmem:[#allocation3 + $0x38] sm:$0xf] %v15841_v0  ;;  %1181 = vmatprep.subr.bf16.mxu1 %v13900_v20  ;;  %v13906_v28 = vld [vmem:[#allocation6 + $0xcc] ss:$16 sps:$4 sm:$0xff]   ;;  %1137 = vmatpush1.bf16.msra.mxu0 %v13920_v27 }
 0x221   : > { %877 = vst [vmem:[#allocation3] sm:$0xe0] %v15841_v0  ;;  %878 = vst [vmem:[#allocation3 + $0x8] sm:$0xe0] %v15841_v0  ;;  %v13921_v29 = vld [vmem:[#allocation6 + $0x84] ss:$16 sps:$4 sm:$0xff]   ;;  %v961_v37 = vrot.slane %v954_v31, %v16457_v32 }
 0x222   : > { %883 = vst [vmem:[#allocation3 + $0x30] sm:$0xe0] %v15841_v0  ;;  %884 = vst [vmem:[#allocation3 + $0x38] sm:$0xe0] %v15841_v0  ;;  %v13910_v30 = vld [vmem:[#allocation6 + $0xc8] ss:$16 sps:$4 sm:$0xff]   ;;  %1138 = vmatprep.subr.bf16.mxu0 %v13921_v29 }
 0x223   : > { %888 = vst [vmem:[#allocation4] sm:$0xf] %v15841_v0  ;;  %891 = vst [vmem:[#allocation4 + $0x18] sm:$0xf] %v15841_v0  ;;  %1182 = vmatpush1.bf16.msra.mxu1 %v13904_v22  ;;  %v13923_v33 = vld [vmem:[#allocation6 + $0x80] ss:$16 sps:$4 sm:$0xff]   ;;  %v968_v41 = vrot.slane %v961_v37, %v16457_v32 }
 0x224   : > { %1183 = vmatprep.subr.bf16.mxu1 %v13906_v28  ;;  %v13912_v34 = vld [vmem:[#allocation6 + $0xec] ss:$16 sps:$4 sm:$0xff]   ;;  %v13924_v35 = vld [vmem:[#allocation6 + $0xa4] ss:$16 sps:$4 sm:$0xff]   ;;  %v13916_v36 = vld [vmem:[#allocation6 + $0xe8] ss:$16 sps:$4 sm:$0xff]   ;;  %1139 = vmatpush1.bf16.msra.mxu0 %v13923_v33 }
 0x225   : > { %v13926_v38 = vld [vmem:[#allocation6 + $0xa0] ss:$16 sps:$4 sm:$0xff]   ;;  %1140 = vmatprep.subr.bf16.mxu0 %v13924_v35  ;;  %v13927_v39 = vld [vmem:[#allocation6 + $0xc4] ss:$16 sps:$4 sm:$0xff]   ;;  %vm1888_vm0 = vsmask.f32 256 }
 0x226   : > { %v13935_v40 = vld [vmem:[#allocation14 + $0x4] ss:$8 sps:$4 sm:$0xff]   ;;  %v13933_v43 = vld [vmem:[#allocation14] ss:$8 sps:$4 sm:$0xff]   ;;  %v13938_v45 = vld [vmem:[#allocation14 + $0x14] ss:$8 sps:$4 sm:$0xff]  }
 0x227   : > { %1184 = vmatpush1.bf16.msra.mxu1 %v13910_v30  ;;  %v13929_v42 = vld [vmem:[#allocation6 + $0xc0] ss:$16 sps:$4 sm:$0xff]   ;;  %v13930_v44 = vld [vmem:[#allocation6 + $0xe4] ss:$16 sps:$4 sm:$0xff]   ;;  %vm1889_vm1 = vsmask.f32 1284 }
 0x228   : > { %1185 = vmatprep.subr.bf16.mxu1 %v13912_v34  ;;  %1141 = vmatpush1.bf16.msra.mxu0 %v13926_v38  ;;  %v13932_v46 = vld [vmem:[#allocation6 + $0xe0] ss:$16 sps:$4 sm:$0xff]   ;;  %v13951_v51 = vld [vmem:[#allocation11] ss:$8 sps:$4 sm:$0xff]   ;;  %v13957_v55 = vld [vmem:[#allocation11 + $0x10] ss:$8 sps:$4 sm:$0xff]  }
 0x229   : > { %1142 = vmatprep.subr.bf16.mxu0 %v13927_v39  ;;  %v13936_v47 = vld [vmem:[#allocation14 + $0x10] ss:$8 sps:$4 sm:$0xff]   ;;  %v13941_v48 = vld [vmem:[#allocation14 + $0x24] ss:$8 sps:$4 sm:$0xff]   ;;  %v13939_v50 = vld [vmem:[#allocation14 + $0x20] ss:$8 sps:$4 sm:$0xff]  }
 0x22a   : > { %v13953_v49 = vld [vmem:[#allocation11 + $0x4] ss:$8 sps:$4 sm:$0xff]   ;;  %v13944_v52 = vld [vmem:[#allocation14 + $0x34] ss:$8 sps:$4 sm:$0xff]   ;;  %v13942_v54 = vld [vmem:[#allocation14 + $0x30] ss:$8 sps:$4 sm:$0xff]  }
 0x22b   : > { %1186 = vmatpush1.bf16.msra.mxu1 %v13916_v36  ;;  %v13959_v53 = vld [vmem:[#allocation11 + $0x14] ss:$8 sps:$4 sm:$0xff]   ;;  %v13947_v56 = vld [vmem:[#allocation14 + $0x44] ss:$8 sps:$4 sm:$0xff]   ;;  %v13945_v58 = vld [vmem:[#allocation14 + $0x40] ss:$8 sps:$4 sm:$0xff]  }
 0x22c   : > { %1671 = vmatprep.subr.bf16.mxu1 %v13935_v40  ;;  %1143 = vmatpush1.bf16.msra.mxu0 %v13929_v42  ;;  %v13965_v57 = vld [vmem:[#allocation11 + $0x24] ss:$8 sps:$4 sm:$0xff]   ;;  %v13963_v59 = vld [vmem:[#allocation11 + $0x20] ss:$8 sps:$4 sm:$0xff]   ;;  %v13971_v61 = vld [vmem:[#allocation11 + $0x34] ss:$8 sps:$4 sm:$0xff]  }
 0x22d   : > { %1144 = vmatprep.subr.bf16.mxu0 %v13930_v44  ;;  %v13950_v60 = vld [vmem:[#allocation14 + $0x54] ss:$8 sps:$4 sm:$0xff]   ;;  %v13948_v62 = vld [vmem:[#allocation14 + $0x50] ss:$8 sps:$4 sm:$0xff]   ;;  %v13956_v0 = vld [vmem:[#allocation14 + $0x64] ss:$8 sps:$4 sm:$0xff]  }
 0x22e   : > { %1204 = vmatmul.mubr.bf16.vlgmr.msra.gmra.mrb[0].mxu1 %v968_v41  ;;  %v13969_v63 = vld [vmem:[#allocation11 + $0x30] ss:$8 sps:$4 sm:$0xff]   ;;  %v13977_v1 = vld [vmem:[#allocation11 + $0x44] ss:$8 sps:$4 sm:$0xff]   ;;  %v13975_v3 = vld [vmem:[#allocation11 + $0x40] ss:$8 sps:$4 sm:$0xff]  }
 0x22f   : > { %1672 = vmatpush1.bf16.msra.mxu1 %v13933_v43  ;;  %v13954_v2 = vld [vmem:[#allocation14 + $0x60] ss:$8 sps:$4 sm:$0xff]   ;;  %v13962_v4 = vld [vmem:[#allocation14 + $0x74] ss:$8 sps:$4 sm:$0xff]   ;;  %v13960_v6 = vld [vmem:[#allocation14 + $0x70] ss:$8 sps:$4 sm:$0xff]  }
 0x230   : > { %1673 = vmatprep.subr.bf16.mxu1 %v13938_v45  ;;  %1145 = vmatpush1.bf16.msra.mxu0 %v13932_v46  ;;  %v13983_v5 = vld [vmem:[#allocation11 + $0x54] ss:$8 sps:$4 sm:$0xff]   ;;  %v13981_v7 = vld [vmem:[#allocation11 + $0x50] ss:$8 sps:$4 sm:$0xff]   ;;  %v13989_v9 = vld [vmem:[#allocation11 + $0x64] ss:$8 sps:$4 sm:$0xff]  }
 0x231   : > { %1424 = vmatprep.subr.bf16.mxu0 %v13953_v49  ;;  %v13968_v8 = vld [vmem:[#allocation14 + $0x84] ss:$8 sps:$4 sm:$0xff]   ;;  %v13966_v10 = vld [vmem:[#allocation14 + $0x80] ss:$8 sps:$4 sm:$0xff]   ;;  %v13974_v12 = vld [vmem:[#allocation14 + $0x94] ss:$8 sps:$4 sm:$0xff]  }
 0x232   : > { %v13987_v11 = vld [vmem:[#allocation11 + $0x60] ss:$8 sps:$4 sm:$0xff]   ;;  %v13995_v13 = vld [vmem:[#allocation11 + $0x74] ss:$8 sps:$4 sm:$0xff]   ;;  %v13993_v15 = vld [vmem:[#allocation11 + $0x70] ss:$8 sps:$4 sm:$0xff]  }
 0x233   : > { %1674 = vmatpush1.bf16.msra.mxu1 %v13936_v47  ;;  %1163 = vmatmul.mubr.bf16.vlgmr.msra.gmra.mrb[0].mxu0 %v968_v41  ;;  %v13972_v14 = vld [vmem:[#allocation14 + $0x90] ss:$8 sps:$4 sm:$0xff]   ;;  %v13980_v17 = vld [vmem:[#allocation14 + $0xa4] ss:$8 sps:$4 sm:$0xff]   ;;  %v13978_v19 = vld [vmem:[#allocation14 + $0xa0] ss:$8 sps:$4 sm:$0xff]  }
 0x234   : > { %1675 = vmatprep.subr.bf16.mxu1 %v13941_v48  ;;  %1425 = vmatpush1.bf16.msra.mxu0 %v13951_v51  ;;  %v14001_v18 = vld [vmem:[#allocation11 + $0x84] ss:$8 sps:$4 sm:$0xff]   ;;  %v13999_v20 = vld [vmem:[#allocation11 + $0x80] ss:$8 sps:$4 sm:$0xff]   ;;  %v13984_v22 = vld [vmem:[#allocation14 + $0xb0] ss:$8 sps:$4 sm:$0xff]  }
 0x235   : > { %1426 = vmatprep.subr.bf16.mxu0 %v13959_v53  ;;  %v13986_v21 = vld [vmem:[#allocation14 + $0xb4] ss:$8 sps:$4 sm:$0xff]   ;;  %v13992_v23 = vld [vmem:[#allocation14 + $0xc4] ss:$8 sps:$4 sm:$0xff]   ;;  %v13990_v24 = vld [vmem:[#allocation14 + $0xc0] ss:$8 sps:$4 sm:$0xff]  }
 0x236   : > { %v13998_v26 = vld [vmem:[#allocation14 + $0xd4] ss:$8 sps:$4 sm:$0xff]   ;;  %v13996_v27 = vld [vmem:[#allocation14 + $0xd0] ss:$8 sps:$4 sm:$0xff]   ;;  %v14004_v28 = vld [vmem:[#allocation14 + $0xe4] ss:$8 sps:$4 sm:$0xff]  }
 0x237   : > { %1676 = vmatpush1.bf16.msra.mxu1 %v13939_v50  ;;  %v14002_v29 = vld [vmem:[#allocation14 + $0xe0] ss:$8 sps:$4 sm:$0xff]   ;;  %v14007_v30 = vld [vmem:[#allocation11 + $0x94] ss:$8 sps:$4 sm:$0xff]   ;;  %v14005_v31 = vld [vmem:[#allocation11 + $0x90] ss:$8 sps:$4 sm:$0xff]  }
 0x238   : > { %1677 = vmatprep.subr.bf16.mxu1 %v13944_v52  ;;  %1427 = vmatpush1.bf16.msra.mxu0 %v13957_v55  ;;  %v14010_v33 = vld [vmem:[#allocation14 + $0xf4] ss:$8 sps:$4 sm:$0xff]   ;;  %v14008_v34 = vld [vmem:[#allocation14 + $0xf0] ss:$8 sps:$4 sm:$0xff]   ;;  %v14013_v35 = vld [vmem:[#allocation11 + $0xa4] ss:$8 sps:$4 sm:$0xff]  }
 0x239   : > { %1428 = vmatprep.subr.bf16.mxu0 %v13965_v57  ;;  %v14011_v36 = vld [vmem:[#allocation11 + $0xa0] ss:$8 sps:$4 sm:$0xff]   ;;  %v14016_v37 = vld [vmem:[#allocation11 + $0xb4] ss:$8 sps:$4 sm:$0xff]   ;;  %v14014_v38 = vld [vmem:[#allocation11 + $0xb0] ss:$8 sps:$4 sm:$0xff]  }
 0x23a   : > { %v14019_v39 = vld [vmem:[#allocation11 + $0xc4] ss:$8 sps:$4 sm:$0xff]   ;;  %v14017_v40 = vld [vmem:[#allocation11 + $0xc0] ss:$8 sps:$4 sm:$0xff]   ;;  %v14022_v41 = vld [vmem:[#allocation11 + $0xd4] ss:$8 sps:$4 sm:$0xff]  }
 0x23b   : > { %1678 = vmatpush1.bf16.msra.mxu1 %v13942_v54  ;;  %v14020_v42 = vld [vmem:[#allocation11 + $0xd0] ss:$8 sps:$4 sm:$0xff]   ;;  %v14025_v43 = vld [vmem:[#allocation11 + $0xe4] ss:$8 sps:$4 sm:$0xff]   ;;  %v14023_v44 = vld [vmem:[#allocation11 + $0xe0] ss:$8 sps:$4 sm:$0xff]  }
 0x23c   : > { %1679 = vmatprep.subr.bf16.mxu1 %v13947_v56  ;;  %1429 = vmatpush1.bf16.msra.mxu0 %v13963_v59  ;;  %v14028_v45 = vld [vmem:[#allocation11 + $0xf4] ss:$8 sps:$4 sm:$0xff]   ;;  %v14026_v46 = vld [vmem:[#allocation11 + $0xf0] ss:$8 sps:$4 sm:$0xff]   ;;  %v942_v48 = vsub.s32 2, %v16454_v25  ;;  %v946_v49 = vsub.s32 3, %v16454_v25  ;;  %vm1890_vm2 = vmor %vm1888_vm0, %vm1889_vm1 }
 0x23d   : > { %1430 = vmatprep.subr.bf16.mxu0 %v13971_v61  ;;  %v930_v47 = vld [vmem:[#allocation9] sm:$0xf]  ;;  %v16464_v55 = vsub.s32 0, %v16454_v25  ;;  %vm1891_vm3 = vsmask.f32 2312  ;;  %vm15845_vm15 = vmmov 0  }
 0x23e   : > { %v943_v50 = vrot.slane %v930_v47, %v942_v48  ;;  %v947_v51 = vrot.slane %v930_v47, %v946_v49  ;;  %v14077_v48 = vld [vmem:[#allocation17 + $0x80] ss:$8 sps:$4 sm:$0xff]   ;;  %v14082_v49 = vld [vmem:[#allocation17 + $0x384] ss:$8 sps:$4 sm:$0xff]   ;;  %vm1892_vm4 = vmor %vm1890_vm2, %vm1891_vm3  ;;  %vm1893_vm5 = vsmask.f32 3340 }
 0x23f   : > { %1680 = vmatpush1.bf16.msra.mxu1 %v13945_v58  ;;  %v16467_v58 = vsub.s32 1, %v16454_v25  ;;  %vm1894_vm6 = vmor %vm1892_vm4, %vm1893_vm5  ;;  %vm1895_vm7 = vsmask.f32 4368  ;;  %vm1897_vm8 = vsmask.f32 5396  ;;  %vm11522_vm2 = vcmask 1041408  }
 0x240   : > { %1681 = vmatprep.subr.bf16.mxu1 %v13950_v60  ;;  %1431 = vmatpush1.bf16.msra.mxu0 %v13969_v63  ;;  %vm1896_vm9 = vmor %vm1894_vm6, %vm1895_vm7  ;;  %vm1899_vm10 = vsmask.f32 6424  ;;  %vm1901_vm11 = vsmask.f32 7452  ;;  %vm11539_vm3 = vcmask 1041409   ;;  %vm11541_vm4 = vcmask 15360  }
 0x241   : > { %1432 = vmatprep.subr.bf16.mxu0 %v13977_v1  ;;  %vm1898_vm12 = vmor %vm1896_vm9, %vm1897_vm8  ;;  %vm11617_vm5 = vcmask 123904   ;;  %s17260_s2 = sld [smem:[#allocation48_spill]]  ;;  %vm11802_vm6 = vcmask 130048   ;;  %s17261_s4 = sld [smem:[#allocation54_spill]] }
 0x242   : > { %vm1900_vm13 = vmor %vm1898_vm12, %vm1899_vm10  ;;  %s13140_s1 = sshll.u32 %s17237_s19, 9  ;;  %s17262_s20 = sld [smem:[#allocation65_spill]] }
 0x243   : > { %1682 = vmatpush1.bf16.msra.mxu1 %v13948_v62  ;;  %v935_v62 = vrot.slane %v930_v47, %v16464_v55  ;;  %vm16503_vm14 = vmor %vm1900_vm13, %vm1901_vm11  ;;  %s15846_s19 = smov [#allocation35]  }
 0x244   : > { %1683 = vmatprep.subr.bf16.mxu1 %v13956_v0  ;;  %1433 = vmatpush1.bf16.msra.mxu0 %v13975_v3  ;;  %v939_v0 = vrot.slane %v930_v47, %v16467_v58  ;;  %v14079_v47 = vld [vmem:[#allocation17 + $0x84] ss:$8 sps:$4 sm:$0xff]   ;;  %s15717_s25 = sshll.u32 %s15846_s19, 4  ;;  %s15718_s25 = int_to_ptr.vmem [resolvable:$false] %s15717_s25 }
 0x245   : > { %1434 = vmatprep.subr.bf16.mxu0 %v13983_v5  ;;  %s15719_s21 = scalar_lea.vmem %s15718_s25, 1024 }
 0x247   : > { %1684 = vmatpush1.bf16.msra.mxu1 %v13954_v2  ;;  %s835_s30 = sand.u32 1, %s17260_s2   ;;  %p17264_p3 = scmp.ne.s32.totalorder %s17261_s4, 0 }
 0x248   : > { %1685 = vmatprep.subr.bf16.mxu1 %v13962_v4  ;;  %1435 = vmatpush1.bf16.msra.mxu0 %v13981_v7  ;;  %s12177_s26 = sshll.u32 %s835_s30, 5  ;;  %s17263_s23 = smov %s17262_s20 }
 0x249   : > { %1436 = vmatprep.subr.bf16.mxu0 %v13989_v9  ;;  %s837_s10 = scalar_lea.vmem [#allocation35], %s12177_s26  ;;  %s17120_s27 = scalar_lea.hbm %s17262_s20, %s13140_s1 }
 0x24a   : > { %s11901_s0 = sshll.u32 %s837_s10, 4  ;;  %s17122_s24 = scalar_lea.sflag [#allocation8], %s835_s30  ;;  %s17115_s0 = int_to_ptr.vmem [resolvable:$true] %s11901_s0 }
 0x24b   : > { %1686 = vmatpush1.bf16.msra.mxu1 %v13960_v6  ;;  %s15713_s22 = scalar_lea.vmem %s17115_s0, 512  ;;  %p15720_p8 = scmp.lt.s32.totalorder %s17115_s0, %s15718_s25 }
 0x24c   : > { %1687 = vmatprep.subr.bf16.mxu1 %v13968_v8  ;;  %1437 = vmatpush1.bf16.msra.mxu0 %v13987_v11  ;;  %p15714_p2 = scmp.ne.s32.totalorder %s17115_s0, %s15713_s22  ;;  %p15721_p11 = scmp.lt.s32.totalorder %s15719_s21, %s15713_s22 }
 0x24d   : > { %1438 = vmatprep.subr.bf16.mxu0 %v13995_v13  ;;  %v14029_v13 = vld [vmem:[#allocation17] ss:$8 sps:$4 sm:$0xff]  }
 0x24e   : > { %p15715_p4 = pnand %p15714_p2, %p17264_p3  ;;  %p15722_p13 = por %p15721_p11, %p15720_p8 }
 0x24f   : > { %1688 = vmatpush1.bf16.msra.mxu1 %v13966_v10 }
 0x250   : > { %1689 = vmatprep.subr.bf16.mxu1 %v13974_v12  ;;  %1439 = vmatpush1.bf16.msra.mxu0 %v13993_v15  ;;  %v14031_v12 = vld [vmem:[#allocation17 + $0x4] ss:$8 sps:$4 sm:$0xff]   ;;  %v14032_v15 = vld [vmem:[#allocation17 + $0x300] ss:$8 sps:$4 sm:$0xff]   ;;  %p15716_p7 = pneg %p15715_p4 }
 0x251   : > { %1440 = vmatprep.subr.bf16.mxu0 %v14001_v18  ;;  %v14035_v18 = vld [vmem:[#allocation17 + $0x10] ss:$8 sps:$4 sm:$0xff]  }
 0x252   : > { %p15723_p1 = pnand %p15722_p13, %p15716_p7 }
 0x253   : > { %1690 = vmatpush1.bf16.msra.mxu1 %v13972_v14  ;;  %v14034_v14 = vld [vmem:[#allocation17 + $0x304] ss:$8 sps:$4 sm:$0xff]  }
 0x254   : > { %1691 = vmatprep.subr.bf16.mxu1 %v13980_v17  ;;  %1441 = vmatpush1.bf16.msra.mxu0 %v13999_v20  ;;  %v14037_v17 = vld [vmem:[#allocation17 + $0x14] ss:$8 sps:$4 sm:$0xff]   ;;  %v14038_v20 = vld [vmem:[#allocation17 + $0x310] ss:$8 sps:$4 sm:$0xff]  }
 0x255   : > { %1442 = vmatprep.subr.bf16.mxu0 %v14007_v30  ;;  %v14055_v30 = vld [vmem:[#allocation17 + $0x44] ss:$8 sps:$4 sm:$0xff]  }
 0x257   : > { %1692 = vmatpush1.bf16.msra.mxu1 %v13978_v19  ;;  %v14040_v19 = vld [vmem:[#allocation17 + $0x314] ss:$8 sps:$4 sm:$0xff]  }
 0x258   : > { %1693 = vmatprep.subr.bf16.mxu1 %v13986_v21  ;;  %1443 = vmatpush1.bf16.msra.mxu0 %v14005_v31  ;;  %v14043_v21 = vld [vmem:[#allocation17 + $0x24] ss:$8 sps:$4 sm:$0xff]   ;;  %v14053_v31 = vld [vmem:[#allocation17 + $0x40] ss:$8 sps:$4 sm:$0xff]  }
 0x259   : > { %1444 = vmatprep.subr.bf16.mxu0 %v14013_v35  ;;  %v14061_v35 = vld [vmem:[#allocation17 + $0x54] ss:$8 sps:$4 sm:$0xff]  }
 0x25b   : > { %1694 = vmatpush1.bf16.msra.mxu1 %v13984_v22  ;;  %v14041_v22 = vld [vmem:[#allocation17 + $0x20] ss:$8 sps:$4 sm:$0xff]  }
 0x25c   : > { %1695 = vmatprep.subr.bf16.mxu1 %v13992_v23  ;;  %1445 = vmatpush1.bf16.msra.mxu0 %v14011_v36  ;;  %v14046_v23 = vld [vmem:[#allocation17 + $0x324] ss:$8 sps:$4 sm:$0xff]   ;;  %v14059_v36 = vld [vmem:[#allocation17 + $0x50] ss:$8 sps:$4 sm:$0xff]  }
 0x25d   : > { %1446 = vmatprep.subr.bf16.mxu0 %v14016_v37  ;;  %v14064_v37 = vld [vmem:[#allocation17 + $0x354] ss:$8 sps:$4 sm:$0xff]  }
 0x25f   : > { %1696 = vmatpush1.bf16.msra.mxu1 %v13990_v24  ;;  %v14044_v24 = vld [vmem:[#allocation17 + $0x320] ss:$8 sps:$4 sm:$0xff]  }
 0x260   : > { %1697 = vmatprep.subr.bf16.mxu1 %v13998_v26  ;;  %1447 = vmatpush1.bf16.msra.mxu0 %v14014_v38  ;;  %v14049_v26 = vld [vmem:[#allocation17 + $0x34] ss:$8 sps:$4 sm:$0xff]   ;;  %v14062_v38 = vld [vmem:[#allocation17 + $0x350] ss:$8 sps:$4 sm:$0xff]  }
 0x261   : > { %1448 = vmatprep.subr.bf16.mxu0 %v14019_v39  ;;  %v14067_v39 = vld [vmem:[#allocation17 + $0x64] ss:$8 sps:$4 sm:$0xff]  }
 0x263   : > { %1698 = vmatpush1.bf16.msra.mxu1 %v13996_v27  ;;  %v14047_v27 = vld [vmem:[#allocation17 + $0x30] ss:$8 sps:$4 sm:$0xff]  }
 0x264   : > { %1699 = vmatprep.subr.bf16.mxu1 %v14004_v28  ;;  %1449 = vmatpush1.bf16.msra.mxu0 %v14017_v40  ;;  %v14052_v28 = vld [vmem:[#allocation17 + $0x334] ss:$8 sps:$4 sm:$0xff]   ;;  %v14065_v40 = vld [vmem:[#allocation17 + $0x60] ss:$8 sps:$4 sm:$0xff]  }
 0x265   : > { %1450 = vmatprep.subr.bf16.mxu0 %v14022_v41  ;;  %v14070_v41 = vld [vmem:[#allocation17 + $0x364] ss:$8 sps:$4 sm:$0xff]  }
 0x267   : > { %1700 = vmatpush1.bf16.msra.mxu1 %v14002_v29  ;;  %v14050_v29 = vld [vmem:[#allocation17 + $0x330] ss:$8 sps:$4 sm:$0xff]  }
 0x268   : > { %1701 = vmatprep.subr.bf16.mxu1 %v14010_v33  ;;  %1451 = vmatpush1.bf16.msra.mxu0 %v14020_v42  ;;  %v14058_v33 = vld [vmem:[#allocation17 + $0x344] ss:$8 sps:$4 sm:$0xff]   ;;  %v14068_v42 = vld [vmem:[#allocation17 + $0x360] ss:$8 sps:$4 sm:$0xff]  }
 0x269   : > { %1452 = vmatprep.subr.bf16.mxu0 %v14025_v43  ;;  %v14073_v43 = vld [vmem:[#allocation17 + $0x74] ss:$8 sps:$4 sm:$0xff]  }
 0x26b   : > { %1702 = vmatpush1.bf16.msra.mxu1 %v14008_v34  ;;  %v14056_v34 = vld [vmem:[#allocation17 + $0x340] ss:$8 sps:$4 sm:$0xff]  }
 0x26c   : > { %1453 = vmatpush1.bf16.msra.mxu0 %v14023_v44  ;;  %2440 = vmatprep.subr.bf16.mxu1 %v14031_v12  ;;  %v14071_v44 = vld [vmem:[#allocation17 + $0x70] ss:$8 sps:$4 sm:$0xff]   ;;  %v14116_v12 = vld [vmem:[#allocation17 + $0x3e0] ss:$8 sps:$4 sm:$0xff]  }
 0x26d   : > { %1454 = vmatprep.subr.bf16.mxu0 %v14028_v45  ;;  %v14076_v45 = vld [vmem:[#allocation17 + $0x374] ss:$8 sps:$4 sm:$0xff]  }
 0x270   : > { %1455 = vmatpush1.bf16.msra.mxu0 %v14026_v46  ;;  %v14074_v46 = vld [vmem:[#allocation17 + $0x370] ss:$8 sps:$4 sm:$0xff]  }
 0x271   : > { %2214 = vmatprep.subr.bf16.mxu0 %v14034_v14  ;;  %v14119_v14 = vld [vmem:[#allocation17 + $0xf0] ss:$8 sps:$4 sm:$0xff]  }
 0x301   : > { %v1205_v52 = vpop.f32.mrb[0].mxu1 }
 0x302   : > { %v1206_v53 = vadd.f32 %v1205_v52, %v943_v50  ;;  %v1207_v54 = vpop.f32.mrb[1].mxu1  ;;  %v14080_v50 = vld [vmem:[#allocation17 + $0x380] ss:$8 sps:$4 sm:$0xff]   ;;  %v14083_v52 = vld [vmem:[#allocation17 + $0x90] ss:$8 sps:$4 sm:$0xff]  }
 0x303   : > { %v1208_v56 = vadd.f32 %v1207_v54, %v947_v51  ;;  %v1209_v57 = vpop.f32.mrb[2].mxu1  ;;  %v14085_v51 = vld [vmem:[#allocation17 + $0x94] ss:$8 sps:$4 sm:$0xff]   ;;  %v14086_v54 = vld [vmem:[#allocation17 + $0x390] ss:$8 sps:$4 sm:$0xff]  }
 0x304   : > { %v1216_v59 = vmax.f32 %v1206_v53, 0.0  ;;  %v1210_v60 = vpop.f32.mrb[3].mxu1  ;;  %v14088_v53 = vld [vmem:[#allocation17 + $0x394] ss:$8 sps:$4 sm:$0xff]   ;;  %v14091_v57 = vld [vmem:[#allocation17 + $0xa4] ss:$8 sps:$4 sm:$0xff]  }
 0x305   : > { %v1217_v61 = vmax.f32 %v1208_v56, 0.0  ;;  %v14089_v56 = vld [vmem:[#allocation17 + $0xa0] ss:$8 sps:$4 sm:$0xff]   ;;  %v14094_v60 = vld [vmem:[#allocation17 + $0x3a4] ss:$8 sps:$4 sm:$0xff]  }
 0x306   : > { %v1218_v1 = vpack.c.bf16 %v1216_v59, %v1216_v59  ;;  %v1164_v2 = vpop.f32.mrb[0].mxu0  ;;  %v14092_v59 = vld [vmem:[#allocation17 + $0x3a0] ss:$8 sps:$4 sm:$0xff]  }
 0x307   : > { %v1219_v63 = vpack.c.bf16 %v1217_v61, %v1217_v61  ;;  %v1165_v3 = vadd.f32 %v1164_v2, %v935_v62  ;;  %v1166_v4 = vpop.f32.mrb[1].mxu0  ;;  %v14097_v61 = vld [vmem:[#allocation17 + $0xb4] ss:$8 sps:$4 sm:$0xff]   ;;  %v14106_v2 = vld [vmem:[#allocation17 + $0x3c4] ss:$8 sps:$4 sm:$0xff]  }
 0x308   : > { %v1167_v5 = vadd.f32 %v1166_v4, %v939_v0  ;;  %v1168_v6 = vpop.f32.mrb[2].mxu0  ;;  %v14100_v62 = vld [vmem:[#allocation17 + $0x3b4] ss:$8 sps:$4 sm:$0xff]   ;;  %v14103_v0 = vld [vmem:[#allocation17 + $0xc4] ss:$8 sps:$4 sm:$0xff]  }
 0x309   : > { %1703 = vmatprep.mubr.bf16.mxu1 %v1219_v63  ;;  %v1212_v7 = vmax.f32 %v1165_v3, 0.0  ;;  %v1169_v8 = vpop.f32.mrb[3].mxu0  ;;  %v14095_v63 = vld [vmem:[#allocation17 + $0xb0] ss:$8 sps:$4 sm:$0xff]   ;;  %v14101_v3 = vld [vmem:[#allocation17 + $0xc0] ss:$8 sps:$4 sm:$0xff]  }
 0x30a   : > { %1704 = vmatmul.mubr.bf16.vlgmr.msra.gmra.mrb[4].mxu1 %v1218_v1  ;;  %v1213_v9 = vmax.f32 %v1167_v5, 0.0  ;;  %v14098_v1 = vld [vmem:[#allocation17 + $0x3b0] ss:$8 sps:$4 sm:$0xff]   ;;  %v14109_v4 = vld [vmem:[#allocation17 + $0xd4] ss:$8 sps:$4 sm:$0xff]  }
 0x30b   : > { %v1214_v10 = vpack.c.bf16 %v1212_v7, %v1212_v7  ;;  %2441 = vmatpush1.bf16.msra.mxu1 %v14029_v13  ;;  %v14104_v5 = vld [vmem:[#allocation17 + $0x3c0] ss:$8 sps:$4 sm:$0xff]   ;;  %v14112_v6 = vld [vmem:[#allocation17 + $0x3d4] ss:$8 sps:$4 sm:$0xff]   ;;  %v14107_v7 = vld [vmem:[#allocation17 + $0xd0] ss:$8 sps:$4 sm:$0xff]  }
 0x30c   : > { %v1215_v11 = vpack.c.bf16 %v1213_v9, %v1213_v9  ;;  %2442 = vmatprep.subr.bf16.mxu1 %v14037_v17  ;;  %v14115_v8 = vld [vmem:[#allocation17 + $0xe4] ss:$8 sps:$4 sm:$0xff]   ;;  %v14110_v9 = vld [vmem:[#allocation17 + $0x3d0] ss:$8 sps:$4 sm:$0xff]   ;;  %v14121_v13 = vld [vmem:[#allocation17 + $0xf4] ss:$8 sps:$4 sm:$0xff]  }
 0x30d   : > { %v14122_v17 = vld [vmem:[#allocation17 + $0x3f0] ss:$8 sps:$4 sm:$0xff]  }
 0x30e   : > { %1456 = vmatprep.mubr.bf16.mxu0 %v1215_v11  ;;  %v14113_v11 = vld [vmem:[#allocation17 + $0xe0] ss:$8 sps:$4 sm:$0xff]  }
 0x30f   : > { %1457 = vmatmul.mubr.bf16.vlgmr.msra.gmra.mrb[4].mxu0 %v1214_v10  ;;  %2443 = vmatpush1.bf16.msra.mxu1 %v14035_v18  ;;  %v14118_v10 = vld [vmem:[#allocation17 + $0x3e4] ss:$8 sps:$4 sm:$0xff]  }
 0x310   : > { %2215 = vmatpush1.bf16.msra.mxu0 %v14032_v15  ;;  %2444 = vmatprep.subr.bf16.mxu1 %v14043_v21  ;;  %v14124_v15 = vld [vmem:[#allocation17 + $0x3f4] ss:$8 sps:$4 sm:$0xff]   ;;  %v14133_v18 = vld [vmem:[#allocation17 + $0x104] ss:$8 sps:$4 sm:$0xff]  }
 0x311   : > { %2216 = vmatprep.subr.bf16.mxu0 %v14040_v19  ;;  %v14139_v19 = vld [vmem:[#allocation17 + $0x604] ss:$8 sps:$4 sm:$0xff]  }
 0x313   : > { %2445 = vmatpush1.bf16.msra.mxu1 %v14041_v22 }
 0x314   : > { %2217 = vmatpush1.bf16.msra.mxu0 %v14038_v20  ;;  %2446 = vmatprep.subr.bf16.mxu1 %v14049_v26  ;;  %v1499_v20 = vld [vmem:[#allocation15] sm:$0x3] }
 0x315   : > { %2218 = vmatprep.subr.bf16.mxu0 %v14046_v23  ;;  %v1504_v21 = vrot.slane %v1499_v20, %v16464_v55  ;;  %v1508_v22 = vrot.slane %v1499_v20, %v16467_v58  ;;  %v14140_v20 = vld [vmem:[#allocation2 + $0x4] ss:$8 sps:$4 sm:$0x11]  }
 0x317   : > { %2447 = vmatpush1.bf16.msra.mxu1 %v14047_v27 }
 0x318   : > { %2219 = vmatpush1.bf16.msra.mxu0 %v14044_v24  ;;  %2448 = vmatprep.subr.bf16.mxu1 %v14055_v30 }
 0x319   : > { %2220 = vmatprep.subr.bf16.mxu0 %v14052_v28 }
 0x31b   : > { %2449 = vmatpush1.bf16.msra.mxu1 %v14053_v31 }
 0x31c   : > { %2221 = vmatpush1.bf16.msra.mxu0 %v14050_v29  ;;  %2450 = vmatprep.subr.bf16.mxu1 %v14061_v35 }
 0x31d   : > { %2222 = vmatprep.subr.bf16.mxu0 %v14058_v33 }
 0x31f   : > { %2451 = vmatpush1.bf16.msra.mxu1 %v14059_v36 }
 0x320   : > { %2223 = vmatpush1.bf16.msra.mxu0 %v14056_v34  ;;  %2452 = vmatprep.subr.bf16.mxu1 %v14067_v39 }
 0x321   : > { %2224 = vmatprep.subr.bf16.mxu0 %v14064_v37 }
 0x323   : > { %2453 = vmatpush1.bf16.msra.mxu1 %v14065_v40 }
 0x324   : > { %2225 = vmatpush1.bf16.msra.mxu0 %v14062_v38  ;;  %2454 = vmatprep.subr.bf16.mxu1 %v14073_v43 }
 0x325   : > { %2226 = vmatprep.subr.bf16.mxu0 %v14070_v41  ;;  %v1252_v41 = vld [vmem:[#allocation12] sm:$0x3] }
 0x326   : > { %v1261_v43 = vrot.slane %v1252_v41, %v16467_v58 }
 0x327   : > { %2455 = vmatpush1.bf16.msra.mxu1 %v14071_v44 }
 0x328   : > { %2227 = vmatpush1.bf16.msra.mxu0 %v14068_v42  ;;  %2456 = vmatprep.subr.bf16.mxu1 %v14079_v47  ;;  %v1257_v42 = vrot.slane %v1252_v41, %v16464_v55 }
 0x329   : > { %2228 = vmatprep.subr.bf16.mxu0 %v14076_v45 }
 0x32b   : > { %2457 = vmatpush1.bf16.msra.mxu1 %v14077_v48 }
 0x32c   : > { %2229 = vmatpush1.bf16.msra.mxu0 %v14074_v46  ;;  %2458 = vmatprep.subr.bf16.mxu1 %v14085_v51 }
 0x32d   : > { %2230 = vmatprep.subr.bf16.mxu0 %v14082_v49 }
 0x32f   : > { %2459 = vmatpush1.bf16.msra.mxu1 %v14083_v52 }
 0x330   : > { %2231 = vmatpush1.bf16.msra.mxu0 %v14080_v50  ;;  %2460 = vmatprep.subr.bf16.mxu1 %v14091_v57 }
 0x331   : > { %2232 = vmatprep.subr.bf16.mxu0 %v14088_v53 }
 0x333   : > { %2461 = vmatpush1.bf16.msra.mxu1 %v14089_v56 }
 0x334   : > { %2233 = vmatpush1.bf16.msra.mxu0 %v14086_v54  ;;  %2462 = vmatprep.subr.bf16.mxu1 %v14097_v61 }
 0x335   : > { %2234 = vmatprep.subr.bf16.mxu0 %v14094_v60  ;;  %v14125_v60 = vld [vmem:[#allocation2] ss:$8 sps:$4 sm:$0x88]  }
 0x337   : > { %2463 = vmatpush1.bf16.msra.mxu1 %v14095_v63 }
 0x338   : > { %2235 = vmatpush1.bf16.msra.mxu0 %v14092_v59  ;;  %2464 = vmatprep.subr.bf16.mxu1 %v14103_v0 }
 0x339   : > { %2236 = vmatprep.subr.bf16.mxu0 %v14100_v62 }
 0x33b   : > { %2465 = vmatpush1.bf16.msra.mxu1 %v14101_v3  ;;  %v1832_v3 = vrot.slane %v14125_v60, %v16457_v32 }
 0x33c   : > { %2237 = vmatpush1.bf16.msra.mxu0 %v14098_v1  ;;  %2466 = vmatprep.subr.bf16.mxu1 %v14109_v4 }
 0x33d   : > { %2238 = vmatprep.subr.bf16.mxu0 %v14106_v2  ;;  %v14142_v2 = vld [vmem:[#allocation2 + $0x30] ss:$8 sps:$4 sm:$0x88]  }
 0x33f   : > { %2467 = vmatpush1.bf16.msra.mxu1 %v14107_v7 }
 0x340   : > { %2239 = vmatpush1.bf16.msra.mxu0 %v14104_v5  ;;  %2468 = vmatprep.subr.bf16.mxu1 %v14115_v8 }
 0x341   : > { %2240 = vmatprep.subr.bf16.mxu0 %v14112_v6 }
 0x343   : > { %2469 = vmatpush1.bf16.msra.mxu1 %v14113_v11  ;;  %v2491_v11 = vrot.slane %v14142_v2, %v16457_v32 }
 0x344   : > { %2241 = vmatpush1.bf16.msra.mxu0 %v14110_v9  ;;  %2470 = vmatprep.subr.bf16.mxu1 %v14121_v13  ;;  %v14127_v13 = vld [vmem:[#allocation2 + $0x4] ss:$8 sps:$4 sm:$0x11]  }
 0x345   : > { %2242 = vmatprep.subr.bf16.mxu0 %v14118_v10 }
 0x347   : > { %2471 = vmatpush1.bf16.msra.mxu1 %v14119_v14  ;;  %v1840_v14 = vcombine.high %v1832_v3, %v1832_v3 }
 0x348   : > { %2243 = vmatpush1.bf16.msra.mxu0 %v14116_v12  ;;  %3045 = vmatprep.subr.bf16.mxu1 %v14133_v18  ;;  %v1839_v18 = vrot.slane %v14127_v13, %v16457_v32 }
 0x349   : > { %2244 = vmatprep.subr.bf16.mxu0 %v14124_v15  ;;  %v14144_v15 = vld [vmem:[#allocation2 + $0x34] ss:$8 sps:$4 sm:$0x11]  }
 0x34c   : > { %2245 = vmatpush1.bf16.msra.mxu0 %v14122_v17  ;;  %v2499_v17 = vcombine.high %v2491_v11, %v2491_v11 }
 0x34d   : > { %2742 = vmatprep.subr.bf16.mxu0 %v14139_v19  ;;  %v1854_v19 = vrot.slane %v1840_v14, %v16457_v32 }
 0x3dd   : > { %v1705_v23 = vpop.f32.mrb[4].mxu1 }
 0x3de   : > { %v1706_v24 = vadd.f32 %v1705_v23, %v1504_v21  ;;  %v1707_v26 = vpop.f32.mrb[5].mxu1  ;;  %v2498_v21 = vrot.slane %v14144_v15, %v16457_v32  ;;  %v14128_v23 = vld [vmem:[#allocation2 + $0x10] ss:$8 sps:$4 sm:$0x88]  }
 0x3df   : > { %v1708_v27 = vadd.f32 %v1707_v26, %v1508_v22  ;;  %v1709_v28 = vpop.f32.mrb[6].mxu1  ;;  %v2513_v22 = vrot.slane %v2499_v17, %v16457_v32  ;;  %v1855_v26 = vcombine.high %v1854_v19, %v1854_v19 }
 0x3e0   : > { %v12275_v29 = vmul.f32 -1.442695, %v1706_v24  ;;  %v1710_v30 = vpop.f32.mrb[7].mxu1  ;;  %v1847_v24 = vrot.slane %v1839_v18, %v16457_v32  ;;  %v2804_v28 = vrot.slane %v14140_v20, %v16457_v32  ;;  %v14137_v18 = vld [vmem:[#allocation17 + $0x600] ss:$8 sps:$4 sm:$0xff]  }
 0x3e1   : > { %v12276_v31 = vmul.f32 -1.442695, %v1708_v27  ;;  %v14134_v30 = vld [vmem:[#allocation2 + $0x20] ss:$8 sps:$4 sm:$0x88]  }
 0x3e2   : > { %15201 = vpow2.f32 %v12275_v29  ;;  %v1458_v33 = vpop.f32.mrb[4].mxu0  ;;  %v1864_v29 = vrot.slane %v14128_v23, %v16457_v32 }
 0x3e3   : > { %15203 = vpow2.f32 %v12276_v31  ;;  %v1460_v34 = vpop.f32.mrb[5].mxu0  ;;  %v1459_v44 = vadd.f32 %v1458_v33, %v1257_v42  ;;  %v2811_v42 = vrot.slane %v2804_v28, %v16457_v32  ;;  %v14156_v28 = vld [vmem:[#allocation17 + $0x624] ss:$8 sps:$4 sm:$0xff]  }
 0x3e4   : > { %v1462_v35 = vpop.f32.mrb[6].mxu0  ;;  %v1461_v45 = vadd.f32 %v1460_v34, %v1261_v43  ;;  %v2506_v34 = vrot.slane %v2498_v21, %v16457_v32  ;;  %v14147_v21 = vld [vmem:[#allocation17 + $0x114] ss:$8 sps:$4 sm:$0xff]  }
 0x3e5   : > { %v1463_v36 = vpop.f32.mrb[7].mxu0  ;;  %v1465_v48 = vmax.f32 %v1459_v44, 0.0  ;;  %v2514_v35 = vcombine.high %v2513_v22, %v2513_v22  ;;  %v14150_v22 = vld [vmem:[#allocation17 + $0x614] ss:$8 sps:$4 sm:$0xff]  }
 0x3e6   : > { %v1466_v50 = vmax.f32 %v1461_v45, 0.0  ;;  %v1872_v36 = vcombine.high %v1864_v29, %v1864_v29  ;;  %v14151_v29 = vld [vmem:[#allocation17 + $0x120] ss:$8 sps:$4 sm:$0xff]  }
 0x3e8   : > { %v1886_v44 = vrot.slane %v1872_v36, %v16457_v32  ;;  %v14160_v36 = vld [vmem:[#allocation17 + $0x630] ss:$8 sps:$4 sm:$0xff]  }
 0x3ec   : > { %v15202_v37 = vpop.eup %15201 }
 0x3ed   : > { %v15204_v38 = vpop.eup %15203  ;;  %v1718_v39 = vadd.f32 1.0, %v15202_v37  ;;  %v1963_v37 = vrot.slane %v14134_v30, %v16457_v32  ;;  %v14159_v30 = vld [vmem:[#allocation17 + $0x134] ss:$8 sps:$4 sm:$0xff]  }
 0x3ee   : > { %v1719_v40 = vadd.f32 1.0, %v15204_v38 }
 0x3ef   : > { %15205 = vrcp.f32 %v1718_v39  ;;  %v1904_v39 = vshrl.u32 %v1855_v26, 16  ;;  %v1971_v45 = vcombine.high %v1963_v37, %v1963_v37  ;;  %v14153_v26 = vld [vmem:[#allocation17 + $0x124] ss:$8 sps:$4 sm:$0xff]  }
 0x3f0   : > { %15207 = vrcp.f32 %v1719_v40  ;;  %v1909_v40 = vshll.u32 %v1847_v24, 16  ;;  %v14145_v24 = vld [vmem:[#allocation17 + $0x110] ss:$8 sps:$4 sm:$0xff]   ;;  %v14168_v37 = vld [vmem:[#allocation17 + $0x644] ss:$8 sps:$4 sm:$0xff]  }
 0x3f9   : > { %v15206_v46 = vpop.eup %15205 }
 0x3fa   : > { %v15208_v47 = vpop.eup %15207  ;;  %v1724_v49 = vadd.f32 1.0, %v15206_v46 }
 0x3fb   : > { %v1725_v51 = vadd.f32 1.0, %v15208_v47  ;;  %v2516_v47 = vshrl.u32 %v2514_v35, 16  ;;  %v14165_v35 = vld [vmem:[#allocation17 + $0x144] ss:$8 sps:$4 sm:$0xff]  }
 0x3fc   : > { %v1726_v52 = vmul.f32 %v1724_v49, %v1465_v48  ;;  %v2521_v48 = vshll.u32 %v2506_v34, 16  ;;  %v1887_v49 = vcombine.high %v1886_v44, %v1886_v44  ;;  %v14157_v34 = vld [vmem:[#allocation17 + $0x130] ss:$8 sps:$4 sm:$0xff]  }
 0x3fd   : > { %v1727_v53 = vmul.f32 %v1725_v51, %v1466_v50  ;;  %v14172_v44 = vld [vmem:[#allocation17 + $0x650] ss:$8 sps:$4 sm:$0xff]  }
 0x3ff   : > { %v12277_v54 = vpack.c.bf16 %v1727_v53, %v1726_v52  ;;  %v1985_v52 = vrot.slane %v1971_v45, %v16457_v32  ;;  %v14180_v45 = vld [vmem:[#allocation17 + $0x664] ss:$8 sps:$4 sm:$0xff]  }
 0x401   : > { %v1739_v56 = vrot.slane %v12277_v54, %v16457_v32  ;;  %v1911_v54 = vsel %vm16503_vm14, %v1904_v39, %v1909_v40  ;;  %v14171_v39 = vld [vmem:[#allocation17 + $0x154] ss:$8 sps:$4 sm:$0xff]   ;;  %v14166_v40 = vld [vmem:[#allocation17 + $0x640] ss:$8 sps:$4 sm:$0xff]  }
 0x403   : > { %v1740_v57 = vcombine.high %v1739_v56, %v1739_v56  ;;  %v1747_v59 = vrot.slane %v1739_v56, %v16457_v32  ;;  %v1913_v56 = vshrl.u32 %v1887_v49, 16  ;;  %v14186_v49 = vld [vmem:[#allocation17 + $0x674] ss:$8 sps:$4 sm:$0xff]  }
 0x405   : > { %v1754_v61 = vrot.slane %v1740_v57, %v16457_v32  ;;  %v1761_v62 = vrot.slane %v1747_v59, %v16457_v32  ;;  %v1986_v59 = vcombine.high %v1985_v52, %v1985_v52  ;;  %v14189_v52 = vld [vmem:[#allocation17 + $0x184] ss:$8 sps:$4 sm:$0xff]  }
 0x407   : > { %v1762_v63 = vcombine.high %v1761_v62, %v1761_v62  ;;  %v1769_v0 = vrot.slane %v1761_v62, %v16457_v32  ;;  %v1785_v1 = vrot.slane %v1754_v61, %v16457_v32  ;;  %v1988_v62 = vshrl.u32 %v1986_v59, 16  ;;  %v14195_v59 = vld [vmem:[#allocation17 + $0x194] ss:$8 sps:$4 sm:$0xff]  }
 0x409   : > { %v1776_v4 = vrot.slane %v1762_v63, %v16457_v32  ;;  %v1777_v5 = vcombine.low %v1769_v0, %v1769_v0  ;;  %v1786_v6 = vcombine.high %v1785_v1, %v1785_v1  ;;  %v1793_v7 = vrot.slane %v1785_v1, %v16457_v32 }
 0x40a   : > { %v2523_v0 = vsel %vm16503_vm14, %v2516_v47, %v2521_v48  ;;  %v14183_v47 = vld [vmem:[#allocation17 + $0x174] ss:$8 sps:$4 sm:$0xff]   ;;  %v14178_v48 = vld [vmem:[#allocation17 + $0x660] ss:$8 sps:$4 sm:$0xff]  }
 0x40b   : > { %v1778_v8 = vcombine.low %v1776_v4, %v1776_v4  ;;  %v1800_v9 = vrot.slane %v1786_v6, %v16457_v32  ;;  %v1801_v10 = vcombine.low %v1793_v7, %v1793_v7  ;;  %1808 = vst [vmem:[#allocation2 + $0x10] sm:$0x10] %v1777_v5 }
 0x40d   : > { %v1802_v12 = vcombine.low %v1800_v9, %v1800_v9  ;;  %1809 = vst [vmem:[#allocation2 + $0x18] sm:$0x10] %v1778_v8  ;;  %1810 = vst [vmem:[#allocation2 + $0x20] sm:$0x10] %v1801_v10 }
 0x40f   : > { %1811 = vst [vmem:[#allocation2 + $0x28] sm:$0x10] %v1802_v12  ;;  %v14131_v12 = vld [vmem:[#allocation17 + $0x100] ss:$8 sps:$4 sm:$0xff]  }
 0x414   : > { %v14130_v27 = vld [vmem:[#allocation2 + $0x14] ss:$8 sps:$4 sm:$0x11]  }
 0x415   : > { %v1871_v31 = vrot.slane %v14130_v27, %v16457_v32  ;;  %v14141_v38 = vld [vmem:[#allocation2 + $0x14] ss:$8 sps:$4 sm:$0x11]  }
 0x416   : > { %v14136_v33 = vld [vmem:[#allocation2 + $0x24] ss:$8 sps:$4 sm:$0x11]   ;;  %v2819_v46 = vrot.slane %v14141_v38, %v16457_v32 }
 0x417   : > { %v1970_v41 = vrot.slane %v14136_v33, %v16457_v32  ;;  %v1879_v43 = vrot.slane %v1871_v31, %v16457_v32  ;;  %v14148_v27 = vld [vmem:[#allocation17 + $0x610] ss:$8 sps:$4 sm:$0xff]   ;;  %v14154_v31 = vld [vmem:[#allocation17 + $0x620] ss:$8 sps:$4 sm:$0xff]   ;;  %v14162_v33 = vld [vmem:[#allocation17 + $0x634] ss:$8 sps:$4 sm:$0xff]  }
 0x418   : > { %v16510_v53 = vrot.slane %v2819_v46, %v16457_v32  ;;  %v14163_v38 = vld [vmem:[#allocation17 + $0x140] ss:$8 sps:$4 sm:$0xff]  }
 0x419   : > { %v1978_v51 = vrot.slane %v1970_v41, %v16457_v32  ;;  %v1918_v57 = vshll.u32 %v1879_v43, 16  ;;  %v14174_v41 = vld [vmem:[#allocation17 + $0x654] ss:$8 sps:$4 sm:$0xff]   ;;  %v14177_v43 = vld [vmem:[#allocation17 + $0x164] ss:$8 sps:$4 sm:$0xff]  }
 0x41a   : > { %v2860_v60 = vcombine.low %v2811_v42, %v16510_v53  ;;  %v14169_v42 = vld [vmem:[#allocation17 + $0x150] ss:$8 sps:$4 sm:$0xff]   ;;  %v14175_v46 = vld [vmem:[#allocation17 + $0x160] ss:$8 sps:$4 sm:$0xff]  }
 0x41b   : > { %v1920_v61 = vsel %vm16503_vm14, %v1913_v56, %v1918_v57  ;;  %v1993_v63 = vshll.u32 %v1978_v51, 16  ;;  %v14181_v51 = vld [vmem:[#allocation17 + $0x170] ss:$8 sps:$4 sm:$0xff]   ;;  %v14192_v56 = vld [vmem:[#allocation17 + $0x684] ss:$8 sps:$4 sm:$0xff]  }
 0x41c   : > { %v2255_v1 = vcombine.low %v1911_v54, %v1920_v61  ;;  %v16522_v3 = vrot.slane %v2860_v60, %v16457_v32  ;;  %v14184_v54 = vld [vmem:[#allocation17 + $0x670] ss:$8 sps:$4 sm:$0xff]   ;;  %v14187_v57 = vld [vmem:[#allocation17 + $0x180] ss:$8 sps:$4 sm:$0xff]  }
 0x41d   : > { %v1995_v2 = vsel %vm16503_vm14, %v1988_v62, %v1993_v63  ;;  %v14190_v60 = vld [vmem:[#allocation17 + $0x680] ss:$8 sps:$4 sm:$0xff]   ;;  %v14193_v62 = vld [vmem:[#allocation17 + $0x190] ss:$8 sps:$4 sm:$0xff]   ;;  %v14201_v63 = vld [vmem:[#allocation17 + $0x1a4] ss:$8 sps:$4 sm:$0xff]  }
 0x41e   : > { %v2262_v4 = vrot.slane %v2255_v1, %v16457_v32  ;;  %v2029_v5 = vcombine.low %v1920_v61, %v1995_v2  ;;  %v2557_v6 = vcombine.low %v1995_v2, %v2523_v0  ;;  %v2868_v10 = vcombine.high %v16522_v3, %v16522_v3  ;;  %v14198_v61 = vld [vmem:[#allocation17 + $0x694] ss:$8 sps:$4 sm:$0xff]   ;;  %v14196_v0 = vld [vmem:[#allocation17 + $0x690] ss:$8 sps:$4 sm:$0xff]   ;;  %v14204_v1 = vld [vmem:[#allocation17 + $0x6a4] ss:$8 sps:$4 sm:$0xff]  }
 0x41f   : > { %v14199_v2 = vld [vmem:[#allocation17 + $0x1a0] ss:$8 sps:$4 sm:$0xff]  }
 0x420   : > { %v2263_v7 = vcombine.high %v2262_v4, %v2262_v4  ;;  %v2036_v8 = vrot.slane %v2029_v5, %v16457_v32  ;;  %v16527_v9 = vrot.slane %v2557_v6, %v16457_v32  ;;  %v2270_v15 = vrot.slane %v2262_v4, %v16457_v32  ;;  %v14207_v4 = vld [vmem:[#allocation17 + $0x1b4] ss:$8 sps:$4 sm:$0xff]   ;;  %v14239_v5 = vld [vmem:[#allocation2 + $0x34] ss:$8 sps:$4 sm:$0x11]  }
 0x421   : > { %v2882_v19 = vrot.slane %v2868_v10, %v16457_v32  ;;  %v14202_v6 = vld [vmem:[#allocation17 + $0x6a0] ss:$8 sps:$4 sm:$0xff]   ;;  %v14205_v10 = vld [vmem:[#allocation17 + $0x1b0] ss:$8 sps:$4 sm:$0xff]  }
 0x422   : > { %v2277_v11 = vrot.slane %v2263_v7, %v16457_v32  ;;  %v2037_v13 = vcombine.high %v2036_v8, %v2036_v8  ;;  %v2565_v14 = vcombine.high %v16527_v9, %v16527_v9  ;;  %v2044_v20 = vrot.slane %v2036_v8, %v16457_v32  ;;  %v14238_v7 = vld [vmem:[#allocation2 + $0x24] ss:$8 sps:$4 sm:$0x11]   ;;  %v14210_v8 = vld [vmem:[#allocation17 + $0x6b4] ss:$8 sps:$4 sm:$0xff]  }
 0x424   : > { %2472 = vmatprep.mubr.bf16.mxu1 %v2277_v11  ;;  %v2051_v17 = vrot.slane %v2037_v13, %v16457_v32  ;;  %v2579_v23 = vrot.slane %v2565_v14, %v16457_v32  ;;  %v14213_v11 = vld [vmem:[#allocation17 + $0x1c4] ss:$8 sps:$4 sm:$0xff]   ;;  %v3097_v13 = vrot.slane %v14238_v7, %v16457_v32  ;;  %v3375_v14 = vrot.slane %v14239_v5, %v16457_v32  ;;  %v14267_v5 = vld [vmem:[#allocation17 + $0x750] ss:$8 sps:$4 sm:$0xff]  }
 0x425   : > { %2473 = vmatmul.mubr.bf16.vlgmr.msra.gmra.mrb[8].mxu1 %v2270_v15  ;;  %v14216_v15 = vld [vmem:[#allocation17 + $0x6c4] ss:$8 sps:$4 sm:$0xff]   ;;  %v14270_v7 = vld [vmem:[#allocation17 + $0x450] ss:$8 sps:$4 sm:$0xff]  }
 0x426   : > { %3046 = vmatpush1.bf16.msra.mxu1 %v14131_v12  ;;  %2246 = vmatprep.mubr.bf16.mxu0 %v2051_v17  ;;  %v14208_v12 = vld [vmem:[#allocation17 + $0x6b0] ss:$8 sps:$4 sm:$0xff]   ;;  %v14211_v17 = vld [vmem:[#allocation17 + $0x1c0] ss:$8 sps:$4 sm:$0xff]  }
 0x427   : > { %3077 = vmatprep.mubr.bf16.mxu1 %v2882_v19  ;;  %2247 = vmatmul.mubr.bf16.vlgmr.msra.gmra.mrb[8].mxu0 %v2044_v20  ;;  %v14214_v19 = vld [vmem:[#allocation17 + $0x6c0] ss:$8 sps:$4 sm:$0xff]   ;;  %v3104_v20 = vrot.slane %v3097_v13, %v16457_v32  ;;  %v14284_v13 = vld [vmem:[#allocation17 + $0x474] ss:$8 sps:$4 sm:$0xff]  }
 0x428   : > { %2743 = vmatpush1.bf16.msra.mxu0 %v14137_v18  ;;  %2774 = vmatprep.mubr.bf16.mxu0 %v2579_v23  ;;  %v14219_v18 = vld [vmem:[#allocation17 + $0x1d4] ss:$8 sps:$4 sm:$0xff]   ;;  %v14217_v23 = vld [vmem:[#allocation17 + $0x1d0] ss:$8 sps:$4 sm:$0xff]  }
 0x429   : > { %3047 = vmatprep.subr.bf16.mxu1 %v14147_v21  ;;  %2744 = vmatprep.subr.bf16.mxu0 %v14150_v22  ;;  %v3382_v21 = vrot.slane %v3375_v14, %v16457_v32  ;;  %v14222_v22 = vld [vmem:[#allocation17 + $0x6d4] ss:$8 sps:$4 sm:$0xff]   ;;  %v14279_v14 = vld [vmem:[#allocation17 + $0x770] ss:$8 sps:$4 sm:$0xff]  }
 0x42a   : > { %3048 = vmatpush1.bf16.msra.mxu1 %v14145_v24  ;;  %v14225_v24 = vld [vmem:[#allocation17 + $0x1e4] ss:$8 sps:$4 sm:$0xff]  }
 0x42b   : > { %3049 = vmatprep.subr.bf16.mxu1 %v14153_v26  ;;  %v14220_v26 = vld [vmem:[#allocation17 + $0x6d0] ss:$8 sps:$4 sm:$0xff]  }
 0x42c   : > { %2745 = vmatpush1.bf16.msra.mxu0 %v14148_v27  ;;  %v3416_v27 = vcombine.low %v3104_v20, %v3382_v21  ;;  %v14341_v21 = vld [vmem:[#allocation2 + $0x4] ss:$8 sps:$4 sm:$0x33]  }
 0x42d   : > { %2746 = vmatprep.subr.bf16.mxu0 %v14156_v28  ;;  %v14228_v28 = vld [vmem:[#allocation17 + $0x6e4] ss:$8 sps:$4 sm:$0xff]  }
 0x42e   : > { %3050 = vmatpush1.bf16.msra.mxu1 %v14151_v29  ;;  %v14223_v29 = vld [vmem:[#allocation17 + $0x1e0] ss:$8 sps:$4 sm:$0xff]  }
 0x42f   : > { %3051 = vmatprep.subr.bf16.mxu1 %v14159_v30  ;;  %v3138_v30 = vcombine.low %v16510_v53, %v3104_v20  ;;  %v14285_v20 = vld [vmem:[#allocation17 + $0x780] ss:$8 sps:$4 sm:$0xff]  }
 0x430   : > { %2747 = vmatpush1.bf16.msra.mxu0 %v14154_v31  ;;  %v14231_v31 = vld [vmem:[#allocation17 + $0x1f4] ss:$8 sps:$4 sm:$0xff]  }
 0x431   : > { %2748 = vmatprep.subr.bf16.mxu0 %v14162_v33  ;;  %v14226_v33 = vld [vmem:[#allocation17 + $0x6e0] ss:$8 sps:$4 sm:$0xff]  }
 0x432   : > { %3052 = vmatpush1.bf16.msra.mxu1 %v14157_v34  ;;  %v16545_v34 = vrot.slane %v3416_v27, %v16457_v32 }
 0x433   : > { %3053 = vmatprep.subr.bf16.mxu1 %v14165_v35  ;;  %v14234_v35 = vld [vmem:[#allocation17 + $0x6f4] ss:$8 sps:$4 sm:$0xff]  }
 0x434   : > { %2749 = vmatpush1.bf16.msra.mxu0 %v14160_v36  ;;  %v14229_v36 = vld [vmem:[#allocation17 + $0x1f0] ss:$8 sps:$4 sm:$0xff]   ;;  %v3424_v53 = vcombine.high %v16545_v34, %v16545_v34 }
 0x435   : > { %2750 = vmatprep.subr.bf16.mxu0 %v14168_v37  ;;  %v16548_v37 = vrot.slane %v3138_v30, %v16457_v32 }
 0x436   : > { %3054 = vmatpush1.bf16.msra.mxu1 %v14163_v38  ;;  %v14237_v38 = vld [vmem:[#allocation17 + $0x704] ss:$8 sps:$4 sm:$0xff]  }
 0x437   : > { %3055 = vmatprep.subr.bf16.mxu1 %v14171_v39  ;;  %v14232_v39 = vld [vmem:[#allocation17 + $0x6f0] ss:$8 sps:$4 sm:$0xff]  }
 0x438   : > { %2751 = vmatpush1.bf16.msra.mxu0 %v14166_v40  ;;  %v14242_v40 = vld [vmem:[#allocation17 + $0x404] ss:$8 sps:$4 sm:$0xff]  }
 0x439   : > { %2752 = vmatprep.subr.bf16.mxu0 %v14174_v41  ;;  %v14235_v41 = vld [vmem:[#allocation17 + $0x700] ss:$8 sps:$4 sm:$0xff]  }
 0x43a   : > { %3056 = vmatpush1.bf16.msra.mxu1 %v14169_v42  ;;  %v3146_v42 = vcombine.high %v16548_v37, %v16548_v37 }
 0x43b   : > { %3057 = vmatprep.subr.bf16.mxu1 %v14177_v43  ;;  %v2875_v43 = vrot.slane %v16522_v3, %v16457_v32  ;;  %v14251_v3 = vld [vmem:[#allocation17 + $0x724] ss:$8 sps:$4 sm:$0xff]  }
 0x43c   : > { %2753 = vmatpush1.bf16.msra.mxu0 %v14172_v44  ;;  %v14245_v44 = vld [vmem:[#allocation17 + $0x714] ss:$8 sps:$4 sm:$0xff]  }
 0x43d   : > { %2754 = vmatprep.subr.bf16.mxu0 %v14180_v45  ;;  %v3438_v45 = vrot.slane %v3424_v53, %v16457_v32 }
 0x43e   : > { %3058 = vmatpush1.bf16.msra.mxu1 %v14175_v46  ;;  %v14240_v46 = vld [vmem:[#allocation17 + $0x400] ss:$8 sps:$4 sm:$0xff]  }
 0x43f   : > { %3059 = vmatprep.subr.bf16.mxu1 %v14183_v47  ;;  %v2572_v47 = vrot.slane %v16527_v9, %v16457_v32  ;;  %v14252_v9 = vld [vmem:[#allocation17 + $0x420] ss:$8 sps:$4 sm:$0xff]  }
 0x440   : > { %2755 = vmatpush1.bf16.msra.mxu0 %v14178_v48  ;;  %v14248_v48 = vld [vmem:[#allocation17 + $0x414] ss:$8 sps:$4 sm:$0xff]  }
 0x441   : > { %2756 = vmatprep.subr.bf16.mxu0 %v14186_v49  ;;  %v3160_v49 = vrot.slane %v3146_v42, %v16457_v32  ;;  %v14308_v42 = vld [vmem:[#allocation17 + $0x4b4] ss:$8 sps:$4 sm:$0xff]  }
 0x442   : > { %3060 = vmatpush1.bf16.msra.mxu1 %v14181_v51  ;;  %v14243_v51 = vld [vmem:[#allocation17 + $0x710] ss:$8 sps:$4 sm:$0xff]  }
 0x443   : > { %3061 = vmatprep.subr.bf16.mxu1 %v14189_v52  ;;  %v14246_v52 = vld [vmem:[#allocation17 + $0x410] ss:$8 sps:$4 sm:$0xff]  }
 0x444   : > { %2757 = vmatpush1.bf16.msra.mxu0 %v14184_v54  ;;  %v14254_v54 = vld [vmem:[#allocation17 + $0x424] ss:$8 sps:$4 sm:$0xff]  }
 0x445   : > { %2758 = vmatprep.subr.bf16.mxu0 %v14192_v56  ;;  %v14249_v56 = vld [vmem:[#allocation17 + $0x720] ss:$8 sps:$4 sm:$0xff]  }
 0x446   : > { %3062 = vmatpush1.bf16.msra.mxu1 %v14187_v57  ;;  %v14257_v57 = vld [vmem:[#allocation17 + $0x734] ss:$8 sps:$4 sm:$0xff]  }
 0x447   : > { %3063 = vmatprep.subr.bf16.mxu1 %v14195_v59  ;;  %v14260_v59 = vld [vmem:[#allocation17 + $0x434] ss:$8 sps:$4 sm:$0xff]  }
 0x448   : > { %2759 = vmatpush1.bf16.msra.mxu0 %v14190_v60  ;;  %v14255_v60 = vld [vmem:[#allocation17 + $0x730] ss:$8 sps:$4 sm:$0xff]  }
 0x449   : > { %2760 = vmatprep.subr.bf16.mxu0 %v14198_v61  ;;  %v14263_v61 = vld [vmem:[#allocation17 + $0x744] ss:$8 sps:$4 sm:$0xff]  }
 0x44a   : > { %3064 = vmatpush1.bf16.msra.mxu1 %v14193_v62  ;;  %v14258_v62 = vld [vmem:[#allocation17 + $0x430] ss:$8 sps:$4 sm:$0xff]  }
 0x44b   : > { %3065 = vmatprep.subr.bf16.mxu1 %v14201_v63  ;;  %v14266_v63 = vld [vmem:[#allocation17 + $0x444] ss:$8 sps:$4 sm:$0xff]  }
 0x44c   : > { %2761 = vmatpush1.bf16.msra.mxu0 %v14196_v0  ;;  %v14261_v0 = vld [vmem:[#allocation17 + $0x740] ss:$8 sps:$4 sm:$0xff]  }
 0x44d   : > { %2762 = vmatprep.subr.bf16.mxu0 %v14204_v1  ;;  %v14269_v1 = vld [vmem:[#allocation17 + $0x754] ss:$8 sps:$4 sm:$0xff]  }
 0x44e   : > { %3066 = vmatpush1.bf16.msra.mxu1 %v14199_v2  ;;  %v14264_v2 = vld [vmem:[#allocation17 + $0x440] ss:$8 sps:$4 sm:$0xff]  }
 0x44f   : > { %3067 = vmatprep.subr.bf16.mxu1 %v14207_v4  ;;  %v14272_v4 = vld [vmem:[#allocation17 + $0x454] ss:$8 sps:$4 sm:$0xff]  }
 0x450   : > { %2763 = vmatpush1.bf16.msra.mxu0 %v14202_v6  ;;  %v14275_v6 = vld [vmem:[#allocation17 + $0x764] ss:$8 sps:$4 sm:$0xff]  }
 0x451   : > { %2764 = vmatprep.subr.bf16.mxu0 %v14210_v8  ;;  %v14278_v8 = vld [vmem:[#allocation17 + $0x464] ss:$8 sps:$4 sm:$0xff]  }
 0x452   : > { %3068 = vmatpush1.bf16.msra.mxu1 %v14205_v10  ;;  %v14273_v10 = vld [vmem:[#allocation17 + $0x760] ss:$8 sps:$4 sm:$0xff]  }
 0x453   : > { %3069 = vmatprep.subr.bf16.mxu1 %v14213_v11  ;;  %v14281_v11 = vld [vmem:[#allocation17 + $0x774] ss:$8 sps:$4 sm:$0xff]  }
 0x454   : > { %2765 = vmatpush1.bf16.msra.mxu0 %v14208_v12  ;;  %v14276_v12 = vld [vmem:[#allocation17 + $0x460] ss:$8 sps:$4 sm:$0xff]  }
 0x455   : > { %2766 = vmatprep.subr.bf16.mxu0 %v14216_v15  ;;  %v14287_v15 = vld [vmem:[#allocation17 + $0x784] ss:$8 sps:$4 sm:$0xff]  }
 0x456   : > { %3070 = vmatpush1.bf16.msra.mxu1 %v14211_v17  ;;  %v14282_v17 = vld [vmem:[#allocation17 + $0x470] ss:$8 sps:$4 sm:$0xff]  }
 0x457   : > { %3071 = vmatprep.subr.bf16.mxu1 %v14219_v18  ;;  %v14290_v18 = vld [vmem:[#allocation17 + $0x484] ss:$8 sps:$4 sm:$0xff]  }
 0x458   : > { %2767 = vmatpush1.bf16.msra.mxu0 %v14214_v19  ;;  %v14337_v19 = vld [vmem:[#allocation2 + $0x24] ss:$8 sps:$4 sm:$0x33]  }
 0x459   : > { %2768 = vmatprep.subr.bf16.mxu0 %v14222_v22  ;;  %v14293_v22 = vld [vmem:[#allocation17 + $0x794] ss:$8 sps:$4 sm:$0xff]   ;;  %v3990_v27 = vrot.slane %v14337_v19, %v16457_v32 }
 0x45a   : > { %3072 = vmatpush1.bf16.msra.mxu1 %v14217_v23  ;;  %v14336_v23 = vld [vmem:[#allocation2 + $0x14] ss:$8 sps:$4 sm:$0x33]  }
 0x45b   : > { %3073 = vmatprep.subr.bf16.mxu1 %v14225_v24  ;;  %v14288_v24 = vld [vmem:[#allocation17 + $0x480] ss:$8 sps:$4 sm:$0xff]   ;;  %v3686_v30 = vrot.slane %v14336_v23, %v16457_v32  ;;  %v14340_v23 = vld [vmem:[#allocation17 + $0x204] ss:$8 sps:$4 sm:$0xff]  }
 0x45c   : > { %2769 = vmatpush1.bf16.msra.mxu0 %v14220_v26  ;;  %v14296_v26 = vld [vmem:[#allocation17 + $0x494] ss:$8 sps:$4 sm:$0xff]  }
 0x45d   : > { %2770 = vmatprep.subr.bf16.mxu0 %v14228_v28  ;;  %v14291_v28 = vld [vmem:[#allocation17 + $0x790] ss:$8 sps:$4 sm:$0xff]   ;;  %v3687_v53 = vcombine.high %v3686_v30, %v3686_v30 }
 0x45e   : > { %3074 = vmatpush1.bf16.msra.mxu1 %v14223_v29  ;;  %v14299_v29 = vld [vmem:[#allocation17 + $0x7a4] ss:$8 sps:$4 sm:$0xff]  }
 0x45f   : > { %3075 = vmatprep.subr.bf16.mxu1 %v14231_v31  ;;  %v3663_v31 = vrot.slane %v14341_v21, %v16457_v32  ;;  %v14330_v21 = vld [vmem:[#allocation17 + $0x4f0] ss:$8 sps:$4 sm:$0xff]  }
 0x460   : > { %2771 = vmatpush1.bf16.msra.mxu0 %v14226_v33  ;;  %v14294_v33 = vld [vmem:[#allocation17 + $0x490] ss:$8 sps:$4 sm:$0xff]  }
 0x461   : > { %2772 = vmatprep.subr.bf16.mxu0 %v14234_v35  ;;  %v14302_v35 = vld [vmem:[#allocation17 + $0x4a4] ss:$8 sps:$4 sm:$0xff]  }
 0x462   : > { %3076 = vmatpush1.bf16.msra.mxu1 %v14229_v36  ;;  %v3991_v36 = vcombine.high %v3990_v27, %v3990_v27 }
 0x463   : > { %3601 = vmatprep.subr.bf16.mxu1 %v14237_v38  ;;  %v14297_v38 = vld [vmem:[#allocation17 + $0x7a0] ss:$8 sps:$4 sm:$0xff]  }
 0x464   : > { %2773 = vmatpush1.bf16.msra.mxu0 %v14232_v39  ;;  %v14305_v39 = vld [vmem:[#allocation17 + $0x7b4] ss:$8 sps:$4 sm:$0xff]  }
 0x465   : > { %3078 = vmatmul.mubr.bf16.vlgmr.msra.gmra.mrb[12].mxu1 %v2875_v43  ;;  %3323 = vmatprep.subr.bf16.mxu0 %v14242_v40  ;;  %v3664_v40 = vcombine.high %v3663_v31, %v3663_v31  ;;  %v4005_v43 = vrot.slane %v3991_v36, %v16457_v32  ;;  %v14342_v36 = vld [vmem:[#allocation17 + $0x510] ss:$8 sps:$4 sm:$0xff]  }
 0x466   : > { %3602 = vmatpush1.bf16.msra.mxu1 %v14235_v41  ;;  %3633 = vmatprep.mubr.bf16.mxu1 %v3438_v45  ;;  %v14300_v41 = vld [vmem:[#allocation17 + $0x4a0] ss:$8 sps:$4 sm:$0xff]   ;;  %v14311_v45 = vld [vmem:[#allocation17 + $0x7c4] ss:$8 sps:$4 sm:$0xff]  }
 0x467   : > { %2775 = vmatmul.mubr.bf16.vlgmr.msra.gmra.mrb[12].mxu0 %v2572_v47  ;;  %3603 = vmatprep.subr.bf16.mxu1 %v14245_v44  ;;  %v14303_v44 = vld [vmem:[#allocation17 + $0x7b0] ss:$8 sps:$4 sm:$0xff]   ;;  %v3998_v47 = vrot.slane %v3990_v27, %v16457_v32  ;;  %v3431_v27 = vrot.slane %v16545_v34, %v16457_v32  ;;  %v14350_v34 = vld [vmem:[#allocation17 + $0x524] ss:$8 sps:$4 sm:$0xff]  }
 0x468   : > { %3324 = vmatpush1.bf16.msra.mxu0 %v14240_v46  ;;  %3355 = vmatprep.mubr.bf16.mxu0 %v3160_v49  ;;  %v3701_v46 = vrot.slane %v3687_v53, %v16457_v32  ;;  %v3678_v49 = vrot.slane %v3664_v40, %v16457_v32  ;;  %v14348_v53 = vld [vmem:[#allocation17 + $0x520] ss:$8 sps:$4 sm:$0xff]   ;;  %v14356_v40 = vld [vmem:[#allocation17 + $0x534] ss:$8 sps:$4 sm:$0xff]  }
 0x469   : > { %3325 = vmatprep.subr.bf16.mxu0 %v14248_v48  ;;  %v3671_v48 = vrot.slane %v3663_v31, %v16457_v32  ;;  %v3153_v31 = vrot.slane %v16548_v37, %v16457_v32  ;;  %v14351_v37 = vld [vmem:[#allocation17 + $0x220] ss:$8 sps:$4 sm:$0xff]  }
 0x46a   : > { %3604 = vmatpush1.bf16.msra.mxu1 %v14243_v51  ;;  %v14306_v51 = vld [vmem:[#allocation17 + $0x4b0] ss:$8 sps:$4 sm:$0xff]  }
 0x46b   : > { %3605 = vmatprep.subr.bf16.mxu1 %v14251_v3  ;;  %v14314_v3 = vld [vmem:[#allocation17 + $0x4c4] ss:$8 sps:$4 sm:$0xff]  }
 0x46c   : > { %3326 = vmatpush1.bf16.msra.mxu0 %v14246_v52  ;;  %v3694_v52 = vrot.slane %v3686_v30, %v16457_v32  ;;  %v14338_v30 = vld [vmem:[#allocation17 + $0x200] ss:$8 sps:$4 sm:$0xff]  }
 0x46d   : > { %3327 = vmatprep.subr.bf16.mxu0 %v14254_v54  ;;  %v4012_v54 = vshll.u32 %v4005_v43, 16  ;;  %v14362_v43 = vld [vmem:[#allocation17 + $0x544] ss:$8 sps:$4 sm:$0xff]  }
 0x46e   : > { %3606 = vmatpush1.bf16.msra.mxu1 %v14249_v56  ;;  %v14309_v56 = vld [vmem:[#allocation17 + $0x7c0] ss:$8 sps:$4 sm:$0xff]  }
 0x46f   : > { %3607 = vmatprep.subr.bf16.mxu1 %v14257_v57  ;;  %v14317_v57 = vld [vmem:[#allocation17 + $0x7d4] ss:$8 sps:$4 sm:$0xff]  }
 0x470   : > { %3328 = vmatpush1.bf16.msra.mxu0 %v14252_v9  ;;  %v3717_v9 = vshll.u32 %v3701_v46, 16  ;;  %v14360_v46 = vld [vmem:[#allocation17 + $0x540] ss:$8 sps:$4 sm:$0xff]  }
 0x471   : > { %3329 = vmatprep.subr.bf16.mxu0 %v14260_v59  ;;  %v4007_v59 = vshrl.u32 %v3998_v47, 16  ;;  %v14368_v47 = vld [vmem:[#allocation17 + $0x554] ss:$8 sps:$4 sm:$0xff]  }
 0x472   : > { %3608 = vmatpush1.bf16.msra.mxu1 %v14255_v60  ;;  %v3703_v60 = vshrl.u32 %v3671_v48, 16  ;;  %v14363_v48 = vld [vmem:[#allocation17 + $0x240] ss:$8 sps:$4 sm:$0xff]  }
 0x473   : > { %3609 = vmatprep.subr.bf16.mxu1 %v14263_v61  ;;  %v3708_v61 = vshll.u32 %v3678_v49, 16  ;;  %v14371_v49 = vld [vmem:[#allocation17 + $0x254] ss:$8 sps:$4 sm:$0xff]  }
 0x474   : > { %3330 = vmatpush1.bf16.msra.mxu0 %v14258_v62  ;;  %v14312_v62 = vld [vmem:[#allocation17 + $0x4c0] ss:$8 sps:$4 sm:$0xff]  }
 0x475   : > { %3331 = vmatprep.subr.bf16.mxu0 %v14266_v63  ;;  %v14320_v63 = vld [vmem:[#allocation17 + $0x4d4] ss:$8 sps:$4 sm:$0xff]  }
 0x476   : > { %3610 = vmatpush1.bf16.msra.mxu1 %v14261_v0  ;;  %v3712_v0 = vshrl.u32 %v3694_v52, 16  ;;  %v14369_v52 = vld [vmem:[#allocation17 + $0x250] ss:$8 sps:$4 sm:$0xff]  }
 0x477   : > { %3611 = vmatprep.subr.bf16.mxu1 %v14269_v1  ;;  %v16571_v1 = vsel %vm16503_vm14, %v4007_v59, %v4012_v54  ;;  %v14377_v54 = vld [vmem:[#allocation17 + $0x264] ss:$8 sps:$4 sm:$0xff]   ;;  %v14383_v59 = vld [vmem:[#allocation17 + $0x274] ss:$8 sps:$4 sm:$0xff]  }
 0x478   : > { %3332 = vmatpush1.bf16.msra.mxu0 %v14264_v2  ;;  %v14315_v2 = vld [vmem:[#allocation17 + $0x7d0] ss:$8 sps:$4 sm:$0xff]  }
 0x479   : > { %3333 = vmatprep.subr.bf16.mxu0 %v14272_v4  ;;  %v14323_v4 = vld [vmem:[#allocation17 + $0x7e4] ss:$8 sps:$4 sm:$0xff]  }
 0x47a   : > { %3612 = vmatpush1.bf16.msra.mxu1 %v14267_v5  ;;  %v3719_v5 = vsel %vm16503_vm14, %v3712_v0, %v3717_v9  ;;  %v14375_v9 = vld [vmem:[#allocation17 + $0x260] ss:$8 sps:$4 sm:$0xff]  }
 0x47b   : > { %3613 = vmatprep.subr.bf16.mxu1 %v14275_v6  ;;  %v3710_v6 = vsel %vm16503_vm14, %v3703_v60, %v3708_v61  ;;  %v14378_v60 = vld [vmem:[#allocation17 + $0x570] ss:$8 sps:$4 sm:$0xff]   ;;  %v14386_v61 = vld [vmem:[#allocation17 + $0x584] ss:$8 sps:$4 sm:$0xff]   ;;  %v14384_v0 = vld [vmem:[#allocation17 + $0x580] ss:$8 sps:$4 sm:$0xff]  }
 0x47c   : > { %3334 = vmatpush1.bf16.msra.mxu0 %v14270_v7  ;;  %v14318_v7 = vld [vmem:[#allocation17 + $0x4d0] ss:$8 sps:$4 sm:$0xff]  }
 0x47d   : > { %3335 = vmatprep.subr.bf16.mxu0 %v14278_v8  ;;  %v4048_v8 = vcombine.low %v3719_v5, %v16571_v1 }
 0x47e   : > { %3614 = vmatpush1.bf16.msra.mxu1 %v14273_v10  ;;  %v14326_v10 = vld [vmem:[#allocation17 + $0x4e4] ss:$8 sps:$4 sm:$0xff]  }
 0x47f   : > { %3615 = vmatprep.subr.bf16.mxu1 %v14281_v11  ;;  %v14321_v11 = vld [vmem:[#allocation17 + $0x7e0] ss:$8 sps:$4 sm:$0xff]  }
 0x480   : > { %3336 = vmatpush1.bf16.msra.mxu0 %v14276_v12  ;;  %v3753_v12 = vcombine.low %v3710_v6, %v3719_v5  ;;  %v14387_v5 = vld [vmem:[#allocation17 + $0x280] ss:$8 sps:$4 sm:$0xff]   ;;  %v14395_v6 = vld [vmem:[#allocation17 + $0x294] ss:$8 sps:$4 sm:$0xff]  }
 0x481   : > { %3337 = vmatprep.subr.bf16.mxu0 %v14284_v13  ;;  %v14329_v13 = vld [vmem:[#allocation17 + $0x7f4] ss:$8 sps:$4 sm:$0xff]  }
 0x482   : > { %3616 = vmatpush1.bf16.msra.mxu1 %v14279_v14  ;;  %v14324_v14 = vld [vmem:[#allocation17 + $0x4e0] ss:$8 sps:$4 sm:$0xff]   ;;  %v16582_v19 = vrot.slane %v3753_v12, %v16457_v32  ;;  %v14401_v12 = vld [vmem:[#allocation17 + $0x2a4] ss:$8 sps:$4 sm:$0xff]  }
 0x483   : > { %3617 = vmatprep.subr.bf16.mxu1 %v14287_v15  ;;  %v16579_v15 = vrot.slane %v4048_v8, %v16457_v32  ;;  %v14398_v8 = vld [vmem:[#allocation17 + $0x5a4] ss:$8 sps:$4 sm:$0xff]  }
 0x484   : > { %3338 = vmatpush1.bf16.msra.mxu0 %v14282_v17  ;;  %v14332_v17 = vld [vmem:[#allocation17 + $0x4f4] ss:$8 sps:$4 sm:$0xff]  }
 0x485   : > { %3339 = vmatprep.subr.bf16.mxu0 %v14290_v18  ;;  %v14327_v18 = vld [vmem:[#allocation17 + $0x7f0] ss:$8 sps:$4 sm:$0xff]  }
 0x486   : > { %3618 = vmatpush1.bf16.msra.mxu1 %v14285_v20  ;;  %v14335_v20 = vld [vmem:[#allocation17 + $0x504] ss:$8 sps:$4 sm:$0xff]  }
 0x487   : > { %3619 = vmatprep.subr.bf16.mxu1 %v14293_v22  ;;  %v4056_v22 = vcombine.high %v16579_v15, %v16579_v15 }
 0x488   : > { %3340 = vmatpush1.bf16.msra.mxu0 %v14288_v24  ;;  %v14333_v24 = vld [vmem:[#allocation17 + $0x500] ss:$8 sps:$4 sm:$0xff]  }
 0x489   : > { %3341 = vmatprep.subr.bf16.mxu0 %v14296_v26  ;;  %v3761_v26 = vcombine.high %v16582_v19, %v16582_v19 }
 0x48a   : > { %3620 = vmatpush1.bf16.msra.mxu1 %v14291_v28  ;;  %v14344_v28 = vld [vmem:[#allocation17 + $0x514] ss:$8 sps:$4 sm:$0xff]  }
 0x48b   : > { %3621 = vmatprep.subr.bf16.mxu1 %v14299_v29  ;;  %v4070_v29 = vrot.slane %v4056_v22, %v16457_v32  ;;  %v14410_v22 = vld [vmem:[#allocation17 + $0x5c4] ss:$8 sps:$4 sm:$0xff]  }
 0x48c   : > { %3342 = vmatpush1.bf16.msra.mxu0 %v14294_v33  ;;  %v14347_v33 = vld [vmem:[#allocation17 + $0x214] ss:$8 sps:$4 sm:$0xff]  }
 0x48d   : > { %3343 = vmatprep.subr.bf16.mxu0 %v14302_v35  ;;  %v3775_v35 = vrot.slane %v3761_v26, %v16457_v32  ;;  %v14405_v26 = vld [vmem:[#allocation17 + $0x2b0] ss:$8 sps:$4 sm:$0xff]  }
 0x48e   : > { %3622 = vmatpush1.bf16.msra.mxu1 %v14297_v38  ;;  %v14345_v38 = vld [vmem:[#allocation17 + $0x210] ss:$8 sps:$4 sm:$0xff]  }
 0x48f   : > { %3623 = vmatprep.subr.bf16.mxu1 %v14305_v39  ;;  %v14353_v39 = vld [vmem:[#allocation17 + $0x224] ss:$8 sps:$4 sm:$0xff]  }
 0x490   : > { %3344 = vmatpush1.bf16.msra.mxu0 %v14300_v41  ;;  %v14359_v41 = vld [vmem:[#allocation17 + $0x234] ss:$8 sps:$4 sm:$0xff]  }
 0x491   : > { %3345 = vmatprep.subr.bf16.mxu0 %v14308_v42  ;;  %v14354_v42 = vld [vmem:[#allocation17 + $0x530] ss:$8 sps:$4 sm:$0xff]  }
 0x492   : > { %3624 = vmatpush1.bf16.msra.mxu1 %v14303_v44  ;;  %v14357_v44 = vld [vmem:[#allocation17 + $0x230] ss:$8 sps:$4 sm:$0xff]  }
 0x493   : > { %3625 = vmatprep.subr.bf16.mxu1 %v14311_v45  ;;  %v14365_v45 = vld [vmem:[#allocation17 + $0x244] ss:$8 sps:$4 sm:$0xff]  }
 0x494   : > { %3346 = vmatpush1.bf16.msra.mxu0 %v14306_v51  ;;  %v14366_v51 = vld [vmem:[#allocation17 + $0x550] ss:$8 sps:$4 sm:$0xff]  }
 0x495   : > { %3347 = vmatprep.subr.bf16.mxu0 %v14314_v3  ;;  %v14374_v3 = vld [vmem:[#allocation17 + $0x564] ss:$8 sps:$4 sm:$0xff]  }
 0x496   : > { %3626 = vmatpush1.bf16.msra.mxu1 %v14309_v56  ;;  %v14372_v56 = vld [vmem:[#allocation17 + $0x560] ss:$8 sps:$4 sm:$0xff]  }
 0x497   : > { %3627 = vmatprep.subr.bf16.mxu1 %v14317_v57  ;;  %v14380_v57 = vld [vmem:[#allocation17 + $0x574] ss:$8 sps:$4 sm:$0xff]  }
 0x498   : > { %3348 = vmatpush1.bf16.msra.mxu0 %v14312_v62  ;;  %v14381_v62 = vld [vmem:[#allocation17 + $0x270] ss:$8 sps:$4 sm:$0xff]  }
 0x499   : > { %3349 = vmatprep.subr.bf16.mxu0 %v14320_v63  ;;  %v14389_v63 = vld [vmem:[#allocation17 + $0x284] ss:$8 sps:$4 sm:$0xff]  }
 0x49a   : > { %3628 = vmatpush1.bf16.msra.mxu1 %v14315_v2  ;;  %v14392_v2 = vld [vmem:[#allocation17 + $0x594] ss:$8 sps:$4 sm:$0xff]  }
 0x49b   : > { %3629 = vmatprep.subr.bf16.mxu1 %v14323_v4  ;;  %v14435_v4 = vld [vmem:[#allocation2 + $0x34] ss:$8 sps:$4 sm:$0x33]  }
 0x49c   : > { %3350 = vmatpush1.bf16.msra.mxu0 %v14318_v7  ;;  %v14390_v7 = vld [vmem:[#allocation17 + $0x590] ss:$8 sps:$4 sm:$0xff]  }
 0x49d   : > { %3351 = vmatprep.subr.bf16.mxu0 %v14326_v10  ;;  %v4285_v10 = vrot.slane %v14435_v4, %v16457_v32 }
 0x49e   : > { %3630 = vmatpush1.bf16.msra.mxu1 %v14321_v11  ;;  %v14393_v11 = vld [vmem:[#allocation17 + $0x290] ss:$8 sps:$4 sm:$0xff]  }
 0x49f   : > { %3631 = vmatprep.subr.bf16.mxu1 %v14329_v13  ;;  %v14396_v13 = vld [vmem:[#allocation17 + $0x5a0] ss:$8 sps:$4 sm:$0xff]  }
 0x4a0   : > { %3352 = vmatpush1.bf16.msra.mxu0 %v14324_v14  ;;  %v14404_v14 = vld [vmem:[#allocation17 + $0x5b4] ss:$8 sps:$4 sm:$0xff]  }
 0x4a1   : > { %3353 = vmatprep.subr.bf16.mxu0 %v14332_v17  ;;  %v4286_v17 = vcombine.high %v4285_v10, %v4285_v10 }
 0x4a2   : > { %3632 = vmatpush1.bf16.msra.mxu1 %v14327_v18  ;;  %v14399_v18 = vld [vmem:[#allocation17 + $0x2a0] ss:$8 sps:$4 sm:$0xff]  }
 0x4a3   : > { %4233 = vmatprep.subr.bf16.mxu1 %v14335_v20  ;;  %v14407_v20 = vld [vmem:[#allocation17 + $0x2b4] ss:$8 sps:$4 sm:$0xff]  }
 0x4a4   : > { %3354 = vmatpush1.bf16.msra.mxu0 %v14330_v21  ;;  %v14402_v21 = vld [vmem:[#allocation17 + $0x5b0] ss:$8 sps:$4 sm:$0xff]  }
 0x4a5   : > { %3634 = vmatmul.mubr.bf16.vlgmr.msra.gmra.mrb[16].mxu1 %v3431_v27  ;;  %3938 = vmatprep.subr.bf16.mxu0 %v14340_v23  ;;  %v4293_v23 = vrot.slane %v4285_v10, %v16457_v32  ;;  %v14413_v27 = vld [vmem:[#allocation17 + $0x2c4] ss:$8 sps:$4 sm:$0xff]  }
 0x4a6   : > { %4234 = vmatpush1.bf16.msra.mxu1 %v14333_v24  ;;  %4265 = vmatprep.mubr.bf16.mxu1 %v4070_v29  ;;  %v4300_v24 = vrot.slane %v4286_v17, %v16457_v32  ;;  %v14416_v29 = vld [vmem:[#allocation17 + $0x5d4] ss:$8 sps:$4 sm:$0xff]   ;;  %v14459_v17 = vld [vmem:[#allocation17 + $0x884] ss:$8 sps:$4 sm:$0xff]  }
 0x4a7   : > { %3356 = vmatmul.mubr.bf16.vlgmr.msra.gmra.mrb[16].mxu0 %v3153_v31  ;;  %4235 = vmatprep.subr.bf16.mxu1 %v14344_v28  ;;  %v14408_v28 = vld [vmem:[#allocation17 + $0x5c0] ss:$8 sps:$4 sm:$0xff]  }
 0x4a8   : > { %3939 = vmatpush1.bf16.msra.mxu0 %v14338_v30  ;;  %3970 = vmatprep.mubr.bf16.mxu0 %v3775_v35  ;;  %v4302_v30 = vshrl.u32 %v4293_v23, 16  ;;  %v4307_v31 = vshll.u32 %v4300_v24, 16  ;;  %v14419_v35 = vld [vmem:[#allocation17 + $0x2d4] ss:$8 sps:$4 sm:$0xff]   ;;  %v14463_v23 = vld [vmem:[#allocation17 + $0x8a0] ss:$8 sps:$4 sm:$0xff]  }
 0x4a9   : > { %3940 = vmatprep.subr.bf16.mxu0 %v14347_v33  ;;  %v14411_v33 = vld [vmem:[#allocation17 + $0x2c0] ss:$8 sps:$4 sm:$0xff]   ;;  %v14468_v24 = vld [vmem:[#allocation17 + $0x8b4] ss:$8 sps:$4 sm:$0xff]  }
 0x4aa   : > { %4236 = vmatpush1.bf16.msra.mxu1 %v14342_v36  ;;  %v14414_v36 = vld [vmem:[#allocation17 + $0x5d0] ss:$8 sps:$4 sm:$0xff]  }
 0x4ab   : > { %4237 = vmatprep.subr.bf16.mxu1 %v14350_v34  ;;  %v14422_v34 = vld [vmem:[#allocation17 + $0x5e4] ss:$8 sps:$4 sm:$0xff]  }
 0x4ac   : > { %3941 = vmatpush1.bf16.msra.mxu0 %v14345_v38  ;;  %v4309_v38 = vsel %vm16503_vm14, %v4302_v30, %v4307_v31  ;;  %v14472_v30 = vld [vmem:[#allocation17 + $0x8d0] ss:$8 sps:$4 sm:$0xff]   ;;  %v14477_v31 = vld [vmem:[#allocation17 + $0x8e4] ss:$8 sps:$4 sm:$0xff]  }
 0x4ad   : > { %3942 = vmatprep.subr.bf16.mxu0 %v14353_v39  ;;  %v14417_v39 = vld [vmem:[#allocation17 + $0x2d0] ss:$8 sps:$4 sm:$0xff]  }
 0x4ae   : > { %4238 = vmatpush1.bf16.msra.mxu1 %v14348_v53  ;;  %v14425_v53 = vld [vmem:[#allocation17 + $0x2e4] ss:$8 sps:$4 sm:$0xff]  }
 0x4af   : > { %4239 = vmatprep.subr.bf16.mxu1 %v14356_v40  ;;  %v14420_v40 = vld [vmem:[#allocation17 + $0x5e0] ss:$8 sps:$4 sm:$0xff]  }
 0x4b0   : > { %3943 = vmatpush1.bf16.msra.mxu0 %v14351_v37  ;;  %v4343_v37 = vcombine.low %v16571_v1, %v4309_v38 }
 0x4b1   : > { %3944 = vmatprep.subr.bf16.mxu0 %v14359_v41  ;;  %v14428_v41 = vld [vmem:[#allocation17 + $0x5f4] ss:$8 sps:$4 sm:$0xff]  }
 0x4b2   : > { %4240 = vmatpush1.bf16.msra.mxu1 %v14354_v42  ;;  %v14423_v42 = vld [vmem:[#allocation17 + $0x2e0] ss:$8 sps:$4 sm:$0xff]  }
 0x4b3   : > { %4241 = vmatprep.subr.bf16.mxu1 %v14362_v43  ;;  %v14431_v43 = vld [vmem:[#allocation17 + $0x2f4] ss:$8 sps:$4 sm:$0xff]  }
 0x4b4   : > { %3945 = vmatpush1.bf16.msra.mxu0 %v14357_v44  ;;  %v14426_v44 = vld [vmem:[#allocation17 + $0x5f0] ss:$8 sps:$4 sm:$0xff]  }
 0x4b5   : > { %3946 = vmatprep.subr.bf16.mxu0 %v14365_v45  ;;  %v16601_v45 = vrot.slane %v4343_v37, %v16457_v32 }
 0x4b6   : > { %4242 = vmatpush1.bf16.msra.mxu1 %v14360_v46  ;;  %v14429_v46 = vld [vmem:[#allocation17 + $0x2f0] ss:$8 sps:$4 sm:$0xff]  }
 0x4b7   : > { %4243 = vmatprep.subr.bf16.mxu1 %v14368_v47  ;;  %v14434_v47 = vld [vmem:[#allocation17 + $0x804] ss:$8 sps:$4 sm:$0xff]   ;;  %v4351_v1 = vcombine.high %v16601_v45, %v16601_v45 }
 0x4b8   : > { %3947 = vmatpush1.bf16.msra.mxu0 %v14363_v48  ;;  %v4063_v48 = vrot.slane %v16579_v15, %v16457_v32  ;;  %v14444_v15 = vld [vmem:[#allocation17 + $0x834] ss:$8 sps:$4 sm:$0xff]  }
 0x4b9   : > { %3948 = vmatprep.subr.bf16.mxu0 %v14371_v49  ;;  %v14432_v49 = vld [vmem:[#allocation17 + $0x800] ss:$8 sps:$4 sm:$0xff]  }
 0x4ba   : > { %4244 = vmatpush1.bf16.msra.mxu1 %v14366_v51  ;;  %v3768_v51 = vrot.slane %v16582_v19, %v16457_v32  ;;  %v14445_v19 = vld [vmem:[#allocation17 + $0x840] ss:$8 sps:$4 sm:$0xff]  }
 0x4bb   : > { %4245 = vmatprep.subr.bf16.mxu1 %v14374_v3  ;;  %v14438_v3 = vld [vmem:[#allocation17 + $0x814] ss:$8 sps:$4 sm:$0xff]  }
 0x4bc   : > { %3949 = vmatpush1.bf16.msra.mxu0 %v14369_v52  ;;  %v4365_v52 = vrot.slane %v4351_v1, %v16457_v32  ;;  %v14481_v1 = vld [vmem:[#allocation20] ss:$8 sps:$4 sm:$0xff]  }
 0x4bd   : > { %3950 = vmatprep.subr.bf16.mxu0 %v14377_v54  ;;  %v14436_v54 = vld [vmem:[#allocation17 + $0x810] ss:$8 sps:$4 sm:$0xff]  }
 0x4be   : > { %4246 = vmatpush1.bf16.msra.mxu1 %v14372_v56  ;;  %v14441_v56 = vld [vmem:[#allocation17 + $0x824] ss:$8 sps:$4 sm:$0xff]  }
 0x4bf   : > { %4247 = vmatprep.subr.bf16.mxu1 %v14380_v57  ;;  %v14439_v57 = vld [vmem:[#allocation17 + $0x820] ss:$8 sps:$4 sm:$0xff]  }
 0x4c0   : > { %3951 = vmatpush1.bf16.msra.mxu0 %v14375_v9  ;;  %v14442_v9 = vld [vmem:[#allocation17 + $0x830] ss:$8 sps:$4 sm:$0xff]  }
 0x4c1   : > { %3952 = vmatprep.subr.bf16.mxu0 %v14383_v59  ;;  %v14447_v59 = vld [vmem:[#allocation17 + $0x844] ss:$8 sps:$4 sm:$0xff]  }
 0x4c2   : > { %4248 = vmatpush1.bf16.msra.mxu1 %v14378_v60  ;;  %v14450_v60 = vld [vmem:[#allocation17 + $0x854] ss:$8 sps:$4 sm:$0xff]  }
 0x4c3   : > { %4249 = vmatprep.subr.bf16.mxu1 %v14386_v61 }
 0x4c4   : > { %3953 = vmatpush1.bf16.msra.mxu0 %v14381_v62  ;;  %v14448_v62 = vld [vmem:[#allocation17 + $0x850] ss:$8 sps:$4 sm:$0xff]  }
 0x4c5   : > { %3954 = vmatprep.subr.bf16.mxu0 %v14389_v63 }
 0x4c6   : > { %4250 = vmatpush1.bf16.msra.mxu1 %v14384_v0  ;;  %v14453_v0 = vld [vmem:[#allocation17 + $0x864] ss:$8 sps:$4 sm:$0xff]  }
 0x4c7   : > { %4251 = vmatprep.subr.bf16.mxu1 %v14392_v2 }
 0x4c8   : > { %3955 = vmatpush1.bf16.msra.mxu0 %v14387_v5 }
 0x4c9   : > { %3956 = vmatprep.subr.bf16.mxu0 %v14395_v6 }
 0x4ca   : > { %4252 = vmatpush1.bf16.msra.mxu1 %v14390_v7 }
 0x4cb   : > { %4253 = vmatprep.subr.bf16.mxu1 %v14398_v8 }
 0x4cc   : > { %3957 = vmatpush1.bf16.msra.mxu0 %v14393_v11  ;;  %v14451_v11 = vld [vmem:[#allocation17 + $0x860] ss:$8 sps:$4 sm:$0xff]  }
 0x4cd   : > { %3958 = vmatprep.subr.bf16.mxu0 %v14401_v12 }
 0x4ce   : > { %4254 = vmatpush1.bf16.msra.mxu1 %v14396_v13  ;;  %v14456_v13 = vld [vmem:[#allocation17 + $0x874] ss:$8 sps:$4 sm:$0xff]  }
 0x4cf   : > { %4255 = vmatprep.subr.bf16.mxu1 %v14404_v14  ;;  %v14454_v14 = vld [vmem:[#allocation17 + $0x870] ss:$8 sps:$4 sm:$0xff]  }
 0x4d0   : > { %3959 = vmatpush1.bf16.msra.mxu0 %v14399_v18  ;;  %v14457_v18 = vld [vmem:[#allocation17 + $0x880] ss:$8 sps:$4 sm:$0xff]  }
 0x4d1   : > { %3960 = vmatprep.subr.bf16.mxu0 %v14407_v20  ;;  %v14462_v20 = vld [vmem:[#allocation17 + $0x894] ss:$8 sps:$4 sm:$0xff]  }
 0x4d2   : > { %4256 = vmatpush1.bf16.msra.mxu1 %v14402_v21  ;;  %v14460_v21 = vld [vmem:[#allocation17 + $0x890] ss:$8 sps:$4 sm:$0xff]  }
 0x4d3   : > { %4257 = vmatprep.subr.bf16.mxu1 %v14410_v22  ;;  %v14465_v22 = vld [vmem:[#allocation17 + $0x8a4] ss:$8 sps:$4 sm:$0xff]  }
 0x4d4   : > { %3961 = vmatpush1.bf16.msra.mxu0 %v14405_v26  ;;  %v14466_v26 = vld [vmem:[#allocation17 + $0x8b0] ss:$8 sps:$4 sm:$0xff]  }
 0x4d5   : > { %3962 = vmatprep.subr.bf16.mxu0 %v14413_v27  ;;  %v14471_v27 = vld [vmem:[#allocation17 + $0x8c4] ss:$8 sps:$4 sm:$0xff]  }
 0x4d6   : > { %4258 = vmatpush1.bf16.msra.mxu1 %v14408_v28  ;;  %v14469_v28 = vld [vmem:[#allocation17 + $0x8c0] ss:$8 sps:$4 sm:$0xff]  }
 0x4d7   : > { %4259 = vmatprep.subr.bf16.mxu1 %v14416_v29  ;;  %v14474_v29 = vld [vmem:[#allocation17 + $0x8d4] ss:$8 sps:$4 sm:$0xff]  }
 0x4d8   : > { %3963 = vmatpush1.bf16.msra.mxu0 %v14411_v33  ;;  %v14475_v33 = vld [vmem:[#allocation17 + $0x8e0] ss:$8 sps:$4 sm:$0xff]  }
 0x4d9   : > { %3964 = vmatprep.subr.bf16.mxu0 %v14419_v35  ;;  %v14480_v35 = vld [vmem:[#allocation17 + $0x8f4] ss:$8 sps:$4 sm:$0xff]  }
 0x4da   : > { %4260 = vmatpush1.bf16.msra.mxu1 %v14414_v36  ;;  %v14478_v36 = vld [vmem:[#allocation17 + $0x8f0] ss:$8 sps:$4 sm:$0xff]  }
 0x4db   : > { %4261 = vmatprep.subr.bf16.mxu1 %v14422_v34  ;;  %v4358_v34 = vrot.slane %v16601_v45, %v16457_v32  ;;  %v14492_v45 = vld [vmem:[#allocation20 + $0x314] ss:$8 sps:$4 sm:$0xff]  }
 0x4dc   : > { %3965 = vmatpush1.bf16.msra.mxu0 %v14417_v39 }
 0x4dd   : > { %3966 = vmatprep.subr.bf16.mxu0 %v14425_v53 }
 0x4de   : > { %4262 = vmatpush1.bf16.msra.mxu1 %v14420_v40 }
 0x4df   : > { %4263 = vmatprep.subr.bf16.mxu1 %v14428_v41 }
 0x4e0   : > { %3967 = vmatpush1.bf16.msra.mxu0 %v14423_v42 }
 0x4e1   : > { %3968 = vmatprep.subr.bf16.mxu0 %v14431_v43 }
 0x4e2   : > { %4264 = vmatpush1.bf16.msra.mxu1 %v14426_v44 }
 0x4e4   : > { %3969 = vmatpush1.bf16.msra.mxu0 %v14429_v46 }
 0x4e5   : > { %4266 = vmatmul.mubr.bf16.vlgmr.msra.gmra.mrb[20].mxu1 %v4063_v48  ;;  %4528 = vmatprep.subr.bf16.mxu0 %v14434_v47  ;;  %v14483_v48 = vld [vmem:[#allocation20 + $0x4] ss:$8 sps:$4 sm:$0xff]  }
 0x4e7   : > { %3971 = vmatmul.mubr.bf16.vlgmr.msra.gmra.mrb[20].mxu0 %v3768_v51  ;;  %v14484_v51 = vld [vmem:[#allocation20 + $0x300] ss:$8 sps:$4 sm:$0xff]  }
 0x4e8   : > { %4529 = vmatpush1.bf16.msra.mxu0 %v14432_v49  ;;  %4560 = vmatprep.mubr.bf16.mxu0 %v4365_v52  ;;  %v14489_v52 = vld [vmem:[#allocation20 + $0x14] ss:$8 sps:$4 sm:$0xff]  }
 0x4e9   : > { %4530 = vmatprep.subr.bf16.mxu0 %v14438_v3  ;;  %v14486_v3 = vld [vmem:[#allocation20 + $0x304] ss:$8 sps:$4 sm:$0xff]  }
 0x4ea   : > { %5058 = vmatprep.subr.bf16.mxu1 %v14486_v3  ;;  %v14558_v3 = vld [vmem:[#allocation20 + $0x3c4] ss:$8 sps:$4 sm:$0xff]  }
 0x4eb   : > { %5059 = vmatpush1.bf16.msra.mxu1 %v14484_v51  ;;  %v14550_v51 = vld [vmem:[#allocation20 + $0x3b0] ss:$8 sps:$4 sm:$0xff]  }
 0x4ec   : > { %4531 = vmatpush1.bf16.msra.mxu0 %v14436_v54  ;;  %v14487_v54 = vld [vmem:[#allocation20 + $0x10] ss:$8 sps:$4 sm:$0xff]   ;;  %5060 = vmatprep.subr.bf16.mxu1 %v14492_v45  ;;  %v14561_v45 = vld [vmem:[#allocation20 + $0xd4] ss:$8 sps:$4 sm:$0xff]  }
 0x4ed   : > { %4532 = vmatprep.subr.bf16.mxu0 %v14441_v56  ;;  %v14490_v56 = vld [vmem:[#allocation20 + $0x310] ss:$8 sps:$4 sm:$0xff]  }
 0x4ef   : > { %5061 = vmatpush1.bf16.msra.mxu1 %v14490_v56  ;;  %v14564_v56 = vld [vmem:[#allocation20 + $0x3d4] ss:$8 sps:$4 sm:$0xff]  }
 0x4f0   : > { %4533 = vmatpush1.bf16.msra.mxu0 %v14439_v57  ;;  %v14495_v57 = vld [vmem:[#allocation20 + $0x24] ss:$8 sps:$4 sm:$0xff]  }
 0x4f1   : > { %4534 = vmatprep.subr.bf16.mxu0 %v14444_v15  ;;  %v14498_v15 = vld [vmem:[#allocation20 + $0x324] ss:$8 sps:$4 sm:$0xff]  }
 0x4f2   : > { %5062 = vmatprep.subr.bf16.mxu1 %v14498_v15  ;;  %v14567_v15 = vld [vmem:[#allocation20 + $0xe4] ss:$8 sps:$4 sm:$0xff]  }
 0x4f4   : > { %4535 = vmatpush1.bf16.msra.mxu0 %v14442_v9  ;;  %v14493_v9 = vld [vmem:[#allocation20 + $0x20] ss:$8 sps:$4 sm:$0xff]  }
 0x4f5   : > { %4536 = vmatprep.subr.bf16.mxu0 %v14447_v59  ;;  %v14496_v59 = vld [vmem:[#allocation20 + $0x320] ss:$8 sps:$4 sm:$0xff]  }
 0x4f6   : > { %5063 = vmatpush1.bf16.msra.mxu1 %v14496_v59  ;;  %v14570_v59 = vld [vmem:[#allocation20 + $0x3e4] ss:$8 sps:$4 sm:$0xff]  }
 0x4f8   : > { %4537 = vmatpush1.bf16.msra.mxu0 %v14445_v19  ;;  %v2474_v61 = vpop.f32.mrb[8].mxu1  ;;  %v14501_v19 = vld [vmem:[#allocation20 + $0x34] ss:$8 sps:$4 sm:$0xff]  }
 0x4f9   : > { %v2476_v63 = vpop.f32.mrb[9].mxu1  ;;  %4538 = vmatprep.subr.bf16.mxu0 %v14450_v60  ;;  %v14499_v60 = vld [vmem:[#allocation20 + $0x30] ss:$8 sps:$4 sm:$0xff]  }
 0x4fa   : > { %v2248_v2 = vpop.f32.mrb[8].mxu0  ;;  %v2478_v4 = vpop.f32.mrb[10].mxu1 }
 0x4fb   : > { %v2475_v5 = vadd.f32 %v2474_v61, %v2248_v2  ;;  %v2250_v6 = vpop.f32.mrb[9].mxu0  ;;  %v2479_v7 = vpop.f32.mrb[11].mxu1 }
 0x4fc   : > { %v2477_v8 = vadd.f32 %v2476_v63, %v2250_v6  ;;  %4539 = vmatpush1.bf16.msra.mxu0 %v14448_v62  ;;  %v2252_v10 = vpop.f32.mrb[10].mxu0 }
 0x4fd   : > { %v2253_v12 = vpop.f32.mrb[11].mxu0  ;;  %4540 = vmatprep.subr.bf16.mxu0 %v14453_v0 }
 0x4fe   : > { %v14504_v12 = vld [vmem:[#allocation20 + $0x334] ss:$8 sps:$4 sm:$0xff]  }
 0x4ff   : > { %5064 = vmatprep.subr.bf16.mxu1 %v14504_v12 }
 0x500   : > { %4541 = vmatpush1.bf16.msra.mxu0 %v14451_v11 }
 0x501   : > { %4542 = vmatprep.subr.bf16.mxu0 %v14456_v13  ;;  %v14502_v13 = vld [vmem:[#allocation20 + $0x330] ss:$8 sps:$4 sm:$0xff]  }
 0x502   : > { %5065 = vmatpush1.bf16.msra.mxu1 %v14502_v13 }
 0x504   : > { %4543 = vmatpush1.bf16.msra.mxu0 %v14454_v14  ;;  %v14507_v14 = vld [vmem:[#allocation20 + $0x44] ss:$8 sps:$4 sm:$0xff]  }
 0x505   : > { %4544 = vmatprep.subr.bf16.mxu0 %v14459_v17  ;;  %v14505_v17 = vld [vmem:[#allocation20 + $0x40] ss:$8 sps:$4 sm:$0xff]  }
 0x508   : > { %4545 = vmatpush1.bf16.msra.mxu0 %v14457_v18  ;;  %v14510_v18 = vld [vmem:[#allocation20 + $0x344] ss:$8 sps:$4 sm:$0xff]  }
 0x509   : > { %4546 = vmatprep.subr.bf16.mxu0 %v14462_v20  ;;  %v14508_v20 = vld [vmem:[#allocation20 + $0x340] ss:$8 sps:$4 sm:$0xff]   ;;  %5066 = vmatprep.subr.bf16.mxu1 %v14510_v18 }
 0x50a   : > { %5067 = vmatpush1.bf16.msra.mxu1 %v14508_v20 }
 0x50c   : > { %4547 = vmatpush1.bf16.msra.mxu0 %v14460_v21  ;;  %v14513_v21 = vld [vmem:[#allocation20 + $0x54] ss:$8 sps:$4 sm:$0xff]  }
 0x50d   : > { %4548 = vmatprep.subr.bf16.mxu0 %v14465_v22  ;;  %v14511_v22 = vld [vmem:[#allocation20 + $0x50] ss:$8 sps:$4 sm:$0xff]  }
 0x510   : > { %4549 = vmatpush1.bf16.msra.mxu0 %v14463_v23  ;;  %v14516_v23 = vld [vmem:[#allocation20 + $0x354] ss:$8 sps:$4 sm:$0xff]  }
 0x511   : > { %4550 = vmatprep.subr.bf16.mxu0 %v14468_v24  ;;  %v14514_v24 = vld [vmem:[#allocation20 + $0x350] ss:$8 sps:$4 sm:$0xff]   ;;  %5068 = vmatprep.subr.bf16.mxu1 %v14516_v23  ;;  %v4571_v23 = vld [vmem:[#allocation18] sm:$0x3] }
 0x512   : > { %5069 = vmatpush1.bf16.msra.mxu1 %v14514_v24  ;;  %v4576_v24 = vrot.slane %v4571_v23, %v16464_v55 }
 0x514   : > { %4551 = vmatpush1.bf16.msra.mxu0 %v14466_v26  ;;  %v14519_v26 = vld [vmem:[#allocation20 + $0x64] ss:$8 sps:$4 sm:$0xff]  }
 0x515   : > { %4552 = vmatprep.subr.bf16.mxu0 %v14471_v27  ;;  %v14517_v27 = vld [vmem:[#allocation20 + $0x60] ss:$8 sps:$4 sm:$0xff]  }
 0x518   : > { %4553 = vmatpush1.bf16.msra.mxu0 %v14469_v28  ;;  %v14520_v28 = vld [vmem:[#allocation20 + $0x360] ss:$8 sps:$4 sm:$0xff]  }
 0x519   : > { %4554 = vmatprep.subr.bf16.mxu0 %v14474_v29  ;;  %v14522_v29 = vld [vmem:[#allocation20 + $0x364] ss:$8 sps:$4 sm:$0xff]  }
 0x51a   : > { %5070 = vmatprep.subr.bf16.mxu1 %v14522_v29 }
 0x51b   : > { %5071 = vmatpush1.bf16.msra.mxu1 %v14520_v28 }
 0x51c   : > { %4555 = vmatpush1.bf16.msra.mxu0 %v14472_v30  ;;  %v14525_v30 = vld [vmem:[#allocation20 + $0x74] ss:$8 sps:$4 sm:$0xff]  }
 0x51d   : > { %4556 = vmatprep.subr.bf16.mxu0 %v14477_v31  ;;  %v14523_v31 = vld [vmem:[#allocation20 + $0x70] ss:$8 sps:$4 sm:$0xff]  }
 0x520   : > { %4557 = vmatpush1.bf16.msra.mxu0 %v14475_v33  ;;  %v14528_v33 = vld [vmem:[#allocation20 + $0x374] ss:$8 sps:$4 sm:$0xff]  }
 0x521   : > { %4558 = vmatprep.subr.bf16.mxu0 %v14480_v35  ;;  %v14531_v35 = vld [vmem:[#allocation20 + $0x84] ss:$8 sps:$4 sm:$0xff]   ;;  %5072 = vmatprep.subr.bf16.mxu1 %v14528_v33 }
 0x524   : > { %4559 = vmatpush1.bf16.msra.mxu0 %v14478_v36  ;;  %v14526_v36 = vld [vmem:[#allocation20 + $0x370] ss:$8 sps:$4 sm:$0xff]  }
 0x525   : > { %5284 = vmatprep.subr.bf16.mxu0 %v14483_v48  ;;  %5073 = vmatpush1.bf16.msra.mxu1 %v14526_v36  ;;  %v14547_v48 = vld [vmem:[#allocation20 + $0xb0] ss:$8 sps:$4 sm:$0xff]  }
 0x527   : > { %4561 = vmatmul.mubr.bf16.vlgmr.msra.gmra.mrb[24].mxu0 %v4358_v34  ;;  %v14534_v34 = vld [vmem:[#allocation20 + $0x384] ss:$8 sps:$4 sm:$0xff]  }
 0x528   : > { %5285 = vmatpush1.bf16.msra.mxu0 %v14481_v1  ;;  %5074 = vmatprep.subr.bf16.mxu1 %v14534_v34  ;;  %v14552_v1 = vld [vmem:[#allocation20 + $0x3b4] ss:$8 sps:$4 sm:$0xff]  }
 0x529   : > { %5286 = vmatprep.subr.bf16.mxu0 %v14489_v52  ;;  %v14553_v52 = vld [vmem:[#allocation20 + $0xc0] ss:$8 sps:$4 sm:$0xff]  }
 0x52c   : > { %5287 = vmatpush1.bf16.msra.mxu0 %v14487_v54  ;;  %v14556_v54 = vld [vmem:[#allocation20 + $0x3c0] ss:$8 sps:$4 sm:$0xff]  }
 0x52d   : > { %5288 = vmatprep.subr.bf16.mxu0 %v14495_v57  ;;  %v14559_v57 = vld [vmem:[#allocation20 + $0xd0] ss:$8 sps:$4 sm:$0xff]  }
 0x530   : > { %5289 = vmatpush1.bf16.msra.mxu0 %v14493_v9  ;;  %v14562_v9 = vld [vmem:[#allocation20 + $0x3d0] ss:$8 sps:$4 sm:$0xff]  }
 0x531   : > { %5290 = vmatprep.subr.bf16.mxu0 %v14501_v19  ;;  %v14565_v19 = vld [vmem:[#allocation20 + $0xe0] ss:$8 sps:$4 sm:$0xff]  }
 0x534   : > { %5291 = vmatpush1.bf16.msra.mxu0 %v14499_v60  ;;  %v14573_v60 = vld [vmem:[#allocation20 + $0xf4] ss:$8 sps:$4 sm:$0xff]  }
 0x535   : > { %5292 = vmatprep.subr.bf16.mxu0 %v14507_v14 }
 0x538   : > { %v3079_v38 = vpop.f32.mrb[12].mxu1  ;;  %5293 = vmatpush1.bf16.msra.mxu0 %v14505_v17 }
 0x539   : > { %v3081_v39 = vpop.f32.mrb[13].mxu1  ;;  %5294 = vmatprep.subr.bf16.mxu0 %v14513_v21 }
 0x53a   : > { %v2776_v53 = vpop.f32.mrb[12].mxu0  ;;  %v3083_v40 = vpop.f32.mrb[14].mxu1 }
 0x53b   : > { %v2783_v37 = vadd.f32 %v2776_v53, %v2475_v5  ;;  %v2778_v41 = vpop.f32.mrb[13].mxu0  ;;  %v3084_v42 = vpop.f32.mrb[15].mxu1  ;;  %v14532_v53 = vld [vmem:[#allocation20 + $0x380] ss:$8 sps:$4 sm:$0xff]   ;;  %v14540_v40 = vld [vmem:[#allocation20 + $0x394] ss:$8 sps:$4 sm:$0xff]  }
 0x53c   : > { %v2784_v43 = vadd.f32 %v2778_v41, %v2477_v8  ;;  %v2780_v44 = vpop.f32.mrb[14].mxu0  ;;  %5295 = vmatpush1.bf16.msra.mxu0 %v14511_v22  ;;  %v14543_v41 = vld [vmem:[#allocation20 + $0xa4] ss:$8 sps:$4 sm:$0xff]   ;;  %5075 = vmatpush1.bf16.msra.mxu1 %v14532_v53  ;;  %v14538_v42 = vld [vmem:[#allocation20 + $0x390] ss:$8 sps:$4 sm:$0xff]  }
 0x53d   : > { %v2781_v46 = vpop.f32.mrb[15].mxu0  ;;  %v3086_v47 = vadd.f32 %v3079_v38, %v2783_v37  ;;  %5296 = vmatprep.subr.bf16.mxu0 %v14519_v26  ;;  %v14529_v38 = vld [vmem:[#allocation20 + $0x80] ss:$8 sps:$4 sm:$0xff]   ;;  %v14535_v37 = vld [vmem:[#allocation20 + $0x90] ss:$8 sps:$4 sm:$0xff]   ;;  %5076 = vmatprep.subr.bf16.mxu1 %v14540_v40 }
 0x53e   : > { %v3087_v49 = vadd.f32 %v3081_v39, %v2784_v43  ;;  %v14537_v39 = vld [vmem:[#allocation20 + $0x94] ss:$8 sps:$4 sm:$0xff]   ;;  %v14546_v43 = vld [vmem:[#allocation20 + $0x3a4] ss:$8 sps:$4 sm:$0xff]   ;;  %v14541_v44 = vld [vmem:[#allocation20 + $0xa0] ss:$8 sps:$4 sm:$0xff]  }
 0x53f   : > { %v14549_v46 = vld [vmem:[#allocation20 + $0xb4] ss:$8 sps:$4 sm:$0xff]  }
 0x540   : > { %5297 = vmatpush1.bf16.msra.mxu0 %v14517_v27  ;;  %5077 = vmatpush1.bf16.msra.mxu1 %v14538_v42  ;;  %v4580_v27 = vrot.slane %v4571_v23, %v16467_v58  ;;  %v14577_v40 = vld [vmem:[#allocation3] ss:$8 sps:$4 sm:$0x88]  }
 0x541   : > { %5298 = vmatprep.subr.bf16.mxu0 %v14525_v30  ;;  %5078 = vmatprep.subr.bf16.mxu1 %v14546_v43 }
 0x544   : > { %5299 = vmatpush1.bf16.msra.mxu0 %v14523_v31 }
 0x545   : > { %5300 = vmatprep.subr.bf16.mxu0 %v14531_v35 }
 0x548   : > { %5301 = vmatpush1.bf16.msra.mxu0 %v14529_v38 }
 0x549   : > { %5302 = vmatprep.subr.bf16.mxu0 %v14537_v39 }
 0x54c   : > { %5303 = vmatpush1.bf16.msra.mxu0 %v14535_v37 }
 0x54d   : > { %5304 = vmatprep.subr.bf16.mxu0 %v14543_v41 }
 0x550   : > { %5305 = vmatpush1.bf16.msra.mxu0 %v14541_v44 }
 0x551   : > { %5306 = vmatprep.subr.bf16.mxu0 %v14549_v46  ;;  %v14594_v46 = vld [vmem:[#allocation3 + $0x30] ss:$8 sps:$4 sm:$0x88]  }
 0x554   : > { %5307 = vmatpush1.bf16.msra.mxu0 %v14547_v48 }
 0x578   : > { %v3635_v61 = vpop.f32.mrb[16].mxu1 }
 0x579   : > { %v3637_v62 = vpop.f32.mrb[17].mxu1 }
 0x57a   : > { %v3357_v63 = vpop.f32.mrb[16].mxu0  ;;  %v3639_v0 = vpop.f32.mrb[18].mxu1 }
 0x57b   : > { %v3364_v2 = vadd.f32 %v3357_v63, %v3086_v47  ;;  %v3359_v4 = vpop.f32.mrb[17].mxu0  ;;  %v3640_v5 = vpop.f32.mrb[19].mxu1  ;;  %v14544_v47 = vld [vmem:[#allocation20 + $0x3a0] ss:$8 sps:$4 sm:$0xff]   ;;  %v14571_v63 = vld [vmem:[#allocation20 + $0xf0] ss:$8 sps:$4 sm:$0xff]  }
 0x57c   : > { %v3365_v6 = vadd.f32 %v3359_v4, %v3087_v49  ;;  %v3361_v7 = vpop.f32.mrb[18].mxu0  ;;  %v14555_v49 = vld [vmem:[#allocation20 + $0xc4] ss:$8 sps:$4 sm:$0xff]   ;;  %5079 = vmatpush1.bf16.msra.mxu1 %v14544_v47  ;;  %v4691_v47 = vrot.slane %v14577_v40, %v16457_v32 }
 0x57d   : > { %v3362_v8 = vpop.f32.mrb[19].mxu0  ;;  %v16612_v10 = vadd.f32 %v3635_v61, %v3364_v2  ;;  %5080 = vmatprep.subr.bf16.mxu1 %v14552_v1  ;;  %5308 = vmatprep.subr.bf16.mxu0 %v14555_v49  ;;  %v14568_v61 = vld [vmem:[#allocation20 + $0x3e0] ss:$8 sps:$4 sm:$0xff]   ;;  %v14585_v0 = vld [vmem:[#allocation20 + $0x104] ss:$8 sps:$4 sm:$0xff]  }
 0x57e   : > { %v16614_v11 = vadd.f32 %v3637_v62, %v3365_v6  ;;  %5309 = vmatpush1.bf16.msra.mxu0 %v14553_v52  ;;  %v14576_v62 = vld [vmem:[#allocation20 + $0x3f4] ss:$8 sps:$4 sm:$0xff]   ;;  %v14574_v2 = vld [vmem:[#allocation20 + $0x3f0] ss:$8 sps:$4 sm:$0xff]   ;;  %v14591_v4 = vld [vmem:[#allocation20 + $0x604] ss:$8 sps:$4 sm:$0xff]  }
 0x57f   : > { %5310 = vmatprep.subr.bf16.mxu0 %v14561_v45 }
 0x580   : > { %5081 = vmatpush1.bf16.msra.mxu1 %v14550_v51 }
 0x581   : > { %5082 = vmatprep.subr.bf16.mxu1 %v14558_v3 }
 0x582   : > { %5311 = vmatpush1.bf16.msra.mxu0 %v14559_v57  ;;  %v14579_v57 = vld [vmem:[#allocation3 + $0x4] ss:$8 sps:$4 sm:$0x11]  }
 0x583   : > { %5312 = vmatprep.subr.bf16.mxu0 %v14567_v15  ;;  %v4699_v15 = vcombine.high %v4691_v47, %v4691_v47 }
 0x584   : > { %5083 = vmatpush1.bf16.msra.mxu1 %v14556_v54  ;;  %v5335_v54 = vrot.slane %v14594_v46, %v16457_v32 }
 0x585   : > { %5084 = vmatprep.subr.bf16.mxu1 %v14564_v56 }
 0x586   : > { %5313 = vmatpush1.bf16.msra.mxu0 %v14565_v19  ;;  %v4698_v19 = vrot.slane %v14579_v57, %v16457_v32 }
 0x587   : > { %5314 = vmatprep.subr.bf16.mxu0 %v14573_v60  ;;  %v4713_v60 = vrot.slane %v4699_v15, %v16457_v32 }
 0x588   : > { %5085 = vmatpush1.bf16.msra.mxu1 %v14562_v9  ;;  %v14596_v9 = vld [vmem:[#allocation3 + $0x34] ss:$8 sps:$4 sm:$0x11]  }
 0x589   : > { %5086 = vmatprep.subr.bf16.mxu1 %v14570_v59  ;;  %v5343_v59 = vcombine.high %v5335_v54, %v5335_v54 }
 0x58a   : > { %5315 = vmatpush1.bf16.msra.mxu0 %v14571_v63 }
 0x58b   : > { %5889 = vmatprep.subr.bf16.mxu0 %v14585_v0  ;;  %v5357_v63 = vrot.slane %v5343_v59, %v16457_v32  ;;  %v14580_v0 = vld [vmem:[#allocation3 + $0x10] ss:$8 sps:$4 sm:$0x88]  }
 0x58c   : > { %5087 = vmatpush1.bf16.msra.mxu1 %v14568_v61  ;;  %v14592_v61 = vld [vmem:[#allocation3 + $0x4] ss:$8 sps:$4 sm:$0x11]  }
 0x58d   : > { %5088 = vmatprep.subr.bf16.mxu1 %v14576_v62  ;;  %v5342_v62 = vrot.slane %v14596_v9, %v16457_v32 }
 0x590   : > { %5089 = vmatpush1.bf16.msra.mxu1 %v14574_v2  ;;  %v4706_v2 = vrot.slane %v4698_v19, %v16457_v32  ;;  %v14589_v19 = vld [vmem:[#allocation20 + $0x600] ss:$8 sps:$4 sm:$0xff]  }
 0x591   : > { %5586 = vmatprep.subr.bf16.mxu1 %v14591_v4  ;;  %v4714_v4 = vcombine.high %v4713_v60, %v4713_v60 }
 0x592   : > { %v4753_v23 = vshll.u32 %v4706_v2, 16  ;;  %v14597_v2 = vld [vmem:[#allocation20 + $0x110] ss:$8 sps:$4 sm:$0xff]  }
 0x5b8   : > { %v4267_v5 = vpop.f32.mrb[20].mxu1 }
 0x5b9   : > { %v4269_v6 = vpop.f32.mrb[21].mxu1 }
 0x5ba   : > { %v3972_v7 = vpop.f32.mrb[20].mxu0  ;;  %v4271_v8 = vpop.f32.mrb[22].mxu1 }
 0x5bb   : > { %v3979_v12 = vadd.f32 %v3972_v7, %v16612_v10  ;;  %v3974_v13 = vpop.f32.mrb[21].mxu0  ;;  %v4272_v14 = vpop.f32.mrb[23].mxu1  ;;  %v4723_v7 = vrot.slane %v14580_v0, %v16457_v32  ;;  %v14586_v8 = vld [vmem:[#allocation3 + $0x20] ss:$8 sps:$4 sm:$0x88]  }
 0x5bc   : > { %v3980_v17 = vadd.f32 %v3974_v13, %v16614_v11  ;;  %v3976_v18 = vpop.f32.mrb[22].mxu0  ;;  %v5350_v14 = vrot.slane %v5342_v62, %v16457_v32  ;;  %v14599_v62 = vld [vmem:[#allocation20 + $0x114] ss:$8 sps:$4 sm:$0xff]  }
 0x5bd   : > { %v3977_v20 = vpop.f32.mrb[23].mxu0  ;;  %v4274_v21 = vadd.f32 %v4267_v5, %v3979_v12  ;;  %v4731_v18 = vcombine.high %v4723_v7, %v4723_v7  ;;  %v14603_v7 = vld [vmem:[#allocation20 + $0x120] ss:$8 sps:$4 sm:$0xff]  }
 0x5be   : > { %v4275_v22 = vadd.f32 %v4269_v6, %v3980_v17  ;;  %v5648_v6 = vrot.slane %v14592_v61, %v16457_v32  ;;  %v5358_v17 = vcombine.high %v5357_v63, %v5357_v63  ;;  %v4807_v20 = vrot.slane %v14586_v8, %v16457_v32  ;;  %v14602_v63 = vld [vmem:[#allocation20 + $0x614] ss:$8 sps:$4 sm:$0xff]  }
 0x5bf   : > { %v14611_v8 = vld [vmem:[#allocation20 + $0x134] ss:$8 sps:$4 sm:$0xff]  }
 0x5fa   : > { %v4562_v26 = vpop.f32.mrb[24].mxu0 }
 0x5fb   : > { %v4569_v28 = vadd.f32 %v4562_v26, %v4274_v21  ;;  %v4564_v29 = vpop.f32.mrb[25].mxu0  ;;  %v5655_v26 = vrot.slane %v5648_v6, %v16457_v32  ;;  %v14608_v6 = vld [vmem:[#allocation20 + $0x624] ss:$8 sps:$4 sm:$0xff]  }
 0x5fc   : > { %v4570_v30 = vadd.f32 %v4564_v29, %v4275_v22  ;;  %v4566_v31 = vpop.f32.mrb[26].mxu0  ;;  %v4748_v22 = vshrl.u32 %v4714_v4, 16  ;;  %v4815_v29 = vcombine.high %v4807_v20, %v4807_v20  ;;  %v14605_v4 = vld [vmem:[#allocation20 + $0x124] ss:$8 sps:$4 sm:$0xff]  }
 0x5fd   : > { %v4583_v10 = vadd.f32 %v4576_v24, %v4569_v28  ;;  %v4567_v33 = vpop.f32.mrb[27].mxu0  ;;  %v4745_v28 = vrot.slane %v4731_v18, %v16457_v32  ;;  %v5360_v31 = vshrl.u32 %v5358_v17, 16  ;;  %v14617_v17 = vld [vmem:[#allocation20 + $0x144] ss:$8 sps:$4 sm:$0xff]   ;;  %v14612_v18 = vld [vmem:[#allocation20 + $0x630] ss:$8 sps:$4 sm:$0xff]  }
 0x5fe   : > { %v4584_v35 = vadd.f32 %v4580_v27, %v4570_v30  ;;  %v14620_v20 = vld [vmem:[#allocation20 + $0x644] ss:$8 sps:$4 sm:$0xff]  }
 0x5ff   : > { %v4585_v36 = vmax.f32 %v4583_v10, 0.0  ;;  %v5365_v10 = vshll.u32 %v5350_v14, 16  ;;  %v4746_v33 = vcombine.high %v4745_v28, %v4745_v28  ;;  %v14609_v14 = vld [vmem:[#allocation20 + $0x130] ss:$8 sps:$4 sm:$0xff]  }
 0x600   : > { %v4586_v34 = vmax.f32 %v4584_v35, 0.0  ;;  %v14624_v28 = vld [vmem:[#allocation20 + $0x650] ss:$8 sps:$4 sm:$0xff]  }
 0x602   : > { %v12574_v11 = vpack.c.bf16 %v4586_v34, %v4585_v36  ;;  %v4829_v36 = vrot.slane %v4815_v29, %v16457_v32  ;;  %v14632_v29 = vld [vmem:[#allocation20 + $0x664] ss:$8 sps:$4 sm:$0xff]  }
 0x604   : > { %v4598_v38 = vrot.slane %v12574_v11, %v16457_v32  ;;  %v4755_v11 = vsel %vm16503_vm14, %v4748_v22, %v4753_v23  ;;  %v14623_v22 = vld [vmem:[#allocation20 + $0x154] ss:$8 sps:$4 sm:$0xff]   ;;  %v14618_v23 = vld [vmem:[#allocation20 + $0x640] ss:$8 sps:$4 sm:$0xff]  }
 0x606   : > { %v4599_v39 = vcombine.high %v4598_v38, %v4598_v38  ;;  %v4606_v53 = vrot.slane %v4598_v38, %v16457_v32  ;;  %v4757_v38 = vshrl.u32 %v4746_v33, 16  ;;  %v14638_v33 = vld [vmem:[#allocation20 + $0x674] ss:$8 sps:$4 sm:$0xff]  }
 0x608   : > { %v4613_v37 = vrot.slane %v4599_v39, %v16457_v32  ;;  %v4620_v41 = vrot.slane %v4606_v53, %v16457_v32  ;;  %v4830_v53 = vcombine.high %v4829_v36, %v4829_v36  ;;  %v14641_v36 = vld [vmem:[#allocation20 + $0x184] ss:$8 sps:$4 sm:$0xff]  }
 0x60a   : > { %v4621_v42 = vcombine.high %v4620_v41, %v4620_v41  ;;  %v4628_v43 = vrot.slane %v4620_v41, %v16457_v32  ;;  %v4644_v44 = vrot.slane %v4613_v37, %v16457_v32  ;;  %v4832_v41 = vshrl.u32 %v4830_v53, 16  ;;  %v14647_v53 = vld [vmem:[#allocation20 + $0x194] ss:$8 sps:$4 sm:$0xff]  }
 0x60c   : > { %v4635_v1 = vrot.slane %v4621_v42, %v16457_v32  ;;  %v4636_v48 = vcombine.low %v4628_v43, %v4628_v43  ;;  %v4645_v49 = vcombine.high %v4644_v44, %v4644_v44  ;;  %v4652_v51 = vrot.slane %v4644_v44, %v16457_v32 }
 0x60d   : > { %v5367_v43 = vsel %vm16503_vm14, %v5360_v31, %v5365_v10  ;;  %v14635_v31 = vld [vmem:[#allocation20 + $0x174] ss:$8 sps:$4 sm:$0xff]   ;;  %v14630_v10 = vld [vmem:[#allocation20 + $0x660] ss:$8 sps:$4 sm:$0xff]  }
 0x60e   : > { %v4637_v3 = vcombine.low %v4635_v1, %v4635_v1  ;;  %v4659_v52 = vrot.slane %v4645_v49, %v16457_v32  ;;  %v4660_v45 = vcombine.low %v4652_v51, %v4652_v51  ;;  %4667 = vst [vmem:[#allocation3 + $0x10] sm:$0x10] %v4636_v48 }
 0x610   : > { %v4661_v56 = vcombine.low %v4659_v52, %v4659_v52  ;;  %4668 = vst [vmem:[#allocation3 + $0x18] sm:$0x10] %v4637_v3  ;;  %4669 = vst [vmem:[#allocation3 + $0x20] sm:$0x10] %v4660_v45 }
 0x612   : > { %4670 = vst [vmem:[#allocation3 + $0x28] sm:$0x10] %v4661_v56  ;;  %v14583_v56 = vld [vmem:[#allocation20 + $0x100] ss:$8 sps:$4 sm:$0xff]  }
 0x617   : > { %v14582_v5 = vld [vmem:[#allocation3 + $0x14] ss:$8 sps:$4 sm:$0x11]  }
 0x618   : > { %v4730_v12 = vrot.slane %v14582_v5, %v16457_v32  ;;  %v14593_v21 = vld [vmem:[#allocation3 + $0x14] ss:$8 sps:$4 sm:$0x11]   ;;  %v14600_v5 = vld [vmem:[#allocation20 + $0x610] ss:$8 sps:$4 sm:$0xff]  }
 0x619   : > { %v14588_v13 = vld [vmem:[#allocation3 + $0x24] ss:$8 sps:$4 sm:$0x11]   ;;  %v5663_v30 = vrot.slane %v14593_v21, %v16457_v32  ;;  %v14615_v21 = vld [vmem:[#allocation20 + $0x140] ss:$8 sps:$4 sm:$0xff]  }
 0x61a   : > { %v4814_v24 = vrot.slane %v14588_v13, %v16457_v32  ;;  %v4738_v27 = vrot.slane %v4730_v12, %v16457_v32  ;;  %v14606_v12 = vld [vmem:[#allocation20 + $0x620] ss:$8 sps:$4 sm:$0xff]   ;;  %v14614_v13 = vld [vmem:[#allocation20 + $0x634] ss:$8 sps:$4 sm:$0xff]  }
 0x61b   : > { %v16649_v34 = vrot.slane %v5663_v30, %v16457_v32  ;;  %v14627_v30 = vld [vmem:[#allocation20 + $0x160] ss:$8 sps:$4 sm:$0xff]  }
 0x61c   : > { %v4822_v35 = vrot.slane %v4814_v24, %v16457_v32  ;;  %v4762_v39 = vshll.u32 %v4738_v27, 16  ;;  %v14626_v24 = vld [vmem:[#allocation20 + $0x654] ss:$8 sps:$4 sm:$0xff]   ;;  %v14629_v27 = vld [vmem:[#allocation20 + $0x164] ss:$8 sps:$4 sm:$0xff]  }
 0x61d   : > { %v5704_v40 = vcombine.low %v5655_v26, %v16649_v34  ;;  %v14621_v26 = vld [vmem:[#allocation20 + $0x150] ss:$8 sps:$4 sm:$0xff]  }
 0x61e   : > { %v4764_v37 = vsel %vm16503_vm14, %v4757_v38, %v4762_v39  ;;  %v4837_v42 = vshll.u32 %v4822_v35, 16  ;;  %v14633_v35 = vld [vmem:[#allocation20 + $0x170] ss:$8 sps:$4 sm:$0xff]   ;;  %v14644_v38 = vld [vmem:[#allocation20 + $0x684] ss:$8 sps:$4 sm:$0xff]  }
 0x61f   : > { %v5099_v44 = vcombine.low %v4755_v11, %v4764_v37  ;;  %v16661_v47 = vrot.slane %v5704_v40, %v16457_v32  ;;  %v14636_v11 = vld [vmem:[#allocation20 + $0x670] ss:$8 sps:$4 sm:$0xff]   ;;  %v14639_v39 = vld [vmem:[#allocation20 + $0x180] ss:$8 sps:$4 sm:$0xff]  }
 0x620   : > { %v4839_v46 = vsel %vm16503_vm14, %v4832_v41, %v4837_v42  ;;  %v14642_v40 = vld [vmem:[#allocation20 + $0x680] ss:$8 sps:$4 sm:$0xff]   ;;  %v14645_v41 = vld [vmem:[#allocation20 + $0x190] ss:$8 sps:$4 sm:$0xff]   ;;  %v14653_v42 = vld [vmem:[#allocation20 + $0x1a4] ss:$8 sps:$4 sm:$0xff]  }
 0x621   : > { %v5106_v1 = vrot.slane %v5099_v44, %v16457_v32  ;;  %v4873_v48 = vcombine.low %v4764_v37, %v4839_v46  ;;  %v5401_v49 = vcombine.low %v4839_v46, %v5367_v43  ;;  %v5712_v45 = vcombine.high %v16661_v47, %v16661_v47  ;;  %v14650_v37 = vld [vmem:[#allocation20 + $0x694] ss:$8 sps:$4 sm:$0xff]   ;;  %v14648_v43 = vld [vmem:[#allocation20 + $0x690] ss:$8 sps:$4 sm:$0xff]   ;;  %v14656_v44 = vld [vmem:[#allocation20 + $0x6a4] ss:$8 sps:$4 sm:$0xff]  }
 0x622   : > { %v14651_v46 = vld [vmem:[#allocation20 + $0x1a0] ss:$8 sps:$4 sm:$0xff]  }
 0x623   : > { %v5107_v51 = vcombine.high %v5106_v1, %v5106_v1  ;;  %v4880_v3 = vrot.slane %v4873_v48, %v16457_v32  ;;  %v16666_v52 = vrot.slane %v5401_v49, %v16457_v32  ;;  %v5114_v9 = vrot.slane %v5106_v1, %v16457_v32  ;;  %v14659_v1 = vld [vmem:[#allocation20 + $0x1b4] ss:$8 sps:$4 sm:$0xff]   ;;  %v14691_v48 = vld [vmem:[#allocation3 + $0x34] ss:$8 sps:$4 sm:$0x11]  }
 0x624   : > { %v5726_v60 = vrot.slane %v5712_v45, %v16457_v32  ;;  %v14654_v49 = vld [vmem:[#allocation20 + $0x6a0] ss:$8 sps:$4 sm:$0xff]   ;;  %v14657_v45 = vld [vmem:[#allocation20 + $0x1b0] ss:$8 sps:$4 sm:$0xff]  }
 0x625   : > { %v5121_v54 = vrot.slane %v5107_v51, %v16457_v32  ;;  %v4881_v57 = vcombine.high %v4880_v3, %v4880_v3  ;;  %v5409_v15 = vcombine.high %v16666_v52, %v16666_v52  ;;  %v4888_v61 = vrot.slane %v4880_v3, %v16457_v32  ;;  %v14690_v51 = vld [vmem:[#allocation3 + $0x24] ss:$8 sps:$4 sm:$0x11]  }
 0x626   : > { %v14662_v3 = vld [vmem:[#allocation20 + $0x6b4] ss:$8 sps:$4 sm:$0xff]  }
 0x627   : > { %5316 = vmatprep.mubr.bf16.mxu0 %v5121_v54  ;;  %v4895_v59 = vrot.slane %v4881_v57, %v16457_v32  ;;  %v5423_v0 = vrot.slane %v5409_v15, %v16457_v32  ;;  %v14665_v54 = vld [vmem:[#allocation20 + $0x1c4] ss:$8 sps:$4 sm:$0xff]   ;;  %v5941_v57 = vrot.slane %v14690_v51, %v16457_v32  ;;  %v6219_v15 = vrot.slane %v14691_v48, %v16457_v32  ;;  %v14719_v48 = vld [vmem:[#allocation20 + $0x750] ss:$8 sps:$4 sm:$0xff]  }
 0x628   : > { %5317 = vmatmul.mubr.bf16.vlgmr.msra.gmra.mrb[28].mxu0 %v5114_v9  ;;  %v14668_v9 = vld [vmem:[#allocation20 + $0x6c4] ss:$8 sps:$4 sm:$0xff]   ;;  %v14722_v51 = vld [vmem:[#allocation20 + $0x450] ss:$8 sps:$4 sm:$0xff]  }
 0x629   : > { %5890 = vmatpush1.bf16.msra.mxu0 %v14583_v56  ;;  %5090 = vmatprep.mubr.bf16.mxu1 %v4895_v59  ;;  %v14660_v56 = vld [vmem:[#allocation20 + $0x6b0] ss:$8 sps:$4 sm:$0xff]   ;;  %v14663_v59 = vld [vmem:[#allocation20 + $0x1c0] ss:$8 sps:$4 sm:$0xff]  }
 0x62a   : > { %5921 = vmatprep.mubr.bf16.mxu0 %v5726_v60  ;;  %5091 = vmatmul.mubr.bf16.vlgmr.msra.gmra.mrb[24].mxu1 %v4888_v61  ;;  %v14666_v60 = vld [vmem:[#allocation20 + $0x6c0] ss:$8 sps:$4 sm:$0xff]   ;;  %v5948_v61 = vrot.slane %v5941_v57, %v16457_v32  ;;  %v14736_v57 = vld [vmem:[#allocation20 + $0x474] ss:$8 sps:$4 sm:$0xff]  }
 0x62b   : > { %5587 = vmatpush1.bf16.msra.mxu1 %v14589_v19  ;;  %5618 = vmatprep.mubr.bf16.mxu1 %v5423_v0  ;;  %v14671_v19 = vld [vmem:[#allocation20 + $0x1d4] ss:$8 sps:$4 sm:$0xff]   ;;  %v14669_v0 = vld [vmem:[#allocation20 + $0x1d0] ss:$8 sps:$4 sm:$0xff]  }
 0x62c   : > { %5891 = vmatprep.subr.bf16.mxu0 %v14599_v62  ;;  %5588 = vmatprep.subr.bf16.mxu1 %v14602_v63  ;;  %v6226_v62 = vrot.slane %v6219_v15, %v16457_v32  ;;  %v14674_v63 = vld [vmem:[#allocation20 + $0x6d4] ss:$8 sps:$4 sm:$0xff]   ;;  %v14731_v15 = vld [vmem:[#allocation20 + $0x770] ss:$8 sps:$4 sm:$0xff]  }
 0x62d   : > { %5892 = vmatpush1.bf16.msra.mxu0 %v14597_v2  ;;  %v14677_v2 = vld [vmem:[#allocation20 + $0x1e4] ss:$8 sps:$4 sm:$0xff]  }
 0x62e   : > { %5893 = vmatprep.subr.bf16.mxu0 %v14605_v4  ;;  %v14672_v4 = vld [vmem:[#allocation20 + $0x6d0] ss:$8 sps:$4 sm:$0xff]  }
 0x62f   : > { %5589 = vmatpush1.bf16.msra.mxu1 %v14600_v5  ;;  %v6260_v5 = vcombine.low %v5948_v61, %v6226_v62  ;;  %v14793_v62 = vld [vmem:[#allocation3 + $0x4] ss:$8 sps:$4 sm:$0x33]  }
 0x630   : > { %5590 = vmatprep.subr.bf16.mxu1 %v14608_v6  ;;  %v14680_v6 = vld [vmem:[#allocation20 + $0x6e4] ss:$8 sps:$4 sm:$0xff]  }
 0x631   : > { %5894 = vmatpush1.bf16.msra.mxu0 %v14603_v7  ;;  %v14675_v7 = vld [vmem:[#allocation20 + $0x1e0] ss:$8 sps:$4 sm:$0xff]  }
 0x632   : > { %5895 = vmatprep.subr.bf16.mxu0 %v14611_v8  ;;  %v5982_v8 = vcombine.low %v16649_v34, %v5948_v61  ;;  %v14737_v61 = vld [vmem:[#allocation20 + $0x780] ss:$8 sps:$4 sm:$0xff]  }
 0x633   : > { %5591 = vmatpush1.bf16.msra.mxu1 %v14606_v12  ;;  %v14683_v12 = vld [vmem:[#allocation20 + $0x1f4] ss:$8 sps:$4 sm:$0xff]  }
 0x634   : > { %5592 = vmatprep.subr.bf16.mxu1 %v14614_v13  ;;  %v14678_v13 = vld [vmem:[#allocation20 + $0x6e0] ss:$8 sps:$4 sm:$0xff]  }
 0x635   : > { %5896 = vmatpush1.bf16.msra.mxu0 %v14609_v14  ;;  %v16684_v14 = vrot.slane %v6260_v5, %v16457_v32 }
 0x636   : > { %5897 = vmatprep.subr.bf16.mxu0 %v14617_v17  ;;  %v14686_v17 = vld [vmem:[#allocation20 + $0x6f4] ss:$8 sps:$4 sm:$0xff]  }
 0x637   : > { %5593 = vmatpush1.bf16.msra.mxu1 %v14612_v18  ;;  %v14681_v18 = vld [vmem:[#allocation20 + $0x1f0] ss:$8 sps:$4 sm:$0xff]   ;;  %v6268_v34 = vcombine.high %v16684_v14, %v16684_v14 }
 0x638   : > { %5594 = vmatprep.subr.bf16.mxu1 %v14620_v20  ;;  %v16687_v20 = vrot.slane %v5982_v8, %v16457_v32 }
 0x639   : > { %5898 = vmatpush1.bf16.msra.mxu0 %v14615_v21  ;;  %v14689_v21 = vld [vmem:[#allocation20 + $0x704] ss:$8 sps:$4 sm:$0xff]  }
 0x63a   : > { %5899 = vmatprep.subr.bf16.mxu0 %v14623_v22  ;;  %v14684_v22 = vld [vmem:[#allocation20 + $0x6f0] ss:$8 sps:$4 sm:$0xff]  }
 0x63b   : > { %5595 = vmatpush1.bf16.msra.mxu1 %v14618_v23  ;;  %v14694_v23 = vld [vmem:[#allocation20 + $0x404] ss:$8 sps:$4 sm:$0xff]  }
 0x63c   : > { %5596 = vmatprep.subr.bf16.mxu1 %v14626_v24  ;;  %v14687_v24 = vld [vmem:[#allocation20 + $0x700] ss:$8 sps:$4 sm:$0xff]  }
 0x63d   : > { %5900 = vmatpush1.bf16.msra.mxu0 %v14621_v26  ;;  %v5990_v26 = vcombine.high %v16687_v20, %v16687_v20 }
 0x63e   : > { %5901 = vmatprep.subr.bf16.mxu0 %v14629_v27  ;;  %v5719_v27 = vrot.slane %v16661_v47, %v16457_v32  ;;  %v14703_v47 = vld [vmem:[#allocation20 + $0x724] ss:$8 sps:$4 sm:$0xff]  }
 0x63f   : > { %5597 = vmatpush1.bf16.msra.mxu1 %v14624_v28  ;;  %v14697_v28 = vld [vmem:[#allocation20 + $0x714] ss:$8 sps:$4 sm:$0xff]  }
 0x640   : > { %5598 = vmatprep.subr.bf16.mxu1 %v14632_v29  ;;  %v6282_v29 = vrot.slane %v6268_v34, %v16457_v32 }
 0x641   : > { %5902 = vmatpush1.bf16.msra.mxu0 %v14627_v30  ;;  %v14692_v30 = vld [vmem:[#allocation20 + $0x400] ss:$8 sps:$4 sm:$0xff]  }
 0x642   : > { %5903 = vmatprep.subr.bf16.mxu0 %v14635_v31  ;;  %v5416_v31 = vrot.slane %v16666_v52, %v16457_v32  ;;  %v14704_v52 = vld [vmem:[#allocation20 + $0x420] ss:$8 sps:$4 sm:$0xff]  }
 0x643   : > { %5599 = vmatpush1.bf16.msra.mxu1 %v14630_v10  ;;  %v14700_v10 = vld [vmem:[#allocation20 + $0x414] ss:$8 sps:$4 sm:$0xff]  }
 0x644   : > { %5600 = vmatprep.subr.bf16.mxu1 %v14638_v33  ;;  %v6004_v33 = vrot.slane %v5990_v26, %v16457_v32  ;;  %v14760_v26 = vld [vmem:[#allocation20 + $0x4b4] ss:$8 sps:$4 sm:$0xff]  }
 0x645   : > { %5904 = vmatpush1.bf16.msra.mxu0 %v14633_v35  ;;  %v14695_v35 = vld [vmem:[#allocation20 + $0x710] ss:$8 sps:$4 sm:$0xff]  }
 0x646   : > { %5905 = vmatprep.subr.bf16.mxu0 %v14641_v36  ;;  %v14698_v36 = vld [vmem:[#allocation20 + $0x410] ss:$8 sps:$4 sm:$0xff]  }
 0x647   : > { %5601 = vmatpush1.bf16.msra.mxu1 %v14636_v11  ;;  %v14706_v11 = vld [vmem:[#allocation20 + $0x424] ss:$8 sps:$4 sm:$0xff]  }
 0x648   : > { %5602 = vmatprep.subr.bf16.mxu1 %v14644_v38  ;;  %v14701_v38 = vld [vmem:[#allocation20 + $0x720] ss:$8 sps:$4 sm:$0xff]  }
 0x649   : > { %5906 = vmatpush1.bf16.msra.mxu0 %v14639_v39  ;;  %v14709_v39 = vld [vmem:[#allocation20 + $0x734] ss:$8 sps:$4 sm:$0xff]  }
 0x64a   : > { %5907 = vmatprep.subr.bf16.mxu0 %v14647_v53  ;;  %v14712_v53 = vld [vmem:[#allocation20 + $0x434] ss:$8 sps:$4 sm:$0xff]  }
 0x64b   : > { %5603 = vmatpush1.bf16.msra.mxu1 %v14642_v40  ;;  %v14707_v40 = vld [vmem:[#allocation20 + $0x730] ss:$8 sps:$4 sm:$0xff]  }
 0x64c   : > { %5604 = vmatprep.subr.bf16.mxu1 %v14650_v37  ;;  %v14715_v37 = vld [vmem:[#allocation20 + $0x744] ss:$8 sps:$4 sm:$0xff]  }
 0x64d   : > { %5908 = vmatpush1.bf16.msra.mxu0 %v14645_v41  ;;  %v14710_v41 = vld [vmem:[#allocation20 + $0x430] ss:$8 sps:$4 sm:$0xff]  }
 0x64e   : > { %5909 = vmatprep.subr.bf16.mxu0 %v14653_v42  ;;  %v14718_v42 = vld [vmem:[#allocation20 + $0x444] ss:$8 sps:$4 sm:$0xff]  }
 0x64f   : > { %5605 = vmatpush1.bf16.msra.mxu1 %v14648_v43  ;;  %v14713_v43 = vld [vmem:[#allocation20 + $0x740] ss:$8 sps:$4 sm:$0xff]  }
 0x650   : > { %5606 = vmatprep.subr.bf16.mxu1 %v14656_v44  ;;  %v14721_v44 = vld [vmem:[#allocation20 + $0x754] ss:$8 sps:$4 sm:$0xff]  }
 0x651   : > { %5910 = vmatpush1.bf16.msra.mxu0 %v14651_v46  ;;  %v14716_v46 = vld [vmem:[#allocation20 + $0x440] ss:$8 sps:$4 sm:$0xff]  }
 0x652   : > { %5911 = vmatprep.subr.bf16.mxu0 %v14659_v1  ;;  %v14724_v1 = vld [vmem:[#allocation20 + $0x454] ss:$8 sps:$4 sm:$0xff]  }
 0x653   : > { %5607 = vmatpush1.bf16.msra.mxu1 %v14654_v49  ;;  %v14727_v49 = vld [vmem:[#allocation20 + $0x764] ss:$8 sps:$4 sm:$0xff]  }
 0x654   : > { %5608 = vmatprep.subr.bf16.mxu1 %v14662_v3  ;;  %v14730_v3 = vld [vmem:[#allocation20 + $0x464] ss:$8 sps:$4 sm:$0xff]  }
 0x655   : > { %5912 = vmatpush1.bf16.msra.mxu0 %v14657_v45  ;;  %v14725_v45 = vld [vmem:[#allocation20 + $0x760] ss:$8 sps:$4 sm:$0xff]  }
 0x656   : > { %5913 = vmatprep.subr.bf16.mxu0 %v14665_v54  ;;  %v14733_v54 = vld [vmem:[#allocation20 + $0x774] ss:$8 sps:$4 sm:$0xff]  }
 0x657   : > { %5609 = vmatpush1.bf16.msra.mxu1 %v14660_v56  ;;  %v14728_v56 = vld [vmem:[#allocation20 + $0x460] ss:$8 sps:$4 sm:$0xff]  }
 0x658   : > { %5610 = vmatprep.subr.bf16.mxu1 %v14668_v9  ;;  %v14739_v9 = vld [vmem:[#allocation20 + $0x784] ss:$8 sps:$4 sm:$0xff]  }
 0x659   : > { %5914 = vmatpush1.bf16.msra.mxu0 %v14663_v59  ;;  %v14734_v59 = vld [vmem:[#allocation20 + $0x470] ss:$8 sps:$4 sm:$0xff]  }
 0x65a   : > { %5915 = vmatprep.subr.bf16.mxu0 %v14671_v19  ;;  %v14742_v19 = vld [vmem:[#allocation20 + $0x484] ss:$8 sps:$4 sm:$0xff]  }
 0x65b   : > { %5611 = vmatpush1.bf16.msra.mxu1 %v14666_v60  ;;  %v14789_v60 = vld [vmem:[#allocation3 + $0x24] ss:$8 sps:$4 sm:$0x33]  }
 0x65c   : > { %5612 = vmatprep.subr.bf16.mxu1 %v14674_v63  ;;  %v14745_v63 = vld [vmem:[#allocation20 + $0x794] ss:$8 sps:$4 sm:$0xff]   ;;  %v6834_v5 = vrot.slane %v14789_v60, %v16457_v32 }
 0x65d   : > { %5916 = vmatpush1.bf16.msra.mxu0 %v14669_v0  ;;  %v14788_v0 = vld [vmem:[#allocation3 + $0x14] ss:$8 sps:$4 sm:$0x33]  }
 0x65e   : > { %5917 = vmatprep.subr.bf16.mxu0 %v14677_v2  ;;  %v14740_v2 = vld [vmem:[#allocation20 + $0x480] ss:$8 sps:$4 sm:$0xff]   ;;  %v6530_v8 = vrot.slane %v14788_v0, %v16457_v32  ;;  %v14792_v0 = vld [vmem:[#allocation20 + $0x204] ss:$8 sps:$4 sm:$0xff]  }
 0x65f   : > { %5613 = vmatpush1.bf16.msra.mxu1 %v14672_v4  ;;  %v14748_v4 = vld [vmem:[#allocation20 + $0x494] ss:$8 sps:$4 sm:$0xff]  }
 0x660   : > { %5614 = vmatprep.subr.bf16.mxu1 %v14680_v6  ;;  %v14743_v6 = vld [vmem:[#allocation20 + $0x790] ss:$8 sps:$4 sm:$0xff]   ;;  %v6531_v34 = vcombine.high %v6530_v8, %v6530_v8 }
 0x661   : > { %5918 = vmatpush1.bf16.msra.mxu0 %v14675_v7  ;;  %v14751_v7 = vld [vmem:[#allocation20 + $0x7a4] ss:$8 sps:$4 sm:$0xff]  }
 0x662   : > { %5919 = vmatprep.subr.bf16.mxu0 %v14683_v12  ;;  %v6507_v12 = vrot.slane %v14793_v62, %v16457_v32  ;;  %v14782_v62 = vld [vmem:[#allocation20 + $0x4f0] ss:$8 sps:$4 sm:$0xff]  }
 0x663   : > { %5615 = vmatpush1.bf16.msra.mxu1 %v14678_v13  ;;  %v14746_v13 = vld [vmem:[#allocation20 + $0x490] ss:$8 sps:$4 sm:$0xff]  }
 0x664   : > { %5616 = vmatprep.subr.bf16.mxu1 %v14686_v17  ;;  %v14754_v17 = vld [vmem:[#allocation20 + $0x4a4] ss:$8 sps:$4 sm:$0xff]  }
 0x665   : > { %5920 = vmatpush1.bf16.msra.mxu0 %v14681_v18  ;;  %v6835_v18 = vcombine.high %v6834_v5, %v6834_v5 }
 0x666   : > { %6445 = vmatprep.subr.bf16.mxu0 %v14689_v21  ;;  %v14749_v21 = vld [vmem:[#allocation20 + $0x7a0] ss:$8 sps:$4 sm:$0xff]  }
 0x667   : > { %5617 = vmatpush1.bf16.msra.mxu1 %v14684_v22  ;;  %v14757_v22 = vld [vmem:[#allocation20 + $0x7b4] ss:$8 sps:$4 sm:$0xff]  }
 0x668   : > { %5922 = vmatmul.mubr.bf16.vlgmr.msra.gmra.mrb[32].mxu0 %v5719_v27  ;;  %6167 = vmatprep.subr.bf16.mxu1 %v14694_v23  ;;  %v6508_v23 = vcombine.high %v6507_v12, %v6507_v12  ;;  %v6849_v27 = vrot.slane %v6835_v18, %v16457_v32  ;;  %v14794_v18 = vld [vmem:[#allocation20 + $0x510] ss:$8 sps:$4 sm:$0xff]  }
 0x669   : > { %6446 = vmatpush1.bf16.msra.mxu0 %v14687_v24  ;;  %6477 = vmatprep.mubr.bf16.mxu0 %v6282_v29  ;;  %v14752_v24 = vld [vmem:[#allocation20 + $0x4a0] ss:$8 sps:$4 sm:$0xff]   ;;  %v14763_v29 = vld [vmem:[#allocation20 + $0x7c4] ss:$8 sps:$4 sm:$0xff]  }
 0x66a   : > { %5619 = vmatmul.mubr.bf16.vlgmr.msra.gmra.mrb[28].mxu1 %v5416_v31  ;;  %6447 = vmatprep.subr.bf16.mxu0 %v14697_v28  ;;  %v14755_v28 = vld [vmem:[#allocation20 + $0x7b0] ss:$8 sps:$4 sm:$0xff]   ;;  %v6842_v31 = vrot.slane %v6834_v5, %v16457_v32  ;;  %v6275_v5 = vrot.slane %v16684_v14, %v16457_v32  ;;  %v14802_v14 = vld [vmem:[#allocation20 + $0x524] ss:$8 sps:$4 sm:$0xff]  }
 0x66b   : > { %6168 = vmatpush1.bf16.msra.mxu1 %v14692_v30  ;;  %6199 = vmatprep.mubr.bf16.mxu1 %v6004_v33  ;;  %v6545_v30 = vrot.slane %v6531_v34, %v16457_v32  ;;  %v6522_v33 = vrot.slane %v6508_v23, %v16457_v32  ;;  %v14800_v34 = vld [vmem:[#allocation20 + $0x520] ss:$8 sps:$4 sm:$0xff]   ;;  %v14808_v23 = vld [vmem:[#allocation20 + $0x534] ss:$8 sps:$4 sm:$0xff]  }
 0x66c   : > { %6169 = vmatprep.subr.bf16.mxu1 %v14700_v10  ;;  %v6515_v10 = vrot.slane %v6507_v12, %v16457_v32  ;;  %v5997_v12 = vrot.slane %v16687_v20, %v16457_v32  ;;  %v14803_v20 = vld [vmem:[#allocation20 + $0x220] ss:$8 sps:$4 sm:$0xff]  }
 0x66d   : > { %6448 = vmatpush1.bf16.msra.mxu0 %v14695_v35  ;;  %v14758_v35 = vld [vmem:[#allocation20 + $0x4b0] ss:$8 sps:$4 sm:$0xff]  }
 0x66e   : > { %6449 = vmatprep.subr.bf16.mxu0 %v14703_v47  ;;  %v14766_v47 = vld [vmem:[#allocation20 + $0x4c4] ss:$8 sps:$4 sm:$0xff]  }
 0x66f   : > { %6170 = vmatpush1.bf16.msra.mxu1 %v14698_v36  ;;  %v6538_v36 = vrot.slane %v6530_v8, %v16457_v32  ;;  %v14790_v8 = vld [vmem:[#allocation20 + $0x200] ss:$8 sps:$4 sm:$0xff]  }
 0x670   : > { %6171 = vmatprep.subr.bf16.mxu1 %v14706_v11  ;;  %v6856_v11 = vshll.u32 %v6849_v27, 16  ;;  %v14814_v27 = vld [vmem:[#allocation20 + $0x544] ss:$8 sps:$4 sm:$0xff]  }
 0x671   : > { %6450 = vmatpush1.bf16.msra.mxu0 %v14701_v38  ;;  %v14761_v38 = vld [vmem:[#allocation20 + $0x7c0] ss:$8 sps:$4 sm:$0xff]  }
 0x672   : > { %6451 = vmatprep.subr.bf16.mxu0 %v14709_v39  ;;  %v14769_v39 = vld [vmem:[#allocation20 + $0x7d4] ss:$8 sps:$4 sm:$0xff]  }
 0x673   : > { %6172 = vmatpush1.bf16.msra.mxu1 %v14704_v52  ;;  %v6561_v52 = vshll.u32 %v6545_v30, 16  ;;  %v14812_v30 = vld [vmem:[#allocation20 + $0x540] ss:$8 sps:$4 sm:$0xff]  }
 0x674   : > { %6173 = vmatprep.subr.bf16.mxu1 %v14712_v53  ;;  %v6851_v53 = vshrl.u32 %v6842_v31, 16  ;;  %v14820_v31 = vld [vmem:[#allocation20 + $0x554] ss:$8 sps:$4 sm:$0xff]  }
 0x675   : > { %6452 = vmatpush1.bf16.msra.mxu0 %v14707_v40  ;;  %v6547_v40 = vshrl.u32 %v6515_v10, 16  ;;  %v14815_v10 = vld [vmem:[#allocation20 + $0x240] ss:$8 sps:$4 sm:$0xff]  }
 0x676   : > { %6453 = vmatprep.subr.bf16.mxu0 %v14715_v37  ;;  %v6552_v37 = vshll.u32 %v6522_v33, 16  ;;  %v14823_v33 = vld [vmem:[#allocation20 + $0x254] ss:$8 sps:$4 sm:$0xff]  }
 0x677   : > { %6174 = vmatpush1.bf16.msra.mxu1 %v14710_v41  ;;  %v14764_v41 = vld [vmem:[#allocation20 + $0x4c0] ss:$8 sps:$4 sm:$0xff]  }
 0x678   : > { %6175 = vmatprep.subr.bf16.mxu1 %v14718_v42  ;;  %v14772_v42 = vld [vmem:[#allocation20 + $0x4d4] ss:$8 sps:$4 sm:$0xff]  }
 0x679   : > { %6454 = vmatpush1.bf16.msra.mxu0 %v14713_v43  ;;  %v6556_v43 = vshrl.u32 %v6538_v36, 16  ;;  %v14821_v36 = vld [vmem:[#allocation20 + $0x250] ss:$8 sps:$4 sm:$0xff]  }
 0x67a   : > { %6455 = vmatprep.subr.bf16.mxu0 %v14721_v44  ;;  %v16710_v44 = vsel %vm16503_vm14, %v6851_v53, %v6856_v11  ;;  %v14829_v11 = vld [vmem:[#allocation20 + $0x264] ss:$8 sps:$4 sm:$0xff]   ;;  %v14835_v53 = vld [vmem:[#allocation20 + $0x274] ss:$8 sps:$4 sm:$0xff]  }
 0x67b   : > { %6176 = vmatpush1.bf16.msra.mxu1 %v14716_v46  ;;  %v14767_v46 = vld [vmem:[#allocation20 + $0x7d0] ss:$8 sps:$4 sm:$0xff]  }
 0x67c   : > { %6177 = vmatprep.subr.bf16.mxu1 %v14724_v1  ;;  %v14775_v1 = vld [vmem:[#allocation20 + $0x7e4] ss:$8 sps:$4 sm:$0xff]  }
 0x67d   : > { %6456 = vmatpush1.bf16.msra.mxu0 %v14719_v48  ;;  %v6563_v48 = vsel %vm16503_vm14, %v6556_v43, %v6561_v52  ;;  %v14827_v52 = vld [vmem:[#allocation20 + $0x260] ss:$8 sps:$4 sm:$0xff]  }
 0x67e   : > { %6457 = vmatprep.subr.bf16.mxu0 %v14727_v49  ;;  %v6554_v49 = vsel %vm16503_vm14, %v6547_v40, %v6552_v37  ;;  %v14830_v40 = vld [vmem:[#allocation20 + $0x570] ss:$8 sps:$4 sm:$0xff]   ;;  %v14838_v37 = vld [vmem:[#allocation20 + $0x584] ss:$8 sps:$4 sm:$0xff]   ;;  %v14836_v43 = vld [vmem:[#allocation20 + $0x580] ss:$8 sps:$4 sm:$0xff]  }
 0x67f   : > { %6178 = vmatpush1.bf16.msra.mxu1 %v14722_v51  ;;  %v14770_v51 = vld [vmem:[#allocation20 + $0x4d0] ss:$8 sps:$4 sm:$0xff]  }
 0x680   : > { %6179 = vmatprep.subr.bf16.mxu1 %v14730_v3  ;;  %v6892_v3 = vcombine.low %v6563_v48, %v16710_v44 }
 0x681   : > { %6458 = vmatpush1.bf16.msra.mxu0 %v14725_v45  ;;  %v14778_v45 = vld [vmem:[#allocation20 + $0x4e4] ss:$8 sps:$4 sm:$0xff]  }
 0x682   : > { %6459 = vmatprep.subr.bf16.mxu0 %v14733_v54  ;;  %v14773_v54 = vld [vmem:[#allocation20 + $0x7e0] ss:$8 sps:$4 sm:$0xff]  }
 0x683   : > { %6180 = vmatpush1.bf16.msra.mxu1 %v14728_v56  ;;  %v6597_v56 = vcombine.low %v6554_v49, %v6563_v48  ;;  %v14839_v48 = vld [vmem:[#allocation20 + $0x280] ss:$8 sps:$4 sm:$0xff]   ;;  %v14847_v49 = vld [vmem:[#allocation20 + $0x294] ss:$8 sps:$4 sm:$0xff]  }
 0x684   : > { %6181 = vmatprep.subr.bf16.mxu1 %v14736_v57  ;;  %v14781_v57 = vld [vmem:[#allocation20 + $0x7f4] ss:$8 sps:$4 sm:$0xff]  }
 0x685   : > { %6460 = vmatpush1.bf16.msra.mxu0 %v14731_v15  ;;  %v14776_v15 = vld [vmem:[#allocation20 + $0x4e0] ss:$8 sps:$4 sm:$0xff]   ;;  %v16721_v60 = vrot.slane %v6597_v56, %v16457_v32  ;;  %v14853_v56 = vld [vmem:[#allocation20 + $0x2a4] ss:$8 sps:$4 sm:$0xff]  }
 0x686   : > { %6461 = vmatprep.subr.bf16.mxu0 %v14739_v9  ;;  %v16718_v9 = vrot.slane %v6892_v3, %v16457_v32  ;;  %v14850_v3 = vld [vmem:[#allocation20 + $0x5a4] ss:$8 sps:$4 sm:$0xff]  }
 0x687   : > { %6182 = vmatpush1.bf16.msra.mxu1 %v14734_v59  ;;  %v14784_v59 = vld [vmem:[#allocation20 + $0x4f4] ss:$8 sps:$4 sm:$0xff]  }
 0x688   : > { %6183 = vmatprep.subr.bf16.mxu1 %v14742_v19  ;;  %v14779_v19 = vld [vmem:[#allocation20 + $0x7f0] ss:$8 sps:$4 sm:$0xff]  }
 0x689   : > { %6462 = vmatpush1.bf16.msra.mxu0 %v14737_v61  ;;  %v14787_v61 = vld [vmem:[#allocation20 + $0x504] ss:$8 sps:$4 sm:$0xff]  }
 0x68a   : > { %6463 = vmatprep.subr.bf16.mxu0 %v14745_v63  ;;  %v6900_v63 = vcombine.high %v16718_v9, %v16718_v9 }
 0x68b   : > { %6184 = vmatpush1.bf16.msra.mxu1 %v14740_v2  ;;  %v14785_v2 = vld [vmem:[#allocation20 + $0x500] ss:$8 sps:$4 sm:$0xff]  }
 0x68c   : > { %6185 = vmatprep.subr.bf16.mxu1 %v14748_v4  ;;  %v6605_v4 = vcombine.high %v16721_v60, %v16721_v60 }
 0x68d   : > { %6464 = vmatpush1.bf16.msra.mxu0 %v14743_v6  ;;  %v14796_v6 = vld [vmem:[#allocation20 + $0x514] ss:$8 sps:$4 sm:$0xff]  }
 0x68e   : > { %6465 = vmatprep.subr.bf16.mxu0 %v14751_v7  ;;  %v6914_v7 = vrot.slane %v6900_v63, %v16457_v32  ;;  %v14862_v63 = vld [vmem:[#allocation20 + $0x5c4] ss:$8 sps:$4 sm:$0xff]  }
 0x68f   : > { %6186 = vmatpush1.bf16.msra.mxu1 %v14746_v13  ;;  %v14799_v13 = vld [vmem:[#allocation20 + $0x214] ss:$8 sps:$4 sm:$0xff]  }
 0x690   : > { %6187 = vmatprep.subr.bf16.mxu1 %v14754_v17  ;;  %v6619_v17 = vrot.slane %v6605_v4, %v16457_v32  ;;  %v14857_v4 = vld [vmem:[#allocation20 + $0x2b0] ss:$8 sps:$4 sm:$0xff]  }
 0x691   : > { %6466 = vmatpush1.bf16.msra.mxu0 %v14749_v21  ;;  %v14797_v21 = vld [vmem:[#allocation20 + $0x210] ss:$8 sps:$4 sm:$0xff]  }
 0x692   : > { %6467 = vmatprep.subr.bf16.mxu0 %v14757_v22  ;;  %v14805_v22 = vld [vmem:[#allocation20 + $0x224] ss:$8 sps:$4 sm:$0xff]  }
 0x693   : > { %6188 = vmatpush1.bf16.msra.mxu1 %v14752_v24  ;;  %v14811_v24 = vld [vmem:[#allocation20 + $0x234] ss:$8 sps:$4 sm:$0xff]  }
 0x694   : > { %6189 = vmatprep.subr.bf16.mxu1 %v14760_v26  ;;  %v14806_v26 = vld [vmem:[#allocation20 + $0x530] ss:$8 sps:$4 sm:$0xff]  }
 0x695   : > { %6468 = vmatpush1.bf16.msra.mxu0 %v14755_v28  ;;  %v14809_v28 = vld [vmem:[#allocation20 + $0x230] ss:$8 sps:$4 sm:$0xff]  }
 0x696   : > { %6469 = vmatprep.subr.bf16.mxu0 %v14763_v29  ;;  %v14817_v29 = vld [vmem:[#allocation20 + $0x244] ss:$8 sps:$4 sm:$0xff]  }
 0x697   : > { %6190 = vmatpush1.bf16.msra.mxu1 %v14758_v35  ;;  %v14818_v35 = vld [vmem:[#allocation20 + $0x550] ss:$8 sps:$4 sm:$0xff]  }
 0x698   : > { %6191 = vmatprep.subr.bf16.mxu1 %v14766_v47  ;;  %v14826_v47 = vld [vmem:[#allocation20 + $0x564] ss:$8 sps:$4 sm:$0xff]  }
 0x699   : > { %6470 = vmatpush1.bf16.msra.mxu0 %v14761_v38  ;;  %v14824_v38 = vld [vmem:[#allocation20 + $0x560] ss:$8 sps:$4 sm:$0xff]  }
 0x69a   : > { %6471 = vmatprep.subr.bf16.mxu0 %v14769_v39  ;;  %v14832_v39 = vld [vmem:[#allocation20 + $0x574] ss:$8 sps:$4 sm:$0xff]  }
 0x69b   : > { %6192 = vmatpush1.bf16.msra.mxu1 %v14764_v41  ;;  %v14833_v41 = vld [vmem:[#allocation20 + $0x270] ss:$8 sps:$4 sm:$0xff]  }
 0x69c   : > { %6193 = vmatprep.subr.bf16.mxu1 %v14772_v42  ;;  %v14841_v42 = vld [vmem:[#allocation20 + $0x284] ss:$8 sps:$4 sm:$0xff]  }
 0x69d   : > { %6472 = vmatpush1.bf16.msra.mxu0 %v14767_v46  ;;  %v14844_v46 = vld [vmem:[#allocation20 + $0x594] ss:$8 sps:$4 sm:$0xff]  }
 0x69e   : > { %6473 = vmatprep.subr.bf16.mxu0 %v14775_v1  ;;  %v14887_v1 = vld [vmem:[#allocation3 + $0x34] ss:$8 sps:$4 sm:$0x33]  }
 0x69f   : > { %6194 = vmatpush1.bf16.msra.mxu1 %v14770_v51  ;;  %v14842_v51 = vld [vmem:[#allocation20 + $0x590] ss:$8 sps:$4 sm:$0xff]  }
 0x6a0   : > { %6195 = vmatprep.subr.bf16.mxu1 %v14778_v45  ;;  %v7129_v45 = vrot.slane %v14887_v1, %v16457_v32 }
 0x6a1   : > { %6474 = vmatpush1.bf16.msra.mxu0 %v14773_v54  ;;  %v14845_v54 = vld [vmem:[#allocation20 + $0x290] ss:$8 sps:$4 sm:$0xff]  }
 0x6a2   : > { %6475 = vmatprep.subr.bf16.mxu0 %v14781_v57  ;;  %v14848_v57 = vld [vmem:[#allocation20 + $0x5a0] ss:$8 sps:$4 sm:$0xff]  }
 0x6a3   : > { %6196 = vmatpush1.bf16.msra.mxu1 %v14776_v15  ;;  %v14856_v15 = vld [vmem:[#allocation20 + $0x5b4] ss:$8 sps:$4 sm:$0xff]  }
 0x6a4   : > { %6197 = vmatprep.subr.bf16.mxu1 %v14784_v59  ;;  %v7130_v59 = vcombine.high %v7129_v45, %v7129_v45 }
 0x6a5   : > { %6476 = vmatpush1.bf16.msra.mxu0 %v14779_v19  ;;  %v14851_v19 = vld [vmem:[#allocation20 + $0x2a0] ss:$8 sps:$4 sm:$0xff]  }
 0x6a6   : > { %7077 = vmatprep.subr.bf16.mxu0 %v14787_v61  ;;  %v14859_v61 = vld [vmem:[#allocation20 + $0x2b4] ss:$8 sps:$4 sm:$0xff]  }
 0x6a7   : > { %6198 = vmatpush1.bf16.msra.mxu1 %v14782_v62  ;;  %v14854_v62 = vld [vmem:[#allocation20 + $0x5b0] ss:$8 sps:$4 sm:$0xff]  }
 0x6a8   : > { %6478 = vmatmul.mubr.bf16.vlgmr.msra.gmra.mrb[36].mxu0 %v6275_v5  ;;  %6782 = vmatprep.subr.bf16.mxu1 %v14792_v0  ;;  %v7137_v0 = vrot.slane %v7129_v45, %v16457_v32  ;;  %v14865_v5 = vld [vmem:[#allocation20 + $0x2c4] ss:$8 sps:$4 sm:$0xff]  }
 0x6a9   : > { %7078 = vmatpush1.bf16.msra.mxu0 %v14785_v2  ;;  %7109 = vmatprep.mubr.bf16.mxu0 %v6914_v7  ;;  %v7144_v2 = vrot.slane %v7130_v59, %v16457_v32  ;;  %v14868_v7 = vld [vmem:[#allocation20 + $0x5d4] ss:$8 sps:$4 sm:$0xff]   ;;  %v14911_v59 = vld [vmem:[#allocation20 + $0x884] ss:$8 sps:$4 sm:$0xff]  }
 0x6aa   : > { %6200 = vmatmul.mubr.bf16.vlgmr.msra.gmra.mrb[32].mxu1 %v5997_v12  ;;  %7079 = vmatprep.subr.bf16.mxu0 %v14796_v6  ;;  %v14860_v6 = vld [vmem:[#allocation20 + $0x5c0] ss:$8 sps:$4 sm:$0xff]  }
 0x6ab   : > { %6783 = vmatpush1.bf16.msra.mxu1 %v14790_v8  ;;  %6814 = vmatprep.mubr.bf16.mxu1 %v6619_v17  ;;  %v7146_v8 = vshrl.u32 %v7137_v0, 16  ;;  %v7151_v12 = vshll.u32 %v7144_v2, 16  ;;  %v14871_v17 = vld [vmem:[#allocation20 + $0x2d4] ss:$8 sps:$4 sm:$0xff]   ;;  %v14915_v0 = vld [vmem:[#allocation20 + $0x8a0] ss:$8 sps:$4 sm:$0xff]  }
 0x6ac   : > { %6784 = vmatprep.subr.bf16.mxu1 %v14799_v13  ;;  %v14863_v13 = vld [vmem:[#allocation20 + $0x2c0] ss:$8 sps:$4 sm:$0xff]   ;;  %v14920_v2 = vld [vmem:[#allocation20 + $0x8b4] ss:$8 sps:$4 sm:$0xff]  }
 0x6ad   : > { %7080 = vmatpush1.bf16.msra.mxu0 %v14794_v18  ;;  %v14866_v18 = vld [vmem:[#allocation20 + $0x5d0] ss:$8 sps:$4 sm:$0xff]  }
 0x6ae   : > { %7081 = vmatprep.subr.bf16.mxu0 %v14802_v14  ;;  %v14874_v14 = vld [vmem:[#allocation20 + $0x5e4] ss:$8 sps:$4 sm:$0xff]  }
 0x6af   : > { %6785 = vmatpush1.bf16.msra.mxu1 %v14797_v21  ;;  %v7153_v21 = vsel %vm16503_vm14, %v7146_v8, %v7151_v12  ;;  %v14924_v8 = vld [vmem:[#allocation20 + $0x8d0] ss:$8 sps:$4 sm:$0xff]   ;;  %v14929_v12 = vld [vmem:[#allocation20 + $0x8e4] ss:$8 sps:$4 sm:$0xff]  }
 0x6b0   : > { %6786 = vmatprep.subr.bf16.mxu1 %v14805_v22  ;;  %v14869_v22 = vld [vmem:[#allocation20 + $0x2d0] ss:$8 sps:$4 sm:$0xff]  }
 0x6b1   : > { %7082 = vmatpush1.bf16.msra.mxu0 %v14800_v34  ;;  %v14877_v34 = vld [vmem:[#allocation20 + $0x2e4] ss:$8 sps:$4 sm:$0xff]  }
 0x6b2   : > { %7083 = vmatprep.subr.bf16.mxu0 %v14808_v23  ;;  %v14872_v23 = vld [vmem:[#allocation20 + $0x5e0] ss:$8 sps:$4 sm:$0xff]  }
 0x6b3   : > { %6787 = vmatpush1.bf16.msra.mxu1 %v14803_v20  ;;  %v7187_v20 = vcombine.low %v16710_v44, %v7153_v21 }
 0x6b4   : > { %6788 = vmatprep.subr.bf16.mxu1 %v14811_v24  ;;  %v14880_v24 = vld [vmem:[#allocation20 + $0x5f4] ss:$8 sps:$4 sm:$0xff]  }
 0x6b5   : > { %7084 = vmatpush1.bf16.msra.mxu0 %v14806_v26  ;;  %v14875_v26 = vld [vmem:[#allocation20 + $0x2e0] ss:$8 sps:$4 sm:$0xff]  }
 0x6b6   : > { %7085 = vmatprep.subr.bf16.mxu0 %v14814_v27  ;;  %v14883_v27 = vld [vmem:[#allocation20 + $0x2f4] ss:$8 sps:$4 sm:$0xff]  }
 0x6b7   : > { %6789 = vmatpush1.bf16.msra.mxu1 %v14809_v28  ;;  %v14878_v28 = vld [vmem:[#allocation20 + $0x5f0] ss:$8 sps:$4 sm:$0xff]  }
 0x6b8   : > { %6790 = vmatprep.subr.bf16.mxu1 %v14817_v29  ;;  %v16740_v29 = vrot.slane %v7187_v20, %v16457_v32 }
 0x6b9   : > { %7086 = vmatpush1.bf16.msra.mxu0 %v14812_v30  ;;  %v14881_v30 = vld [vmem:[#allocation20 + $0x2f0] ss:$8 sps:$4 sm:$0xff]  }
 0x6ba   : > { %7087 = vmatprep.subr.bf16.mxu0 %v14820_v31  ;;  %v14886_v31 = vld [vmem:[#allocation20 + $0x804] ss:$8 sps:$4 sm:$0xff]   ;;  %v7195_v44 = vcombine.high %v16740_v29, %v16740_v29 }
 0x6bb   : > { %6791 = vmatpush1.bf16.msra.mxu1 %v14815_v10  ;;  %v6907_v10 = vrot.slane %v16718_v9, %v16457_v32  ;;  %v14896_v9 = vld [vmem:[#allocation20 + $0x834] ss:$8 sps:$4 sm:$0xff]  }
 0x6bc   : > { %6792 = vmatprep.subr.bf16.mxu1 %v14823_v33  ;;  %v14884_v33 = vld [vmem:[#allocation20 + $0x800] ss:$8 sps:$4 sm:$0xff]  }
 0x6bd   : > { %7088 = vmatpush1.bf16.msra.mxu0 %v14818_v35  ;;  %v6612_v35 = vrot.slane %v16721_v60, %v16457_v32  ;;  %v14897_v60 = vld [vmem:[#allocation20 + $0x840] ss:$8 sps:$4 sm:$0xff]  }
 0x6be   : > { %7089 = vmatprep.subr.bf16.mxu0 %v14826_v47  ;;  %v14890_v47 = vld [vmem:[#allocation20 + $0x814] ss:$8 sps:$4 sm:$0xff]  }
 0x6bf   : > { %6793 = vmatpush1.bf16.msra.mxu1 %v14821_v36  ;;  %v7209_v36 = vrot.slane %v7195_v44, %v16457_v32 }
 0x6c0   : > { %6794 = vmatprep.subr.bf16.mxu1 %v14829_v11  ;;  %v14888_v11 = vld [vmem:[#allocation20 + $0x810] ss:$8 sps:$4 sm:$0xff]  }
 0x6c1   : > { %7090 = vmatpush1.bf16.msra.mxu0 %v14824_v38  ;;  %v14893_v38 = vld [vmem:[#allocation20 + $0x824] ss:$8 sps:$4 sm:$0xff]  }
 0x6c2   : > { %7091 = vmatprep.subr.bf16.mxu0 %v14832_v39  ;;  %v14891_v39 = vld [vmem:[#allocation20 + $0x820] ss:$8 sps:$4 sm:$0xff]  }
 0x6c3   : > { %6795 = vmatpush1.bf16.msra.mxu1 %v14827_v52  ;;  %v14894_v52 = vld [vmem:[#allocation20 + $0x830] ss:$8 sps:$4 sm:$0xff]  }
 0x6c4   : > { %6796 = vmatprep.subr.bf16.mxu1 %v14835_v53  ;;  %v14899_v53 = vld [vmem:[#allocation20 + $0x844] ss:$8 sps:$4 sm:$0xff]  }
 0x6c5   : > { %7092 = vmatpush1.bf16.msra.mxu0 %v14830_v40  ;;  %v14902_v40 = vld [vmem:[#allocation20 + $0x854] ss:$8 sps:$4 sm:$0xff]  }
 0x6c6   : > { %7093 = vmatprep.subr.bf16.mxu0 %v14838_v37 }
 0x6c7   : > { %6797 = vmatpush1.bf16.msra.mxu1 %v14833_v41  ;;  %v14900_v41 = vld [vmem:[#allocation20 + $0x850] ss:$8 sps:$4 sm:$0xff]  }
 0x6c8   : > { %6798 = vmatprep.subr.bf16.mxu1 %v14841_v42 }
 0x6c9   : > { %7094 = vmatpush1.bf16.msra.mxu0 %v14836_v43  ;;  %v14905_v43 = vld [vmem:[#allocation20 + $0x864] ss:$8 sps:$4 sm:$0xff]  }
 0x6ca   : > { %7095 = vmatprep.subr.bf16.mxu0 %v14844_v46 }
 0x6cb   : > { %6799 = vmatpush1.bf16.msra.mxu1 %v14839_v48 }
 0x6cc   : > { %6800 = vmatprep.subr.bf16.mxu1 %v14847_v49 }
 0x6cd   : > { %7096 = vmatpush1.bf16.msra.mxu0 %v14842_v51 }
 0x6ce   : > { %7097 = vmatprep.subr.bf16.mxu0 %v14850_v3 }
 0x6cf   : > { %6801 = vmatpush1.bf16.msra.mxu1 %v14845_v54  ;;  %v14903_v54 = vld [vmem:[#allocation20 + $0x860] ss:$8 sps:$4 sm:$0xff]  }
 0x6d0   : > { %6802 = vmatprep.subr.bf16.mxu1 %v14853_v56 }
 0x6d1   : > { %7098 = vmatpush1.bf16.msra.mxu0 %v14848_v57  ;;  %v14908_v57 = vld [vmem:[#allocation20 + $0x874] ss:$8 sps:$4 sm:$0xff]  }
 0x6d2   : > { %7099 = vmatprep.subr.bf16.mxu0 %v14856_v15  ;;  %v14906_v15 = vld [vmem:[#allocation20 + $0x870] ss:$8 sps:$4 sm:$0xff]  }
 0x6d3   : > { %6803 = vmatpush1.bf16.msra.mxu1 %v14851_v19  ;;  %v14909_v19 = vld [vmem:[#allocation20 + $0x880] ss:$8 sps:$4 sm:$0xff]  }
 0x6d4   : > { %6804 = vmatprep.subr.bf16.mxu1 %v14859_v61  ;;  %v14914_v61 = vld [vmem:[#allocation20 + $0x894] ss:$8 sps:$4 sm:$0xff]  }
 0x6d5   : > { %7100 = vmatpush1.bf16.msra.mxu0 %v14854_v62  ;;  %v14912_v62 = vld [vmem:[#allocation20 + $0x890] ss:$8 sps:$4 sm:$0xff]  }
 0x6d6   : > { %7101 = vmatprep.subr.bf16.mxu0 %v14862_v63  ;;  %v14917_v63 = vld [vmem:[#allocation20 + $0x8a4] ss:$8 sps:$4 sm:$0xff]  }
 0x6d7   : > { %6805 = vmatpush1.bf16.msra.mxu1 %v14857_v4  ;;  %v14918_v4 = vld [vmem:[#allocation20 + $0x8b0] ss:$8 sps:$4 sm:$0xff]  }
 0x6d8   : > { %6806 = vmatprep.subr.bf16.mxu1 %v14865_v5  ;;  %v14923_v5 = vld [vmem:[#allocation20 + $0x8c4] ss:$8 sps:$4 sm:$0xff]  }
 0x6d9   : > { %7102 = vmatpush1.bf16.msra.mxu0 %v14860_v6  ;;  %v14921_v6 = vld [vmem:[#allocation20 + $0x8c0] ss:$8 sps:$4 sm:$0xff]  }
 0x6da   : > { %7103 = vmatprep.subr.bf16.mxu0 %v14868_v7  ;;  %v14926_v7 = vld [vmem:[#allocation20 + $0x8d4] ss:$8 sps:$4 sm:$0xff]  }
 0x6db   : > { %6807 = vmatpush1.bf16.msra.mxu1 %v14863_v13  ;;  %v14927_v13 = vld [vmem:[#allocation20 + $0x8e0] ss:$8 sps:$4 sm:$0xff]  }
 0x6dc   : > { %6808 = vmatprep.subr.bf16.mxu1 %v14871_v17  ;;  %v14932_v17 = vld [vmem:[#allocation20 + $0x8f4] ss:$8 sps:$4 sm:$0xff]  }
 0x6dd   : > { %7104 = vmatpush1.bf16.msra.mxu0 %v14866_v18  ;;  %v14930_v18 = vld [vmem:[#allocation20 + $0x8f0] ss:$8 sps:$4 sm:$0xff]  }
 0x6de   : > { %7105 = vmatprep.subr.bf16.mxu0 %v14874_v14  ;;  %v7202_v14 = vrot.slane %v16740_v29, %v16457_v32 }
 0x6df   : > { %6809 = vmatpush1.bf16.msra.mxu1 %v14869_v22 }
 0x6e0   : > { %6810 = vmatprep.subr.bf16.mxu1 %v14877_v34 }
 0x6e1   : > { %7106 = vmatpush1.bf16.msra.mxu0 %v14872_v23 }
 0x6e2   : > { %7107 = vmatprep.subr.bf16.mxu0 %v14880_v24 }
 0x6e3   : > { %6811 = vmatpush1.bf16.msra.mxu1 %v14875_v26 }
 0x6e4   : > { %6812 = vmatprep.subr.bf16.mxu1 %v14883_v27 }
 0x6e5   : > { %7108 = vmatpush1.bf16.msra.mxu0 %v14878_v28 }
 0x6e7   : > { %6813 = vmatpush1.bf16.msra.mxu1 %v14881_v30 }
 0x6e8   : > { %7110 = vmatmul.mubr.bf16.vlgmr.msra.gmra.mrb[40].mxu0 %v6907_v10  ;;  %7372 = vmatprep.subr.bf16.mxu1 %v14886_v31 }
 0x6ea   : > { %6815 = vmatmul.mubr.bf16.vlgmr.msra.gmra.mrb[36].mxu1 %v6612_v35 }
 0x6eb   : > { %7373 = vmatpush1.bf16.msra.mxu1 %v14884_v33  ;;  %7404 = vmatprep.mubr.bf16.mxu1 %v7209_v36 }
 0x6ec   : > { %7374 = vmatprep.subr.bf16.mxu1 %v14890_v47 }
 0x6ef   : > { %7375 = vmatpush1.bf16.msra.mxu1 %v14888_v11 }
 0x6f0   : > { %7376 = vmatprep.subr.bf16.mxu1 %v14893_v38 }
 0x6f3   : > { %7377 = vmatpush1.bf16.msra.mxu1 %v14891_v39 }
 0x6f4   : > { %7378 = vmatprep.subr.bf16.mxu1 %v14896_v9 }
 0x6f7   : > { %7379 = vmatpush1.bf16.msra.mxu1 %v14894_v52 }
 0x6f8   : > { %7380 = vmatprep.subr.bf16.mxu1 %v14899_v53 }
 0x6fb   : > { %7381 = vmatpush1.bf16.msra.mxu1 %v14897_v60  ;;  %v5318_v37 = vpop.f32.mrb[28].mxu0  ;;  %v14935_v60 = vld [vmem:[#allocation23 + $0x40] sm:$0xff]  }
 0x6fc   : > { %v5320_v42 = vpop.f32.mrb[29].mxu0  ;;  %7382 = vmatprep.subr.bf16.mxu1 %v14902_v40  ;;  %v14936_v40 = vld [vmem:[#allocation23] sm:$0xff]  }
 0x6fd   : > { %v5092_v46 = vpop.f32.mrb[24].mxu1  ;;  %v5322_v1 = vpop.f32.mrb[30].mxu0 }
 0x6fe   : > { %v5319_v48 = vadd.f32 %v5318_v37, %v5092_v46  ;;  %v5094_v49 = vpop.f32.mrb[25].mxu1  ;;  %v5323_v51 = vpop.f32.mrb[31].mxu0  ;;  %v14937_v37 = vld [vmem:[#allocation23 + $0x1c0] sm:$0xff]   ;;  %v14940_v46 = vld [vmem:[#allocation23 + $0x8] sm:$0xff]  }
 0x6ff   : > { %v5321_v3 = vadd.f32 %v5320_v42, %v5094_v49  ;;  %7383 = vmatpush1.bf16.msra.mxu1 %v14900_v41  ;;  %v5096_v45 = vpop.f32.mrb[26].mxu1  ;;  %v14938_v41 = vld [vmem:[#allocation23 + $0x180] sm:$0xff]   ;;  %v14939_v42 = vld [vmem:[#allocation23 + $0x48] sm:$0xff]   ;;  %13141 = vmatprep.subr.bf16.mxu0 %v14937_v37  ;;  %v14945_v49 = vld [vmem:[#allocation23 + $0x1d0] sm:$0xff]  }
 0x700   : > { %v5097_v56 = vpop.f32.mrb[27].mxu1  ;;  %7384 = vmatprep.subr.bf16.mxu1 %v14905_v43  ;;  %v14941_v43 = vld [vmem:[#allocation23 + $0x1c8] sm:$0xff]   ;;  %13142 = vmatpush3.bf16.msra.mxu0 %v14938_v41  ;;  %v14944_v51 = vld [vmem:[#allocation23 + $0x10] sm:$0xff]   ;;  %v14947_v45 = vld [vmem:[#allocation23 + $0x58] sm:$0xff]  }
 0x701   : > { %v14942_v1 = vld [vmem:[#allocation23 + $0x188] sm:$0xff]   ;;  %13143 = vmatprep.subr.bf16.mxu0 %v14941_v43  ;;  %v14948_v56 = vld [vmem:[#allocation23 + $0x18] sm:$0xff]  }
 0x703   : > { %7385 = vmatpush1.bf16.msra.mxu1 %v14903_v54  ;;  %v14949_v54 = vld [vmem:[#allocation23 + $0x1d8] sm:$0xff]  }
 0x704   : > { %7386 = vmatprep.subr.bf16.mxu1 %v14908_v57  ;;  %13144 = vmatpush3.bf16.msra.mxu0 %v14942_v1  ;;  %v14950_v57 = vld [vmem:[#allocation23 + $0x198] sm:$0xff]  }
 0x705   : > { %13145 = vmatprep.subr.bf16.mxu0 %v14945_v49 }
 0x707   : > { %7387 = vmatpush1.bf16.msra.mxu1 %v14906_v15  ;;  %v14951_v15 = vld [vmem:[#allocation23 + $0x60] sm:$0xff]  }
 0x708   : > { %7388 = vmatprep.subr.bf16.mxu1 %v14911_v59  ;;  %v14953_v59 = vld [vmem:[#allocation23 + $0x1e0] sm:$0xff]  }
 0x70b   : > { %7389 = vmatpush1.bf16.msra.mxu1 %v14909_v19  ;;  %v14952_v19 = vld [vmem:[#allocation23 + $0x20] sm:$0xff]  }
 0x70c   : > { %7390 = vmatprep.subr.bf16.mxu1 %v14914_v61  ;;  %v14954_v61 = vld [vmem:[#allocation23 + $0x1a0] sm:$0xff]  }
 0x70f   : > { %7391 = vmatpush1.bf16.msra.mxu1 %v14912_v62  ;;  %v14955_v62 = vld [vmem:[#allocation23 + $0x68] sm:$0xff]  }
 0x710   : > { %7392 = vmatprep.subr.bf16.mxu1 %v14917_v63  ;;  %v14957_v63 = vld [vmem:[#allocation23 + $0x1e8] sm:$0xff]  }
 0x713   : > { %7393 = vmatpush1.bf16.msra.mxu1 %v14915_v0  ;;  %v14956_v0 = vld [vmem:[#allocation23 + $0x28] sm:$0xff]  }
 0x714   : > { %7394 = vmatprep.subr.bf16.mxu1 %v14920_v2  ;;  %v14958_v2 = vld [vmem:[#allocation23 + $0x1a8] sm:$0xff]  }
 0x717   : > { %7395 = vmatpush1.bf16.msra.mxu1 %v14918_v4  ;;  %v14959_v4 = vld [vmem:[#allocation23 + $0x70] sm:$0xff]  }
 0x718   : > { %7396 = vmatprep.subr.bf16.mxu1 %v14923_v5  ;;  %v14961_v5 = vld [vmem:[#allocation23 + $0x1f0] sm:$0xff]  }
 0x71b   : > { %7397 = vmatpush1.bf16.msra.mxu1 %v14921_v6  ;;  %v14960_v6 = vld [vmem:[#allocation23 + $0x30] sm:$0xff]  }
 0x71c   : > { %7398 = vmatprep.subr.bf16.mxu1 %v14926_v7  ;;  %v14962_v7 = vld [vmem:[#allocation23 + $0x1b0] sm:$0xff]  }
 0x71f   : > { %7399 = vmatpush1.bf16.msra.mxu1 %v14924_v8  ;;  %v14963_v8 = vld [vmem:[#allocation23 + $0x78] sm:$0xff]  }
 0x720   : > { %7400 = vmatprep.subr.bf16.mxu1 %v14929_v12  ;;  %v14965_v12 = vld [vmem:[#allocation23 + $0x1f8] sm:$0xff]  }
 0x723   : > { %7401 = vmatpush1.bf16.msra.mxu1 %v14927_v13  ;;  %v14964_v13 = vld [vmem:[#allocation23 + $0x38] sm:$0xff]  }
 0x724   : > { %7402 = vmatprep.subr.bf16.mxu1 %v14932_v17  ;;  %v14966_v17 = vld [vmem:[#allocation23 + $0x1b8] sm:$0xff]  }
 0x727   : > { %7403 = vmatpush1.bf16.msra.mxu1 %v14930_v18  ;;  %v14973_v18 = vld [vmem:[#allocation23 + $0xc0] sm:$0xff]  }
 0x728   : > { %13163 = vmatprep.subr.bf16.mxu1 %v14935_v60 }
 0x72a   : > { %7405 = vmatmul.mubr.bf16.vlgmr.msra.gmra.mrb[40].mxu1 %v7202_v14  ;;  %v14978_v14 = vld [vmem:[#allocation23 + $0x340] sm:$0xff]  }
 0x72b   : > { %13164 = vmatpush3.bf16.msra.mxu1 %v14936_v40 }
 0x72c   : > { %13165 = vmatprep.subr.bf16.mxu1 %v14939_v42 }
 0x72f   : > { %13166 = vmatpush3.bf16.msra.mxu1 %v14940_v46 }
 0x73b   : > { %v5923_v21 = vpop.f32.mrb[32].mxu0 }
 0x73c   : > { %v5925_v22 = vpop.f32.mrb[33].mxu0 }
 0x73d   : > { %v5620_v34 = vpop.f32.mrb[28].mxu1  ;;  %v5927_v23 = vpop.f32.mrb[34].mxu0 }
 0x73e   : > { %v5627_v20 = vadd.f32 %v5620_v34, %v5319_v48  ;;  %v5622_v24 = vpop.f32.mrb[29].mxu1  ;;  %v5928_v26 = vpop.f32.mrb[35].mxu0  ;;  %v14943_v48 = vld [vmem:[#allocation23 + $0x50] sm:$0xff]  }
 0x73f   : > { %v5628_v27 = vadd.f32 %v5622_v24, %v5321_v3  ;;  %v5624_v28 = vpop.f32.mrb[30].mxu1  ;;  %v14946_v3 = vld [vmem:[#allocation23 + $0x190] sm:$0xff]   ;;  %13167 = vmatprep.subr.bf16.mxu1 %v14943_v48 }
 0x740   : > { %v5625_v30 = vpop.f32.mrb[31].mxu1  ;;  %v5930_v31 = vadd.f32 %v5923_v21, %v5627_v20  ;;  %13168 = vmatpush3.bf16.msra.mxu1 %v14944_v51  ;;  %13146 = vmatpush3.bf16.msra.mxu0 %v14946_v3 }
 0x741   : > { %v5931_v44 = vadd.f32 %v5925_v22, %v5628_v27  ;;  %13169 = vmatprep.subr.bf16.mxu1 %v14947_v45  ;;  %13147 = vmatprep.subr.bf16.mxu0 %v14949_v54 }
 0x744   : > { %13170 = vmatpush3.bf16.msra.mxu1 %v14948_v56  ;;  %13148 = vmatpush3.bf16.msra.mxu0 %v14950_v57 }
 0x745   : > { %13171 = vmatprep.subr.bf16.mxu1 %v14951_v15  ;;  %13149 = vmatprep.subr.bf16.mxu0 %v14953_v59 }
 0x748   : > { %13172 = vmatpush3.bf16.msra.mxu1 %v14952_v19  ;;  %13150 = vmatpush3.bf16.msra.mxu0 %v14954_v61  ;;  %v14967_v61 = vld [vmem:[#allocation2] ss:$8 sps:$4 sm:$0x88]  }
 0x749   : > { %13173 = vmatprep.subr.bf16.mxu1 %v14955_v62  ;;  %13151 = vmatprep.subr.bf16.mxu0 %v14957_v63 }
 0x74c   : > { %13174 = vmatpush3.bf16.msra.mxu1 %v14956_v0  ;;  %13152 = vmatpush3.bf16.msra.mxu0 %v14958_v2 }
 0x74d   : > { %13175 = vmatprep.subr.bf16.mxu1 %v14959_v4  ;;  %13153 = vmatprep.subr.bf16.mxu0 %v14961_v5  ;;  %v14982_v4 = vld [vmem:[#allocation2 + $0x30] ss:$8 sps:$4 sm:$0x88]   ;;  %v7589_v5 = vrot.slane %v14967_v61, %v16457_v32 }
 0x750   : > { %13176 = vmatpush3.bf16.msra.mxu1 %v14960_v6  ;;  %13154 = vmatpush3.bf16.msra.mxu0 %v14962_v7 }
 0x751   : > { %13177 = vmatprep.subr.bf16.mxu1 %v14963_v8  ;;  %13155 = vmatprep.subr.bf16.mxu0 %v14965_v12 }
 0x754   : > { %13178 = vmatpush3.bf16.msra.mxu1 %v14964_v13  ;;  %13156 = vmatpush3.bf16.msra.mxu0 %v14966_v17 }
 0x755   : > { %13207 = vmatprep.subr.bf16.mxu1 %v14973_v18  ;;  %13185 = vmatprep.subr.bf16.mxu0 %v14978_v14  ;;  %v8103_v14 = vrot.slane %v14982_v4, %v16457_v32 }
 0x77b   : > { %v6479_v10 = vpop.f32.mrb[36].mxu0 }
 0x77c   : > { %v6481_v33 = vpop.f32.mrb[37].mxu0 }
 0x77d   : > { %v6201_v35 = vpop.f32.mrb[32].mxu1  ;;  %v6483_v47 = vpop.f32.mrb[38].mxu0 }
 0x77e   : > { %v6208_v36 = vadd.f32 %v6201_v35, %v5930_v31  ;;  %v6203_v11 = vpop.f32.mrb[33].mxu1  ;;  %v6484_v29 = vpop.f32.mrb[39].mxu0 }
 0x77f   : > { %v6209_v38 = vadd.f32 %v6203_v11, %v5931_v44  ;;  %v6205_v39 = vpop.f32.mrb[34].mxu1  ;;  %v15843_v11 = vmov 1983009808  }
 0x780   : > { %v6206_v9 = vpop.f32.mrb[35].mxu1  ;;  %v16751_v52 = vadd.f32 %v6479_v10, %v6208_v36  ;;  %v14934_v10 = vld [vmem:[#allocation2 + $0x24] ss:$8 sps:$4 sm:$0x11]   ;;  %v7475_v29 = vunpack.c.l.s4 %v15843_v11 }
 0x781   : > { %v16753_v53 = vadd.f32 %v6481_v33, %v6209_v38  ;;  %v14933_v33 = vld [vmem:[#allocation2 + $0x14] ss:$8 sps:$4 sm:$0x11]   ;;  %v7459_v35 = vrot.slane %v14934_v10, %v16457_v32 }
 0x782   : > { %v7444_v47 = vrot.slane %v14933_v33, %v16457_v32  ;;  %v7476_v9 = vunpack.c.0.s8 %v7475_v29 }
 0x783   : > { %v7466_v36 = vrot.slane %v7459_v35, %v16457_v32 }
 0x784   : > { %v7451_v38 = vrot.slane %v7444_v47, %v16457_v32  ;;  %v16762_v40 = vsub.s32 %v7476_v9, %v16454_v25 }
 0x785   : > { %v7470_v39 = vunpack.c.l.bf16 %v7466_v36  ;;  %v14975_v36 = vld [vmem:[#allocation2 + $0x20] ss:$8 sps:$4 sm:$0x88]  }
 0x7bb   : > { %v7111_v21 = vpop.f32.mrb[40].mxu0 }
 0x7bc   : > { %v7113_v22 = vpop.f32.mrb[41].mxu0 }
 0x7bd   : > { %v6816_v34 = vpop.f32.mrb[36].mxu1  ;;  %v7115_v23 = vpop.f32.mrb[42].mxu0 }
 0x7be   : > { %v6823_v20 = vadd.f32 %v6816_v34, %v16751_v52  ;;  %v6818_v24 = vpop.f32.mrb[37].mxu1  ;;  %v7116_v26 = vpop.f32.mrb[43].mxu0  ;;  %v7469_v52 = vunpack.c.l.bf16 %v7451_v38  ;;  %v7597_v34 = vcombine.high %v7589_v5, %v7589_v5  ;;  %v14984_v23 = vld [vmem:[#allocation2 + $0x34] ss:$8 sps:$4 sm:$0x11]  }
 0x7bf   : > { %v6824_v27 = vadd.f32 %v6818_v24, %v16753_v53  ;;  %v6820_v28 = vpop.f32.mrb[38].mxu1  ;;  %v7415_v53 = vld [vmem:[#allocation21] sm:$0x3] }
 0x7c0   : > { %v6821_v30 = vpop.f32.mrb[39].mxu1  ;;  %v7118_v31 = vadd.f32 %v7111_v21, %v6823_v20  ;;  %v7473_v60 = vcombine.low %v7469_v52, %v7470_v39  ;;  %v7420_v37 = vrot.slane %v7415_v53, %v16464_v55  ;;  %v7424_v43 = vrot.slane %v7415_v53, %v16467_v58 }
 0x7c1   : > { %v7119_v44 = vadd.f32 %v7113_v22, %v6824_v27  ;;  %v14969_v22 = vld [vmem:[#allocation2 + $0x4] ss:$8 sps:$4 sm:$0x11]   ;;  %v8111_v20 = vcombine.high %v8103_v14, %v8103_v14  ;;  %v7611_v26 = vrot.slane %v7597_v34, %v16457_v32  ;;  %v8110_v28 = vrot.slane %v14984_v23, %v16457_v32  ;;  %v14974_v14 = vld [vmem:[#allocation23 + $0x80] sm:$0xff]  }
 0x7c2   : > { %v7480_v42 = vrot.slane %v7473_v60, %v16762_v40  ;;  %v7596_v24 = vrot.slane %v14969_v22, %v16457_v32  ;;  %v14979_v27 = vld [vmem:[#allocation2 + $0x4] ss:$8 sps:$4 sm:$0x11]   ;;  %v7705_v52 = vrot.slane %v14975_v36, %v16457_v32  ;;  %v15016_v36 = vld [vmem:[#allocation2 + $0x34] ss:$8 sps:$4 sm:$0x11]  }
 0x7c3   : > { %v8125_v30 = vrot.slane %v8111_v20, %v16457_v32  ;;  %v7612_v10 = vcombine.high %v7611_v26, %v7611_v26  ;;  %v8350_v35 = vrot.slane %v14979_v27, %v16457_v32  ;;  %v8118_v38 = vrot.slane %v8110_v28, %v16457_v32  ;;  %v14981_v20 = vld [vmem:[#allocation23 + $0x300] sm:$0xff]   ;;  %v14985_v27 = vld [vmem:[#allocation23 + $0xc8] sm:$0xff]  }
 0x7c4   : > { %v7481_v54 = vcombine.high %v7480_v42, %v7480_v42  ;;  %v14987_v28 = vld [vmem:[#allocation23 + $0x348] sm:$0xff]  }
 0x7c5   : > { %v8126_v39 = vcombine.high %v8125_v30, %v8125_v30  ;;  %v7646_v60 = vshrl.u32 %v7612_v10, 16  ;;  %v14988_v10 = vld [vmem:[#allocation23 + $0x308] sm:$0xff]  }
 0x7fd   : > { %v7406_v41 = vpop.f32.mrb[40].mxu1 }
 0x7fe   : > { %v7413_v46 = vadd.f32 %v7406_v41, %v7118_v31  ;;  %v7408_v1 = vpop.f32.mrb[41].mxu1  ;;  %v14970_v31 = vld [vmem:[#allocation2 + $0x10] ss:$8 sps:$4 sm:$0x88]  }
 0x7ff   : > { %v7414_v48 = vadd.f32 %v7408_v1, %v7119_v44  ;;  %v7410_v49 = vpop.f32.mrb[42].mxu1  ;;  %v7604_v44 = vrot.slane %v7596_v24, %v16457_v32  ;;  %v7621_v47 = vrot.slane %v14970_v31, %v16457_v32  ;;  %v7713_v1 = vcombine.high %v7705_v52, %v7705_v52  ;;  %v14986_v31 = vld [vmem:[#allocation23 + $0x88] sm:$0xff]   ;;  %v14996_v52 = vld [vmem:[#allocation23 + $0x318] sm:$0xff]  }
 0x800   : > { %v7427_v51 = vadd.f32 %v7420_v37, %v7413_v46  ;;  %v7411_v3 = vpop.f32.mrb[43].mxu1  ;;  %v8128_v49 = vshrl.u32 %v8126_v39, 16  ;;  %v14994_v39 = vld [vmem:[#allocation23 + $0x98] sm:$0xff]  }
 0x801   : > { %v7428_v45 = vadd.f32 %v7424_v43, %v7414_v48  ;;  %v7629_v9 = vcombine.high %v7621_v47, %v7621_v47  ;;  %v7651_v37 = vshll.u32 %v7604_v44, 16  ;;  %v14989_v44 = vld [vmem:[#allocation23 + $0xd0] sm:$0xff]   ;;  %v14993_v47 = vld [vmem:[#allocation23 + $0xd8] sm:$0xff]  }
 0x802   : > { %v7484_v56 = vadd.f32 %v7480_v42, %v7427_v51  ;;  %v8357_v42 = vrot.slane %v8350_v35, %v16457_v32  ;;  %v8133_v51 = vshll.u32 %v8118_v38, 16  ;;  %v14990_v35 = vld [vmem:[#allocation23 + $0x90] sm:$0xff]   ;;  %v14995_v38 = vld [vmem:[#allocation23 + $0x358] sm:$0xff]  }
 0x803   : > { %v7485_v57 = vadd.f32 %v7481_v54, %v7428_v45  ;;  %v7643_v46 = vrot.slane %v7629_v9, %v16457_v32  ;;  %v7727_v54 = vrot.slane %v7713_v1, %v16457_v32  ;;  %v14997_v9 = vld [vmem:[#allocation23 + $0xe0] sm:$0xff]  }
 0x805   : > { %v12871_v15 = vpack.c.bf16 %v7485_v57, %v7484_v56  ;;  %v7644_v3 = vcombine.high %v7643_v46, %v7643_v46  ;;  %v7653_v57 = vsel %vm16503_vm14, %v7646_v60, %v7651_v37  ;;  %v8789_v60 = vrot.slane %v15016_v36, %v16457_v32  ;;  %v14999_v37 = vld [vmem:[#allocation23 + $0x360] sm:$0xff]  }
 0x807   : > { %v7497_v59 = vrot.slane %v12871_v15, %v16457_v32  ;;  %v7655_v15 = vshrl.u32 %v7644_v3, 16  ;;  %v8796_v1 = vrot.slane %v8789_v60, %v16457_v32  ;;  %v15004_v3 = vld [vmem:[#allocation23 + $0x328] sm:$0xff]   ;;  %v15033_v60 = vld [vmem:[#allocation23 + $0x260] sm:$0xff]  }
 0x809   : > { %v7498_v19 = vcombine.high %v7497_v59, %v7497_v59  ;;  %v7505_v55 = vrot.slane %v7497_v59, %v16457_v32 }
 0x80b   : > { %v7512_v62 = vrot.slane %v7498_v19, %v16457_v32  ;;  %v7519_v58 = vrot.slane %v7505_v55, %v16457_v32  ;;  %v7728_v19 = vcombine.high %v7727_v54, %v7727_v54  ;;  %v15007_v54 = vld [vmem:[#allocation23 + $0x370] sm:$0xff]  }
 0x80d   : > { %v7520_v63 = vcombine.high %v7519_v58, %v7519_v58  ;;  %v7527_v0 = vrot.slane %v7519_v58, %v16457_v32  ;;  %v7543_v2 = vrot.slane %v7512_v62, %v16457_v32  ;;  %v7730_v62 = vshrl.u32 %v7728_v19, 16  ;;  %v15008_v19 = vld [vmem:[#allocation23 + $0x330] sm:$0xff]  }
 0x80f   : > { %v7534_v6 = vrot.slane %v7520_v63, %v16457_v32  ;;  %v7535_v7 = vcombine.low %v7527_v0, %v7527_v0  ;;  %v7544_v8 = vcombine.high %v7543_v2, %v7543_v2  ;;  %v7551_v12 = vrot.slane %v7543_v2, %v16457_v32 }
 0x810   : > { %v8135_v63 = vsel %vm16503_vm14, %v8128_v49, %v8133_v51  ;;  %v15002_v49 = vld [vmem:[#allocation23 + $0xa8] sm:$0xff]   ;;  %v15005_v51 = vld [vmem:[#allocation23 + $0xf0] sm:$0xff]  }
 0x811   : > { %v7536_v13 = vcombine.low %v7534_v6, %v7534_v6  ;;  %v7558_v17 = vrot.slane %v7544_v8, %v16457_v32  ;;  %v7559_v18 = vcombine.low %v7551_v12, %v7551_v12  ;;  %7565 = vst [vmem:[#allocation2 + $0x10] sm:$0x10] %v7535_v7 }
 0x813   : > { %v7560_v21 = vcombine.low %v7558_v17, %v7558_v17  ;;  %7566 = vst [vmem:[#allocation2 + $0x18] sm:$0x10] %v7536_v13  ;;  %7567 = vst [vmem:[#allocation2 + $0x20] sm:$0x10] %v7559_v18 }
 0x815   : > { %7568 = vst [vmem:[#allocation2 + $0x28] sm:$0x10] %v7560_v21 }
 0x81a   : > { %v14972_v33 = vld [vmem:[#allocation2 + $0x14] ss:$8 sps:$4 sm:$0x11]  }
 0x81b   : > { %v7628_v11 = vrot.slane %v14972_v33, %v16457_v32  ;;  %v14980_v53 = vld [vmem:[#allocation2 + $0x14] ss:$8 sps:$4 sm:$0x11]   ;;  %v14991_v33 = vld [vmem:[#allocation23 + $0x350] sm:$0xff]  }
 0x81c   : > { %v14977_v29 = vld [vmem:[#allocation2 + $0x24] ss:$8 sps:$4 sm:$0x11]   ;;  %v8365_v48 = vrot.slane %v14980_v53, %v16457_v32 }
 0x81d   : > { %v7712_v41 = vrot.slane %v14977_v29, %v16457_v32  ;;  %v7636_v43 = vrot.slane %v7628_v11, %v16457_v32  ;;  %v14992_v11 = vld [vmem:[#allocation23 + $0x310] sm:$0xff]  }
 0x81e   : > { %v16796_v56 = vrot.slane %v8365_v48, %v16457_v32  ;;  %v15015_v29 = vld [vmem:[#allocation2 + $0x24] ss:$8 sps:$4 sm:$0x11]   ;;  %v15003_v48 = vld [vmem:[#allocation23 + $0x368] sm:$0xff]  }
 0x81f   : > { %v7720_v45 = vrot.slane %v7712_v41, %v16457_v32  ;;  %v7660_v59 = vshll.u32 %v7636_v43, 16  ;;  %v8577_v53 = vrot.slane %v15015_v29, %v16457_v32  ;;  %v14998_v41 = vld [vmem:[#allocation23 + $0xa0] sm:$0xff]  }
 0x820   : > { %v8406_v55 = vcombine.low %v8357_v42, %v16796_v56  ;;  %v15001_v42 = vld [vmem:[#allocation23 + $0xe8] sm:$0xff]   ;;  %v15000_v43 = vld [vmem:[#allocation23 + $0x320] sm:$0xff]  }
 0x821   : > { %v7662_v61 = vsel %vm16503_vm14, %v7655_v15, %v7660_v59  ;;  %v7735_v58 = vshll.u32 %v7720_v45, 16  ;;  %v8584_v46 = vrot.slane %v8577_v53, %v16457_v32  ;;  %v15009_v59 = vld [vmem:[#allocation23 + $0xf8] sm:$0xff]   ;;  %v15031_v29 = vld [vmem:[#allocation23 + $0x3e0] sm:$0xff]  }
 0x822   : > { %v7932_v0 = vcombine.low %v7653_v57, %v7662_v61  ;;  %v16808_v4 = vrot.slane %v8406_v55, %v16457_v32  ;;  %v15006_v57 = vld [vmem:[#allocation23 + $0xb0] sm:$0xff]   ;;  %v15030_v53 = vld [vmem:[#allocation23 + $0x218] sm:$0xff]  }
 0x823   : > { %v7737_v2 = vsel %vm16503_vm14, %v7730_v62, %v7735_v58  ;;  %v8830_v45 = vcombine.low %v8584_v46, %v8796_v1  ;;  %v8618_v15 = vcombine.low %v16796_v56, %v8584_v46  ;;  %v15010_v62 = vld [vmem:[#allocation23 + $0xb8] sm:$0xff]  }
 0x824   : > { %v7939_v5 = vrot.slane %v7932_v0, %v16457_v32  ;;  %v7771_v6 = vcombine.low %v7662_v61, %v7737_v2  ;;  %v8169_v7 = vcombine.low %v7737_v2, %v8135_v63  ;;  %v8414_v17 = vcombine.high %v16808_v4, %v16808_v4  ;;  %v15011_v61 = vld [vmem:[#allocation23 + $0x378] sm:$0xff]   ;;  %v15013_v63 = vld [vmem:[#allocation23 + $0x3c0] sm:$0xff]  }
 0x825   : > { %v16831_v55 = vrot.slane %v8830_v45, %v16457_v32  ;;  %v16834_v58 = vrot.slane %v8618_v15, %v16457_v32  ;;  %v15012_v0 = vld [vmem:[#allocation23 + $0x338] sm:$0xff]   ;;  %v15017_v2 = vld [vmem:[#allocation23 + $0x240] sm:$0xff]   ;;  %v15039_v15 = vld [vmem:[#allocation23 + $0x3f0] sm:$0xff]  }
 0x826   : > { %v7940_v8 = vcombine.high %v7939_v5, %v7939_v5  ;;  %v7778_v12 = vrot.slane %v7771_v6, %v16457_v32  ;;  %v16813_v13 = vrot.slane %v8169_v7, %v16457_v32  ;;  %v7947_v34 = vrot.slane %v7939_v5, %v16457_v32  ;;  %v15050_v5 = vld [vmem:[#allocation2 + $0x24] ss:$8 sps:$4 sm:$0x33]   ;;  %v15014_v6 = vld [vmem:[#allocation23 + $0x380] sm:$0xff]  }
 0x827   : > { %v8428_v24 = vrot.slane %v8414_v17, %v16457_v32  ;;  %v8838_v56 = vcombine.high %v16831_v55, %v16831_v55  ;;  %v8626_v7 = vcombine.high %v16834_v58, %v16834_v58  ;;  %v15019_v17 = vld [vmem:[#allocation23 + $0x3c8] sm:$0xff]  }
 0x828   : > { %v7954_v18 = vrot.slane %v7940_v8, %v16457_v32  ;;  %v7779_v21 = vcombine.high %v7778_v12, %v7778_v12  ;;  %v8177_v22 = vcombine.high %v16813_v13, %v16813_v13  ;;  %v7786_v26 = vrot.slane %v7778_v12, %v16457_v32  ;;  %v15053_v8 = vld [vmem:[#allocation2 + $0x4] ss:$8 sps:$4 sm:$0x33]  }
 0x829   : > { %v8421_v12 = vrot.slane %v16808_v4, %v16457_v32  ;;  %v15020_v4 = vld [vmem:[#allocation23 + $0x388] sm:$0xff]  }
 0x82a   : > { %8085 = vmatprep.mubr.bf16.mxu1 %v7954_v18  ;;  %v7793_v23 = vrot.slane %v7779_v21, %v16457_v32  ;;  %v8191_v30 = vrot.slane %v8177_v22, %v16457_v32  ;;  %v15049_v18 = vld [vmem:[#allocation2 + $0x14] ss:$8 sps:$4 sm:$0x33]   ;;  %v8184_v22 = vrot.slane %v16813_v13, %v16457_v32  ;;  %v15025_v13 = vld [vmem:[#allocation23 + $0x250] sm:$0xff]  }
 0x82b   : > { %8086 = vmatmul.mubr.bf16.vlgmr.msra.gmra.mrb[44].mxu1 %v7947_v34  ;;  %v15018_v21 = vld [vmem:[#allocation23 + $0x200] sm:$0xff]   ;;  %v15021_v34 = vld [vmem:[#allocation23 + $0x248] sm:$0xff]  }
 0x82c   : > { %13208 = vmatpush3.bf16.msra.mxu1 %v14974_v14  ;;  %7924 = vmatprep.mubr.bf16.mxu0 %v7793_v23  ;;  %v8852_v14 = vrot.slane %v8838_v56, %v16457_v32  ;;  %v9272_v23 = vrot.slane %v15050_v5, %v16457_v32  ;;  %v15042_v5 = vld [vmem:[#allocation23 + $0x230] sm:$0xff]  }
 0x82d   : > { %8559 = vmatprep.mubr.bf16.mxu1 %v8428_v24  ;;  %7925 = vmatmul.mubr.bf16.vlgmr.msra.gmra.mrb[44].mxu0 %v7786_v26  ;;  %v15023_v24 = vld [vmem:[#allocation23 + $0x3d0] sm:$0xff]   ;;  %v9034_v26 = vrot.slane %v15049_v18, %v16457_v32  ;;  %v15046_v18 = vld [vmem:[#allocation23 + $0x238] sm:$0xff]  }
 0x82e   : > { %13186 = vmatpush3.bf16.msra.mxu0 %v14981_v20  ;;  %8322 = vmatprep.mubr.bf16.mxu0 %v8191_v30  ;;  %v8640_v20 = vrot.slane %v8626_v7, %v16457_v32  ;;  %v9273_v30 = vcombine.high %v9272_v23, %v9272_v23  ;;  %v15045_v7 = vld [vmem:[#allocation23 + $0x278] sm:$0xff]  }
 0x82f   : > { %13209 = vmatprep.subr.bf16.mxu1 %v14985_v27  ;;  %13187 = vmatprep.subr.bf16.mxu0 %v14987_v28  ;;  %v9011_v27 = vrot.slane %v15053_v8, %v16457_v32  ;;  %v15022_v28 = vld [vmem:[#allocation23 + $0x208] sm:$0xff]   ;;  %v15044_v8 = vld [vmem:[#allocation23 + $0x3b8] sm:$0xff]  }
 0x830   : > { %13210 = vmatpush3.bf16.msra.mxu1 %v14986_v31  ;;  %v15024_v31 = vld [vmem:[#allocation23 + $0x390] sm:$0xff]   ;;  %v9287_v36 = vrot.slane %v9273_v30, %v16457_v32  ;;  %v15055_v30 = vld [vmem:[#allocation23 + $0x288] sm:$0xff]  }
 0x831   : > { %13211 = vmatprep.subr.bf16.mxu1 %v14989_v44  ;;  %v15027_v44 = vld [vmem:[#allocation23 + $0x3d8] sm:$0xff]  }
 0x832   : > { %13188 = vmatpush3.bf16.msra.mxu0 %v14988_v10  ;;  %v9035_v10 = vcombine.high %v9034_v26, %v9034_v26 }
 0x833   : > { %13189 = vmatprep.subr.bf16.mxu0 %v14991_v33  ;;  %v9012_v33 = vcombine.high %v9011_v27, %v9011_v27 }
 0x834   : > { %13212 = vmatpush3.bf16.msra.mxu1 %v14990_v35  ;;  %v15026_v35 = vld [vmem:[#allocation23 + $0x210] sm:$0xff]  }
 0x835   : > { %13213 = vmatprep.subr.bf16.mxu1 %v14993_v47  ;;  %v15029_v47 = vld [vmem:[#allocation23 + $0x258] sm:$0xff]  }
 0x836   : > { %13190 = vmatpush3.bf16.msra.mxu0 %v14992_v11  ;;  %v15028_v11 = vld [vmem:[#allocation23 + $0x398] sm:$0xff]  }
 0x837   : > { %13191 = vmatprep.subr.bf16.mxu0 %v14995_v38  ;;  %v9049_v38 = vrot.slane %v9035_v10, %v16457_v32  ;;  %v15060_v10 = vld [vmem:[#allocation23 + $0x150] sm:$0xff]  }
 0x838   : > { %13214 = vmatpush3.bf16.msra.mxu1 %v14994_v39  ;;  %v9280_v39 = vrot.slane %v9272_v23, %v16457_v32  ;;  %v8845_v23 = vrot.slane %v16831_v55, %v16457_v32  ;;  %v15058_v55 = vld [vmem:[#allocation23 + $0x2d0] sm:$0xff]  }
 0x839   : > { %13215 = vmatprep.subr.bf16.mxu1 %v14997_v9  ;;  %v9019_v9 = vrot.slane %v9011_v27, %v16457_v32  ;;  %v9065_v46 = vshll.u32 %v9049_v38, 16  ;;  %v8633_v27 = vrot.slane %v16834_v58, %v16457_v32  ;;  %v15062_v58 = vld [vmem:[#allocation23 + $0x2d8] sm:$0xff]   ;;  %v15084_v38 = vld [vmem:[#allocation2 + $0x14] ss:$8 sps:$4 sm:$0x11]  }
 0x83a   : > { %13192 = vmatpush3.bf16.msra.mxu0 %v14996_v52  ;;  %v9026_v52 = vrot.slane %v9012_v33, %v16457_v32  ;;  %v9289_v1 = vshrl.u32 %v9280_v39, 16  ;;  %v15059_v33 = vld [vmem:[#allocation23 + $0x290] sm:$0xff]   ;;  %v15066_v39 = vld [vmem:[#allocation23 + $0x2e0] sm:$0xff]  }
 0x83b   : > { %13193 = vmatprep.subr.bf16.mxu0 %v14999_v37  ;;  %v9042_v37 = vrot.slane %v9034_v26, %v16457_v32  ;;  %v15052_v26 = vld [vmem:[#allocation23 + $0x100] sm:$0xff]  }
 0x83c   : > { %13216 = vmatpush3.bf16.msra.mxu1 %v14998_v41  ;;  %v9294_v41 = vshll.u32 %v9287_v36, 16  ;;  %v15085_v36 = vld [vmem:[#allocation2 + $0x24] ss:$8 sps:$4 sm:$0x11]  }
 0x83d   : > { %13217 = vmatprep.subr.bf16.mxu1 %v15001_v42  ;;  %v15032_v42 = vld [vmem:[#allocation23 + $0x3a0] sm:$0xff]   ;;  %v9060_v45 = vshrl.u32 %v9042_v37, 16 }
 0x83e   : > { %13194 = vmatpush3.bf16.msra.mxu0 %v15000_v43  ;;  %v15035_v43 = vld [vmem:[#allocation23 + $0x3e8] sm:$0xff]   ;;  %v15068_v37 = vld [vmem:[#allocation23 + $0x160] sm:$0xff]  }
 0x83f   : > { %13195 = vmatprep.subr.bf16.mxu0 %v15003_v48  ;;  %v9051_v48 = vshrl.u32 %v9019_v9, 16 }
 0x840   : > { %13218 = vmatpush3.bf16.msra.mxu1 %v15002_v49  ;;  %v9056_v49 = vshll.u32 %v9026_v52, 16 }
 0x841   : > { %13219 = vmatprep.subr.bf16.mxu1 %v15005_v51  ;;  %v15034_v51 = vld [vmem:[#allocation23 + $0x220] sm:$0xff]  }
 0x842   : > { %13196 = vmatpush3.bf16.msra.mxu0 %v15004_v3  ;;  %v15037_v3 = vld [vmem:[#allocation23 + $0x268] sm:$0xff]  }
 0x843   : > { %13197 = vmatprep.subr.bf16.mxu0 %v15007_v54  ;;  %v16857_v54 = vsel %vm16503_vm14, %v9289_v1, %v9294_v41  ;;  %v15067_v41 = vld [vmem:[#allocation23 + $0x2a0] sm:$0xff]  }
 0x844   : > { %13220 = vmatpush3.bf16.msra.mxu1 %v15006_v57  ;;  %v15036_v57 = vld [vmem:[#allocation23 + $0x3a8] sm:$0xff]  }
 0x845   : > { %13221 = vmatprep.subr.bf16.mxu1 %v15009_v59  ;;  %v9067_v59 = vsel %vm16503_vm14, %v9060_v45, %v9065_v46 }
 0x846   : > { %13198 = vmatpush3.bf16.msra.mxu0 %v15008_v19  ;;  %v9058_v19 = vsel %vm16503_vm14, %v9051_v48, %v9056_v49  ;;  %v15069_v48 = vld [vmem:[#allocation23 + $0x120] sm:$0xff]  }
 0x847   : > { %13199 = vmatprep.subr.bf16.mxu0 %v15011_v61  ;;  %v15038_v61 = vld [vmem:[#allocation23 + $0x228] sm:$0xff]   ;;  %v9101_v56 = vcombine.low %v9058_v19, %v9067_v59 }
 0x848   : > { %13222 = vmatpush3.bf16.msra.mxu1 %v15010_v62  ;;  %v9330_v62 = vcombine.low %v9067_v59, %v16857_v54  ;;  %v15073_v59 = vld [vmem:[#allocation23 + $0x128] sm:$0xff]  }
 0x849   : > { %13251 = vmatprep.subr.bf16.mxu1 %v15013_v63  ;;  %v15041_v63 = vld [vmem:[#allocation23 + $0x270] sm:$0xff]  }
 0x84a   : > { %13200 = vmatpush3.bf16.msra.mxu0 %v15012_v0  ;;  %v15040_v0 = vld [vmem:[#allocation23 + $0x3b0] sm:$0xff]  }
 0x84b   : > { %8560 = vmatmul.mubr.bf16.vlgmr.msra.gmra.mrb[48].mxu1 %v8421_v12  ;;  %13229 = vmatprep.subr.bf16.mxu0 %v15017_v2  ;;  %v15043_v2 = vld [vmem:[#allocation23 + $0x3f8] sm:$0xff]   ;;  %v16868_v12 = vrot.slane %v9101_v56, %v16457_v32  ;;  %v15077_v56 = vld [vmem:[#allocation23 + $0x130] sm:$0xff]  }
 0x84c   : > { %13252 = vmatpush3.bf16.msra.mxu1 %v15014_v6  ;;  %8983 = vmatprep.mubr.bf16.mxu1 %v8852_v14  ;;  %v16865_v6 = vrot.slane %v9330_v62, %v16457_v32  ;;  %v15075_v62 = vld [vmem:[#allocation23 + $0x2b0] sm:$0xff]  }
 0x84d   : > { %8323 = vmatmul.mubr.bf16.vlgmr.msra.gmra.mrb[48].mxu0 %v8184_v22  ;;  %13253 = vmatprep.subr.bf16.mxu1 %v15019_v17  ;;  %v15047_v17 = vld [vmem:[#allocation23 + $0x2c0] sm:$0xff]  }
 0x84e   : > { %13230 = vmatpush3.bf16.msra.mxu0 %v15018_v21  ;;  %8771 = vmatprep.mubr.bf16.mxu0 %v8640_v20  ;;  %v9338_v14 = vcombine.high %v16865_v6, %v16865_v6  ;;  %v15051_v21 = vld [vmem:[#allocation23 + $0x140] sm:$0xff]   ;;  %v15054_v20 = vld [vmem:[#allocation23 + $0x2c8] sm:$0xff]  }
 0x84f   : > { %13231 = vmatprep.subr.bf16.mxu0 %v15021_v34  ;;  %v15048_v22 = vld [vmem:[#allocation23 + $0x280] sm:$0xff]   ;;  %v9109_v34 = vcombine.high %v16868_v12, %v16868_v12 }
 0x850   : > { %13254 = vmatpush3.bf16.msra.mxu1 %v15020_v4  ;;  %v15088_v4 = vld [vmem:[#allocation2 + $0x34] ss:$8 sps:$4 sm:$0x33]  }
 0x851   : > { %13255 = vmatprep.subr.bf16.mxu1 %v15023_v24  ;;  %v9352_v24 = vrot.slane %v9338_v14, %v16457_v32  ;;  %v15086_v14 = vld [vmem:[#allocation23 + $0x440] sm:$0xff]  }
 0x852   : > { %13232 = vmatpush3.bf16.msra.mxu0 %v15022_v28  ;;  %v15056_v28 = vld [vmem:[#allocation23 + $0x148] sm:$0xff]  }
 0x853   : > { %13233 = vmatprep.subr.bf16.mxu0 %v15025_v13  ;;  %v9123_v13 = vrot.slane %v9109_v34, %v16457_v32  ;;  %v9345_v34 = vrot.slane %v16865_v6, %v16457_v32  ;;  %v15093_v6 = vld [vmem:[#allocation29 + $0x50] sm:$0xff]  }
 0x854   : > { %13256 = vmatpush3.bf16.msra.mxu1 %v15024_v31  ;;  %v9501_v31 = vrot.slane %v15088_v4, %v16457_v32  ;;  %v15087_v4 = vld [vmem:[#allocation23 + $0x400] sm:$0xff]  }
 0x855   : > { %13257 = vmatprep.subr.bf16.mxu1 %v15027_v44  ;;  %v15057_v44 = vld [vmem:[#allocation23 + $0x108] sm:$0xff]  }
 0x856   : > { %13234 = vmatpush3.bf16.msra.mxu0 %v15026_v35  ;;  %v9502_v35 = vcombine.high %v9501_v31, %v9501_v31  ;;  %v9509_v9 = vrot.slane %v9501_v31, %v16457_v32  ;;  %v15097_v31 = vld [vmem:[#allocation29 + $0x58] sm:$0xff]  }
 0x857   : > { %13235 = vmatprep.subr.bf16.mxu0 %v15029_v47  ;;  %v15061_v47 = vld [vmem:[#allocation23 + $0x110] sm:$0xff]  }
 0x858   : > { %13258 = vmatpush3.bf16.msra.mxu1 %v15028_v11  ;;  %v15064_v11 = vld [vmem:[#allocation23 + $0x158] sm:$0xff]   ;;  %v9516_v52 = vrot.slane %v9502_v35, %v16457_v32  ;;  %v9518_v46 = vshrl.u32 %v9509_v9, 16  ;;  %v15103_v35 = vld [vmem:[#allocation23 + $0x460] sm:$0xff]   ;;  %v15108_v9 = vld [vmem:[#allocation23 + $0x428] sm:$0xff]  }
 0x859   : > { %13259 = vmatprep.subr.bf16.mxu1 %v15031_v29  ;;  %v15063_v29 = vld [vmem:[#allocation23 + $0x298] sm:$0xff]  }
 0x85a   : > { %13236 = vmatpush3.bf16.msra.mxu0 %v15030_v53  ;;  %v15065_v53 = vld [vmem:[#allocation23 + $0x118] sm:$0xff]   ;;  %v9523_v1 = vshll.u32 %v9516_v52, 16  ;;  %v15111_v52 = vld [vmem:[#allocation23 + $0x470] sm:$0xff]  }
 0x85b   : > { %13237 = vmatprep.subr.bf16.mxu0 %v15033_v60  ;;  %v9819_v60 = vrot.slane %v15085_v36, %v16457_v32  ;;  %v15105_v36 = vld [vmem:[#allocation29 + $0x68] sm:$0xff]  }
 0x85c   : > { %13260 = vmatpush3.bf16.msra.mxu1 %v15032_v42  ;;  %v9804_v42 = vrot.slane %v15084_v38, %v16457_v32  ;;  %v15106_v38 = vld [vmem:[#allocation29 + $0x28] sm:$0xff]  }
 0x85d   : > { %13261 = vmatprep.subr.bf16.mxu1 %v15035_v43  ;;  %v15070_v43 = vld [vmem:[#allocation23 + $0x2e8] sm:$0xff]   ;;  %v9826_v49 = vrot.slane %v9819_v60, %v16457_v32  ;;  %v15113_v60 = vld [vmem:[#allocation29 + $0x78] sm:$0xff]  }
 0x85e   : > { %13238 = vmatpush3.bf16.msra.mxu0 %v15034_v51  ;;  %v15072_v51 = vld [vmem:[#allocation23 + $0x168] sm:$0xff]   ;;  %v9811_v45 = vrot.slane %v9804_v42, %v16457_v32  ;;  %v15114_v42 = vld [vmem:[#allocation29 + $0x38] sm:$0xff]  }
 0x85f   : > { %13239 = vmatprep.subr.bf16.mxu0 %v15037_v3  ;;  %v15071_v3 = vld [vmem:[#allocation23 + $0x2a8] sm:$0xff]  }
 0x860   : > { %13262 = vmatpush3.bf16.msra.mxu1 %v15036_v57  ;;  %v15074_v57 = vld [vmem:[#allocation23 + $0x2f0] sm:$0xff]   ;;  %v9866_v19 = vcombine.low %v9811_v45, %v9826_v49 }
 0x861   : > { %13263 = vmatprep.subr.bf16.mxu1 %v15039_v15  ;;  %v9525_v15 = vsel %vm16503_vm14, %v9518_v46, %v9523_v1 }
 0x862   : > { %13240 = vmatpush3.bf16.msra.mxu0 %v15038_v61  ;;  %v15076_v61 = vld [vmem:[#allocation23 + $0x170] sm:$0xff]  }
 0x863   : > { %13241 = vmatprep.subr.bf16.mxu0 %v15041_v63  ;;  %v9559_v63 = vcombine.low %v16857_v54, %v9525_v15 }
 0x864   : > { %13264 = vmatpush3.bf16.msra.mxu1 %v15040_v0  ;;  %v15078_v0 = vld [vmem:[#allocation23 + $0x2f8] sm:$0xff]  }
 0x865   : > { %13265 = vmatprep.subr.bf16.mxu1 %v15043_v2  ;;  %v16891_v2 = vrot.slane %v9866_v19, %v16457_v32 }
 0x866   : > { %13242 = vmatpush3.bf16.msra.mxu0 %v15042_v5  ;;  %v15080_v5 = vld [vmem:[#allocation23 + $0x178] sm:$0xff]  }
 0x867   : > { %13243 = vmatprep.subr.bf16.mxu0 %v15045_v7  ;;  %v15079_v7 = vld [vmem:[#allocation23 + $0x2b8] sm:$0xff]   ;;  %v9874_v54 = vcombine.high %v16891_v2, %v16891_v2  ;;  %v9881_v46 = vrot.slane %v16891_v2, %v16457_v32  ;;  %v15119_v2 = vld [vmem:[#allocation26 + $0x8] sm:$0xff]  }
 0x868   : > { %13266 = vmatpush3.bf16.msra.mxu1 %v15044_v8  ;;  %v16894_v8 = vrot.slane %v9559_v63, %v16457_v32  ;;  %v15117_v63 = vld [vmem:[#allocation26] sm:$0xff]  }
 0x869   : > { %13295 = vmatprep.subr.bf16.mxu1 %v15047_v17  ;;  %v15082_v17 = vld [vmem:[#allocation29 + $0x40] sm:$0xff]  }
 0x86a   : > { %13244 = vmatpush3.bf16.msra.mxu0 %v15046_v18  ;;  %v15081_v18 = vld [vmem:[#allocation23 + $0x138] sm:$0xff]   ;;  %v9574_v1 = vrot.slane %v16894_v8, %v16457_v32 }
 0x86b   : > { %8984 = vmatmul.mubr.bf16.vlgmr.msra.gmra.mrb[52].mxu1 %v8845_v23  ;;  %13273 = vmatprep.subr.bf16.mxu0 %v15051_v21  ;;  %v15083_v21 = vld [vmem:[#allocation29] sm:$0xff]   ;;  %v15089_v23 = vld [vmem:[#allocation29 + $0x48] sm:$0xff]  }
 0x86c   : > { %13296 = vmatpush3.bf16.msra.mxu1 %v15048_v22  ;;  %9483 = vmatprep.mubr.bf16.mxu1 %v9352_v24  ;;  %v9567_v22 = vcombine.high %v16894_v8, %v16894_v8  ;;  %v9116_v24 = vrot.slane %v16868_v12, %v16457_v32  ;;  %v15096_v12 = vld [vmem:[#allocation23 + $0x410] sm:$0xff]  }
 0x86d   : > { %8772 = vmatmul.mubr.bf16.vlgmr.msra.gmra.mrb[52].mxu0 %v8633_v27  ;;  %13297 = vmatprep.subr.bf16.mxu1 %v15054_v20  ;;  %v9888_v20 = vrot.slane %v9874_v54, %v16457_v32  ;;  %v15121_v8 = vld [vmem:[#allocation26 + $0x10] sm:$0xff]  }
 0x86e   : > { %13274 = vmatpush3.bf16.msra.mxu0 %v15052_v26  ;;  %9254 = vmatprep.mubr.bf16.mxu0 %v9123_v13  ;;  %v15091_v26 = vld [vmem:[#allocation23 + $0x448] sm:$0xff]   ;;  %v9581_v27 = vrot.slane %v9567_v22, %v16457_v32 }
 0x86f   : > { %13275 = vmatprep.subr.bf16.mxu0 %v15056_v28  ;;  %v15090_v28 = vld [vmem:[#allocation29 + $0x8] sm:$0xff]  }
 0x870   : > { %13298 = vmatpush3.bf16.msra.mxu1 %v15055_v30  ;;  %v15092_v13 = vld [vmem:[#allocation23 + $0x408] sm:$0xff]   ;;  %v15095_v30 = vld [vmem:[#allocation23 + $0x450] sm:$0xff]  }
 0x871   : > { %13299 = vmatprep.subr.bf16.mxu1 %v15058_v55  ;;  %v15094_v55 = vld [vmem:[#allocation29 + $0x10] sm:$0xff]  }
 0x872   : > { %13276 = vmatpush3.bf16.msra.mxu0 %v15057_v44  ;;  %v15099_v44 = vld [vmem:[#allocation23 + $0x458] sm:$0xff]  }
 0x873   : > { %13277 = vmatprep.subr.bf16.mxu0 %v15060_v10  ;;  %v15098_v10 = vld [vmem:[#allocation29 + $0x18] sm:$0xff]  }
 0x874   : > { %13300 = vmatpush3.bf16.msra.mxu1 %v15059_v33  ;;  %v15101_v33 = vld [vmem:[#allocation29 + $0x60] sm:$0xff]  }
 0x875   : > { %13301 = vmatprep.subr.bf16.mxu1 %v15062_v58  ;;  %v15100_v58 = vld [vmem:[#allocation23 + $0x418] sm:$0xff]  }
 0x876   : > { %13278 = vmatpush3.bf16.msra.mxu0 %v15061_v47  ;;  %v15102_v47 = vld [vmem:[#allocation29 + $0x20] sm:$0xff]  }
 0x877   : > { %13279 = vmatprep.subr.bf16.mxu0 %v15064_v11  ;;  %v15104_v11 = vld [vmem:[#allocation23 + $0x420] sm:$0xff]  }
 0x878   : > { %13302 = vmatpush3.bf16.msra.mxu1 %v15063_v29  ;;  %v15107_v29 = vld [vmem:[#allocation23 + $0x468] sm:$0xff]  }
 0x879   : > { %13303 = vmatprep.subr.bf16.mxu1 %v15066_v39  ;;  %v15109_v39 = vld [vmem:[#allocation29 + $0x70] sm:$0xff]  }
 0x87a   : > { %13280 = vmatpush3.bf16.msra.mxu0 %v15065_v53  ;;  %v15110_v53 = vld [vmem:[#allocation29 + $0x30] sm:$0xff]  }
 0x87b   : > { %13281 = vmatprep.subr.bf16.mxu0 %v15068_v37  ;;  %v15112_v37 = vld [vmem:[#allocation23 + $0x430] sm:$0xff]  }
 0x87c   : > { %13304 = vmatpush3.bf16.msra.mxu1 %v15067_v41  ;;  %v15115_v41 = vld [vmem:[#allocation23 + $0x478] sm:$0xff]  }
 0x87d   : > { %13305 = vmatprep.subr.bf16.mxu1 %v15070_v43  ;;  %v15116_v43 = vld [vmem:[#allocation23 + $0x438] sm:$0xff]  }
 0x87e   : > { %13282 = vmatpush3.bf16.msra.mxu0 %v15069_v48 }
 0x87f   : > { %13283 = vmatprep.subr.bf16.mxu0 %v15072_v51 }
 0x880   : > { %13306 = vmatpush3.bf16.msra.mxu1 %v15071_v3 }
 0x881   : > { %13307 = vmatprep.subr.bf16.mxu1 %v15074_v57 }
 0x882   : > { %13284 = vmatpush3.bf16.msra.mxu0 %v15073_v59 }
 0x883   : > { %13285 = vmatprep.subr.bf16.mxu0 %v15076_v61 }
 0x884   : > { %13308 = vmatpush3.bf16.msra.mxu1 %v15075_v62 }
 0x885   : > { %13309 = vmatprep.subr.bf16.mxu1 %v15078_v0  ;;  %v15118_v0 = vld [vmem:[#allocation26 + $0xc0] sm:$0xff]  }
 0x886   : > { %13286 = vmatpush3.bf16.msra.mxu0 %v15077_v56  ;;  %v15844_v56 = vmov 0.0  }
 0x887   : > { %13287 = vmatprep.subr.bf16.mxu0 %v15080_v5  ;;  %v15120_v5 = vld [vmem:[#allocation26 + $0xc8] sm:$0xff]  }
 0x888   : > { %13310 = vmatpush3.bf16.msra.mxu1 %v15079_v7 }
 0x889   : > { %13339 = vmatprep.subr.bf16.mxu1 %v15082_v17  ;;  %v15122_v17 = vld [vmem:[#allocation26 + $0xd0] sm:$0xff]  }
 0x88a   : > { %13288 = vmatpush3.bf16.msra.mxu0 %v15081_v18 }
 0x88b   : > { %9484 = vmatmul.mubr.bf16.vlgmr.msra.gmra.mrb[56].mxu1 %v9345_v34  ;;  %13317 = vmatprep.subr.bf16.mxu0 %v15086_v14 }
 0x88c   : > { %13340 = vmatpush3.bf16.msra.mxu1 %v15083_v21  ;;  %10019 = vmatprep.mubr.bf16.mxu1 %v9888_v20 }
 0x88d   : > { %9255 = vmatmul.mubr.bf16.vlgmr.msra.gmra.mrb[56].mxu0 %v9116_v24  ;;  %13341 = vmatprep.subr.bf16.mxu1 %v15089_v23  ;;  %v15124_v24 = vld [vmem:[#allocation26 + $0xd8] sm:$0xff]  }
 0x88e   : > { %13318 = vmatpush3.bf16.msra.mxu0 %v15087_v4  ;;  %9712 = vmatprep.mubr.bf16.mxu0 %v9581_v27  ;;  %v15123_v4 = vld [vmem:[#allocation26 + $0x18] sm:$0xff]  }
 0x88f   : > { %13319 = vmatprep.subr.bf16.mxu0 %v15091_v26 }
 0x890   : > { %13342 = vmatpush3.bf16.msra.mxu1 %v15090_v28 }
 0x891   : > { %13343 = vmatprep.subr.bf16.mxu1 %v15093_v6  ;;  %v15125_v6 = vld [vmem:[#allocation26 + $0x20] sm:$0xff]  }
 0x892   : > { %13320 = vmatpush3.bf16.msra.mxu0 %v15092_v13  ;;  %v15126_v13 = vld [vmem:[#allocation26 + $0xe0] sm:$0xff]  }
 0x893   : > { %13321 = vmatprep.subr.bf16.mxu0 %v15095_v30  ;;  %v15127_v30 = vld [vmem:[#allocation26 + $0x28] sm:$0xff]  }
 0x894   : > { %13344 = vmatpush3.bf16.msra.mxu1 %v15094_v55  ;;  %v15128_v55 = vld [vmem:[#allocation26 + $0xe8] sm:$0xff]  }
 0x895   : > { %13345 = vmatprep.subr.bf16.mxu1 %v15097_v31  ;;  %v15129_v31 = vld [vmem:[#allocation26 + $0x30] sm:$0xff]  }
 0x896   : > { %13322 = vmatpush3.bf16.msra.mxu0 %v15096_v12  ;;  %v15130_v12 = vld [vmem:[#allocation26 + $0xf0] sm:$0xff]  }
 0x897   : > { %13323 = vmatprep.subr.bf16.mxu0 %v15099_v44  ;;  %v15131_v44 = vld [vmem:[#allocation26 + $0x38] sm:$0xff]  }
 0x898   : > { %13346 = vmatpush3.bf16.msra.mxu1 %v15098_v10  ;;  %v15132_v10 = vld [vmem:[#allocation26 + $0xf8] sm:$0xff]  }
 0x899   : > { %13347 = vmatprep.subr.bf16.mxu1 %v15101_v33 }
 0x89a   : > { %13324 = vmatpush3.bf16.msra.mxu0 %v15100_v58 }
 0x89b   : > { %13325 = vmatprep.subr.bf16.mxu0 %v15103_v35 }
 0x89c   : > { %13348 = vmatpush3.bf16.msra.mxu1 %v15102_v47 }
 0x89d   : > { %13349 = vmatprep.subr.bf16.mxu1 %v15105_v36 }
 0x89e   : > { %13326 = vmatpush3.bf16.msra.mxu0 %v15104_v11 }
 0x89f   : > { %13327 = vmatprep.subr.bf16.mxu0 %v15107_v29 }
 0x8a0   : > { %13350 = vmatpush3.bf16.msra.mxu1 %v15106_v38 }
 0x8a1   : > { %13351 = vmatprep.subr.bf16.mxu1 %v15109_v39 }
 0x8a2   : > { %13328 = vmatpush3.bf16.msra.mxu0 %v15108_v9 }
 0x8a3   : > { %13329 = vmatprep.subr.bf16.mxu0 %v15111_v52 }
 0x8a4   : > { %13352 = vmatpush3.bf16.msra.mxu1 %v15110_v53 }
 0x8a5   : > { %13353 = vmatprep.subr.bf16.mxu1 %v15113_v60 }
 0x8a6   : > { %13330 = vmatpush3.bf16.msra.mxu0 %v15112_v37 }
 0x8a7   : > { %13331 = vmatprep.subr.bf16.mxu0 %v15115_v41 }
 0x8a8   : > { %13354 = vmatpush3.bf16.msra.mxu1 %v15114_v42 }
 0x8a9   : > { %13472 = vmatprep.subr.bf16.mxu1 %v15844_v56 }
 0x8aa   : > { %13332 = vmatpush3.bf16.msra.mxu0 %v15116_v43 }
 0x8ab   : > { %10020 = vmatmul.mubr.bf16.vlgmr.msra.gmra.mrb[60].mxu1 %v9881_v46  ;;  %13452 = vmatprep.subr.bf16.mxu0 %v15844_v56 }
 0x8ac   : > { %13473 = vmatpush3.bf16.msra.mxu1 %v15117_v63  ;;  %13488 = vmatprep.mubr.msk.bf16.mxu1 %vm15845_vm15, %v15844_v56 }
 0x8ad   : > { %9713 = vmatmul.mubr.bf16.vlgmr.msra.gmra.mrb[60].mxu0 %v9574_v1  ;;  %13474 = vmatprep.subr.bf16.mxu1 %v15844_v56 }
 0x8ae   : > { %13453 = vmatpush3.bf16.msra.mxu0 %v15118_v0  ;;  %13468 = vmatprep.mubr.msk.bf16.mxu0 %vm15845_vm15, %v15844_v56 }
 0x8af   : > { %13454 = vmatprep.subr.bf16.mxu0 %v15844_v56 }
 0x8b0   : > { %13475 = vmatpush3.bf16.msra.mxu1 %v15119_v2 }
 0x8b1   : > { %13476 = vmatprep.subr.bf16.mxu1 %v15844_v56 }
 0x8b2   : > { %13455 = vmatpush3.bf16.msra.mxu0 %v15120_v5  ;;  %v13024_v5 = vld [vmem:[#allocation24] ss:$0 sm:$0xff] }
 0x8b3   : > { %13456 = vmatprep.subr.bf16.mxu0 %v15844_v56 }
 0x8b4   : > { %13477 = vmatpush3.bf16.msra.mxu1 %v15121_v8 }
 0x8b5   : > { %13478 = vmatprep.subr.bf16.mxu1 %v15844_v56 }
 0x8b6   : > { %13457 = vmatpush3.bf16.msra.mxu0 %v15122_v17 }
 0x8b7   : > { %13458 = vmatprep.subr.bf16.mxu0 %v15844_v56 }
 0x8b8   : > { %13479 = vmatpush3.bf16.msra.mxu1 %v15123_v4 }
 0x8b9   : > { %13480 = vmatprep.subr.bf16.mxu1 %v15844_v56 }
 0x8ba   : > { %13459 = vmatpush3.bf16.msra.mxu0 %v15124_v24 }
 0x8bb   : > { %13460 = vmatprep.subr.bf16.mxu0 %v15844_v56 }
 0x8bc   : > { %13481 = vmatpush3.bf16.msra.mxu1 %v15125_v6 }
 0x8bd   : > { %13482 = vmatprep.subr.bf16.mxu1 %v15844_v56 }
 0x8be   : > { %13461 = vmatpush3.bf16.msra.mxu0 %v15126_v13 }
 0x8bf   : > { %13462 = vmatprep.subr.bf16.mxu0 %v15844_v56 }
 0x8c0   : > { %13483 = vmatpush3.bf16.msra.mxu1 %v15127_v30 }
 0x8c1   : > { %13484 = vmatprep.subr.bf16.mxu1 %v15844_v56 }
 0x8c2   : > { %13463 = vmatpush3.bf16.msra.mxu0 %v15128_v55 }
 0x8c3   : > { %13464 = vmatprep.subr.bf16.mxu0 %v15844_v56 }
 0x8c4   : > { %13485 = vmatpush3.bf16.msra.mxu1 %v15129_v31 }
 0x8c5   : > { %13486 = vmatprep.subr.bf16.mxu1 %v15844_v56 }
 0x8c6   : > { %13465 = vmatpush3.bf16.msra.mxu0 %v15130_v12 }
 0x8c7   : > { %13466 = vmatprep.subr.bf16.mxu0 %v15844_v56 }
 0x8c8   : > { %13487 = vmatpush3.bf16.msra.mxu1 %v15131_v44 }
 0x8c9   : > { %13512 = vmatprep.subr.bf16.mxu1 %v15844_v56 }
 0x8ca   : > { %13467 = vmatpush3.bf16.msra.mxu0 %v15132_v10 }
 0x8cb   : > { %13492 = vmatprep.subr.bf16.mxu0 %v15844_v56 }
 0x8fe   : > { %v13179_v48 = vpop.f32.mrb[44].mxu1 }
 0x8ff   : > { %v13180_v49 = vpop.f32.mrb[45].mxu1 }
 0x900   : > { %v13181_v51 = vadd.f32 %v13180_v49, %v13179_v48  ;;  %v13157_v3 = vpop.f32.mrb[44].mxu0  ;;  %v13182_v45 = vpop.f32.mrb[46].mxu1 }
 0x901   : > { %v13158_v57 = vpop.f32.mrb[45].mxu0  ;;  %v13183_v15 = vpop.f32.mrb[47].mxu1 }
 0x902   : > { %v13159_v59 = vadd.f32 %v13158_v57, %v13157_v3  ;;  %v13160_v19 = vpop.f32.mrb[46].mxu0 }
 0x903   : > { %v13161_v61 = vpop.f32.mrb[47].mxu0 }
 0x904   : > { %v8088_v62 = vadd.f32 %v13181_v51, %v13159_v59 }
 0x91e   : > { %v13223_v7 = vpop.f32.mrb[48].mxu1 }
 0x91f   : > { %v13224_v18 = vpop.f32.mrb[49].mxu1 }
 0x920   : > { %v13225_v54 = vadd.f32 %v13224_v18, %v13223_v7  ;;  %v13201_v14 = vpop.f32.mrb[48].mxu0  ;;  %v13226_v21 = vpop.f32.mrb[50].mxu1 }
 0x921   : > { %v13202_v22 = vpop.f32.mrb[49].mxu0  ;;  %v13227_v34 = vpop.f32.mrb[51].mxu1 }
 0x922   : > { %v13203_v23 = vadd.f32 %v13202_v22, %v13201_v14  ;;  %v13204_v20 = vpop.f32.mrb[50].mxu0  ;;  %v10027_v34 = vld [vmem:[#allocation4] sm:$0x18] }
 0x923   : > { %v13205_v26 = vpop.f32.mrb[51].mxu0  ;;  %v10040_v4 = vrot.slane %v10027_v34, %v16457_v32  ;;  %v10033_v6 = vcombine.high %v10027_v34, %v10027_v34 }
 0x924   : > { %v8330_v27 = vadd.f32 %v13203_v23, %v8088_v62 }
 0x925   : > { %v10048_v13 = vcombine.high %v10040_v4, %v10040_v4  ;;  %v10047_v55 = vrot.slane %v10033_v6, %v16457_v32 }
 0x926   : > { %v8567_v28 = vadd.f32 %v13225_v54, %v8330_v27 }
 0x927   : > { %v10062_v31 = vrot.slane %v10048_v13, %v16457_v32  ;;  %v10055_v44 = vrot.slane %v10047_v55, %v16457_v32  ;;  %v15146_v55 = vld [vmem:[#allocation26 + $0x68] sm:$0xff]  }
 0x929   : > { %v10063_v10 = vcombine.high %v10062_v31, %v10062_v31 }
 0x93e   : > { %v13267_v33 = vpop.f32.mrb[52].mxu1 }
 0x93f   : > { %v13268_v58 = vpop.f32.mrb[53].mxu1 }
 0x940   : > { %v13269_v35 = vadd.f32 %v13268_v58, %v13267_v33  ;;  %v13245_v47 = vpop.f32.mrb[52].mxu0  ;;  %v13270_v36 = vpop.f32.mrb[54].mxu1 }
 0x941   : > { %v13246_v11 = vpop.f32.mrb[53].mxu0  ;;  %v13271_v29 = vpop.f32.mrb[55].mxu1 }
 0x942   : > { %v13247_v38 = vadd.f32 %v13246_v11, %v13245_v47  ;;  %v13248_v39 = vpop.f32.mrb[54].mxu0 }
 0x943   : > { %v13249_v9 = vpop.f32.mrb[55].mxu0  ;;  %v10101_v39 = vshll.u32 %v10055_v44, 16 }
 0x944   : > { %v8779_v52 = vadd.f32 %v13247_v38, %v8567_v28  ;;  %v10096_v38 = vshrl.u32 %v10063_v10, 16 }
 0x946   : > { %v8991_v53 = vadd.f32 %v13269_v35, %v8779_v52 }
 0x95e   : > { %v13311_v60 = vpop.f32.mrb[56].mxu1 }
 0x95f   : > { %v13312_v37 = vpop.f32.mrb[57].mxu1 }
 0x960   : > { %v13313_v41 = vadd.f32 %v13312_v37, %v13311_v60  ;;  %v13289_v42 = vpop.f32.mrb[56].mxu0  ;;  %v13314_v43 = vpop.f32.mrb[58].mxu1 }
 0x961   : > { %v13290_v46 = vpop.f32.mrb[57].mxu0  ;;  %v13315_v1 = vpop.f32.mrb[59].mxu1  ;;  %v10103_v43 = vsel %vm16503_vm14, %v10096_v38, %v10101_v39  ;;  %v15151_v39 = vld [vmem:[#allocation26 + $0x1b8] sm:$0xff]  }
 0x962   : > { %v13291_v48 = vadd.f32 %v13290_v46, %v13289_v42  ;;  %v13292_v49 = vpop.f32.mrb[58].mxu0 }
 0x963   : > { %v13293_v51 = vpop.f32.mrb[59].mxu0 }
 0x964   : > { %v9262_v3 = vadd.f32 %v13291_v48, %v8991_v53 }
 0x966   : > { %v9491_v45 = vadd.f32 %v13313_v41, %v9262_v3 }
 0x97e   : > { %v13355_v57 = vpop.f32.mrb[60].mxu1 }
 0x97f   : > { %v13356_v15 = vpop.f32.mrb[61].mxu1 }
 0x980   : > { %v16932_v59 = vadd.f32 %v13356_v15, %v13355_v57  ;;  %v13333_v19 = vpop.f32.mrb[60].mxu0  ;;  %v13358_v61 = vpop.f32.mrb[62].mxu1 }
 0x981   : > { %v13334_v62 = vpop.f32.mrb[61].mxu0  ;;  %v13359_v63 = vpop.f32.mrb[63].mxu1  ;;  %v15135_v61 = vld [vmem:[#allocation26 + $0x40] sm:$0xff]  }
 0x982   : > { %v13335_v0 = vadd.f32 %v13334_v62, %v13333_v19  ;;  %v13336_v2 = vpop.f32.mrb[62].mxu0 }
 0x983   : > { %v13337_v7 = vpop.f32.mrb[63].mxu0  ;;  %v15137_v2 = vld [vmem:[#allocation26 + $0x180] sm:$0xff]  }
 0x984   : > { %v9720_v8 = vadd.f32 %v13335_v0, %v9491_v45  ;;  %v10030_v0 = vld [vmem:[#allocation4 + $0x18] sm:$0x18] }
 0x985   : > { %v15138_v7 = vld [vmem:[#allocation26 + $0x48] sm:$0xff]  }
 0x986   : > { %v9728_v17 = vadd.f32 %v13024_v5, %v9720_v8  ;;  %v10403_v8 = vrot.slane %v10030_v0, %v16457_v32 }
 0x988   : > { %v9729_v18 = vmax.f32 %v9728_v17, 0.0  ;;  %v15139_v17 = vld [vmem:[#allocation26 + $0x188] sm:$0xff]  }
 0x98a   : > { %v9730_v54 = vpack.c.bf16 %v9729_v18, %v9729_v18  ;;  %v15140_v18 = vld [vmem:[#allocation26 + $0x50] sm:$0xff]  }
 0x98c   : > { %v9738_v14 = vrot.slane %v9730_v54, %v16457_v32  ;;  %v10396_v54 = vcombine.high %v10030_v0, %v10030_v0  ;;  %v15167_v0 = vld [vmem:[#allocation26 + $0x1f0] sm:$0xff]  }
 0x98e   : > { %v9739_v21 = vcombine.high %v9738_v14, %v9738_v14  ;;  %v9746_v22 = vrot.slane %v9738_v14, %v16457_v32  ;;  %v10411_v14 = vcombine.high %v10403_v8, %v10403_v8  ;;  %v10410_v34 = vrot.slane %v10396_v54, %v16457_v32  ;;  %v15169_v8 = vld [vmem:[#allocation26 + $0x1f8] sm:$0xff]  }
 0x990   : > { %v9753_v23 = vrot.slane %v9739_v21, %v16457_v32  ;;  %v9760_v20 = vrot.slane %v9746_v22, %v16457_v32  ;;  %v15141_v21 = vld [vmem:[#allocation26 + $0x190] sm:$0xff]   ;;  %v15142_v22 = vld [vmem:[#allocation26 + $0x58] sm:$0xff]  }
 0x992   : > { %v9767_v24 = vrot.slane %v9760_v20, %v16457_v32  ;;  %v9775_v26 = vrot.slane %v9753_v23, %v16457_v32  ;;  %v10425_v23 = vrot.slane %v10411_v14, %v16457_v32  ;;  %v15152_v20 = vld [vmem:[#allocation4 + $0x4] ss:$0 sps:$4 sm:$0x11]   ;;  %v15173_v14 = vld [vmem:[#allocation26 + $0x140] sm:$0xff]  }
 0x993   : > { %v10571_v6 = vrot.slane %v15152_v20, %v16457_v32  ;;  %v15191_v20 = vld [vmem:[#allocation4 + $0x4] ss:$0 sps:$4 sm:$0x33]  }
 0x994   : > { %v9768_v27 = vcombine.low %v9767_v24, %v9767_v24  ;;  %v9782_v28 = vrot.slane %v9775_v26, %v16457_v32  ;;  %v15143_v24 = vld [vmem:[#allocation26 + $0x198] sm:$0xff]   ;;  %v15144_v26 = vld [vmem:[#allocation26 + $0x60] sm:$0xff]  }
 0x995   : > { %v10578_v44 = vrot.slane %v10571_v6, %v16457_v32 }
 0x996   : > { %v9783_v30 = vcombine.low %v9782_v28, %v9782_v28  ;;  %9787 = vst [vmem:[#allocation4 + $0x8] sm:$0x10] %v9768_v27  ;;  %v10418_v27 = vrot.slane %v10410_v34, %v16457_v32  ;;  %v10426_v28 = vcombine.high %v10425_v23, %v10425_v23 }
 0x998   : > { %9788 = vst [vmem:[#allocation4 + $0x10] sm:$0x10] %v9783_v30  ;;  %v15145_v30 = vld [vmem:[#allocation26 + $0x1a0] sm:$0xff]   ;;  %v10428_v31 = vshrl.u32 %v10426_v28, 16  ;;  %v15177_v28 = vld [vmem:[#allocation26 + $0x150] sm:$0xff]  }
 0x99d   : > { %v10028_v12 = vld [vmem:[#allocation4 + $0x8] sm:$0x18] }
 0x99e   : > { %v10064_v33 = vcombine.high %v10028_v12, %v10028_v12  ;;  %v10071_v58 = vrot.slane %v10028_v12, %v16457_v32  ;;  %v15153_v4 = vld [vmem:[#allocation4 + $0xc] ss:$0 sps:$4 sm:$0x11]   ;;  %v10433_v12 = vshll.u32 %v10418_v27, 16 }
 0x99f   : > { %v10029_v35 = vld [vmem:[#allocation4 + $0x10] sm:$0x18]  ;;  %v10586_v13 = vrot.slane %v15153_v4, %v16457_v32  ;;  %v15175_v4 = vld [vmem:[#allocation26 + $0x148] sm:$0xff]  }
 0x9a0   : > { %v10078_v47 = vrot.slane %v10064_v33, %v16457_v32  ;;  %v10079_v36 = vcombine.high %v10071_v58, %v10071_v58  ;;  %v10130_v11 = vcombine.high %v10029_v35, %v10029_v35  ;;  %v10137_v29 = vrot.slane %v10029_v35, %v16457_v32  ;;  %v15147_v33 = vld [vmem:[#allocation26 + $0x1a8] sm:$0xff]   ;;  %v15148_v58 = vld [vmem:[#allocation26 + $0x70] sm:$0xff]   ;;  %v15190_v34 = vld [vmem:[#allocation4 + $0x14] ss:$0 sps:$4 sm:$0x33]  }
 0x9a1   : > { %v16987_v10 = vrot.slane %v10586_v13, %v16457_v32  ;;  %v10435_v35 = vsel %vm16503_vm14, %v10428_v31, %v10433_v12  ;;  %v11192_v27 = vrot.slane %v15190_v34, %v16457_v32  ;;  %v11005_v13 = vrot.slane %v15191_v20, %v16457_v32  ;;  %v15179_v31 = vld [vmem:[#allocation26 + $0x158] sm:$0xff]   ;;  %v15197_v34 = vld [vmem:[#allocation26 + $0x228] sm:$0xff]   ;;  %v15198_v20 = vld [vmem:[#allocation26 + $0x230] sm:$0xff]  }
 0x9a2   : > { %v10086_v9 = vrot.slane %v10078_v47, %v16457_v32  ;;  %v10093_v52 = vrot.slane %v10079_v36, %v16457_v32  ;;  %v10144_v53 = vrot.slane %v10130_v11, %v16457_v32  ;;  %v10145_v60 = vcombine.high %v10137_v29, %v10137_v29  ;;  %v15149_v36 = vld [vmem:[#allocation26 + $0x1b0] sm:$0xff]   ;;  %v15150_v29 = vld [vmem:[#allocation26 + $0x78] sm:$0xff]  }
 0x9a3   : > { %v10611_v47 = vcombine.low %v10578_v44, %v16987_v10  ;;  %v11006_v44 = vcombine.high %v11005_v13, %v11005_v13 }
 0x9a4   : > { %v10094_v37 = vcombine.high %v10093_v52, %v10093_v52  ;;  %v10152_v41 = vrot.slane %v10144_v53, %v16457_v32  ;;  %v10159_v42 = vrot.slane %v10145_v60, %v16457_v32  ;;  %v10110_v1 = vshll.u32 %v10086_v9, 16  ;;  %v15154_v52 = vld [vmem:[#allocation26 + $0x1c0] sm:$0xff]  }
 0x9a5   : > { %v10618_v38 = vrot.slane %v10611_v47, %v16457_v32  ;;  %v15156_v60 = vld [vmem:[#allocation26 + $0x100] sm:$0xff]   ;;  %v11200_v47 = vrot.slane %v11192_v27, %v16457_v32 }
 0x9a6   : > { %v10105_v46 = vshrl.u32 %v10094_v37, 16  ;;  %v10160_v48 = vcombine.high %v10159_v42, %v10159_v42  ;;  %v10167_v3 = vshll.u32 %v10152_v41, 16  ;;  %v15157_v41 = vld [vmem:[#allocation26 + $0x1c8] sm:$0xff]  }
 0x9a7   : > { %v10625_v53 = vrot.slane %v10618_v38, %v16457_v32  ;;  %v15158_v42 = vld [vmem:[#allocation26 + $0x108] sm:$0xff]  }
 0x9a8   : > { %v10112_v49 = vsel %vm16503_vm14, %v10105_v46, %v10110_v1  ;;  %v10162_v51 = vshrl.u32 %v10160_v48, 16  ;;  %v15160_v46 = vld [vmem:[#allocation26 + $0x110] sm:$0xff]   ;;  %v15161_v1 = vld [vmem:[#allocation26 + $0x1d8] sm:$0xff]   ;;  %v15171_v48 = vld [vmem:[#allocation4 + $0x14] ss:$0 sps:$4 sm:$0x11]  }
 0x9a9   : > { %v10291_v45 = vcombine.low %v10103_v43, %v10112_v49  ;;  %v15159_v43 = vld [vmem:[#allocation26 + $0x1d0] sm:$0xff]  }
 0x9aa   : > { %v16959_v57 = vsel %vm16503_vm14, %v10162_v51, %v10167_v3  ;;  %v15162_v51 = vld [vmem:[#allocation26 + $0x118] sm:$0xff]   ;;  %v15163_v3 = vld [vmem:[#allocation26 + $0x1e0] sm:$0xff]  }
 0x9ab   : > { %v10298_v15 = vrot.slane %v10291_v45, %v16457_v32  ;;  %v10187_v19 = vcombine.low %v10112_v49, %v16959_v57  ;;  %v10453_v11 = vcombine.low %v16959_v57, %v10435_v35  ;;  %v15172_v49 = vld [vmem:[#allocation4 + $0x1c] ss:$0 sps:$4 sm:$0x11]   ;;  %v10724_v45 = vrot.slane %v15171_v48, %v16457_v32 }
 0x9ac   : > { %v10862_v57 = vrot.slane %v15172_v49, %v16457_v32 }
 0x9ad   : > { %v10305_v62 = vrot.slane %v10298_v15, %v16457_v32  ;;  %v10194_v63 = vrot.slane %v10187_v19, %v16457_v32  ;;  %v10460_v9 = vrot.slane %v10453_v11, %v16457_v32  ;;  %v15164_v15 = vld [vmem:[#allocation26 + $0x120] sm:$0xff]   ;;  %v15165_v19 = vld [vmem:[#allocation26 + $0x1e8] sm:$0xff]   ;;  %v11020_v11 = vrot.slane %v11006_v44, %v16457_v32 }
 0x9af   : > { %13489 = vmatmul.mubr.bf16.vlgmr.msra.gmra.mrb[64].mxu1 %v10305_v62  ;;  %v10201_v5 = vrot.slane %v10194_v63, %v16457_v32  ;;  %v10467_v37 = vrot.slane %v10460_v9, %v16457_v32  ;;  %v10869_v62 = vrot.slane %v10862_v57, %v16457_v32  ;;  %v15166_v63 = vld [vmem:[#allocation26 + $0x128] sm:$0xff]  }
 0x9b0   : > { %13513 = vmatpush3.bf16.msra.mxu1 %v15135_v61  ;;  %13528 = vmatprep.mubr.msk.bf16.mxu1 %vm15845_vm15, %v15844_v56  ;;  %v10731_v61 = vrot.slane %v10724_v45, %v16457_v32  ;;  %v15183_v9 = vld [vmem:[#allocation26 + $0x168] sm:$0xff]   ;;  %v15187_v45 = vld [vmem:[#allocation26 + $0x178] sm:$0xff]  }
 0x9b1   : > { %13469 = vmatmul.mubr.bf16.vlgmr.msra.gmra.mrb[64].mxu0 %v10201_v5  ;;  %13514 = vmatprep.subr.bf16.mxu1 %v15844_v56  ;;  %v15168_v5 = vld [vmem:[#allocation26 + $0x130] sm:$0xff]  }
 0x9b2   : > { %13493 = vmatpush3.bf16.msra.mxu0 %v15137_v2  ;;  %13508 = vmatprep.mubr.msk.bf16.mxu0 %vm15845_vm15, %v15844_v56  ;;  %v10887_v2 = vcombine.low %v10731_v61, %v10869_v62  ;;  %v15192_v62 = vld [vmem:[#allocation26 + $0x200] sm:$0xff]  }
 0x9b3   : > { %13494 = vmatprep.subr.bf16.mxu0 %v15844_v56 }
 0x9b4   : > { %13515 = vmatpush3.bf16.msra.mxu1 %v15138_v7  ;;  %v10749_v7 = vcombine.low %v16987_v10, %v10731_v61  ;;  %v15180_v10 = vld [vmem:[#allocation26 + $0x98] sm:$0xff]  }
 0x9b5   : > { %13516 = vmatprep.subr.bf16.mxu1 %v15844_v56 }
 0x9b6   : > { %13495 = vmatpush3.bf16.msra.mxu0 %v15139_v17  ;;  %v10894_v17 = vrot.slane %v10887_v2, %v16457_v32  ;;  %v10756_v54 = vrot.slane %v10749_v7, %v16457_v32  ;;  %v15193_v2 = vld [vmem:[#allocation26 + $0x208] sm:$0xff]   ;;  %v15194_v7 = vld [vmem:[#allocation26 + $0x210] sm:$0xff]  }
 0x9b7   : > { %13496 = vmatprep.subr.bf16.mxu0 %v15844_v56 }
 0x9b8   : > { %13517 = vmatpush3.bf16.msra.mxu1 %v15140_v18  ;;  %v15170_v18 = vld [vmem:[#allocation26 + $0x138] sm:$0xff]   ;;  %v10763_v23 = vrot.slane %v10756_v54, %v16457_v32 }
 0x9b9   : > { %13518 = vmatprep.subr.bf16.mxu1 %v15844_v56 }
 0x9ba   : > { %13497 = vmatpush3.bf16.msra.mxu0 %v15141_v21  ;;  %v10901_v21 = vrot.slane %v10894_v17, %v16457_v32  ;;  %v15195_v17 = vld [vmem:[#allocation26 + $0x218] sm:$0xff]  }
 0x9bb   : > { %13498 = vmatprep.subr.bf16.mxu0 %v15844_v56 }
 0x9bc   : > { %13519 = vmatpush3.bf16.msra.mxu1 %v15142_v22  ;;  %v15174_v22 = vld [vmem:[#allocation26 + $0x80] sm:$0xff]  }
 0x9bd   : > { %13520 = vmatprep.subr.bf16.mxu1 %v15844_v56 }
 0x9be   : > { %13499 = vmatpush3.bf16.msra.mxu0 %v15143_v24  ;;  %v15189_v24 = vld [vmem:[#allocation4 + $0xc] ss:$0 sps:$4 sm:$0x33]  }
 0x9bf   : > { %13500 = vmatprep.subr.bf16.mxu0 %v15844_v56  ;;  %v11028_v6 = vrot.slane %v15189_v24, %v16457_v32  ;;  %v15199_v24 = vld [vmem:[#allocation26 + $0x238] sm:$0xff]  }
 0x9c0   : > { %13521 = vmatpush3.bf16.msra.mxu1 %v15144_v26  ;;  %v15176_v26 = vld [vmem:[#allocation26 + $0x88] sm:$0xff]  }
 0x9c1   : > { %13522 = vmatprep.subr.bf16.mxu1 %v15844_v56  ;;  %v11029_v12 = vcombine.high %v11028_v6, %v11028_v6  ;;  %v11036_v38 = vrot.slane %v11028_v6, %v16457_v32 }
 0x9c2   : > { %13501 = vmatpush3.bf16.msra.mxu0 %v15145_v30  ;;  %v15178_v30 = vld [vmem:[#allocation26 + $0x90] sm:$0xff]  }
 0x9c3   : > { %13502 = vmatprep.subr.bf16.mxu0 %v15844_v56  ;;  %v11043_v35 = vrot.slane %v11029_v12, %v16457_v32 }
 0x9c4   : > { %13523 = vmatpush3.bf16.msra.mxu1 %v15146_v55  ;;  %v11193_v55 = vcombine.high %v11192_v27, %v11192_v27 }
 0x9c5   : > { %13524 = vmatprep.subr.bf16.mxu1 %v15844_v56 }
 0x9c6   : > { %13503 = vmatpush3.bf16.msra.mxu0 %v15147_v33  ;;  %v11207_v33 = vrot.slane %v11193_v55, %v16457_v32 }
 0x9c7   : > { %13504 = vmatprep.subr.bf16.mxu0 %v15844_v56 }
 0x9c8   : > { %13525 = vmatpush3.bf16.msra.mxu1 %v15148_v58  ;;  %v15181_v58 = vld [vmem:[#allocation26 + $0x160] sm:$0xff]  }
 0x9c9   : > { %13526 = vmatprep.subr.bf16.mxu1 %v15844_v56 }
 0x9ca   : > { %13505 = vmatpush3.bf16.msra.mxu0 %v15149_v36  ;;  %v11013_v36 = vrot.slane %v11005_v13, %v16457_v32 }
 0x9cb   : > { %13506 = vmatprep.subr.bf16.mxu0 %v15844_v56 }
 0x9cc   : > { %13527 = vmatpush3.bf16.msra.mxu1 %v15150_v29  ;;  %v15182_v29 = vld [vmem:[#allocation26 + $0xa0] sm:$0xff]  }
 0x9cd   : > { %13552 = vmatprep.subr.bf16.mxu1 %v15844_v56 }
 0x9ce   : > { %13507 = vmatpush3.bf16.msra.mxu0 %v15151_v39  ;;  %v11214_v39 = vshll.u32 %v11207_v33, 16 }
 0x9cf   : > { %13529 = vmatmul.mubr.bf16.vlgmr.msra.gmra.mrb[68].mxu1 %v10625_v53  ;;  %13532 = vmatprep.subr.bf16.mxu0 %v15844_v56  ;;  %v11209_v53 = vshrl.u32 %v11200_v47, 16 }
 0x9d0   : > { %13553 = vmatpush3.bf16.msra.mxu1 %v15154_v52  ;;  %13568 = vmatprep.mubr.msk.bf16.mxu1 %vm15845_vm15, %v15844_v56  ;;  %v11059_v52 = vshll.u32 %v11043_v35, 16 }
 0x9d1   : > { %13509 = vmatmul.mubr.bf16.vlgmr.msra.gmra.mrb[68].mxu0 %v10467_v37  ;;  %13554 = vmatprep.subr.bf16.mxu1 %v15844_v56  ;;  %v11050_v37 = vshll.u32 %v11020_v11, 16 }
 0x9d2   : > { %13533 = vmatpush3.bf16.msra.mxu0 %v15156_v60  ;;  %13548 = vmatprep.mubr.msk.bf16.mxu0 %vm15845_vm15, %v15844_v56  ;;  %v11045_v60 = vshrl.u32 %v11013_v36, 16 }
 0x9d3   : > { %13534 = vmatprep.subr.bf16.mxu0 %v15844_v56 }
 0x9d4   : > { %13555 = vmatpush3.bf16.msra.mxu1 %v15157_v41  ;;  %v15184_v41 = vld [vmem:[#allocation26 + $0xa8] sm:$0xff]   ;;  %v11052_v48 = vsel %vm16503_vm14, %v11045_v60, %v11050_v37 }
 0x9d5   : > { %13556 = vmatprep.subr.bf16.mxu1 %v15844_v56 }
 0x9d6   : > { %13535 = vmatpush3.bf16.msra.mxu0 %v15158_v42  ;;  %v11054_v42 = vshrl.u32 %v11036_v38, 16 }
 0x9d7   : > { %13536 = vmatprep.subr.bf16.mxu0 %v15844_v56 }
 0x9d8   : > { %13557 = vmatpush3.bf16.msra.mxu1 %v15159_v43  ;;  %v11216_v43 = vsel %vm16503_vm14, %v11209_v53, %v11214_v39 }
 0x9d9   : > { %13558 = vmatprep.subr.bf16.mxu1 %v15844_v56 }
 0x9da   : > { %13537 = vmatpush3.bf16.msra.mxu0 %v15160_v46  ;;  %v15185_v46 = vld [vmem:[#allocation26 + $0x170] sm:$0xff]  }
 0x9db   : > { %13538 = vmatprep.subr.bf16.mxu0 %v15844_v56 }
 0x9dc   : > { %13559 = vmatpush3.bf16.msra.mxu1 %v15161_v1  ;;  %v11061_v1 = vsel %vm16503_vm14, %v11054_v42, %v11059_v52 }
 0x9dd   : > { %13560 = vmatprep.subr.bf16.mxu1 %v15844_v56  ;;  %v11234_v49 = vcombine.low %v11061_v1, %v11216_v43 }
 0x9de   : > { %13539 = vmatpush3.bf16.msra.mxu0 %v15162_v51  ;;  %v15186_v51 = vld [vmem:[#allocation26 + $0xb0] sm:$0xff]  }
 0x9df   : > { %13540 = vmatprep.subr.bf16.mxu0 %v15844_v56  ;;  %v11241_v57 = vrot.slane %v11234_v49, %v16457_v32 }
 0x9e0   : > { %13561 = vmatpush3.bf16.msra.mxu1 %v15163_v3  ;;  %v11079_v3 = vcombine.low %v11052_v48, %v11061_v1 }
 0x9e1   : > { %13562 = vmatprep.subr.bf16.mxu1 %v15844_v56  ;;  %v11248_v61 = vrot.slane %v11241_v57, %v16457_v32 }
 0x9e2   : > { %13541 = vmatpush3.bf16.msra.mxu0 %v15164_v15  ;;  %v15188_v15 = vld [vmem:[#allocation26 + $0xb8] sm:$0xff]  }
 0x9e3   : > { %13542 = vmatprep.subr.bf16.mxu0 %v15844_v56 }
 0x9e4   : > { %13563 = vmatpush3.bf16.msra.mxu1 %v15165_v19  ;;  %v11086_v19 = vrot.slane %v11079_v3, %v16457_v32 }
 0x9e5   : > { %13564 = vmatprep.subr.bf16.mxu1 %v15844_v56 }
 0x9e6   : > { %13543 = vmatpush3.bf16.msra.mxu0 %v15166_v63  ;;  %v11093_v63 = vrot.slane %v11086_v19, %v16457_v32 }
 0x9e7   : > { %13544 = vmatprep.subr.bf16.mxu0 %v15844_v56 }
 0x9e8   : > { %13565 = vmatpush3.bf16.msra.mxu1 %v15167_v0  ;;  %v15200_v0 = vld [vmem:[#allocation4 + $0x1c] ss:$0 sps:$4 sm:$0x33]  }
 0x9e9   : > { %13566 = vmatprep.subr.bf16.mxu1 %v15844_v56 }
 0x9ea   : > { %13545 = vmatpush3.bf16.msra.mxu0 %v15168_v5  ;;  %v11347_v5 = vrot.slane %v15200_v0, %v16457_v32  ;;  %v13122_v0 = vld [vmem:[#allocation27] ss:$0 sm:$0xff] }
 0x9eb   : > { %13546 = vmatprep.subr.bf16.mxu0 %v15844_v56 }
 0x9ec   : > { %13567 = vmatpush3.bf16.msra.mxu1 %v15169_v8  ;;  %v11348_v8 = vcombine.high %v11347_v5, %v11347_v5 }
 0x9ed   : > { %13592 = vmatprep.subr.bf16.mxu1 %v15844_v56 }
 0x9ee   : > { %13547 = vmatpush3.bf16.msra.mxu0 %v15170_v18  ;;  %v11355_v18 = vrot.slane %v11347_v5, %v16457_v32  ;;  %v11362_v54 = vrot.slane %v11348_v8, %v16457_v32  ;;  %v11515_v8 = vand.u32 127, %v932_v16 }
 0x9ef   : > { %13569 = vmatmul.mubr.bf16.vlgmr.msra.gmra.mrb[72].mxu1 %v10901_v21  ;;  %13572 = vmatprep.subr.bf16.mxu0 %v15844_v56 }
 0x9f0   : > { %13593 = vmatpush3.bf16.msra.mxu1 %v15173_v14  ;;  %13608 = vmatprep.mubr.msk.bf16.mxu1 %vm15845_vm15, %v15844_v56  ;;  %v15196_v14 = vld [vmem:[#allocation26 + $0x220] sm:$0xff]   ;;  %v11364_v21 = vshrl.u32 %v11355_v18, 16  ;;  %vm11619_vm0 = vcmp.eq.s32.totalorder %v11515_v8, 1  ;;  %vm11517_vm1 = vcmp.eq.s32.totalorder %v11515_v8, 0 }
 0x9f1   : > { %13549 = vmatmul.mubr.bf16.vlgmr.msra.gmra.mrb[72].mxu0 %v10763_v23  ;;  %13594 = vmatprep.subr.bf16.mxu1 %v15844_v56 }
 0x9f2   : > { %13573 = vmatpush3.bf16.msra.mxu0 %v15174_v22  ;;  %13588 = vmatprep.mubr.msk.bf16.mxu0 %vm15845_vm15, %v15844_v56  ;;  %v11369_v22 = vshll.u32 %v11362_v54, 16 }
 0x9f3   : > { %13574 = vmatprep.subr.bf16.mxu0 %v15844_v56 }
 0x9f4   : > { %13595 = vmatpush3.bf16.msra.mxu1 %v15175_v4  ;;  %v11371_v23 = vsel %vm16503_vm14, %v11364_v21, %v11369_v22 }
 0x9f5   : > { %13596 = vmatprep.subr.bf16.mxu1 %v15844_v56  ;;  %v11389_v4 = vcombine.low %v11216_v43, %v11371_v23 }
 0x9f6   : > { %13575 = vmatpush3.bf16.msra.mxu0 %v15176_v26 }
 0x9f7   : > { %13576 = vmatprep.subr.bf16.mxu0 %v15844_v56  ;;  %v11396_v26 = vrot.slane %v11389_v4, %v16457_v32 }
 0x9f8   : > { %13597 = vmatpush3.bf16.msra.mxu1 %v15177_v28 }
 0x9f9   : > { %13598 = vmatprep.subr.bf16.mxu1 %v15844_v56  ;;  %v11403_v27 = vrot.slane %v11396_v26, %v16457_v32 }
 0x9fa   : > { %13577 = vmatpush3.bf16.msra.mxu0 %v15178_v30 }
 0x9fb   : > { %13578 = vmatprep.subr.bf16.mxu0 %v15844_v56 }
 0x9fc   : > { %13599 = vmatpush3.bf16.msra.mxu1 %v15179_v31 }
 0x9fd   : > { %13600 = vmatprep.subr.bf16.mxu1 %v15844_v56 }
 0x9fe   : > { %13579 = vmatpush3.bf16.msra.mxu0 %v15180_v10 }
 0x9ff   : > { %13580 = vmatprep.subr.bf16.mxu0 %v15844_v56 }
 0xa00   : > { %13601 = vmatpush3.bf16.msra.mxu1 %v15181_v58 }
 0xa01   : > { %13602 = vmatprep.subr.bf16.mxu1 %v15844_v56 }
 0xa02   : > { %13581 = vmatpush3.bf16.msra.mxu0 %v15182_v29 }
 0xa03   : > { %13582 = vmatprep.subr.bf16.mxu0 %v15844_v56 }
 0xa04   : > { %13603 = vmatpush3.bf16.msra.mxu1 %v15183_v9 }
 0xa05   : > { %13604 = vmatprep.subr.bf16.mxu1 %v15844_v56 }
 0xa06   : > { %13583 = vmatpush3.bf16.msra.mxu0 %v15184_v41 }
 0xa07   : > { %13584 = vmatprep.subr.bf16.mxu0 %v15844_v56 }
 0xa08   : > { %13605 = vmatpush3.bf16.msra.mxu1 %v15185_v46 }
 0xa09   : > { %13606 = vmatprep.subr.bf16.mxu1 %v15844_v56 }
 0xa0a   : > { %13585 = vmatpush3.bf16.msra.mxu0 %v15186_v51 }
 0xa0b   : > { %13586 = vmatprep.subr.bf16.mxu0 %v15844_v56 }
 0xa0c   : > { %13607 = vmatpush3.bf16.msra.mxu1 %v15187_v45 }
 0xa0d   : > { %13632 = vmatprep.subr.mxu1 %v15844_v56 }
 0xa0e   : > { %13587 = vmatpush3.bf16.msra.mxu0 %v15188_v15 }
 0xa0f   : > { %13609 = vmatmul.mubr.bf16.vlgmr.msra.gmra.mrb[76].mxu1 %v11248_v61  ;;  %13612 = vmatprep.subr.bf16.mxu0 %v15844_v56 }
 0xa10   : > { %13634 = vmatprep.mubr.msk.f32.mxu1 %vm15845_vm15, %v15844_v56 }
 0xa11   : > { %13589 = vmatmul.mubr.bf16.vlgmr.msra.gmra.mrb[76].mxu0 %v11093_v63 }
 0xa12   : > { %13613 = vmatpush3.bf16.msra.mxu0 %v15192_v62  ;;  %13628 = vmatprep.mubr.msk.bf16.mxu0 %vm15845_vm15, %v15844_v56  ;;  %v13025_v62 = vld [vmem:[#allocation30] ss:$0 sm:$0xff] }
 0xa13   : > { %13614 = vmatprep.subr.bf16.mxu0 %v15844_v56 }
 0xa16   : > { %13615 = vmatpush3.bf16.msra.mxu0 %v15193_v2 }
 0xa17   : > { %13616 = vmatprep.subr.bf16.mxu0 %v15844_v56 }
 0xa1a   : > { %13617 = vmatpush3.bf16.msra.mxu0 %v15194_v7 }
 0xa1b   : > { %13618 = vmatprep.subr.bf16.mxu0 %v15844_v56 }
 0xa1e   : > { %13619 = vmatpush3.bf16.msra.mxu0 %v15195_v17  ;;  %v10022_v17 = vadd.f32 %v16932_v59, %v13025_v62 }
 0xa1f   : > { %13620 = vmatprep.subr.bf16.mxu0 %v15844_v56 }
 0xa22   : > { %13621 = vmatpush3.bf16.msra.mxu0 %v15196_v14 }
 0xa23   : > { %13622 = vmatprep.subr.bf16.mxu0 %v15844_v56 }
 0xa26   : > { %13623 = vmatpush3.bf16.msra.mxu0 %v15197_v34 }
 0xa27   : > { %13624 = vmatprep.subr.bf16.mxu0 %v15844_v56 }
 0xa2a   : > { %13625 = vmatpush3.bf16.msra.mxu0 %v15198_v20 }
 0xa2b   : > { %13626 = vmatprep.subr.bf16.mxu0 %v15844_v56 }
 0xa2e   : > { %13627 = vmatpush3.bf16.msra.mxu0 %v15199_v24 }
 0xa31   : > { %13629 = vmatmul.mubr.bf16.vlgmr.msra.gmra.mrb[80].mxu0 %v11403_v27  ;;  %v11516_v27 = vld [vmem:[#allocation33] sm:$0x3] }
 0xa32   : > { %13633 = vmatpush3.msk.msra.mxu1 %vm11522_vm2, %v11516_v27 }
 0xa33   : > { %13637 = vmatprep.subr.mxu1 %v15844_v56 }
 0xa82   : > { %v10389_v28 = vpop.f32.mrb[64].mxu1 }
 0xa83   : > { %v13490_v6 = vpop.f32.mrb[65].mxu1 }
 0xa84   : > { %v10285_v13 = vpop.f32.mrb[64].mxu0  ;;  %v10392_v50 = vpop.f32.mrb[66].mxu1  ;;  %v11533_v6 = vsub.s32 %v11515_v8, %v16454_v25  ;;  %v11715_v25 = vld [vmem:[#allocation32] sm:$0xff] }
 0xa85   : > { %v10390_v30 = vadd.f32 %v10389_v28, %v10285_v13  ;;  %v13470_v55 = vpop.f32.mrb[65].mxu0  ;;  %v13491_v31 = vpop.f32.mrb[67].mxu1 }
 0xa86   : > { %v10288_v12 = vpop.f32.mrb[66].mxu0 }
 0xa87   : > { %v13471_v44 = vpop.f32.mrb[67].mxu0 }
 0xaa2   : > { %v10709_v10 = vpop.f32.mrb[68].mxu1 }
 0xaa3   : > { %v13530_v33 = vpop.f32.mrb[69].mxu1 }
 0xaa4   : > { %v10551_v58 = vpop.f32.mrb[68].mxu0  ;;  %v10712_v35 = vpop.f32.mrb[70].mxu1 }
 0xaa5   : > { %v10557_v47 = vadd.f32 %v10551_v58, %v10390_v30  ;;  %v13510_v36 = vpop.f32.mrb[69].mxu0  ;;  %v13531_v11 = vpop.f32.mrb[71].mxu1 }
 0xaa6   : > { %v10554_v29 = vpop.f32.mrb[70].mxu0  ;;  %v11716_v11 = vld [vmem:[#allocation32 + $0x8] sm:$0xff] }
 0xaa7   : > { %v13511_v38 = vpop.f32.mrb[71].mxu0  ;;  %v10715_v32 = vadd.f32 %v10709_v10, %v10557_v47 }
 0xac2   : > { %v10985_v39 = vpop.f32.mrb[72].mxu1 }
 0xac3   : > { %v13570_v9 = vpop.f32.mrb[73].mxu1 }
 0xac4   : > { %v10847_v52 = vpop.f32.mrb[72].mxu0  ;;  %v10988_v53 = vpop.f32.mrb[74].mxu1 }
 0xac5   : > { %v10853_v60 = vadd.f32 %v10847_v52, %v10715_v32  ;;  %v13550_v37 = vpop.f32.mrb[73].mxu0  ;;  %v13571_v41 = vpop.f32.mrb[75].mxu1 }
 0xac6   : > { %v10850_v42 = vpop.f32.mrb[74].mxu0 }
 0xac7   : > { %v13551_v43 = vpop.f32.mrb[75].mxu0  ;;  %v10991_v46 = vadd.f32 %v10985_v39, %v10853_v60 }
 0xae2   : > { %v11332_v1 = vpop.f32.mrb[76].mxu1 }
 0xae3   : > { %v13610_v48 = vpop.f32.mrb[77].mxu1 }
 0xae4   : > { %v11177_v49 = vpop.f32.mrb[76].mxu0  ;;  %v11335_v51 = vpop.f32.mrb[78].mxu1 }
 0xae5   : > { %v11183_v3 = vadd.f32 %v11177_v49, %v10991_v46  ;;  %v13590_v45 = vpop.f32.mrb[77].mxu0  ;;  %v13611_v57 = vpop.f32.mrb[79].mxu1 }
 0xae6   : > { %v11180_v15 = vpop.f32.mrb[78].mxu0 }
 0xae7   : > { %v13591_v19 = vpop.f32.mrb[79].mxu0  ;;  %v11338_v61 = vadd.f32 %v11332_v1, %v11183_v3 }
 0xb04   : > { %v11487_v63 = vpop.f32.mrb[80].mxu0 }
 0xb05   : > { %v11493_v2 = vadd.f32 %v11487_v63, %v11338_v61  ;;  %v13630_v5 = vpop.f32.mrb[81].mxu0 }
 0xb06   : > { %v11490_v7 = vpop.f32.mrb[82].mxu0 }
 0xb07   : > { %v11501_v18 = vadd.f32 %v13122_v0, %v11493_v2  ;;  %v13631_v54 = vpop.f32.mrb[83].mxu0 }
 0xb09   : > { %v11502_v14 = vadd.f32 %v11501_v18, %v10022_v17 }
 0xb0b   : > { %v11510_v21 = vrot.slane %v11502_v14, %v16762_v40 }
 0xb0d   : > { %v11622_v22 = vsel %vm11619_vm0, %v11510_v21, 0.0  ;;  %v11520_v34 = vsel %vm11517_vm1, %v11510_v21, 0.0  ;;  %v11511_v23 = vcombine.high %v11510_v21, %v11510_v21 }
 0xb0e   : > { %v11624_v20 = vsel %vm11522_vm2, %v11622_v22, 0.0  ;;  %v11523_v4 = vsel %vm11522_vm2, %v11520_v34, 0.0 }
 0xb0f   : > { %11625 = vadd.xlane.f32.xlu1 %v11624_v20  ;;  %11524 = vadd.xlane.f32.xlu0 %v11523_v4  ;;  %v11623_v16 = vsel %vm11619_vm0, %v11511_v23, 0.0  ;;  %v11521_v24 = vsel %vm11517_vm1, %v11511_v23, 0.0 }
 0xb10   : > { %v11627_v59 = vsel %vm11522_vm2, %v11623_v16, 0.0  ;;  %v11526_v26 = vsel %vm11522_vm2, %v11521_v24, 0.0 }
 0xb13   : > { %11628 = vadd.xlane.f32.xlu1 %v11627_v59  ;;  %11527 = vadd.xlane.f32.xlu0 %v11526_v26 }
 0xb9c   : > { %v11626_v40 = vpop.xlane.xlu1 %11625  ;;  %v11525_v28 = vpop.xlane.xlu0 %11524 }
 0xb9d   : > { %v11534_v30 = vrot.slane %v11525_v28, %v11533_v6  ;;  %v11635_v44 = vrot.slane %v11626_v40, %v11533_v6 }
 0xba0   : > { %v11629_v13 = vpop.xlane.xlu1 %11628  ;;  %v11528_v50 = vpop.xlane.xlu0 %11527 }
 0xba1   : > { %v11538_v55 = vrot.slane %v11528_v50, %v11533_v6  ;;  %v11639_v31 = vrot.slane %v11629_v13, %v11533_v6 }
 0xba3   : > { %v11540_v12 = vsel %vm11539_vm3, %v11538_v55, %v11534_v30  ;;  %v11640_v10 = vsel %vm11539_vm3, %v11639_v31, %v11635_v44 }
 0xba4   : > { %13635 = vmatmul.mubr.msk.f32.vlgmr.msra.gmra.mrb[80].mxu1 %vm11541_vm4, %v11540_v12 }
 0xba5   : > { %13638 = vmatpush3.msk.msra.mxu1 %vm11522_vm2, %v11516_v27  ;;  %13639 = vmatprep.mubr.msk.f32.mxu1 %vm15845_vm15, %v15844_v56 }
 0xba8   : > { %13640 = vmatmul.mubr.msk.f32.vlgmr.msra.gmra.mrb[82].mxu1 %vm11541_vm4, %v11640_v10 }
 0xba9   : > { %13644 = vmatprep.mubr.msk.f32.mxu1 %vm11541_vm4, %v11715_v25 }
 0xc77   : > { %v11613_v33 = vpop.f32.mrb[80].mxu1 }
 0xc78   : > { %11618 = vst.msk [vmem:[#allocation5] sm:$0x3] %vm11617_vm5, %v11613_v33  ;;  %v13636_v58 = vpop.f32.mrb[81].mxu1 }
 0xc7b   : > { %v11709_v35 = vpop.f32.mrb[82].mxu1 }
 0xc7c   : > { %11714 = vst.msk [vmem:[#allocation5 + $0x2] sm:$0x3] %vm11617_vm5, %v11709_v35  ;;  %v13641_v47 = vpop.f32.mrb[83].mxu1 }
 0xc7f   : > { %v11717_v36 = vld [vmem:[#allocation5] sm:$0x3] }
 0xc80   : > { %13642 = vmatprep.subr.msk.mxu1 %vm11522_vm2, %v11717_v36 }
 0xc81   : > { %13643 = vmatpush3.msk.msra.mxu1 %vm11522_vm2, %v11717_v36 }
 0xc82   : > { %13645 = vmatmul.mubr.msk.f32.vlgmr.msra.gmra.mrb[84].mxu1 %vm11541_vm4, %v11716_v11 }
 0xc83   : > { %v11805_v56 = vld [vmem:[#allocation5 + $0x2] sm:$0x3]  ;;  %13649 = vmatprep.mubr.msk.f32.mxu1 %vm11541_vm4, %v11715_v25 }
 0xc84   : > { %13647 = vmatprep.subr.msk.mxu1 %vm11522_vm2, %v11805_v56 }
 0xc85   : > { %13648 = vmatpush3.msk.msra.mxu1 %vm11522_vm2, %v11805_v56 }
 0xc86   : > { %13650 = vmatmul.mubr.msk.f32.vlgmr.msra.gmra.mrb[86].mxu1 %vm11541_vm4, %v11716_v11 }
 0xd55   : > { %v13646_v29 = vpop.f32.mrb[84].mxu1 }
 0xd56   : > { %11804 = vst.msk [vmem:[%s837_s10 + $0x8] sm:$0xff] %vm11802_vm6, %v13646_v29  ;;  %v11793_v38 = vpop.f32.mrb[85].mxu1 }
 0xd57   : > { %11803 = vst.msk [vmem:[%s837_s10] sm:$0xff] %vm11802_vm6, %v11793_v38 }
 0xd59   : > { %v13651_v32 = vpop.f32.mrb[86].mxu1 }
 0xd5a   : > { %13134 = vst.msk [vmem:[%s837_s10 + $0x18] sm:$0xff] %vm11802_vm6, %v13651_v32  ;;  %v11875_v39 = vpop.f32.mrb[87].mxu1 }
 0xd5b   : > { %13133 = vst.msk [vmem:[%s837_s10 + $0x10] sm:$0xff] %vm11802_vm6, %v11875_v39 }
 0xd5c   : > { %15726 = shalt.err (!%p15723_p1)
}
 0xd5d   : > { %s15727_s8 = scalar_lea.hbm %s17120_s27, 512  ;;  %s15731_s26 = scalar_lea.hbm %s17263_s23, 1024 }
 0xd5e   : > { %p15728_p0 = scmp.ne.s32.totalorder %s17120_s27, %s15727_s8  ;;  %p15732_p9 = scmp.lt.u32.totalorder %s17120_s27, %s17263_s23 }
 0xd5f   : > { %p15733_p12 = scmp.lt.u32.totalorder %s15731_s26, %s15727_s8  ;;  %p15735_p2 = scmp.lt.u32.totalorder %s15727_s8, %s17120_s27 }
 0xd60   : > { %p15729_p6 = pnand %p15728_p0, %p17264_p3 }
 0xd61   : > { %p15734_p10 = por %p15733_p12, %p15732_p9 }
 0xd62   : > { %p15730_p5 = pneg %p15729_p6 }
 0xd63   : > { %p15736_p4 = por %p15735_p2, %p15734_p10 }
 0xd65   : > { %p15737_p7 = pnand %p15736_p4, %p15730_p5 }
 0xd67   : > { %15740 = shalt.err (!%p15737_p7)
}
 0xd68   : > { %s15847_s12 = smov 128   ;;  %s15848_s3 = smov 8  }
 0xd69   : > { %13724 = dma.vmem_to_hbm [thread:$0]  (%p17264_p3), %s17115_s0, 512, %s17120_s27, %s17122_s24, %s15847_s12, %s15847_s12, %s15848_s3  }
 0xd6a PF: > { %s17265_s20 = sld [smem:[#allocation50_spill]]  ;;  %s17266_s22 = sld [smem:[#allocation47_spill]] }
 0xd6b   : > { %s17267_s19 = sld [smem:[#allocation55_spill]] }
 0xd70   : > { %p13821_p8 = scmp.ge.s32.totalorder %s17265_s20, 2  ;;  %s11916_s25 = sand.u32 1, %s17266_s22  }
 0xd71   : > { %p17268_p11 = scmp.ne.s32.totalorder %s17267_s19, 0  ;;  %s11917_s21 = scalar_lea.sflag [#allocation8], %s11916_s25 }
 0xd73   : > { %p13782_p13 = pnand %p13821_p8, %p17268_p11 }
 0xd75   : > { %15798 = dma.done.wait (!%p13782_p13), %s11917_s21, 512  }
 0xd76   : > { %15800 = vsyncadd (!%p13782_p13), %s11917_s21, 4294966784  ;;  %s17269_s21 = sld [smem:[#allocation52_spill]]  ;;  %s17270_s0 = sld [smem:[#allocation48_spill]] }
 0xd77   : > { %s17271_s30 = sld [smem:[#allocation49_spill]]  ;;  %s17272_s20 = sld [smem:[#allocation53_spill]] }
 0xd7c   : > { %p39_p1 = scmp.ge.s32.totalorder %s17269_s21, 4  }
 0xd7e   :  { %41 = sbr.rel (!%p39_p1) target bundleno = 24 (0x18), region = 244 }
 0xd85   :  { %11922 = vsyncpa [#allocation7], 1 }
 0xd86   :  { %11924 = vsyncpa [#allocation7 + $0x1], 1 }
 0xd87   :  { %11925 = vsyncpa [#allocation10], 1 }
 0xd88   :  { %11926 = vsyncpa [#allocation13], 1 }
 0xd89   :  { %11927 = vsyncpa [#allocation16], 1 }
 0xd8a   :  { %11928 = vsyncpa [#allocation19], 1 }
 0xd8b   :  { %11929 = vsyncpa [#allocation22], 1 }
 0xd8c   :  { %11930 = vsyncpa [#allocation25], 1 }
 0xd8d   :  { %11931 = vsyncpa [#allocation28], 1 }
 0xd8e   :  { %11932 = vsyncpa [#allocation31], 1 }
 0xd8f   :  { %11933 = vsyncpa [#allocation34], 1 }
 0xd90   :  { %11934 = vsyncpa [#allocation8], 1 }
 0xd91   :  { %11936 = vsyncpa [#allocation8 + $0x1], 1 }

</bundles_post_ra>
